<compile_context>
chip_gen: v7x
topology: tpu7x:2x2x1
jax: 0.10.0
libtpu: 0.0.40
codegen_flags: <defaults>
</compile_context>

<pallas_src>
import functools

import jax
import jax.numpy as jnp
from jax.experimental import pallas as pl
from jax.experimental.pallas import tpu as pltpu


def _round_up(x, m):
    return ((x + m - 1) // m) * m


def residual_ff_kernel(x_ref, w1_ref, b1_ref, w2_ref, b2_ref, o_ref, *,
                       approximate_gelu):
    """o = gelu(x @ w1 + b1) @ w2 + b2 + x   for one (TM, D) token tile."""
    x = x_ref[...]                                   # (TM, D)
    # MXU work in the weight dtype (bf16), f32 accumulation.
    h = jnp.dot(x.astype(w1_ref.dtype), w1_ref[...],
                preferred_element_type=jnp.float32)
    h = h + b1_ref[...]                              # (1, H) broadcast, f32 VPU
    # TODO(synk): PyTorch nn.GELU() defaults to exact erf GELU; the tanh
    # approximation is used by default here for guaranteed Mosaic lowering.
    h = jax.nn.gelu(h, approximate=approximate_gelu)
    y = jnp.dot(h.astype(w2_ref.dtype), w2_ref[...],
                preferred_element_type=jnp.float32)
    # bias + residual fused in f32, one downcast at the very end.
    o_ref[...] = (y + b2_ref[...] + x.astype(jnp.float32)).astype(o_ref.dtype)


def _pick_tile_rows(M, D, H, x_itemsize, w_bytes, block_rows, budget_bytes):
    """Largest TM (multiple of 8, <= block_rows) whose working set fits."""
    tm = min(_round_up(M, 8), _round_up(block_rows, 8))
    while tm > 8:
        # 2 double-buffered (TM, D) tiles (x + out) + f32 hidden + weights.
        tile_bytes = 2 * (2 * tm * D * x_itemsize)
        h_bytes = tm * H * 4
        if tile_bytes + h_bytes + w_bytes <= budget_bytes:
            break
        tm -= 8
    return max(tm, 8)


def residual_feedforward(x, w1, b1, w2, b2, *, block_rows=512,
                         approximate_gelu=True):
    """Residual(FeedForward)(x): x (B, N, D) -> (B, N, D)."""
    B, N, D = x.shape
    H = w1.shape[1]
    M = B * N

    x2d = x.reshape(M, D)
    b1_2d = b1.reshape(1, H).astype(jnp.float32)
    b2_2d = b2.reshape(1, D).astype(jnp.float32)

    itemsize = x2d.dtype.itemsize
    w_bytes = (D * H) * w1.dtype.itemsize + (H * D) * w2.dtype.itemsize \
        + (H + D) * 4

    # Token-tile size: biggest multiple of 8 that fits a ~40 MiB VMEM budget
    # (leaves headroom under v7x's 64 MiB physical VMEM).
    TM = _pick_tile_rows(M, D, H, itemsize, w_bytes, block_rows,
                         budget_bytes=40 << 20)
    M_pad = _round_up(M, TM)
    if M_pad != M:
        x2d = jnp.pad(x2d, ((0, M_pad - M), (0, 0)))
    grid = (M_pad // TM,)

    tile_bytes = 2 * (2 * TM * D * itemsize)    # double-buffered x + out tiles
    h_bytes = TM * H * 4                        # f32 hidden intermediate
    vmem_limit = int(1.5 * (tile_bytes + w_bytes + h_bytes)) + (4 << 20)
    vmem_limit = max(16 << 20, min(vmem_limit, 48 << 20))  # fits v7x 64 MiB

    cost = pl.CostEstimate(
        flops=4 * M_pad * D * H,                    # two matmuls
        transcendentals=M_pad * H,                  # one per GELU element
        bytes_accessed=2 * M_pad * D * itemsize + w_bytes,
    )

    kernel = functools.partial(residual_ff_kernel,
                               approximate_gelu=approximate_gelu)

    out2d = pl.pallas_call(
        kernel,
        out_shape=jax.ShapeDtypeStruct((M_pad, D), x.dtype),
        grid=grid,
        in_specs=[
            pl.BlockSpec((TM, D), lambda i: (i, 0)),   # x tile: streamed
            pl.BlockSpec((D, H), lambda i: (0, 0)),    # w1: VMEM-resident
            pl.BlockSpec((1, H), lambda i: (0, 0)),    # b1: VMEM-resident
            pl.BlockSpec((H, D), lambda i: (0, 0)),    # w2: VMEM-resident
            pl.BlockSpec((1, D), lambda i: (0, 0)),    # b2: VMEM-resident
        ],
        out_specs=pl.BlockSpec((TM, D), lambda i: (i, 0)),
        input_output_aliases={0: 0},                   # reuse x2d HBM buffer
        compiler_params=pltpu.CompilerParams(
            dimension_semantics=("parallel",),         # v7x: 2 TCs share grid
            vmem_limit_bytes=vmem_limit,
        ),
        cost_estimate=cost,
    )(x2d, w1, b1_2d, w2, b2_2d)

    if M_pad != M:
        out2d = out2d[:M]
    return out2d.reshape(B, N, D)


def reference(x, w1, b1, w2, b2, *, approximate_gelu=True):
    """Pure-JAX reference mirroring the kernel's dtype pipeline."""
    h = jnp.dot(x.astype(w1.dtype), w1,
                preferred_element_type=jnp.float32) + b1.astype(jnp.float32)
    h = jax.nn.gelu(h, approximate=approximate_gelu)
    y = jnp.dot(h.astype(w2.dtype), w2,
                preferred_element_type=jnp.float32) + b2.astype(jnp.float32)
    return (y + x.astype(jnp.float32)).astype(x.dtype)


if __name__ == "__main__":
    key = jax.random.PRNGKey(0)
    # tokens M = B*N = 512 -> single grid step at TM = 512; lane-dense D = 128.
    B, N, D, H = 2, 256, 128, 512

    k_x, k_w1, k_b1, k_w2, k_b2 = jax.random.split(key, 5)
    x = jax.random.normal(k_x, (B, N, D), dtype=jnp.float32)
    w1 = (jax.random.normal(k_w1, (D, H), dtype=jnp.float32) * 0.05
          ).astype(jnp.bfloat16)
    b1 = jax.random.normal(k_b1, (H,), dtype=jnp.float32) * 0.01
    w2 = (jax.random.normal(k_w2, (H, D), dtype=jnp.float32) * 0.05
          ).astype(jnp.bfloat16)
    b2 = jax.random.normal(k_b2, (D,), dtype=jnp.float32) * 0.01

    ref = jax.block_until_ready(reference(x, w1, b1, w2, b2))
    out = jax.block_until_ready(residual_feedforward(x, w1, b1, w2, b2))
    assert out.shape == ref.shape == (B, N, D)
    assert jnp.allclose(out, ref, atol=1e-2, rtol=1e-2), "mismatch vs reference"

    # Also exercise the token-padding path (M not a multiple of the tile).
    x_odd = x[:, :100]                     # M = 200, TM = 128 -> padded to 256
    ref_odd = jax.block_until_ready(reference(x_odd, w1, b1, w2, b2))
    out_odd = jax.block_until_ready(
        residual_feedforward(x_odd, w1, b1, w2, b2, block_rows=128))
    assert out_odd.shape == ref_odd.shape == (B, 100, D)
    assert jnp.allclose(out_odd, ref_odd, atol=1e-2, rtol=1e-2), \
        "mismatch vs reference (padded path)"

    print("KERNEL_OK")
</pallas_src>

<mosaic_0001>
module attributes {stable_mosaic.version = 11 : i64} {
  func.func @residual_ff_kernel(%arg0: i32, %arg1: memref<512x128xf32, #tpu.memory_space<vmem>>, %arg2: memref<128x512xbf16, #tpu.memory_space<vmem>>, %arg3: memref<1x512xf32, #tpu.memory_space<vmem>>, %arg4: memref<512x128xbf16, #tpu.memory_space<vmem>>, %arg5: memref<1x128xf32, #tpu.memory_space<vmem>>, %arg6: memref<512x128xf32, #tpu.memory_space<vmem>>) attributes {dimension_semantics = [#tpu.dimension_semantics<parallel>], iteration_bounds = array<i64: 1>, scalar_prefetch = 0 : i64, scratch_operands = 0 : i64, tpu.core_type = #tpu.core_type<tc>, window_params = [{transform_indices = @transform_0, window_bounds = array<i64: 512, 128>}, {pipeline_mode = #tpu.pipeline_mode<synchronous>, transform_indices = @transform_1, window_bounds = array<i64: 128, 512>}, {pipeline_mode = #tpu.pipeline_mode<synchronous>, transform_indices = @transform_2, window_bounds = array<i64: 1, 512>}, {pipeline_mode = #tpu.pipeline_mode<synchronous>, transform_indices = @transform_3, window_bounds = array<i64: 512, 128>}, {pipeline_mode = #tpu.pipeline_mode<synchronous>, transform_indices = @transform_4, window_bounds = array<i64: 1, 128>}, {transform_indices = @transform_5, window_bounds = array<i64: 512, 128>}]} {
    %c0 = arith.constant 0 : index
    %c0_0 = arith.constant 0 : index
    %0 = vector.load %arg1[%c0, %c0_0] : memref<512x128xf32, #tpu.memory_space<vmem>>, vector<512x128xf32>
    %1 = arith.truncf %0 : vector<512x128xf32> to vector<512x128xbf16>
    %c0_1 = arith.constant 0 : index
    %c0_2 = arith.constant 0 : index
    %2 = vector.load %arg2[%c0_1, %c0_2] : memref<128x512xbf16, #tpu.memory_space<vmem>>, vector<128x512xbf16>
    %cst = arith.constant dense<0.000000e+00> : vector<512x512xf32>
    %3 = tpu.matmul %1, %2, %cst {dimension_numbers = #tpu.dot_dimension_numbers<[1], [0], [0], [1], [0, 0, 1, 1], [], []>} : vector<512x128xbf16>, vector<128x512xbf16>, vector<512x512xf32> -> vector<512x512xf32>
    %c0_3 = arith.constant 0 : index
    %c0_4 = arith.constant 0 : index
    %4 = vector.load %arg3[%c0_3, %c0_4] : memref<1x512xf32, #tpu.memory_space<vmem>>, vector<1x512xf32>
    %5 = vector.broadcast %4 : vector<1x512xf32> to vector<512x512xf32>
    %6 = arith.addf %3, %5 : vector<512x512xf32>
    %7 = arith.mulf %6, %6 : vector<512x512xf32>
    %8 = arith.mulf %6, %7 : vector<512x512xf32>
    %cst_5 = arith.constant 4.471500e-02 : f32
    %9 = vector.broadcast %cst_5 : f32 to vector<512x512xf32>
    %10 = arith.mulf %9, %8 : vector<512x512xf32>
    %11 = arith.addf %6, %10 : vector<512x512xf32>
    %cst_6 = arith.constant 0.797884583 : f32
    %12 = vector.broadcast %cst_6 : f32 to vector<512x512xf32>
    %13 = arith.mulf %12, %11 : vector<512x512xf32>
    %14 = math.tanh %13 : vector<512x512xf32>
    %cst_7 = arith.constant 1.000000e+00 : f32
    %15 = vector.broadcast %cst_7 : f32 to vector<512x512xf32>
    %16 = arith.addf %15, %14 : vector<512x512xf32>
    %cst_8 = arith.constant 5.000000e-01 : f32
    %17 = vector.broadcast %cst_8 : f32 to vector<512x512xf32>
    %18 = arith.mulf %17, %16 : vector<512x512xf32>
    %19 = arith.mulf %6, %18 : vector<512x512xf32>
    %20 = arith.truncf %19 : vector<512x512xf32> to vector<512x512xbf16>
    %c0_9 = arith.constant 0 : index
    %c0_10 = arith.constant 0 : index
    %21 = vector.load %arg4[%c0_9, %c0_10] : memref<512x128xbf16, #tpu.memory_space<vmem>>, vector<512x128xbf16>
    %cst_11 = arith.constant dense<0.000000e+00> : vector<512x128xf32>
    %22 = tpu.matmul %20, %21, %cst_11 {dimension_numbers = #tpu.dot_dimension_numbers<[1], [0], [0], [1], [0, 0, 1, 1], [], []>} : vector<512x512xbf16>, vector<512x128xbf16>, vector<512x128xf32> -> vector<512x128xf32>
    %c0_12 = arith.constant 0 : index
    %c0_13 = arith.constant 0 : index
    %23 = vector.load %arg5[%c0_12, %c0_13] : memref<1x128xf32, #tpu.memory_space<vmem>>, vector<1x128xf32>
    %24 = vector.broadcast %23 : vector<1x128xf32> to vector<512x128xf32>
    %25 = arith.addf %22, %24 : vector<512x128xf32>
    %26 = arith.addf %25, %0 : vector<512x128xf32>
    %c0_14 = arith.constant 0 : index
    %c0_15 = arith.constant 0 : index
    %27 = vector.load %arg6[%c0_14, %c0_15] : memref<512x128xf32, #tpu.memory_space<vmem>>, vector<512x128xf32>
    tpu.vector_store %arg6[%c0_14, %c0_15], %26 {strides = array<i32>} : memref<512x128xf32, #tpu.memory_space<vmem>>, vector<512x128xf32>,
    return
  }
  func.func @transform_0(%arg0: i32) -> (i32, i32) {
    %c0_i32 = arith.constant 0 : i32
    %c0_i32_0 = arith.constant 0 : i32
    return %arg0, %c0_i32 : i32, i32
  }
  func.func @transform_1(%arg0: i32) -> (i32, i32) {
    %c0_i32 = arith.constant 0 : i32
    %c0_i32_0 = arith.constant 0 : i32
    %c0_i32_1 = arith.constant 0 : i32
    return %c0_i32, %c0_i32_0 : i32, i32
  }
  func.func @transform_2(%arg0: i32) -> (i32, i32) {
    %c0_i32 = arith.constant 0 : i32
    %c0_i32_0 = arith.constant 0 : i32
    %c0_i32_1 = arith.constant 0 : i32
    return %c0_i32, %c0_i32_0 : i32, i32
  }
  func.func @transform_3(%arg0: i32) -> (i32, i32) {
    %c0_i32 = arith.constant 0 : i32
    %c0_i32_0 = arith.constant 0 : i32
    %c0_i32_1 = arith.constant 0 : i32
    return %c0_i32, %c0_i32_0 : i32, i32
  }
  func.func @transform_4(%arg0: i32) -> (i32, i32) {
    %c0_i32 = arith.constant 0 : i32
    %c0_i32_0 = arith.constant 0 : i32
    %c0_i32_1 = arith.constant 0 : i32
    return %c0_i32, %c0_i32_0 : i32, i32
  }
  func.func @transform_5(%arg0: i32) -> (i32, i32) {
    %c0_i32 = arith.constant 0 : i32
    %c0_i32_0 = arith.constant 0 : i32
    return %arg0, %c0_i32 : i32, i32
  }
}

</mosaic_0001>

<bundles_post_ra>
// kernel: tpu_custom_call.1
= control target key start
LH: loop header
LB: loop body
LE: loop exit
PB: predicated region body
PF: predicated region fallthrough
CT: control target
= control target key end

     0   :  { %10 = vsyncpa [#allocation3], 0  ;;  %s9461_s0 = inlined_call_operand.hbm [shape: f32[512,128], index: 0, kind: input, shape index: {}, may-alias: {0,5}]   ;;  %s9462_s1 = inlined_call_operand.vmem [shape: bf16[128,512], index: 1, kind: input, shape index: {}]   ;;  %s9463_s2 = inlined_call_operand.vmem [shape: f32[1,512], index: 2, kind: input, shape index: {}]   ;;  %s9464_s3 = inlined_call_operand.vmem [shape: bf16[512,128], index: 3, kind: input, shape index: {}]   ;;  %s9465_s4 = inlined_call_operand.vmem [shape: f32[1,128], index: 4, kind: input, shape index: {}]   ;;  %s9466_s5 = inlined_call_operand.hbm [shape: f32[512,128], index: 5, kind: output, shape index: {}, may-alias: {0,5}]  }
   0x1   :  { %11 = vsyncpa [#allocation4], 0  ;;  %s5245_s18 = smov [#allocation2]   ;;  %s5197_s22 = scalar_lea.hbm %s9461_s0, 8192 }
   0x2   :  { %s17_s19 = sshll.u32 %s5245_s18, 4  ;;  %p5198_p0 = scmp.ne.s32.totalorder %s9461_s0, %s5197_s22  ;;  %s18_s19 = int_to_ptr.vmem [resolvable:$true] %s17_s19 }
   0x3   :  { %p5201_p1 = scmp.lt.u32.totalorder %s5197_s22, %s9461_s0 }
   0x5   :  { %p5203_p2 = pnand %p5201_p1, %p5198_p0 }
   0x7   :  { %5206 = shalt.err (!%p5203_p2)
}
   0x8   :  { %s5207_s27 = scalar_lea.vmem %s18_s19, 8192  ;;  %p5212_p4 = scmp.lt.s32.totalorder %s18_s19, %s18_s19 }
   0x9   :  { %p5208_p3 = scmp.ne.s32.totalorder %s18_s19, %s5207_s27  ;;  %p5213_p5 = scmp.lt.s32.totalorder %s5207_s27, %s5207_s27 }
   0xb   :  { %p5214_p6 = por %p5213_p5, %p5212_p4 }
   0xd   :  { %p5215_p7 = pnand %p5214_p6, %p5208_p3 }
   0xf   :  { %5218 = shalt.err (!%p5215_p7)
}
  0x10   :  { %s5246_s28 = smov 128   ;;  %s5247_s29 = smov 8  }
  0x11   :  { %23 = dma.hbm_to_vmem [thread:$0]  %s9461_s0, 8192, %s18_s19, [#allocation3], %s5246_s28, %s5246_s28, %s5247_s29  }
  0x12   :  { %5241 = dma.done.wait [#allocation3], 8192  }
  0x13   :  { %5242 = vsyncadd [#allocation3], 4294959104  ;;  %v5248_v0 = vmov 0   ;;  %v4540_v1 = vld [vmem:[%s9462_s1 + $0x4] ss:$16 sps:$4 sm:$0xff]   ;;  %v37_v34 = vld [vmem:[#allocation2 + $0x8] sm:$0xff] }
  0x14   :  { %378 = vmatprep.mubr.bf16.mxu0 %v5248_v0  ;;  %731 = vmatprep.mubr.bf16.mxu1 %v5248_v0  ;;  %v4542_v2 = vld [vmem:[%s9462_s1 + $0xc] ss:$16 sps:$4 sm:$0xff]   ;;  %v4544_v3 = vld [vmem:[%s9462_s1] ss:$16 sps:$4 sm:$0xff]   ;;  %v4545_v4 = vld [vmem:[%s9462_s1 + $0x8] ss:$16 sps:$4 sm:$0xff]  }
  0x15   :  { %346 = vmatprep.subr.bf16.mxu0 %v4540_v1  ;;  %699 = vmatprep.subr.bf16.mxu1 %v4542_v2  ;;  %v4546_v5 = vld [vmem:[%s9462_s1 + $0x24] ss:$16 sps:$4 sm:$0xff]   ;;  %v4548_v6 = vld [vmem:[%s9462_s1 + $0x2c] ss:$16 sps:$4 sm:$0xff]   ;;  %v4550_v7 = vld [vmem:[%s9462_s1 + $0x20] ss:$16 sps:$4 sm:$0xff]  }
  0x16   :  { %347 = vmatpush1.bf16.msra.mxu0 %v4544_v3  ;;  %700 = vmatpush1.bf16.msra.mxu1 %v4545_v4  ;;  %v4551_v8 = vld [vmem:[%s9462_s1 + $0x28] ss:$16 sps:$4 sm:$0xff]   ;;  %v4552_v9 = vld [vmem:[%s9462_s1 + $0x44] ss:$16 sps:$4 sm:$0xff]   ;;  %v4554_v10 = vld [vmem:[%s9462_s1 + $0x4c] ss:$16 sps:$4 sm:$0xff]  }
  0x17   :  { %348 = vmatprep.subr.bf16.mxu0 %v4546_v5  ;;  %701 = vmatprep.subr.bf16.mxu1 %v4548_v6  ;;  %v4556_v11 = vld [vmem:[%s9462_s1 + $0x40] ss:$16 sps:$4 sm:$0xff]   ;;  %v4557_v12 = vld [vmem:[%s9462_s1 + $0x48] ss:$16 sps:$4 sm:$0xff]   ;;  %v4558_v13 = vld [vmem:[%s9462_s1 + $0x64] ss:$16 sps:$4 sm:$0xff]  }
  0x18   :  { %v4560_v14 = vld [vmem:[%s9462_s1 + $0x6c] ss:$16 sps:$4 sm:$0xff]   ;;  %v4562_v15 = vld [vmem:[%s9462_s1 + $0x60] ss:$16 sps:$4 sm:$0xff]   ;;  %v4563_v16 = vld [vmem:[%s9462_s1 + $0x68] ss:$16 sps:$4 sm:$0xff]  }
  0x19   :  { %v4564_v17 = vld [vmem:[%s9462_s1 + $0x84] ss:$16 sps:$4 sm:$0xff]   ;;  %v4566_v18 = vld [vmem:[%s9462_s1 + $0x8c] ss:$16 sps:$4 sm:$0xff]   ;;  %v4568_v19 = vld [vmem:[%s9462_s1 + $0x80] ss:$16 sps:$4 sm:$0xff]  }
  0x1a   :  { %349 = vmatpush1.bf16.msra.mxu0 %v4550_v7  ;;  %702 = vmatpush1.bf16.msra.mxu1 %v4551_v8  ;;  %v4569_v20 = vld [vmem:[%s9462_s1 + $0x88] ss:$16 sps:$4 sm:$0xff]   ;;  %v4570_v21 = vld [vmem:[%s9462_s1 + $0xa4] ss:$16 sps:$4 sm:$0xff]   ;;  %v4572_v22 = vld [vmem:[%s9462_s1 + $0xac] ss:$16 sps:$4 sm:$0xff]  }
  0x1b   :  { %350 = vmatprep.subr.bf16.mxu0 %v4552_v9  ;;  %703 = vmatprep.subr.bf16.mxu1 %v4554_v10  ;;  %v4574_v23 = vld [vmem:[%s9462_s1 + $0xa0] ss:$16 sps:$4 sm:$0xff]   ;;  %v4575_v24 = vld [vmem:[%s9462_s1 + $0xa8] ss:$16 sps:$4 sm:$0xff]   ;;  %v4576_v25 = vld [vmem:[%s9462_s1 + $0xc4] ss:$16 sps:$4 sm:$0xff]  }
  0x1c   :  { %v4578_v26 = vld [vmem:[%s9462_s1 + $0xcc] ss:$16 sps:$4 sm:$0xff]   ;;  %v4580_v27 = vld [vmem:[%s9462_s1 + $0xc0] ss:$16 sps:$4 sm:$0xff]   ;;  %v4581_v28 = vld [vmem:[%s9462_s1 + $0xc8] ss:$16 sps:$4 sm:$0xff]  }
  0x1d   :  { %v4582_v29 = vld [vmem:[%s9462_s1 + $0xe4] ss:$16 sps:$4 sm:$0xff]   ;;  %v4584_v30 = vld [vmem:[%s9462_s1 + $0xec] ss:$16 sps:$4 sm:$0xff]   ;;  %v4586_v31 = vld [vmem:[%s9462_s1 + $0xe0] ss:$16 sps:$4 sm:$0xff]  }
  0x1e   :  { %351 = vmatpush1.bf16.msra.mxu0 %v4556_v11  ;;  %704 = vmatpush1.bf16.msra.mxu1 %v4557_v12  ;;  %v4587_v32 = vld [vmem:[%s9462_s1 + $0xe8] ss:$16 sps:$4 sm:$0xff]   ;;  %v36_v33 = vld [vmem:[#allocation2] sm:$0xff]  ;;  %v38_v38 = vld [vmem:[#allocation2 + $0x10] sm:$0xff] }
  0x1f   :  { %352 = vmatprep.subr.bf16.mxu0 %v4558_v13  ;;  %705 = vmatprep.subr.bf16.mxu1 %v4560_v14  ;;  %v100_v35 = vpack.c.bf16 %v37_v34, %v36_v33  ;;  %v4588_v36 = vld [vmem:[%s9464_s3] sm:$0xff]   ;;  %v39_v39 = vld [vmem:[#allocation2 + $0x18] sm:$0xff]  ;;  %v4590_v40 = vld [vmem:[%s9464_s3 + $0x8] sm:$0xff]  }
  0x20   :  { %v4589_v37 = vld [vmem:[%s9464_s3 + $0x80] sm:$0xff]   ;;  %v4591_v41 = vld [vmem:[%s9464_s3 + $0x88] sm:$0xff]   ;;  %v101_v42 = vpack.c.bf16 %v39_v39, %v38_v38  ;;  %v4592_v43 = vld [vmem:[%s9464_s3 + $0x10] sm:$0xff]  }
  0x21   :  { %v4593_v44 = vld [vmem:[%s9464_s3 + $0x90] sm:$0xff]   ;;  %v40_v45 = vld [vmem:[#allocation2 + $0x20] sm:$0xff]  ;;  %v41_v46 = vld [vmem:[#allocation2 + $0x28] sm:$0xff] }
  0x22   :  { %353 = vmatpush1.bf16.msra.mxu0 %v4562_v15  ;;  %706 = vmatpush1.bf16.msra.mxu1 %v4563_v16  ;;  %v4594_v47 = vld [vmem:[%s9464_s3 + $0x18] sm:$0xff]   ;;  %v102_v49 = vpack.c.bf16 %v41_v46, %v40_v45  ;;  %v4596_v50 = vld [vmem:[%s9464_s3 + $0x20] sm:$0xff]   ;;  %v42_v52 = vld [vmem:[#allocation2 + $0x30] sm:$0xff] }
  0x23   :  { %354 = vmatprep.subr.bf16.mxu0 %v4564_v17  ;;  %707 = vmatprep.subr.bf16.mxu1 %v4566_v18  ;;  %v4595_v48 = vld [vmem:[%s9464_s3 + $0x98] sm:$0xff]   ;;  %v4597_v51 = vld [vmem:[%s9464_s3 + $0xa0] sm:$0xff]   ;;  %v4598_v54 = vld [vmem:[%s9464_s3 + $0x28] sm:$0xff]  }
  0x24   :  { %v43_v53 = vld [vmem:[#allocation2 + $0x38] sm:$0xff]  ;;  %v4599_v55 = vld [vmem:[%s9464_s3 + $0xa8] sm:$0xff]   ;;  %v4600_v57 = vld [vmem:[%s9464_s3 + $0x30] sm:$0xff]  }
  0x25   :  { %v103_v56 = vpack.c.bf16 %v43_v53, %v42_v52  ;;  %v4601_v58 = vld [vmem:[%s9464_s3 + $0xb0] sm:$0xff]   ;;  %v44_v59 = vld [vmem:[#allocation2 + $0x40] sm:$0xff]  ;;  %v45_v60 = vld [vmem:[#allocation2 + $0x48] sm:$0xff] }
  0x26   :  { %355 = vmatpush1.bf16.msra.mxu0 %v4568_v19  ;;  %708 = vmatpush1.bf16.msra.mxu1 %v4569_v20  ;;  %v4602_v61 = vld [vmem:[%s9464_s3 + $0x38] sm:$0xff]   ;;  %v104_v63 = vpack.c.bf16 %v45_v60, %v44_v59  ;;  %v4604_v1 = vld [vmem:[%s9464_s3 + $0x40] sm:$0xff]   ;;  %v46_v3 = vld [vmem:[#allocation2 + $0x50] sm:$0xff] }
  0x27   :  { %356 = vmatprep.subr.bf16.mxu0 %v4570_v21  ;;  %709 = vmatprep.subr.bf16.mxu1 %v4572_v22  ;;  %v4603_v62 = vld [vmem:[%s9464_s3 + $0xb8] sm:$0xff]   ;;  %v4605_v2 = vld [vmem:[%s9464_s3 + $0xc0] sm:$0xff]   ;;  %v4606_v5 = vld [vmem:[%s9464_s3 + $0x48] sm:$0xff]  }
  0x28   :  { %v47_v4 = vld [vmem:[#allocation2 + $0x58] sm:$0xff]  ;;  %v4607_v6 = vld [vmem:[%s9464_s3 + $0xc8] sm:$0xff]   ;;  %v4608_v8 = vld [vmem:[%s9464_s3 + $0x50] sm:$0xff]  }
  0x29   :  { %v105_v7 = vpack.c.bf16 %v47_v4, %v46_v3  ;;  %v4609_v9 = vld [vmem:[%s9464_s3 + $0xd0] sm:$0xff]   ;;  %v48_v10 = vld [vmem:[#allocation2 + $0x60] sm:$0xff]  ;;  %v49_v11 = vld [vmem:[#allocation2 + $0x68] sm:$0xff] }
  0x2a   :  { %357 = vmatpush1.bf16.msra.mxu0 %v4574_v23  ;;  %710 = vmatpush1.bf16.msra.mxu1 %v4575_v24  ;;  %v106_v12 = vpack.c.bf16 %v49_v11, %v48_v10  ;;  %v4610_v13 = vld [vmem:[%s9464_s3 + $0x58] sm:$0xff]   ;;  %v50_v15 = vld [vmem:[#allocation2 + $0x70] sm:$0xff]  ;;  %v52_v18 = vld [vmem:[#allocation2 + $0x80] sm:$0xff] }
  0x2b   :  { %358 = vmatprep.subr.bf16.mxu0 %v4576_v25  ;;  %711 = vmatprep.subr.bf16.mxu1 %v4578_v26  ;;  %v4611_v14 = vld [vmem:[%s9464_s3 + $0xd8] sm:$0xff]   ;;  %v53_v19 = vld [vmem:[#allocation2 + $0x88] sm:$0xff]  ;;  %v4612_v21 = vld [vmem:[%s9464_s3 + $0x60] sm:$0xff]  }
  0x2c   :  { %v51_v16 = vld [vmem:[#allocation2 + $0x78] sm:$0xff]  ;;  %v108_v20 = vpack.c.bf16 %v53_v19, %v52_v18  ;;  %v4613_v22 = vld [vmem:[%s9464_s3 + $0xe0] sm:$0xff]   ;;  %v54_v23 = vld [vmem:[#allocation2 + $0x90] sm:$0xff] }
  0x2d   :  { %v107_v17 = vpack.c.bf16 %v51_v16, %v50_v15  ;;  %v55_v24 = vld [vmem:[#allocation2 + $0x98] sm:$0xff]  ;;  %v56_v26 = vld [vmem:[#allocation2 + $0xa0] sm:$0xff]  ;;  %v61_v34 = vld [vmem:[#allocation2 + $0xc8] sm:$0xff] }
  0x2e   :  { %359 = vmatpush1.bf16.msra.mxu0 %v4580_v27  ;;  %712 = vmatpush1.bf16.msra.mxu1 %v4581_v28  ;;  %v109_v25 = vpack.c.bf16 %v55_v24, %v54_v23  ;;  %v57_v27 = vld [vmem:[#allocation2 + $0xa8] sm:$0xff]  ;;  %v60_v33 = vld [vmem:[#allocation2 + $0xc0] sm:$0xff]  ;;  %v71_v52 = vld [vmem:[#allocation2 + $0x118] sm:$0xff] }
  0x2f   :  { %360 = vmatprep.subr.bf16.mxu0 %v4582_v29  ;;  %713 = vmatprep.subr.bf16.mxu1 %v4584_v30  ;;  %v110_v28 = vpack.c.bf16 %v57_v27, %v56_v26  ;;  %v4614_v29 = vld [vmem:[%s9464_s3 + $0x68] sm:$0xff]   ;;  %v58_v30 = vld [vmem:[#allocation2 + $0xb0] sm:$0xff]  ;;  %v64_v39 = vld [vmem:[#allocation2 + $0xe0] sm:$0xff] }
  0x30   :  { %v68_v46 = vld [vmem:[#allocation2 + $0x100] sm:$0xff]  ;;  %v4618_v60 = vld [vmem:[%s9464_s3 + $0x78] sm:$0xff]   ;;  %v90_v27 = vld [vmem:[#allocation2 + $0x1b0] sm:$0xff] }
  0x31   :  { %v79_v3 = vld [vmem:[#allocation2 + $0x158] sm:$0xff]  ;;  %v84_v11 = vld [vmem:[#allocation2 + $0x180] sm:$0xff] }
  0x32   :  { %361 = vmatpush1.bf16.msra.mxu0 %v4586_v31  ;;  %714 = vmatpush1.bf16.msra.mxu1 %v4587_v32  ;;  %v59_v31 = vld [vmem:[#allocation2 + $0xb8] sm:$0xff]  ;;  %v88_v19 = vld [vmem:[#allocation2 + $0x1a0] sm:$0xff] }
  0x33   :  { %3747 = vmatprep.subr.bf16.mxu0 %v5248_v0  ;;  %4036 = vmatprep.subr.bf16.mxu1 %v5248_v0  ;;  %v111_v32 = vpack.c.bf16 %v59_v31, %v58_v30  ;;  %v87_v15 = vld [vmem:[#allocation2 + $0x198] sm:$0xff]  ;;  %v164_v24 = vld [vmem:[%s9463_s2] sm:$0xf] }
  0x34   :  { %v91_v30 = vld [vmem:[#allocation2 + $0x1b8] sm:$0xff]  ;;  %v92_v31 = vld [vmem:[#allocation2 + $0x1c0] sm:$0xff] }
  0x35   :  { %379 = vmatmul.mubr.bf16.vlgmr.msra.gmra.mrb[0].mxu0 %v100_v35  ;;  %732 = vmatmul.mubr.bf16.vlgmr.msra.gmra.mrb[0].mxu1 %v100_v35  ;;  %v112_v35 = vpack.c.bf16 %v61_v34, %v60_v33 }
  0x36   :  { %3748 = vmatpush1.bf16.msra.mxu0 %v4588_v36  ;;  %4037 = vmatpush1.bf16.msra.mxu1 %v4589_v37  ;;  %v62_v36 = vld [vmem:[#allocation2 + $0xd0] sm:$0xff]  ;;  %v63_v37 = vld [vmem:[#allocation2 + $0xd8] sm:$0xff] }
  0x37   :  { %388 = vmatprep.mubr.bf16.mxu0 %v5248_v0  ;;  %741 = vmatprep.mubr.bf16.mxu1 %v5248_v0  ;;  %v113_v38 = vpack.c.bf16 %v63_v37, %v62_v36  ;;  %v95_v36 = vld [vmem:[#allocation2 + $0x1d8] sm:$0xff]  ;;  %v96_v37 = vld [vmem:[#allocation2 + $0x1e0] sm:$0xff] }
  0x38   :  { %3749 = vmatprep.subr.bf16.mxu0 %v5248_v0  ;;  %4038 = vmatprep.subr.bf16.mxu1 %v5248_v0 }
  0x3a   :  { %3750 = vmatpush1.bf16.msra.mxu0 %v4590_v40  ;;  %4039 = vmatpush1.bf16.msra.mxu1 %v4591_v41  ;;  %v65_v40 = vld [vmem:[#allocation2 + $0xe8] sm:$0xff] }
  0x3b   :  { %3751 = vmatprep.subr.bf16.mxu0 %v5248_v0  ;;  %4040 = vmatprep.subr.bf16.mxu1 %v5248_v0  ;;  %v114_v41 = vpack.c.bf16 %v65_v40, %v64_v39  ;;  %v98_v39 = vld [vmem:[#allocation2 + $0x1f0] sm:$0xff]  ;;  %v99_v40 = vld [vmem:[#allocation2 + $0x1f8] sm:$0xff] }
  0x3d   :  { %389 = vmatmul.mubr.bf16.gmra.mrb[4].mxu0 %v101_v42  ;;  %742 = vmatmul.mubr.bf16.gmra.mrb[4].mxu1 %v101_v42  ;;  %v4615_v42 = vld [vmem:[%s9464_s3 + $0xe8] sm:$0xff]  }
  0x3e   :  { %398 = vmatprep.mubr.bf16.mxu0 %v5248_v0  ;;  %751 = vmatprep.mubr.bf16.mxu1 %v5248_v0 }
  0x3f   :  { %3752 = vmatpush1.bf16.msra.mxu0 %v4592_v43  ;;  %4041 = vmatpush1.bf16.msra.mxu1 %v4593_v44  ;;  %v66_v43 = vld [vmem:[#allocation2 + $0xf0] sm:$0xff]  ;;  %v67_v44 = vld [vmem:[#allocation2 + $0xf8] sm:$0xff] }
  0x40   :  { %3753 = vmatprep.subr.bf16.mxu0 %v5248_v0  ;;  %4042 = vmatprep.subr.bf16.mxu1 %v5248_v0  ;;  %v115_v45 = vpack.c.bf16 %v67_v44, %v66_v43  ;;  %v127_v43 = vpack.c.bf16 %v91_v30, %v90_v27 }
  0x43   :  { %3754 = vmatpush1.bf16.msra.mxu0 %v4594_v47  ;;  %4043 = vmatpush1.bf16.msra.mxu1 %v4595_v48  ;;  %v69_v47 = vld [vmem:[#allocation2 + $0x108] sm:$0xff]  ;;  %v4616_v48 = vld [vmem:[%s9464_s3 + $0x70] sm:$0xff]  }
  0x44   :  { %3755 = vmatprep.subr.bf16.mxu0 %v5248_v0  ;;  %4044 = vmatprep.subr.bf16.mxu1 %v5248_v0 }
  0x45   :  { %399 = vmatmul.mubr.bf16.gmra.mrb[8].mxu0 %v102_v49  ;;  %752 = vmatmul.mubr.bf16.gmra.mrb[8].mxu1 %v102_v49  ;;  %v116_v49 = vpack.c.bf16 %v69_v47, %v68_v46 }
  0x46   :  { %408 = vmatprep.mubr.bf16.mxu0 %v5248_v0  ;;  %761 = vmatprep.mubr.bf16.mxu1 %v5248_v0 }
  0x47   :  { %3756 = vmatpush1.bf16.msra.mxu0 %v4596_v50  ;;  %4045 = vmatpush1.bf16.msra.mxu1 %v4597_v51  ;;  %v4617_v50 = vld [vmem:[%s9464_s3 + $0xf0] sm:$0xff]  }
  0x48   :  { %3757 = vmatprep.subr.bf16.mxu0 %v5248_v0  ;;  %4046 = vmatprep.subr.bf16.mxu1 %v5248_v0  ;;  %v70_v51 = vld [vmem:[#allocation2 + $0x110] sm:$0xff] }
  0x49   :  { %v117_v53 = vpack.c.bf16 %v71_v52, %v70_v51 }
  0x4b   :  { %3758 = vmatpush1.bf16.msra.mxu0 %v4598_v54  ;;  %4047 = vmatpush1.bf16.msra.mxu1 %v4599_v55  ;;  %v72_v54 = vld [vmem:[#allocation2 + $0x120] sm:$0xff]  ;;  %v73_v55 = vld [vmem:[#allocation2 + $0x128] sm:$0xff] }
  0x4c   :  { %3759 = vmatprep.subr.bf16.mxu0 %v5248_v0  ;;  %4048 = vmatprep.subr.bf16.mxu1 %v5248_v0 }
  0x4d   :  { %409 = vmatmul.mubr.bf16.gmra.mrb[12].mxu0 %v103_v56  ;;  %762 = vmatmul.mubr.bf16.gmra.mrb[12].mxu1 %v103_v56  ;;  %v118_v56 = vpack.c.bf16 %v73_v55, %v72_v54  ;;  %v5604_v55 = vpack.c.bf16 %v99_v40, %v98_v39 }
  0x4e   :  { %418 = vmatprep.mubr.bf16.mxu0 %v5248_v0  ;;  %771 = vmatprep.mubr.bf16.mxu1 %v5248_v0 }
  0x4f   :  { %3760 = vmatpush1.bf16.msra.mxu0 %v4600_v57  ;;  %4049 = vmatpush1.bf16.msra.mxu1 %v4601_v58  ;;  %v74_v57 = vld [vmem:[#allocation2 + $0x130] sm:$0xff]  ;;  %v75_v58 = vld [vmem:[#allocation2 + $0x138] sm:$0xff] }
  0x50   :  { %3761 = vmatprep.subr.bf16.mxu0 %v5248_v0  ;;  %4050 = vmatprep.subr.bf16.mxu1 %v5248_v0  ;;  %v119_v59 = vpack.c.bf16 %v75_v58, %v74_v57 }
  0x53   :  { %3762 = vmatpush1.bf16.msra.mxu0 %v4602_v61  ;;  %4051 = vmatpush1.bf16.msra.mxu1 %v4603_v62  ;;  %v4619_v61 = vld [vmem:[%s9464_s3 + $0xf8] sm:$0xff]   ;;  %v76_v62 = vld [vmem:[#allocation2 + $0x140] sm:$0xff] }
  0x54   :  { %3763 = vmatprep.subr.bf16.mxu0 %v5248_v0  ;;  %4052 = vmatprep.subr.bf16.mxu1 %v5248_v0 }
  0x55   :  { %419 = vmatmul.mubr.bf16.gmra.mrb[16].mxu0 %v104_v63  ;;  %772 = vmatmul.mubr.bf16.gmra.mrb[16].mxu1 %v104_v63  ;;  %v77_v63 = vld [vmem:[#allocation2 + $0x148] sm:$0xff] }
  0x56   :  { %428 = vmatprep.mubr.bf16.mxu0 %v5248_v0  ;;  %781 = vmatprep.mubr.bf16.mxu1 %v5248_v0 }
  0x57   :  { %3764 = vmatpush1.bf16.msra.mxu0 %v4604_v1  ;;  %4053 = vmatpush1.bf16.msra.mxu1 %v4605_v2  ;;  %v120_v1 = vpack.c.bf16 %v77_v63, %v76_v62  ;;  %v78_v2 = vld [vmem:[#allocation2 + $0x150] sm:$0xff] }
  0x58   :  { %3765 = vmatprep.subr.bf16.mxu0 %v5248_v0  ;;  %4054 = vmatprep.subr.bf16.mxu1 %v5248_v0  ;;  %v121_v4 = vpack.c.bf16 %v79_v3, %v78_v2 }
  0x5b   :  { %3766 = vmatpush1.bf16.msra.mxu0 %v4606_v5  ;;  %4055 = vmatpush1.bf16.msra.mxu1 %v4607_v6  ;;  %v80_v5 = vld [vmem:[#allocation2 + $0x160] sm:$0xff]  ;;  %v81_v6 = vld [vmem:[#allocation2 + $0x168] sm:$0xff] }
  0x5c   :  { %3767 = vmatprep.subr.bf16.mxu0 %v5248_v0  ;;  %4056 = vmatprep.subr.bf16.mxu1 %v5248_v0 }
  0x5d   :  { %429 = vmatmul.mubr.bf16.gmra.mrb[20].mxu0 %v105_v7  ;;  %782 = vmatmul.mubr.bf16.gmra.mrb[20].mxu1 %v105_v7  ;;  %v122_v7 = vpack.c.bf16 %v81_v6, %v80_v5 }
  0x5e   :  { %438 = vmatprep.mubr.bf16.mxu0 %v5248_v0  ;;  %791 = vmatprep.mubr.bf16.mxu1 %v5248_v0 }
  0x5f   :  { %3768 = vmatpush1.bf16.msra.mxu0 %v4608_v8  ;;  %4057 = vmatpush1.bf16.msra.mxu1 %v4609_v9  ;;  %v82_v8 = vld [vmem:[#allocation2 + $0x170] sm:$0xff]  ;;  %v83_v9 = vld [vmem:[#allocation2 + $0x178] sm:$0xff] }
  0x60   :  { %3769 = vmatprep.subr.bf16.mxu0 %v5248_v0  ;;  %4058 = vmatprep.subr.bf16.mxu1 %v5248_v0  ;;  %v123_v10 = vpack.c.bf16 %v83_v9, %v82_v8 }
  0x63   :  { %3770 = vmatpush1.bf16.msra.mxu0 %v4610_v13  ;;  %4059 = vmatpush1.bf16.msra.mxu1 %v4611_v14  ;;  %v86_v14 = vld [vmem:[#allocation2 + $0x190] sm:$0xff] }
  0x64   :  { %3771 = vmatprep.subr.bf16.mxu0 %v5248_v0  ;;  %4060 = vmatprep.subr.bf16.mxu1 %v5248_v0  ;;  %v125_v16 = vpack.c.bf16 %v87_v15, %v86_v14 }
  0x65   :  { %439 = vmatmul.mubr.bf16.gmra.mrb[24].mxu0 %v106_v12  ;;  %792 = vmatmul.mubr.bf16.gmra.mrb[24].mxu1 %v106_v12  ;;  %v85_v12 = vld [vmem:[#allocation2 + $0x188] sm:$0xff] }
  0x66   :  { %448 = vmatprep.mubr.bf16.mxu0 %v5248_v0  ;;  %801 = vmatprep.mubr.bf16.mxu1 %v5248_v0  ;;  %v124_v13 = vpack.c.bf16 %v85_v12, %v84_v11 }
  0x67   :  { %3772 = vmatpush1.bf16.msra.mxu0 %v4612_v21  ;;  %4061 = vmatpush1.bf16.msra.mxu1 %v4613_v22 }
  0x68   :  { %3773 = vmatprep.subr.bf16.mxu0 %v5248_v0  ;;  %4062 = vmatprep.subr.bf16.mxu1 %v5248_v0 }
  0x6b   :  { %3774 = vmatpush1.bf16.msra.mxu0 %v4614_v29  ;;  %4063 = vmatpush1.bf16.msra.mxu1 %v4615_v42 }
  0x6c   :  { %3775 = vmatprep.subr.bf16.mxu0 %v5248_v0  ;;  %4064 = vmatprep.subr.bf16.mxu1 %v5248_v0 }
  0x6d   :  { %449 = vmatmul.mubr.bf16.gmra.mrb[28].mxu0 %v107_v17  ;;  %802 = vmatmul.mubr.bf16.gmra.mrb[28].mxu1 %v107_v17  ;;  %v166_v17 = vlaneseq }
  0x6e   :  { %458 = vmatprep.mubr.bf16.mxu0 %v5248_v0  ;;  %811 = vmatprep.mubr.bf16.mxu1 %v5248_v0 }
  0x6f   :  { %3776 = vmatpush1.bf16.msra.mxu0 %v4616_v48  ;;  %4065 = vmatpush1.bf16.msra.mxu1 %v4617_v50  ;;  %v167_v18 = vshrl.u32 %v166_v17, 7 }
  0x70   :  { %3777 = vmatprep.subr.bf16.mxu0 %v5248_v0  ;;  %4066 = vmatprep.subr.bf16.mxu1 %v5248_v0 }
  0x71   :  { %v168_v22 = vsub.s32 0, %v167_v18  ;;  %v176_v23 = vsub.s32 2, %v167_v18  ;;  %v180_v26 = vsub.s32 3, %v167_v18 }
  0x73   :  { %3778 = vmatpush1.bf16.msra.mxu0 %v4618_v60  ;;  %4067 = vmatpush1.bf16.msra.mxu1 %v4619_v61  ;;  %v5578_v29 = vrot.slane %v164_v24, %v176_v23  ;;  %v5582_v34 = vrot.slane %v164_v24, %v180_v26 }
  0x75   :  { %459 = vmatmul.mubr.bf16.gmra.mrb[32].mxu0 %v108_v20  ;;  %812 = vmatmul.mubr.bf16.gmra.mrb[32].mxu1 %v108_v20  ;;  %v89_v20 = vld [vmem:[#allocation2 + $0x1a8] sm:$0xff] }
  0x76   :  { %468 = vmatprep.mubr.bf16.mxu0 %v5248_v0  ;;  %821 = vmatprep.mubr.bf16.mxu1 %v5248_v0  ;;  %v126_v21 = vpack.c.bf16 %v89_v20, %v88_v19 }
  0x7d   :  { %469 = vmatmul.mubr.bf16.gmra.mrb[36].mxu0 %v109_v25  ;;  %822 = vmatmul.mubr.bf16.gmra.mrb[36].mxu1 %v109_v25  ;;  %v172_v25 = vsub.s32 1, %v167_v18 }
  0x7e   :  { %478 = vmatprep.mubr.bf16.mxu0 %v5248_v0  ;;  %831 = vmatprep.mubr.bf16.mxu1 %v5248_v0 }
  0x7f   :  { %v5580_v33 = vrot.slane %v164_v24, %v172_v25 }
  0x85   :  { %479 = vmatmul.mubr.bf16.gmra.mrb[40].mxu0 %v110_v28  ;;  %832 = vmatmul.mubr.bf16.gmra.mrb[40].mxu1 %v110_v28  ;;  %v5576_v28 = vrot.slane %v164_v24, %v168_v22 }
  0x86   :  { %488 = vmatprep.mubr.bf16.mxu0 %v5248_v0  ;;  %841 = vmatprep.mubr.bf16.mxu1 %v5248_v0 }
  0x8d   :  { %489 = vmatmul.mubr.bf16.gmra.mrb[44].mxu0 %v111_v32  ;;  %842 = vmatmul.mubr.bf16.gmra.mrb[44].mxu1 %v111_v32  ;;  %v93_v32 = vld [vmem:[#allocation2 + $0x1c8] sm:$0xff] }
  0x8e   :  { %498 = vmatprep.mubr.bf16.mxu0 %v5248_v0  ;;  %851 = vmatprep.mubr.bf16.mxu1 %v5248_v0  ;;  %v5592_v48 = vpack.c.bf16 %v93_v32, %v92_v31 }
  0x95   :  { %499 = vmatmul.mubr.bf16.gmra.mrb[48].mxu0 %v112_v35  ;;  %852 = vmatmul.mubr.bf16.gmra.mrb[48].mxu1 %v112_v35  ;;  %v94_v35 = vld [vmem:[#allocation2 + $0x1d0] sm:$0xff] }
  0x96   :  { %508 = vmatprep.mubr.bf16.mxu0 %v5248_v0  ;;  %861 = vmatprep.mubr.bf16.mxu1 %v5248_v0 }
  0x9d   :  { %509 = vmatmul.mubr.bf16.gmra.mrb[52].mxu0 %v113_v38  ;;  %862 = vmatmul.mubr.bf16.gmra.mrb[52].mxu1 %v113_v38  ;;  %v97_v38 = vld [vmem:[#allocation2 + $0x1e8] sm:$0xff] }
  0x9e   :  { %518 = vmatprep.mubr.bf16.mxu0 %v5248_v0  ;;  %871 = vmatprep.mubr.bf16.mxu1 %v5248_v0  ;;  %v5602_v54 = vpack.c.bf16 %v97_v38, %v96_v37 }
  0xa5   :  { %519 = vmatmul.mubr.bf16.gmra.mrb[56].mxu0 %v114_v41  ;;  %872 = vmatmul.mubr.bf16.gmra.mrb[56].mxu1 %v114_v41 }
  0xa6   :  { %528 = vmatprep.mubr.bf16.mxu0 %v5248_v0  ;;  %881 = vmatprep.mubr.bf16.mxu1 %v5248_v0 }
  0xad   :  { %529 = vmatmul.mubr.bf16.gmra.mrb[60].mxu0 %v115_v45  ;;  %882 = vmatmul.mubr.bf16.gmra.mrb[60].mxu1 %v115_v45 }
  0xae   :  { %538 = vmatprep.mubr.bf16.mxu0 %v5248_v0  ;;  %891 = vmatprep.mubr.bf16.mxu1 %v5248_v0 }
  0xb5   :  { %539 = vmatmul.mubr.bf16.gmra.mrb[64].mxu0 %v116_v49  ;;  %892 = vmatmul.mubr.bf16.gmra.mrb[64].mxu1 %v116_v49  ;;  %v5594_v49 = vpack.c.bf16 %v95_v36, %v94_v35 }
  0xb6   :  { %548 = vmatprep.mubr.bf16.mxu0 %v5248_v0  ;;  %901 = vmatprep.mubr.bf16.mxu1 %v5248_v0 }
  0xbd   :  { %549 = vmatmul.mubr.bf16.gmra.mrb[68].mxu0 %v117_v53  ;;  %902 = vmatmul.mubr.bf16.gmra.mrb[68].mxu1 %v117_v53 }
  0xbe   :  { %558 = vmatprep.mubr.bf16.mxu0 %v5248_v0  ;;  %911 = vmatprep.mubr.bf16.mxu1 %v5248_v0 }
  0xc5   :  { %559 = vmatmul.mubr.bf16.gmra.mrb[72].mxu0 %v118_v56  ;;  %912 = vmatmul.mubr.bf16.gmra.mrb[72].mxu1 %v118_v56 }
  0xc6   :  { %568 = vmatprep.mubr.bf16.mxu0 %v5248_v0  ;;  %921 = vmatprep.mubr.bf16.mxu1 %v5248_v0 }
  0xcd   :  { %569 = vmatmul.mubr.bf16.gmra.mrb[76].mxu0 %v119_v59  ;;  %922 = vmatmul.mubr.bf16.gmra.mrb[76].mxu1 %v119_v59 }
  0xce   :  { %578 = vmatprep.mubr.bf16.mxu0 %v5248_v0  ;;  %931 = vmatprep.mubr.bf16.mxu1 %v5248_v0 }
  0xd5   :  { %579 = vmatmul.mubr.bf16.gmra.mrb[80].mxu0 %v120_v1  ;;  %932 = vmatmul.mubr.bf16.gmra.mrb[80].mxu1 %v120_v1 }
  0xd6   :  { %588 = vmatprep.mubr.bf16.mxu0 %v5248_v0  ;;  %941 = vmatprep.mubr.bf16.mxu1 %v5248_v0 }
  0xdd   :  { %589 = vmatmul.mubr.bf16.gmra.mrb[84].mxu0 %v121_v4  ;;  %942 = vmatmul.mubr.bf16.gmra.mrb[84].mxu1 %v121_v4 }
  0xde   :  { %598 = vmatprep.mubr.bf16.mxu0 %v5248_v0  ;;  %951 = vmatprep.mubr.bf16.mxu1 %v5248_v0 }
  0xe5   :  { %599 = vmatmul.mubr.bf16.gmra.mrb[88].mxu0 %v122_v7  ;;  %952 = vmatmul.mubr.bf16.gmra.mrb[88].mxu1 %v122_v7 }
  0xe6   :  { %608 = vmatprep.mubr.bf16.mxu0 %v5248_v0  ;;  %961 = vmatprep.mubr.bf16.mxu1 %v5248_v0 }
  0xed   :  { %609 = vmatmul.mubr.bf16.gmra.mrb[92].mxu0 %v123_v10  ;;  %962 = vmatmul.mubr.bf16.gmra.mrb[92].mxu1 %v123_v10 }
  0xee   :  { %618 = vmatprep.mubr.bf16.mxu0 %v5248_v0  ;;  %971 = vmatprep.mubr.bf16.mxu1 %v5248_v0 }
  0xf5   :  { %619 = vmatmul.mubr.bf16.gmra.mrb[96].mxu0 %v124_v13  ;;  %972 = vmatmul.mubr.bf16.gmra.mrb[96].mxu1 %v124_v13 }
  0xf6   :  { %628 = vmatprep.mubr.bf16.mxu0 %v5248_v0  ;;  %981 = vmatprep.mubr.bf16.mxu1 %v5248_v0 }
  0xfd   :  { %629 = vmatmul.mubr.bf16.gmra.mrb[100].mxu0 %v125_v16  ;;  %982 = vmatmul.mubr.bf16.gmra.mrb[100].mxu1 %v125_v16 }
  0xfe   :  { %638 = vmatprep.mubr.bf16.mxu0 %v5248_v0  ;;  %991 = vmatprep.mubr.bf16.mxu1 %v5248_v0 }
 0x105   :  { %639 = vmatmul.mubr.bf16.gmra.mrb[104].mxu0 %v126_v21  ;;  %992 = vmatmul.mubr.bf16.gmra.mrb[104].mxu1 %v126_v21 }
 0x106   :  { %648 = vmatprep.mubr.bf16.mxu0 %v5248_v0  ;;  %1001 = vmatprep.mubr.bf16.mxu1 %v5248_v0 }
 0x108   :  { %v380_v41 = vpop.f32.mrb[0].mxu0  ;;  %v733_v42 = vpop.f32.mrb[0].mxu1 }
 0x109   :  { %v5587_v44 = vadd.f32 %v380_v41, %v5576_v28  ;;  %v5590_v45 = vadd.f32 %v733_v42, %v5578_v29  ;;  %v382_v46 = vpop.f32.mrb[1].mxu0  ;;  %v735_v47 = vpop.f32.mrb[1].mxu1 }
 0x10a   :  { %v5597_v50 = vadd.f32 %v382_v46, %v5580_v33  ;;  %v5600_v51 = vadd.f32 %v735_v47, %v5582_v34  ;;  %v384_v52 = vpop.f32.mrb[2].mxu0  ;;  %v737_v53 = vpop.f32.mrb[2].mxu1 }
 0x10b   :  { %v1052_v56 = vmul.f32 %v5587_v44, %v5587_v44  ;;  %v1054_v57 = vmul.f32 %v5590_v45, %v5590_v45  ;;  %v5611_v58 = vadd.f32 %v384_v52, %v5576_v28  ;;  %v5614_v59 = vadd.f32 %v737_v53, %v5578_v29  ;;  %v386_v60 = vpop.f32.mrb[3].mxu0  ;;  %v739_v61 = vpop.f32.mrb[3].mxu1 }
 0x10c   :  { %v1053_v62 = vmul.f32 %v5597_v50, %v5597_v50  ;;  %v1055_v63 = vmul.f32 %v5600_v51, %v5600_v51  ;;  %v5621_v1 = vadd.f32 %v386_v60, %v5580_v33  ;;  %v5624_v2 = vadd.f32 %v739_v61, %v5582_v34 }
 0x10d   :  { %v1308_v3 = vmul.f32 %v1052_v56, %v5587_v44  ;;  %v1310_v4 = vmul.f32 %v1054_v57, %v5590_v45  ;;  %v1056_v5 = vmul.f32 %v5611_v58, %v5611_v58  ;;  %v1058_v6 = vmul.f32 %v5614_v59, %v5614_v59  ;;  %649 = vmatmul.mubr.bf16.gmra.mrb[108].mxu0 %v127_v43 }
 0x10e   :  { %v1309_v7 = vmul.f32 %v1053_v62, %v5597_v50  ;;  %v1311_v8 = vmul.f32 %v1055_v63, %v5600_v51  ;;  %v1057_v9 = vmul.f32 %v5621_v1, %v5621_v1  ;;  %v1059_v10 = vmul.f32 %v5624_v2, %v5624_v2  ;;  %1002 = vmatmul.mubr.bf16.gmra.mrb[108].mxu1 %v127_v43 }
 0x10f   :  { %v1564_v11 = vmul.f32 0.044715, %v1308_v3  ;;  %v1566_v12 = vmul.f32 0.044715, %v1310_v4  ;;  %v1312_v13 = vmul.f32 %v1056_v5, %v5611_v58  ;;  %v1314_v14 = vmul.f32 %v1058_v6, %v5614_v59  ;;  %658 = vmatprep.mubr.bf16.mxu0 %v5248_v0  ;;  %1011 = vmatprep.mubr.bf16.mxu1 %v5248_v0 }
 0x110   :  { %v1565_v15 = vmul.f32 0.044715, %v1309_v7  ;;  %v1567_v16 = vmul.f32 0.044715, %v1311_v8  ;;  %v1313_v17 = vmul.f32 %v1057_v9, %v5621_v1  ;;  %v1315_v18 = vmul.f32 %v1059_v10, %v5624_v2  ;;  %v390_v19 = vpop.f32.mrb[4].mxu0  ;;  %v743_v20 = vpop.f32.mrb[4].mxu1 }
 0x111   :  { %v1820_v21 = vadd.f32 %v1564_v11, %v5587_v44  ;;  %v1822_v22 = vadd.f32 %v1566_v12, %v5590_v45  ;;  %v1568_v23 = vmul.f32 0.044715, %v1312_v13  ;;  %v1570_v24 = vmul.f32 0.044715, %v1314_v14  ;;  %v392_v25 = vpop.f32.mrb[5].mxu0  ;;  %v745_v26 = vpop.f32.mrb[5].mxu1 }
 0x112   :  { %v1821_v27 = vadd.f32 %v1565_v15, %v5597_v50  ;;  %v1823_v30 = vadd.f32 %v1567_v16, %v5600_v51  ;;  %v1569_v31 = vmul.f32 0.044715, %v1313_v17  ;;  %v1571_v32 = vmul.f32 0.044715, %v1315_v18  ;;  %v394_v35 = vpop.f32.mrb[6].mxu0  ;;  %v747_v36 = vpop.f32.mrb[6].mxu1 }
 0x113   :  { %v2076_v37 = vmul.f32 0.7978846, %v1820_v21  ;;  %v2078_v38 = vmul.f32 0.7978846, %v1822_v22  ;;  %v1824_v39 = vadd.f32 %v1568_v23, %v5611_v58  ;;  %v1826_v40 = vadd.f32 %v1570_v24, %v5614_v59  ;;  %v396_v41 = vpop.f32.mrb[7].mxu0  ;;  %v749_v42 = vpop.f32.mrb[7].mxu1 }
 0x114   :  { %v2077_v43 = vmul.f32 0.7978846, %v1821_v27  ;;  %v2079_v46 = vmul.f32 0.7978846, %v1823_v30  ;;  %v1825_v47 = vadd.f32 %v1569_v31, %v5621_v1  ;;  %v1827_v52 = vadd.f32 %v1571_v32, %v5624_v2 }
 0x115   :  { %4620 = vtanh.f32 %v2076_v37  ;;  %v2080_v53 = vmul.f32 0.7978846, %v1824_v39  ;;  %v2082_v56 = vmul.f32 0.7978846, %v1826_v40  ;;  %v5653_v57 = vadd.f32 %v390_v19, %v5576_v28  ;;  %659 = vmatmul.mubr.bf16.gmra.mrb[112].mxu0 %v5592_v48 }
 0x116   :  { %4622 = vtanh.f32 %v2078_v38  ;;  %v2081_v60 = vmul.f32 0.7978846, %v1825_v47  ;;  %v2083_v61 = vmul.f32 0.7978846, %v1827_v52  ;;  %v5657_v62 = vadd.f32 %v743_v20, %v5578_v29  ;;  %1012 = vmatmul.mubr.bf16.gmra.mrb[112].mxu1 %v5592_v48  ;;  %668 = vmatprep.mubr.bf16.mxu0 %v5248_v0 }
 0x117   :  { %9627 = vst [vmem:[#allocation8_spill] sm:$0xff] %v5653_v57  ;;  %4624 = vtanh.f32 %v2077_v43  ;;  %v1060_v63 = vmul.f32 %v5653_v57, %v5653_v57  ;;  %v5664_v3 = vadd.f32 %v392_v25, %v5580_v33  ;;  %v5667_v4 = vadd.f32 %v745_v26, %v5582_v34  ;;  %1021 = vmatprep.mubr.bf16.mxu1 %v5248_v0 }
 0x118   :  { %9628 = vst [vmem:[#allocation9_spill] sm:$0xff] %v5657_v62  ;;  %4626 = vtanh.f32 %v2079_v46  ;;  %v1062_v5 = vmul.f32 %v5657_v62, %v5657_v62  ;;  %v5673_v48 = vadd.f32 %v394_v35, %v5576_v28  ;;  %v5676_v6 = vadd.f32 %v747_v36, %v5578_v29  ;;  %v5678_v7 = vpop.f32.mrb[8].mxu0  ;;  %v5680_v8 = vpop.f32.mrb[8].mxu1 }
 0x119   :  { %9629 = vst [vmem:[#allocation10_spill] sm:$0xff] %v5667_v4  ;;  %4628 = vtanh.f32 %v2080_v53  ;;  %v1316_v9 = vmul.f32 %v1060_v63, %v5653_v57  ;;  %v1061_v10 = vmul.f32 %v5664_v3, %v5664_v3  ;;  %v1063_v11 = vmul.f32 %v5667_v4, %v5667_v4  ;;  %v5687_v12 = vpop.f32.mrb[9].mxu0  ;;  %v5689_v13 = vpop.f32.mrb[9].mxu1 }
 0x11a   :  { %9630 = vst [vmem:[#allocation11_spill] sm:$0xff] %v5673_v48  ;;  %9631 = vst [vmem:[#allocation12_spill] sm:$0xff] %v5676_v6  ;;  %4630 = vtanh.f32 %v2082_v56  ;;  %v1318_v14 = vmul.f32 %v1062_v5, %v5657_v62  ;;  %v1064_v15 = vmul.f32 %v5673_v48, %v5673_v48  ;;  %v1066_v16 = vmul.f32 %v5676_v6, %v5676_v6  ;;  %v5696_v17 = vpop.f32.mrb[10].mxu0  ;;  %v5698_v18 = vpop.f32.mrb[10].mxu1 }
 0x11b   :  { %4632 = vtanh.f32 %v2081_v60  ;;  %v1572_v19 = vmul.f32 0.044715, %v1316_v9  ;;  %v1317_v20 = vmul.f32 %v1061_v10, %v5664_v3  ;;  %v1319_v21 = vmul.f32 %v1063_v11, %v5667_v4  ;;  %v5702_v22 = vpop.f32.mrb[11].mxu0  ;;  %v5704_v23 = vpop.f32.mrb[11].mxu1 }
 0x11c   :  { %4634 = vtanh.f32 %v2083_v61  ;;  %v1574_v24 = vmul.f32 0.044715, %v1318_v14  ;;  %v1320_v25 = vmul.f32 %v1064_v15, %v5673_v48  ;;  %v1322_v26 = vmul.f32 %v1066_v16, %v5676_v6 }
 0x11d   :  { %v1828_v27 = vadd.f32 %v1572_v19, %v5653_v57  ;;  %v1573_v30 = vmul.f32 0.044715, %v1317_v20  ;;  %v1575_v31 = vmul.f32 0.044715, %v1319_v21  ;;  %v5710_v32 = vadd.f32 %v396_v41, %v5580_v33  ;;  %669 = vmatmul.mubr.bf16.gmra.mrb[116].mxu0 %v5594_v49 }
 0x11e   :  { %v1830_v35 = vadd.f32 %v1574_v24, %v5657_v62  ;;  %v1576_v36 = vmul.f32 0.044715, %v1320_v25  ;;  %v1578_v37 = vmul.f32 0.044715, %v1322_v26  ;;  %v5715_v38 = vadd.f32 %v749_v42, %v5582_v34  ;;  %1022 = vmatmul.mubr.bf16.gmra.mrb[116].mxu1 %v5594_v49  ;;  %678 = vmatprep.mubr.bf16.mxu0 %v5248_v0 }
 0x11f   :  { %v4621_v39 = vpop.eup %4620  ;;  %v2084_v40 = vmul.f32 0.7978846, %v1828_v27  ;;  %v1829_v43 = vadd.f32 %v1573_v30, %v5664_v3  ;;  %v1831_v41 = vadd.f32 %v1575_v31, %v5667_v4  ;;  %v1065_v46 = vmul.f32 %v5710_v32, %v5710_v32  ;;  %1031 = vmatprep.mubr.bf16.mxu1 %v5248_v0 }
 0x120   :  { %9632 = vst [vmem:[#allocation13_spill] sm:$0xff] %v5715_v38  ;;  %v4623_v47 = vpop.eup %4622  ;;  %v2588_v52 = vadd.f32 1.0, %v4621_v39  ;;  %v2086_v53 = vmul.f32 0.7978846, %v1830_v35  ;;  %v1832_v42 = vadd.f32 %v1576_v36, %v5673_v48  ;;  %v1834_v49 = vadd.f32 %v1578_v37, %v5676_v6  ;;  %v5726_v56 = vpop.f32.mrb[12].mxu0 }
 0x121   :  { %v5728_v60 = vpop.f32.mrb[12].mxu1  ;;  %v5730_v61 = vpop.eup %4624  ;;  %v2590_v63 = vadd.f32 1.0, %v4623_v47  ;;  %4636 = vtanh.f32 %v2084_v40  ;;  %v2085_v5 = vmul.f32 0.7978846, %v1829_v43  ;;  %v2087_v9 = vmul.f32 0.7978846, %v1831_v41 }
 0x122   :  { %v5732_v10 = vpop.f32.mrb[13].mxu0  ;;  %v5734_v11 = vpop.eup %4626  ;;  %v2844_v14 = vmul.f32 0.5, %v2588_v52  ;;  %4638 = vtanh.f32 %v2086_v53  ;;  %v2088_v15 = vmul.f32 0.7978846, %v1832_v42  ;;  %v2090_v16 = vmul.f32 0.7978846, %v1834_v49 }
 0x123   :  { %v5736_v19 = vpop.f32.mrb[13].mxu1  ;;  %v4629_v20 = vpop.eup %4628  ;;  %v2846_v21 = vmul.f32 0.5, %v2590_v63  ;;  %4640 = vtanh.f32 %v2085_v5  ;;  %v1321_v24 = vmul.f32 %v1065_v46, %v5710_v32  ;;  %v1067_v25 = vmul.f32 %v5715_v38, %v5715_v38 }
 0x124   :  { %v5741_v26 = vpop.f32.mrb[14].mxu0  ;;  %v5743_v27 = vpop.f32.mrb[14].mxu1  ;;  %v5746_v31 = vmul.f32 %v2844_v14, %v5587_v44  ;;  %v2592_v35 = vadd.f32 1.0, %v4629_v20  ;;  %4642 = vtanh.f32 %v2087_v9  ;;  %v5750_v36 = vadd.f32 %v5678_v7, %v5576_v28 }
 0x125   :  { %v4631_v30 = vpop.eup %4630  ;;  %v5752_v37 = vpop.f32.mrb[15].mxu0  ;;  %v5759_v43 = vmul.f32 %v2846_v21, %v5590_v45  ;;  %4644 = vtanh.f32 %v2088_v15  ;;  %v1577_v46 = vmul.f32 0.044715, %v1321_v24  ;;  %679 = vmatmul.mubr.bf16.gmra.mrb[120].mxu0 %v5602_v54  ;;  %v1323_v7 = vmul.f32 %v1067_v25, %v5715_v38 }
 0x126   :  { %9633 = vst [vmem:[#allocation14_spill] sm:$0xff] %v5750_v36  ;;  %v5754_v39 = vpop.f32.mrb[15].mxu1  ;;  %v5756_v40 = vpop.eup %4632  ;;  %v2594_v41 = vadd.f32 1.0, %v4631_v30  ;;  %v2848_v47 = vmul.f32 0.5, %v2592_v35  ;;  %4646 = vtanh.f32 %v2090_v16  ;;  %v1068_v52 = vmul.f32 %v5750_v36, %v5750_v36  ;;  %1032 = vmatmul.mubr.bf16.gmra.mrb[120].mxu1 %v5602_v54  ;;  %688 = vmatprep.mubr.bf16.mxu0 %v5248_v0 }
 0x127   :  { %v5762_v44 = vpop.eup %4634  ;;  %v1833_v53 = vadd.f32 %v1577_v46, %v5710_v32  ;;  %v5772_v42 = vadd.f32 %v5680_v8, %v5578_v29  ;;  %v5776_v49 = vadd.f32 %v5687_v12, %v5580_v33  ;;  %1041 = vmatprep.mubr.bf16.mxu1 %v5248_v0  ;;  %v1579_v5 = vmul.f32 0.044715, %v1323_v7 }
 0x128   :  { %v2850_v45 = vmul.f32 0.5, %v2594_v41  ;;  %v5780_v63 = vmul.f32 %v2848_v47, %v5611_v58  ;;  %v1324_v54 = vmul.f32 %v1068_v52, %v5750_v36  ;;  %v5785_v9 = vadd.f32 %v5689_v13, %v5582_v34  ;;  %v5787_v14 = vpop.f32.mrb[16].mxu0  ;;  %v5789_v8 = vpop.f32.mrb[16].mxu1 }
 0x129   :  { %9634 = vst [vmem:[#allocation15_spill] sm:$0xff] %v5772_v42  ;;  %9635 = vst [vmem:[#allocation16_spill] sm:$0xff] %v5776_v49  ;;  %v2089_v12 = vmul.f32 0.7978846, %v1833_v53  ;;  %v1070_v0 = vmul.f32 %v5772_v42, %v5772_v42  ;;  %v1069_v58 = vmul.f32 %v5776_v49, %v5776_v49  ;;  %v5798_v16 = vpop.f32.mrb[17].mxu0  ;;  %v5800_v20 = vpop.f32.mrb[17].mxu1  ;;  %v1835_v21 = vadd.f32 %v1579_v5, %v5715_v38 }
 0x12a   :  { %9636 = vst [vmem:[#allocation17_spill] sm:$0xff] %v5785_v9  ;;  %v5792_v15 = vmul.f32 %v2850_v45, %v5614_v59  ;;  %v1580_v24 = vmul.f32 0.044715, %v1324_v54  ;;  %v1071_v59 = vmul.f32 %v5785_v9, %v5785_v9  ;;  %v5807_v25 = vpop.f32.mrb[18].mxu0  ;;  %v5809_v30 = vpop.f32.mrb[18].mxu1  ;;  %v5827_v13 = vadd.f32 %v5696_v17, %v5576_v28 }
 0x12b   :  { %v5811_v35 = vpop.eup %4636  ;;  %4648 = vtanh.f32 %v2089_v12  ;;  %v1326_v46 = vmul.f32 %v1070_v0, %v5772_v42  ;;  %v1325_v47 = vmul.f32 %v1069_v58, %v5776_v49  ;;  %v5817_v7 = vpop.f32.mrb[19].mxu0  ;;  %v2091_v53 = vmul.f32 0.7978846, %v1835_v21 }
 0x12c   :  { %9637 = vst [vmem:[#allocation18_spill] sm:$0xff] %v5811_v35  ;;  %v5819_v52 = vpop.f32.mrb[19].mxu1  ;;  %v5821_v45 = vpop.eup %4638  ;;  %v1836_v5 = vadd.f32 %v1580_v24, %v5750_v36  ;;  %v1327_v54 = vmul.f32 %v1071_v59, %v5785_v9  ;;  %9639 = vst [vmem:[#allocation20_spill] sm:$0xff] %v5827_v13  ;;  %v5833_v58 = vadd.f32 %v5698_v18, %v5578_v29 }
 0x12d   :  { %9638 = vst [vmem:[#allocation19_spill] sm:$0xff] %v5821_v45  ;;  %v5829_v12 = vpop.eup %4640  ;;  %v1582_v0 = vmul.f32 0.044715, %v1326_v46  ;;  %v1581_v41 = vmul.f32 0.044715, %v1325_v47  ;;  %v5837_v6 = vadd.f32 %v5702_v22, %v5580_v33  ;;  %689 = vmatmul.mubr.bf16.gmra.mrb[124].mxu0 %v5604_v55  ;;  %4650 = vtanh.f32 %v2091_v53 }
 0x12e   :  { %9640 = vst [vmem:[#allocation21_spill] sm:$0xff] %v5833_v58  ;;  %v5840_v21 = vpop.eup %4642  ;;  %v2092_v24 = vmul.f32 0.7978846, %v1836_v5  ;;  %v1583_v17 = vmul.f32 0.044715, %v1327_v54  ;;  %v1072_v59 = vmul.f32 %v5827_v13, %v5827_v13  ;;  %1042 = vmatmul.mubr.bf16.gmra.mrb[124].mxu1 %v5604_v55  ;;  %v1074_v22 = vmul.f32 %v5833_v58, %v5833_v58 }
 0x12f   :  { %9641 = vst [vmem:[#allocation22_spill] sm:$0xff] %v5837_v6  ;;  %v5845_v46 = vpop.eup %4644  ;;  %v1838_v18 = vadd.f32 %v1582_v0, %v5772_v42  ;;  %v1837_v47 = vadd.f32 %v1581_v41, %v5776_v49  ;;  %v1073_v36 = vmul.f32 %v5837_v6, %v5837_v6  ;;  %v5859_v55 = vadd.f32 %v5704_v23, %v5582_v34 }
 0x130   :  { %9642 = vst [vmem:[#allocation23_spill] sm:$0xff] %v5845_v46  ;;  %v5853_v53 = vpop.eup %4646  ;;  %4652 = vtanh.f32 %v2092_v24  ;;  %v1839_v5 = vadd.f32 %v1583_v17, %v5785_v9  ;;  %v1328_v54 = vmul.f32 %v1072_v59, %v5827_v13  ;;  %v5861_v0 = vpop.f32.mrb[20].mxu0  ;;  %v1330_v62 = vmul.f32 %v1074_v22, %v5833_v58 }
 0x131   :  { %9643 = vst [vmem:[#allocation24_spill] sm:$0xff] %v5853_v53  ;;  %9644 = vst [vmem:[#allocation25_spill] sm:$0xff] %v5859_v55  ;;  %v5863_v41 = vpop.f32.mrb[20].mxu1  ;;  %v2094_v42 = vmul.f32 0.7978846, %v1838_v18  ;;  %v1329_v48 = vmul.f32 %v1073_v36, %v5837_v6  ;;  %v5867_v57 = vpop.f32.mrb[21].mxu0  ;;  %v1075_v23 = vmul.f32 %v5859_v55, %v5859_v55  ;;  %v5875_v9 = vadd.f32 %v5726_v56, %v5576_v28 }
 0x132   :  { %v2093_v49 = vmul.f32 0.7978846, %v1837_v47  ;;  %v5869_v24 = vpop.f32.mrb[21].mxu1  ;;  %v2095_v17 = vmul.f32 0.7978846, %v1839_v5  ;;  %v5877_v53 = vpop.f32.mrb[22].mxu0  ;;  %v5883_v22 = vadd.f32 %v5728_v60, %v5578_v29 }
 0x133   :  { %v1584_v59 = vmul.f32 0.044715, %v1328_v54  ;;  %9645 = vst [vmem:[#allocation26_spill] sm:$0xff] %v5875_v9  ;;  %v5879_v18 = vpop.f32.mrb[22].mxu1  ;;  %4654 = vtanh.f32 %v2094_v42  ;;  %v1586_v47 = vmul.f32 0.044715, %v1330_v62  ;;  %v1331_v56 = vmul.f32 %v1075_v23, %v5859_v55 }
 0x134   :  { %v1585_v36 = vmul.f32 0.044715, %v1329_v48  ;;  %9646 = vst [vmem:[#allocation27_spill] sm:$0xff] %v5883_v22  ;;  %v5885_v5 = vpop.f32.mrb[23].mxu0  ;;  %v5887_v54 = vpop.f32.mrb[23].mxu1  ;;  %4656 = vtanh.f32 %v2093_v49  ;;  %v1076_v46 = vmul.f32 %v5875_v9, %v5875_v9  ;;  %v1078_v60 = vmul.f32 %v5883_v22, %v5883_v22 }
 0x135   :  { %v1840_v45 = vadd.f32 %v1584_v59, %v5827_v13  ;;  %v5893_v35 = vpop.eup %4648  ;;  %4658 = vtanh.f32 %v2095_v17  ;;  %v1842_v62 = vadd.f32 %v1586_v47, %v5833_v58  ;;  %v1587_v38 = vmul.f32 0.044715, %v1331_v56 }
 0x136   :  { %v1841_v48 = vadd.f32 %v1585_v36, %v5837_v6  ;;  %v1332_v49 = vmul.f32 %v1076_v46, %v5875_v9  ;;  %v5902_v59 = vadd.f32 %v5732_v10, %v5580_v33  ;;  %v1334_v4 = vmul.f32 %v1078_v60, %v5883_v22 }
 0x137   :  { %v2096_v42 = vmul.f32 0.7978846, %v1840_v45  ;;  %v2098_v23 = vmul.f32 0.7978846, %v1842_v62  ;;  %v5907_v17 = vadd.f32 %v5736_v19, %v5582_v34  ;;  %v5909_v47 = vpop.eup %4650  ;;  %v1843_v45 = vadd.f32 %v1587_v38, %v5859_v55 }
 0x138   :  { %9647 = vst [vmem:[#allocation28_spill] sm:$0xff] %v5902_v59  ;;  %v2097_v13 = vmul.f32 0.7978846, %v1841_v48  ;;  %v1588_v36 = vmul.f32 0.044715, %v1332_v49  ;;  %v1077_v46 = vmul.f32 %v5902_v59, %v5902_v59  ;;  %v5914_v56 = vpop.f32.mrb[24].mxu0  ;;  %v5922_v19 = vadd.f32 %v5741_v26, %v5576_v28 }
 0x139   :  { %9648 = vst [vmem:[#allocation29_spill] sm:$0xff] %v5907_v17  ;;  %4660 = vtanh.f32 %v2096_v42  ;;  %v5916_v10 = vpop.f32.mrb[24].mxu1  ;;  %v1590_v62 = vmul.f32 0.044715, %v1334_v4  ;;  %v1079_v48 = vmul.f32 %v5907_v17, %v5907_v17  ;;  %v5924_v60 = vpop.f32.mrb[25].mxu0 }
 0x13a   :  { %4662 = vtanh.f32 %v2098_v23  ;;  %9649 = vst [vmem:[#allocation30_spill] sm:$0xff] %v5922_v19  ;;  %9650 = vst [vmem:[#allocation31_spill] sm:$0xff] %v5924_v60  ;;  %v5926_v38 = vpop.f32.mrb[25].mxu1  ;;  %v5928_v42 = vpop.eup %4652  ;;  %v2099_v49 = vmul.f32 0.7978846, %v1843_v45  ;;  %v1844_v58 = vadd.f32 %v1588_v36, %v5875_v9  ;;  %v1333_v23 = vmul.f32 %v1077_v46, %v5902_v59 }
 0x13b   :  { %9651 = vst [vmem:[#allocation32_spill] sm:$0xff] %v5928_v42  ;;  %4664 = vtanh.f32 %v2097_v13  ;;  %v5932_v4 = vpop.f32.mrb[26].mxu0  ;;  %v5934_v55 = vpop.f32.mrb[26].mxu1  ;;  %v1846_v6 = vadd.f32 %v1590_v62, %v5883_v22  ;;  %v1335_v26 = vmul.f32 %v1079_v48, %v5907_v17  ;;  %v1080_v60 = vmul.f32 %v5922_v19, %v5922_v19 }
 0x13c   :  { %9652 = vst [vmem:[#allocation33_spill] sm:$0xff] %v5932_v4  ;;  %9653 = vst [vmem:[#allocation34_spill] sm:$0xff] %v5934_v55  ;;  %v5942_v42 = vadd.f32 %v5743_v27, %v5578_v29  ;;  %v5944_v13 = vpop.f32.mrb[27].mxu0  ;;  %v5946_v45 = vpop.f32.mrb[27].mxu1  ;;  %4666 = vtanh.f32 %v2099_v49  ;;  %v2100_v36 = vmul.f32 0.7978846, %v1844_v58  ;;  %v5950_v9 = vadd.f32 %v5752_v37, %v5580_v33 }
 0x13d   :  { %v1589_v46 = vmul.f32 0.044715, %v1333_v23  ;;  %v5952_v62 = vpop.eup %4654  ;;  %v2102_v48 = vmul.f32 0.7978846, %v1846_v6  ;;  %v1591_v22 = vmul.f32 0.044715, %v1335_v26  ;;  %v1336_v55 = vmul.f32 %v1080_v60, %v5922_v19 }
 0x13e   :  { %9654 = vst [vmem:[#allocation35_spill] sm:$0xff] %v5942_v42  ;;  %9655 = vst [vmem:[#allocation36_spill] sm:$0xff] %v5950_v9  ;;  %v1082_v27 = vmul.f32 %v5942_v42, %v5942_v42  ;;  %v5957_v4 = vpop.eup %4656  ;;  %4668 = vtanh.f32 %v2100_v36  ;;  %v1081_v58 = vmul.f32 %v5950_v9, %v5950_v9  ;;  %v5964_v37 = vadd.f32 %v5754_v39, %v5582_v34 }
 0x13f   :  { %9656 = vst [vmem:[#allocation37_spill] sm:$0xff] %v5952_v62  ;;  %9657 = vst [vmem:[#allocation38_spill] sm:$0xff] %v5957_v4  ;;  %v1845_v49 = vadd.f32 %v1589_v46, %v5902_v59  ;;  %v5966_v23 = vpop.eup %4658  ;;  %4670 = vtanh.f32 %v2102_v48  ;;  %v1847_v6 = vadd.f32 %v1591_v22, %v5907_v17  ;;  %v1592_v60 = vmul.f32 0.044715, %v1336_v55 }
 0x140   :  { %9658 = vst [vmem:[#allocation39_spill] sm:$0xff] %v5964_v37  ;;  %v1338_v26 = vmul.f32 %v1082_v27, %v5942_v42  ;;  %v1337_v36 = vmul.f32 %v1081_v58, %v5950_v9  ;;  %v1083_v46 = vmul.f32 %v5964_v37, %v5964_v37  ;;  %v5975_v59 = vadd.f32 %v5787_v14, %v5576_v28  ;;  %v5977_v39 = vpop.f32.mrb[28].mxu0  ;;  %v5979_v4 = vpop.f32.mrb[28].mxu1 }
 0x141   :  { %v2101_v62 = vmul.f32 0.7978846, %v1845_v49  ;;  %9660 = vst [vmem:[#allocation41_spill] sm:$0xff] %v5977_v39  ;;  %9661 = vst [vmem:[#allocation42_spill] sm:$0xff] %v5979_v4  ;;  %v2103_v48 = vmul.f32 0.7978846, %v1847_v6  ;;  %v1848_v22 = vadd.f32 %v1592_v60, %v5922_v19  ;;  %v5984_v27 = vadd.f32 %v5789_v8, %v5578_v29 }
 0x142   :  { %9659 = vst [vmem:[#allocation40_spill] sm:$0xff] %v5975_v59  ;;  %v1594_v55 = vmul.f32 0.044715, %v1338_v26  ;;  %v5986_v49 = vpop.f32.mrb[29].mxu0  ;;  %v5988_v58 = vpop.f32.mrb[29].mxu1  ;;  %v1339_v39 = vmul.f32 %v1083_v46, %v5964_v37  ;;  %v1084_v6 = vmul.f32 %v5975_v59, %v5975_v59 }
 0x143   :  { %9662 = vst [vmem:[#allocation43_spill] sm:$0xff] %v5984_v27  ;;  %9663 = vst [vmem:[#allocation44_spill] sm:$0xff] %v5988_v58  ;;  %v5990_v17 = vpop.eup %4660  ;;  %4672 = vtanh.f32 %v2101_v62  ;;  %v1593_v14 = vmul.f32 0.044715, %v1337_v36  ;;  %v5995_v4 = vpop.f32.mrb[30].mxu0 }
 0x144   :  { %9664 = vst [vmem:[#allocation45_spill] sm:$0xff] %v5990_v17  ;;  %9665 = vst [vmem:[#allocation46_spill] sm:$0xff] %v5995_v4  ;;  %v5997_v60 = vpop.f32.mrb[30].mxu1  ;;  %v5999_v26 = vpop.eup %4662  ;;  %4674 = vtanh.f32 %v2103_v48  ;;  %v2104_v8 = vmul.f32 0.7978846, %v1848_v22  ;;  %v1850_v19 = vadd.f32 %v1594_v55, %v5942_v42  ;;  %v1086_v17 = vmul.f32 %v5984_v27, %v5984_v27 }
 0x145   :  { %9666 = vst [vmem:[#allocation47_spill] sm:$0xff] %v5997_v60  ;;  %9667 = vst [vmem:[#allocation48_spill] sm:$0xff] %v5999_v26  ;;  %v6004_v62 = vpop.f32.mrb[31].mxu0  ;;  %v6006_v36 = vpop.f32.mrb[31].mxu1  ;;  %v1849_v58 = vadd.f32 %v1593_v14, %v5950_v9  ;;  %v1595_v4 = vmul.f32 0.044715, %v1339_v39  ;;  %v1340_v60 = vmul.f32 %v1084_v6, %v5975_v59  ;;  %v6014_v48 = vadd.f32 %v5798_v16, %v5580_v33 }
 0x146   :  { %9668 = vst [vmem:[#allocation49_spill] sm:$0xff] %v6006_v36  ;;  %v6008_v46 = vpop.eup %4664  ;;  %4676 = vtanh.f32 %v2104_v8  ;;  %v2106_v22 = vmul.f32 0.7978846, %v1850_v19  ;;  %v1342_v55 = vmul.f32 %v1086_v17, %v5984_v27  ;;  %v6019_v42 = vadd.f32 %v5800_v20, %v5582_v34 }
 0x147   :  { %9669 = vst [vmem:[#allocation50_spill] sm:$0xff] %v6014_v48  ;;  %v6021_v26 = vpop.eup %4666  ;;  %v2105_v36 = vmul.f32 0.7978846, %v1849_v58  ;;  %v1851_v14 = vadd.f32 %v1595_v4, %v5964_v37  ;;  %v1596_v39 = vmul.f32 0.044715, %v1340_v60  ;;  %v1085_v6 = vmul.f32 %v6014_v48, %v6014_v48 }
 0x148   :  { %9670 = vst [vmem:[#allocation51_spill] sm:$0xff] %v6019_v42  ;;  %4678 = vtanh.f32 %v2106_v22  ;;  %v1598_v16 = vmul.f32 0.044715, %v1342_v55  ;;  %v1087_v19 = vmul.f32 %v6019_v42, %v6019_v42  ;;  %v6030_v17 = vadd.f32 %v5807_v25, %v5576_v28  ;;  %v6032_v20 = vpop.eup %4668  ;;  %v6036_v60 = vpop.f32.mrb[32].mxu0 }
 0x149   :  { %9672 = vst [vmem:[#allocation53_spill] sm:$0xff] %v6032_v20  ;;  %4680 = vtanh.f32 %v2105_v36  ;;  %v2107_v8 = vmul.f32 0.7978846, %v1851_v14  ;;  %v1852_v58 = vadd.f32 %v1596_v39, %v5975_v59  ;;  %v1341_v4 = vmul.f32 %v1085_v6, %v6014_v48  ;;  %9673 = vst [vmem:[#allocation54_spill] sm:$0xff] %v6036_v60  ;;  %v6038_v37 = vpop.f32.mrb[32].mxu1  ;;  %v6040_v22 = vpop.eup %4670 }
 0x14a   :  { %9671 = vst [vmem:[#allocation52_spill] sm:$0xff] %v6030_v17  ;;  %9674 = vst [vmem:[#allocation55_spill] sm:$0xff] %v6038_v37  ;;  %v1854_v55 = vadd.f32 %v1598_v16, %v5984_v27  ;;  %v1343_v9 = vmul.f32 %v1087_v19, %v6019_v42  ;;  %v1088_v25 = vmul.f32 %v6030_v17, %v6030_v17  ;;  %v6050_v14 = vpop.f32.mrb[33].mxu0  ;;  %v6052_v39 = vpop.f32.mrb[33].mxu1 }
 0x14b   :  { %9675 = vst [vmem:[#allocation56_spill] sm:$0xff] %v6040_v22  ;;  %v6048_v36 = vadd.f32 %v5809_v30, %v5578_v29  ;;  %9677 = vst [vmem:[#allocation58_spill] sm:$0xff] %v6050_v14  ;;  %4682 = vtanh.f32 %v2107_v8  ;;  %v2108_v6 = vmul.f32 0.7978846, %v1852_v58  ;;  %v1597_v59 = vmul.f32 0.044715, %v1341_v4 }
 0x14c   :  { %9678 = vst [vmem:[#allocation59_spill] sm:$0xff] %v6052_v39  ;;  %v6056_v22 = vadd.f32 %v5817_v7, %v5580_v33  ;;  %v6058_v16 = vpop.f32.mrb[34].mxu0  ;;  %v6060_v19 = vpop.f32.mrb[34].mxu1  ;;  %v2110_v27 = vmul.f32 0.7978846, %v1854_v55  ;;  %v1344_v30 = vmul.f32 %v1088_v25, %v6030_v17 }
 0x14d   :  { %9676 = vst [vmem:[#allocation57_spill] sm:$0xff] %v6048_v36  ;;  %9679 = vst [vmem:[#allocation60_spill] sm:$0xff] %v6058_v16  ;;  %v1599_v20 = vmul.f32 0.044715, %v1343_v9  ;;  %v1090_v14 = vmul.f32 %v6048_v36, %v6048_v36  ;;  %v6065_v37 = vpop.f32.mrb[35].mxu0  ;;  %v6067_v8 = vpop.f32.mrb[35].mxu1  ;;  %4684 = vtanh.f32 %v2108_v6  ;;  %v1853_v7 = vadd.f32 %v1597_v59, %v6014_v48 }
 0x14e   :  { %9680 = vst [vmem:[#allocation61_spill] sm:$0xff] %v6060_v19  ;;  %9681 = vst [vmem:[#allocation62_spill] sm:$0xff] %v6065_v37  ;;  %v6069_v58 = vpop.eup %4672  ;;  %v1089_v4 = vmul.f32 %v6056_v22, %v6056_v22  ;;  %v6076_v9 = vadd.f32 %v5819_v52, %v5582_v34  ;;  %4686 = vtanh.f32 %v2110_v27  ;;  %v1600_v37 = vmul.f32 0.044715, %v1344_v30 }
 0x14f   :  { %9682 = vst [vmem:[#allocation63_spill] sm:$0xff] %v6067_v8  ;;  %v6078_v55 = vpop.eup %4674  ;;  %v1855_v25 = vadd.f32 %v1599_v20, %v6019_v42  ;;  %v1346_v8 = vmul.f32 %v1090_v14, %v6048_v36  ;;  %v2109_v19 = vmul.f32 0.7978846, %v1853_v7  ;;  %v2589_v48 = vadd.f32 1.0, %v5730_v61 }
 0x150   :  { %v1345_v6 = vmul.f32 %v1089_v4, %v6056_v22  ;;  %v1091_v59 = vmul.f32 %v6076_v9, %v6076_v9  ;;  %v6086_v16 = vpop.eup %4676  ;;  %v1856_v39 = vadd.f32 %v1600_v37, %v6030_v17  ;;  %v2593_v27 = vadd.f32 1.0, %v5756_v40  ;;  %v6091_v7 = vpop.f32.mrb[36].mxu0 }
 0x151   :  { %9683 = vst [vmem:[#allocation64_spill] sm:$0xff] %v6086_v16  ;;  %v2111_v52 = vmul.f32 0.7978846, %v1855_v25  ;;  %v1602_v60 = vmul.f32 0.044715, %v1346_v8  ;;  %4688 = vtanh.f32 %v2109_v19  ;;  %v2845_v30 = vmul.f32 0.5, %v2589_v48 }
 0x152   :  { %v1601_v20 = vmul.f32 0.044715, %v1345_v6  ;;  %v1347_v14 = vmul.f32 %v1091_v59, %v6076_v9  ;;  %v6093_v4 = vpop.f32.mrb[36].mxu1  ;;  %v6095_v42 = vpop.eup %4678  ;;  %v2112_v61 = vmul.f32 0.7978846, %v1856_v39  ;;  %v2849_v16 = vmul.f32 0.5, %v2593_v27 }
 0x153   :  { %4690 = vtanh.f32 %v2111_v52  ;;  %v1858_v25 = vadd.f32 %v1602_v60, %v6048_v36  ;;  %v6098_v37 = vpop.f32.mrb[37].mxu0  ;;  %v6100_v8 = vpop.f32.mrb[37].mxu1  ;;  %v3101_v6 = vmul.f32 %v2845_v30, %v5597_v50  ;;  %v2591_v59 = vadd.f32 1.0, %v5734_v11 }
 0x154   :  { %9684 = vst [vmem:[#allocation65_spill] sm:$0xff] %v6100_v8  ;;  %v6102_v40 = vpop.eup %4680  ;;  %v1857_v19 = vadd.f32 %v1601_v20, %v6056_v22  ;;  %v1603_v48 = vmul.f32 0.044715, %v1347_v14  ;;  %v6107_v17 = vpop.f32.mrb[38].mxu0  ;;  %4692 = vtanh.f32 %v2112_v61  ;;  %v3105_v39 = vmul.f32 %v2849_v16, %v5621_v1 }
 0x155   :  { %v6109_v52 = vpop.f32.mrb[38].mxu1  ;;  %v2114_v60 = vmul.f32 0.7978846, %v1858_v25  ;;  %v2595_v27 = vadd.f32 1.0, %v5762_v44  ;;  %v6113_v36 = vpop.f32.mrb[39].mxu0  ;;  %v2847_v11 = vmul.f32 0.5, %v2591_v59  ;;  %v6122_v30 = vadd.f32 %v5861_v0, %v5576_v28 }
 0x156   :  { %v6115_v8 = vpop.f32.mrb[39].mxu1  ;;  %v6117_v20 = vpop.eup %4682  ;;  %v2113_v14 = vmul.f32 0.7978846, %v1857_v19  ;;  %v1859_v50 = vadd.f32 %v1603_v48, %v6076_v9  ;;  %v3357_v61 = vpack.c.bf16 %v3105_v39, %v3101_v6  ;;  %v6126_v1 = vadd.f32 %v5863_v41, %v5578_v29 }
 0x157   :  { %9685 = vst [vmem:[#allocation66_spill] sm:$0xff] %v6122_v30  ;;  %4694 = vtanh.f32 %v2114_v60  ;;  %v2851_v25 = vmul.f32 0.5, %v2595_v27  ;;  %v6128_v44 = vpop.eup %4684  ;;  %v3103_v19 = vmul.f32 %v2847_v11, %v5600_v51  ;;  %v1092_v48 = vmul.f32 %v6122_v30, %v6122_v30 }
 0x158   :  { %9686 = vst [vmem:[#allocation67_spill] sm:$0xff] %v6126_v1  ;;  %9687 = vst [vmem:[#allocation68_spill] sm:$0xff] %v6128_v44  ;;  %4696 = vtanh.f32 %v2113_v14  ;;  %v2115_v16 = vmul.f32 0.7978846, %v1859_v50  ;;  %v6133_v59 = vpop.eup %4686  ;;  %3779 = vmatprep.mubr.bf16.mxu0 %v3357_v61  ;;  %v1094_v6 = vmul.f32 %v6126_v1, %v6126_v1  ;;  %v6140_v41 = vadd.f32 %v5867_v57, %v5580_v33  ;;  %v6158_v57 = vpop.f32.mrb[40].mxu0 }
 0x159   :  { %9688 = vst [vmem:[#allocation69_spill] sm:$0xff] %v6133_v59  ;;  %v3107_v0 = vmul.f32 %v2851_v25, %v5624_v2  ;;  %v6144_v60 = vadd.f32 %v5869_v24, %v5582_v34  ;;  %v1348_v51 = vmul.f32 %v1092_v48, %v6122_v30  ;;  %v6149_v39 = vadd.f32 %v5877_v53, %v5576_v28  ;;  %v6160_v14 = vpop.f32.mrb[40].mxu1  ;;  %v6167_v61 = vpop.f32.mrb[41].mxu0 }
 0x15a   :  { %4698 = vtanh.f32 %v2115_v16  ;;  %v6153_v2 = vadd.f32 %v5879_v18, %v5578_v29  ;;  %v9692_v27 = vpack.c.bf16 %v5780_v63, %v5746_v31  ;;  %9693 = vst [vmem:[#allocation73_spill] sm:$0xff] %v6158_v57  ;;  %9694 = vst [vmem:[#allocation74_spill] sm:$0xff] %v6160_v14  ;;  %v1350_v50 = vmul.f32 %v1094_v6, %v6126_v1  ;;  %v6169_v18 = vpop.f32.mrb[41].mxu1  ;;  %v6181_v48 = vpop.f32.mrb[42].mxu0 }
 0x15b   :  { %9689 = vst [vmem:[#allocation70_spill] sm:$0xff] %v6144_v60  ;;  %9690 = vst [vmem:[#allocation71_spill] sm:$0xff] %v6149_v39  ;;  %v3359_v24 = vpack.c.bf16 %v3107_v0, %v3103_v19  ;;  %v1093_v11 = vmul.f32 %v6140_v41, %v6140_v41  ;;  %v1095_v53 = vmul.f32 %v6144_v60, %v6144_v60  ;;  %v6171_v25 = vpop.eup %4688  ;;  %v1604_v31 = vmul.f32 0.044715, %v1348_v51  ;;  %v6183_v0 = vpop.f32.mrb[42].mxu1 }
 0x15c   :  { %9691 = vst [vmem:[#allocation72_spill] sm:$0xff] %v6153_v2  ;;  %3780 = vmatmul.mubr.bf16.vlgmr.msra.gmra.mrb[128].mxu0 %v9692_v27  ;;  %9695 = vst [vmem:[#allocation75_spill] sm:$0xff] %v6167_v61  ;;  %v1096_v63 = vmul.f32 %v6149_v39, %v6149_v39  ;;  %v1098_v16 = vmul.f32 %v6153_v2, %v6153_v2  ;;  %v6179_v19 = vadd.f32 %v5885_v5, %v5580_v33  ;;  %v6193_v14 = vpop.f32.mrb[43].mxu0  ;;  %v6195_v5 = vpop.f32.mrb[43].mxu1 }
 0x15d   :  { %9696 = vst [vmem:[#allocation76_spill] sm:$0xff] %v6169_v18  ;;  %9697 = vst [vmem:[#allocation77_spill] sm:$0xff] %v6181_v48  ;;  %v6185_v6 = vpop.eup %4690  ;;  %4068 = vmatprep.mubr.bf16.mxu1 %v3359_v24  ;;  %v1606_v27 = vmul.f32 0.044715, %v1350_v50  ;;  %v1349_v51 = vmul.f32 %v1093_v11, %v6140_v41  ;;  %v1351_v18 = vmul.f32 %v1095_v53, %v6144_v60 }
 0x15e   :  { %9698 = vst [vmem:[#allocation78_spill] sm:$0xff] %v6183_v0  ;;  %v6191_v61 = vadd.f32 %v5887_v54, %v5582_v34  ;;  %9699 = vst [vmem:[#allocation79_spill] sm:$0xff] %v6193_v14  ;;  %v1860_v48 = vadd.f32 %v1604_v31, %v6122_v30  ;;  %v1352_v0 = vmul.f32 %v1096_v63, %v6149_v39  ;;  %v6205_v11 = vpop.eup %4692 }
 0x15f   :  { %9700 = vst [vmem:[#allocation80_spill] sm:$0xff] %v6195_v5  ;;  %v1354_v57 = vmul.f32 %v1098_v16, %v6153_v2  ;;  %v1097_v24 = vmul.f32 %v6179_v19, %v6179_v19  ;;  %v9701_v50 = vpack.c.bf16 %v5792_v15, %v5759_v43  ;;  %v1862_v54 = vadd.f32 %v1606_v27, %v6126_v1 }
 0x160   :  { %v1605_v53 = vmul.f32 0.044715, %v1349_v51  ;;  %v1607_v14 = vmul.f32 0.044715, %v1351_v18  ;;  %v1099_v31 = vmul.f32 %v6191_v61, %v6191_v61  ;;  %v2116_v30 = vmul.f32 0.7978846, %v1860_v48 }
 0x161   :  { %4069 = vmatmul.mubr.bf16.vlgmr.msra.gmra.mrb[128].mxu1 %v9701_v50  ;;  %v1608_v63 = vmul.f32 0.044715, %v1352_v0  ;;  %v1610_v5 = vmul.f32 0.044715, %v1354_v57  ;;  %v1353_v16 = vmul.f32 %v1097_v24, %v6179_v19  ;;  %v6211_v59 = vpop.eup %4694  ;;  %v2118_v44 = vmul.f32 0.7978846, %v1862_v54 }
 0x162   :  { %v1861_v43 = vadd.f32 %v1605_v53, %v6140_v41  ;;  %v1863_v15 = vadd.f32 %v1607_v14, %v6144_v60  ;;  %v1355_v50 = vmul.f32 %v1099_v31, %v6191_v61  ;;  %v6216_v27 = vpop.eup %4696  ;;  %4700 = vtanh.f32 %v2116_v30  ;;  %v6220_v57 = vpop.f32.mrb[44].mxu0 }
 0x163   :  { %v1864_v18 = vadd.f32 %v1608_v63, %v6149_v39  ;;  %v1866_v48 = vadd.f32 %v1610_v5, %v6153_v2  ;;  %v1609_v0 = vmul.f32 0.044715, %v1353_v16  ;;  %9702 = vst [vmem:[#allocation81_spill] sm:$0xff] %v6220_v57  ;;  %v6222_v51 = vpop.f32.mrb[44].mxu1  ;;  %4702 = vtanh.f32 %v2118_v44  ;;  %v6228_v63 = vpop.f32.mrb[45].mxu0 }
 0x164   :  { %9703 = vst [vmem:[#allocation82_spill] sm:$0xff] %v6222_v51  ;;  %v2117_v24 = vmul.f32 0.7978846, %v1861_v43  ;;  %v2119_v54 = vmul.f32 0.7978846, %v1863_v15  ;;  %v6224_v1 = vpop.eup %4698  ;;  %v2597_v30 = vadd.f32 1.0, %v5829_v12 }
 0x165   :  { %v1611_v53 = vmul.f32 0.044715, %v1355_v50  ;;  %v2120_v14 = vmul.f32 0.7978846, %v1864_v18  ;;  %v2122_v31 = vmul.f32 0.7978846, %v1866_v48  ;;  %v1865_v60 = vadd.f32 %v1609_v0, %v6179_v19 }
 0x166   :  { %9704 = vst [vmem:[#allocation83_spill] sm:$0xff] %v6228_v63  ;;  %4704 = vtanh.f32 %v2117_v24  ;;  %v2601_v16 = vadd.f32 1.0, %v5893_v35  ;;  %v2599_v44 = vadd.f32 1.0, %v5840_v21  ;;  %v6233_v43 = vpop.f32.mrb[45].mxu1  ;;  %v6235_v15 = vpop.f32.mrb[46].mxu0  ;;  %v2853_v18 = vmul.f32 0.5, %v2597_v30 }
 0x167   :  { %v1867_v5 = vadd.f32 %v1611_v53, %v6191_v61  ;;  %9705 = vst [vmem:[#allocation84_spill] sm:$0xff] %v6233_v43  ;;  %9706 = vst [vmem:[#allocation85_spill] sm:$0xff] %v6235_v15  ;;  %4706 = vtanh.f32 %v2119_v54  ;;  %v2121_v50 = vmul.f32 0.7978846, %v1865_v60  ;;  %v2603_v48 = vadd.f32 1.0, %v5909_v47  ;;  %v6238_v0 = vpop.f32.mrb[46].mxu1 }
 0x168   :  { %9707 = vst [vmem:[#allocation86_spill] sm:$0xff] %v6238_v0  ;;  %v6240_v12 = vpop.f32.mrb[47].mxu0  ;;  %4708 = vtanh.f32 %v2120_v14  ;;  %v2857_v53 = vmul.f32 0.5, %v2601_v16  ;;  %v2855_v63 = vmul.f32 0.5, %v2599_v44  ;;  %v6242_v35 = vpop.f32.mrb[47].mxu1  ;;  %v3109_v21 = vmul.f32 %v2853_v18, %v5664_v3  ;;  %v9711_v54 = vld [vmem:[#allocation10_spill] sm:$0xff] }
 0x169   :  { %9708 = vst [vmem:[#allocation87_spill] sm:$0xff] %v6240_v12  ;;  %v2123_v24 = vmul.f32 0.7978846, %v1867_v5  ;;  %9709 = vst [vmem:[#allocation88_spill] sm:$0xff] %v6242_v35  ;;  %4710 = vtanh.f32 %v2122_v31  ;;  %v2859_v43 = vmul.f32 0.5, %v2603_v48  ;;  %v6247_v60 = vadd.f32 %v5914_v56, %v5576_v28  ;;  %v9713_v5 = vld [vmem:[#allocation13_spill] sm:$0xff] }
 0x16a   :  { %4712 = vtanh.f32 %v2121_v50  ;;  %v3113_v47 = vmul.f32 %v2857_v53, %v5710_v32  ;;  %v3111_v30 = vmul.f32 %v2855_v63, %v9711_v54  ;;  %v6253_v14 = vadd.f32 %v5916_v10, %v5578_v29  ;;  %v9714_v31 = vld [vmem:[#allocation31_spill] sm:$0xff]  ;;  %v9717_v10 = vld [vmem:[#allocation33_spill] sm:$0xff]  ;;  %v9719_v53 = vld [vmem:[#allocation34_spill] sm:$0xff] }
 0x16b   :  { %9710 = vst [vmem:[#allocation89_spill] sm:$0xff] %v6247_v60  ;;  %4714 = vtanh.f32 %v2123_v24  ;;  %v3115_v16 = vmul.f32 %v2859_v43, %v9713_v5  ;;  %v1100_v3 = vmul.f32 %v6247_v60, %v6247_v60  ;;  %v6260_v44 = vadd.f32 %v9714_v31, %v5580_v33 }
 0x16c   :  { %9712 = vst [vmem:[#allocation10_spill] sm:$0xff] %v6253_v14  ;;  %v3361_v56 = vpack.c.bf16 %v3113_v47, %v3109_v21  ;;  %v1102_v32 = vmul.f32 %v6253_v14, %v6253_v14  ;;  %v6266_v63 = vadd.f32 %v5926_v38, %v5582_v34  ;;  %v6270_v50 = vadd.f32 %v9717_v10, %v5576_v28  ;;  %v6272_v43 = vpop.eup %4700 }
 0x16d   :  { %9715 = vst [vmem:[#allocation13_spill] sm:$0xff] %v6260_v44  ;;  %v3363_v18 = vpack.c.bf16 %v3115_v16, %v3111_v30  ;;  %v1356_v48 = vmul.f32 %v1100_v3, %v6247_v60  ;;  %v1101_v24 = vmul.f32 %v6260_v44, %v6260_v44  ;;  %v6279_v21 = vadd.f32 %v9719_v53, %v5578_v29  ;;  %v6281_v47 = vpop.eup %4702  ;;  %v6292_v16 = vpop.f32.mrb[48].mxu0 }
 0x16e   :  { %9716 = vst [vmem:[#allocation31_spill] sm:$0xff] %v6266_v63  ;;  %9718 = vst [vmem:[#allocation33_spill] sm:$0xff] %v6270_v50  ;;  %3787 = vmatprep.mubr.bf16.mxu0 %v3361_v56  ;;  %v1358_v38 = vmul.f32 %v1102_v32, %v6253_v14  ;;  %v1103_v54 = vmul.f32 %v6266_v63, %v6266_v63  ;;  %v1104_v30 = vmul.f32 %v6270_v50, %v6270_v50 }
 0x16f   :  { %9720 = vst [vmem:[#allocation34_spill] sm:$0xff] %v6279_v21  ;;  %9721 = vst [vmem:[#allocation90_spill] sm:$0xff] %v6281_v47  ;;  %v6290_v5 = vadd.f32 %v5944_v13, %v5580_v33  ;;  %4076 = vmatprep.mubr.bf16.mxu1 %v3363_v18  ;;  %v1612_v3 = vmul.f32 0.044715, %v1356_v48  ;;  %v1357_v31 = vmul.f32 %v1101_v24, %v6260_v44 }
 0x170   :  { %9723 = vst [vmem:[#allocation92_spill] sm:$0xff] %v6292_v16  ;;  %v1106_v56 = vmul.f32 %v6279_v21, %v6279_v21  ;;  %v6299_v32 = vadd.f32 %v5946_v45, %v5582_v34  ;;  %v6301_v10 = vpop.eup %4704  ;;  %v1614_v53 = vmul.f32 0.044715, %v1358_v38  ;;  %v1359_v35 = vmul.f32 %v1103_v54, %v6266_v63 }
 0x171   :  { %9722 = vst [vmem:[#allocation91_spill] sm:$0xff] %v6290_v5  ;;  %v1360_v13 = vmul.f32 %v1104_v30, %v6270_v50  ;;  %v1105_v18 = vmul.f32 %v6290_v5, %v6290_v5  ;;  %v6307_v48 = vpop.eup %4706  ;;  %v1868_v24 = vadd.f32 %v1612_v3, %v6247_v60  ;;  %v1613_v16 = vmul.f32 0.044715, %v1357_v31 }
 0x172   :  { %9724 = vst [vmem:[#allocation93_spill] sm:$0xff] %v6299_v32  ;;  %v1362_v12 = vmul.f32 %v1106_v56, %v6279_v21  ;;  %v1107_v45 = vmul.f32 %v6299_v32, %v6299_v32  ;;  %v6313_v0 = vpop.eup %4708  ;;  %v1870_v38 = vadd.f32 %v1614_v53, %v6253_v14  ;;  %v1615_v54 = vmul.f32 0.044715, %v1359_v35  ;;  %v6321_v56 = vpop.f32.mrb[48].mxu1 }
 0x173   :  { %v1616_v15 = vmul.f32 0.044715, %v1360_v13  ;;  %v1361_v30 = vmul.f32 %v1105_v18, %v6290_v5  ;;  %v6317_v51 = vpop.eup %4710  ;;  %v2124_v57 = vmul.f32 0.7978846, %v1868_v24  ;;  %v1869_v2 = vadd.f32 %v1613_v16, %v6260_v44  ;;  %9725 = vst [vmem:[#allocation94_spill] sm:$0xff] %v6321_v56  ;;  %v6327_v13 = vpop.f32.mrb[49].mxu0 }
 0x174   :  { %v1618_v3 = vmul.f32 0.044715, %v1362_v12  ;;  %v1363_v31 = vmul.f32 %v1107_v45, %v6299_v32  ;;  %v6323_v60 = vpop.eup %4712  ;;  %v2126_v39 = vmul.f32 0.7978846, %v1870_v38  ;;  %v1871_v47 = vadd.f32 %v1615_v54, %v6266_v63  ;;  %9726 = vst [vmem:[#allocation95_spill] sm:$0xff] %v6327_v13  ;;  %v6332_v45 = vpop.f32.mrb[49].mxu1 }
 0x175   :  { %v1872_v35 = vadd.f32 %v1616_v15, %v6270_v50  ;;  %v1617_v53 = vmul.f32 0.044715, %v1361_v30  ;;  %v6329_v18 = vpop.eup %4714  ;;  %4716 = vtanh.f32 %v2124_v57  ;;  %v2125_v24 = vmul.f32 0.7978846, %v1869_v2  ;;  %9727 = vst [vmem:[#allocation96_spill] sm:$0xff] %v6332_v45  ;;  %v6335_v54 = vpop.f32.mrb[50].mxu0 }
 0x176   :  { %v1874_v12 = vadd.f32 %v1618_v3, %v6279_v21  ;;  %v1619_v16 = vmul.f32 0.044715, %v1363_v31  ;;  %4718 = vtanh.f32 %v2126_v39  ;;  %v2127_v56 = vmul.f32 0.7978846, %v1871_v47  ;;  %9728 = vst [vmem:[#allocation97_spill] sm:$0xff] %v6335_v54  ;;  %v9729_v13 = vld [vmem:[#allocation18_spill] sm:$0xff] }
 0x177   :  { %v2128_v14 = vmul.f32 0.7978846, %v1872_v35  ;;  %v1873_v38 = vadd.f32 %v1617_v53, %v6290_v5  ;;  %4720 = vtanh.f32 %v2125_v24  ;;  %v2596_v50 = vadd.f32 1.0, %v9729_v13  ;;  %v6339_v57 = vpop.f32.mrb[50].mxu1  ;;  %v9731_v3 = vld [vmem:[#allocation23_spill] sm:$0xff]  ;;  %v6343_v47 = vpop.f32.mrb[51].mxu0 }
 0x178   :  { %v2130_v15 = vmul.f32 0.7978846, %v1874_v12  ;;  %v1875_v30 = vadd.f32 %v1619_v16, %v6299_v32  ;;  %9730 = vst [vmem:[#allocation18_spill] sm:$0xff] %v6339_v57  ;;  %4722 = vtanh.f32 %v2127_v56  ;;  %v2600_v31 = vadd.f32 1.0, %v9731_v3  ;;  %v9732_v45 = vld [vmem:[#allocation19_spill] sm:$0xff]  ;;  %9733 = vst [vmem:[#allocation23_spill] sm:$0xff] %v6343_v47 }
 0x179   :  { %v2129_v2 = vmul.f32 0.7978846, %v1873_v38  ;;  %v2598_v39 = vadd.f32 1.0, %v9732_v45  ;;  %4724 = vtanh.f32 %v2128_v14  ;;  %v2852_v53 = vmul.f32 0.5, %v2596_v50  ;;  %v9734_v54 = vld [vmem:[#allocation24_spill] sm:$0xff]  ;;  %v6346_v12 = vpop.f32.mrb[51].mxu1 }
 0x17a   :  { %v2131_v35 = vmul.f32 0.7978846, %v1875_v30  ;;  %v2602_v24 = vadd.f32 1.0, %v9734_v54  ;;  %9735 = vst [vmem:[#allocation19_spill] sm:$0xff] %v6346_v12  ;;  %4726 = vtanh.f32 %v2130_v15  ;;  %v2856_v16 = vmul.f32 0.5, %v2600_v31  ;;  %v9736_v21 = vld [vmem:[#allocation38_spill] sm:$0xff] }
 0x17b   :  { %v2854_v13 = vmul.f32 0.5, %v2598_v39  ;;  %v2605_v57 = vadd.f32 1.0, %v9736_v21  ;;  %4728 = vtanh.f32 %v2129_v2  ;;  %v9737_v56 = vld [vmem:[#allocation8_spill] sm:$0xff]  ;;  %v2609_v45 = vadd.f32 1.0, %v6008_v46  ;;  %v9738_v47 = vld [vmem:[#allocation11_spill] sm:$0xff]  ;;  %v9739_v30 = vld [vmem:[#allocation9_spill] sm:$0xff] }
 0x17c   :  { %v3108_v38 = vmul.f32 %v2852_v53, %v9737_v56  ;;  %v2858_v3 = vmul.f32 0.5, %v2602_v24  ;;  %4730 = vtanh.f32 %v2131_v35  ;;  %v3112_v14 = vmul.f32 %v2856_v16, %v9738_v47  ;;  %v9740_v54 = vld [vmem:[#allocation12_spill] sm:$0xff]  ;;  %v9742_v53 = vld [vmem:[#allocation41_spill] sm:$0xff]  ;;  %v9744_v46 = vld [vmem:[#allocation42_spill] sm:$0xff] }
 0x17d   :  { %v3110_v50 = vmul.f32 %v2854_v13, %v9739_v30  ;;  %v2861_v32 = vmul.f32 0.5, %v2605_v57  ;;  %v2865_v12 = vmul.f32 0.5, %v2609_v45  ;;  %v2607_v15 = vadd.f32 1.0, %v5966_v23  ;;  %v9741_v2 = vld [vmem:[#allocation16_spill] sm:$0xff]  ;;  %v9747_v16 = vld [vmem:[#allocation22_spill] sm:$0xff]  ;;  %v9751_v30 = vld [vmem:[#allocation17_spill] sm:$0xff] }
 0x17e   :  { %v3114_v63 = vmul.f32 %v2858_v3, %v9740_v54  ;;  %v2611_v31 = vadd.f32 1.0, %v6021_v26  ;;  %v3360_v21 = vpack.c.bf16 %v3112_v14, %v3108_v38  ;;  %v6359_v24 = vadd.f32 %v9742_v53, %v5576_v28  ;;  %v9749_v45 = vld [vmem:[#allocation44_spill] sm:$0xff]  ;;  %v9752_v54 = vld [vmem:[#allocation25_spill] sm:$0xff] }
 0x17f   :  { %v3117_v39 = vmul.f32 %v2861_v32, %v9741_v2  ;;  %v6363_v47 = vadd.f32 %v9744_v46, %v5578_v29  ;;  %v6365_v35 = vpop.eup %4716  ;;  %v3121_v13 = vmul.f32 %v2865_v12, %v9747_v16  ;;  %v2863_v56 = vmul.f32 0.5, %v2607_v15 }
 0x180   :  { %9743 = vst [vmem:[#allocation24_spill] sm:$0xff] %v6359_v24  ;;  %9746 = vst [vmem:[#allocation8_spill] sm:$0xff] %v6365_v35  ;;  %v3362_v57 = vpack.c.bf16 %v3114_v63, %v3110_v50  ;;  %v2867_v23 = vmul.f32 0.5, %v2611_v31  ;;  %v6368_v3 = vpop.eup %4718  ;;  %3788 = vmatmul.mubr.bf16.gmra.mrb[132].mxu0 %v3360_v21  ;;  %v1108_v26 = vmul.f32 %v6359_v24, %v6359_v24  ;;  %v9753_v31 = vld [vmem:[#allocation46_spill] sm:$0xff] }
 0x181   :  { %9745 = vst [vmem:[#allocation38_spill] sm:$0xff] %v6363_v47  ;;  %9748 = vst [vmem:[#allocation11_spill] sm:$0xff] %v6368_v3  ;;  %v1110_v32 = vmul.f32 %v6363_v47, %v6363_v47  ;;  %v6376_v38 = vadd.f32 %v5986_v49, %v5580_v33  ;;  %v6380_v63 = vadd.f32 %v9749_v45, %v5582_v34  ;;  %v6382_v12 = vpop.eup %4720 }
 0x182   :  { %4077 = vmatmul.mubr.bf16.gmra.mrb[132].mxu1 %v3362_v57  ;;  %v3365_v14 = vpack.c.bf16 %v3121_v13, %v3117_v39  ;;  %v3119_v50 = vmul.f32 %v2863_v56, %v9751_v30  ;;  %v3123_v15 = vmul.f32 %v2867_v23, %v9752_v54  ;;  %v6388_v21 = vadd.f32 %v9753_v31, %v5576_v28  ;;  %v6390_v2 = vpop.eup %4722  ;;  %v9757_v56 = vld [vmem:[#allocation47_spill] sm:$0xff] }
 0x183   :  { %9750 = vst [vmem:[#allocation9_spill] sm:$0xff] %v6380_v63  ;;  %9755 = vst [vmem:[#allocation16_spill] sm:$0xff] %v6390_v2  ;;  %v1364_v49 = vmul.f32 %v1108_v26, %v6359_v24  ;;  %v1366_v53 = vmul.f32 %v1110_v32, %v6363_v47  ;;  %v1109_v46 = vmul.f32 %v6376_v38, %v6376_v38  ;;  %v6398_v57 = vpop.eup %4724  ;;  %v6410_v32 = vpop.f32.mrb[52].mxu0 }
 0x184   :  { %9754 = vst [vmem:[#allocation12_spill] sm:$0xff] %v6388_v21  ;;  %v1111_v39 = vmul.f32 %v6380_v63, %v6380_v63  ;;  %9756 = vst [vmem:[#allocation41_spill] sm:$0xff] %v6398_v57  ;;  %3795 = vmatprep.mubr.bf16.mxu0 %v3365_v14  ;;  %v3367_v16 = vpack.c.bf16 %v3123_v15, %v3119_v50  ;;  %v1112_v13 = vmul.f32 %v6388_v21, %v6388_v21  ;;  %v6412_v45 = vpop.eup %4726  ;;  %v6437_v2 = vpop.f32.mrb[52].mxu1 }
 0x185   :  { %v6404_v23 = vadd.f32 %v9757_v56, %v5578_v29  ;;  %v6408_v26 = vadd.f32 %v6004_v62, %v5580_v33  ;;  %9760 = vst [vmem:[#allocation44_spill] sm:$0xff] %v6410_v32  ;;  %9761 = vst [vmem:[#allocation17_spill] sm:$0xff] %v6412_v45  ;;  %v1620_v30 = vmul.f32 0.044715, %v1364_v49  ;;  %v1622_v54 = vmul.f32 0.044715, %v1366_v53  ;;  %v6416_v15 = vpop.eup %4728 }
 0x186   :  { %v1365_v14 = vmul.f32 %v1109_v46, %v6376_v38  ;;  %v1367_v50 = vmul.f32 %v1111_v39, %v6380_v63  ;;  %4084 = vmatprep.mubr.bf16.mxu1 %v3367_v16  ;;  %v1368_v31 = vmul.f32 %v1112_v13, %v6388_v21  ;;  %v9762_v32 = vld [vmem:[#allocation49_spill] sm:$0xff]  ;;  %v6427_v49 = vpop.eup %4730  ;;  %9765 = vst [vmem:[#allocation47_spill] sm:$0xff] %v6437_v2 }
 0x187   :  { %9758 = vst [vmem:[#allocation42_spill] sm:$0xff] %v6404_v23  ;;  %9759 = vst [vmem:[#allocation22_spill] sm:$0xff] %v6408_v26  ;;  %v1114_v56 = vmul.f32 %v6404_v23, %v6404_v23  ;;  %v1113_v62 = vmul.f32 %v6408_v26, %v6408_v26  ;;  %v6425_v45 = vadd.f32 %v9762_v32, %v5582_v34 }
 0x188   :  { %9764 = vst [vmem:[#allocation46_spill] sm:$0xff] %v6427_v49  ;;  %v1876_v53 = vadd.f32 %v1620_v30, %v6359_v24  ;;  %v1878_v46 = vadd.f32 %v1622_v54, %v6363_v47  ;;  %v1621_v39 = vmul.f32 0.044715, %v1365_v14  ;;  %v1623_v16 = vmul.f32 0.044715, %v1367_v50  ;;  %v9767_v47 = vld [vmem:[#allocation32_spill] sm:$0xff] }
 0x189   :  { %9763 = vst [vmem:[#allocation25_spill] sm:$0xff] %v6425_v45  ;;  %v1624_v3 = vmul.f32 0.044715, %v1368_v31  ;;  %v1370_v13 = vmul.f32 %v1114_v56, %v6404_v23  ;;  %v1369_v57 = vmul.f32 %v1113_v62, %v6408_v26  ;;  %v1115_v35 = vmul.f32 %v6425_v45, %v6425_v45  ;;  %v6441_v31 = vpop.f32.mrb[53].mxu0 }
 0x18a   :  { %v2132_v5 = vmul.f32 0.7978846, %v1876_v53  ;;  %v2134_v44 = vmul.f32 0.7978846, %v1878_v46  ;;  %v1877_v32 = vadd.f32 %v1621_v39, %v6376_v38  ;;  %v1879_v49 = vadd.f32 %v1623_v16, %v6380_v63  ;;  %9766 = vst [vmem:[#allocation49_spill] sm:$0xff] %v6441_v31  ;;  %v6444_v46 = vpop.f32.mrb[53].mxu1 }
 0x18b   :  { %v1880_v30 = vadd.f32 %v1624_v3, %v6388_v21  ;;  %v1626_v54 = vmul.f32 0.044715, %v1370_v13  ;;  %v1625_v14 = vmul.f32 0.044715, %v1369_v57  ;;  %v1371_v50 = vmul.f32 %v1115_v35, %v6425_v45  ;;  %9768 = vst [vmem:[#allocation32_spill] sm:$0xff] %v6444_v46  ;;  %v6448_v3 = vpop.f32.mrb[54].mxu0 }
 0x18c   :  { %4732 = vtanh.f32 %v2132_v5  ;;  %v2133_v56 = vmul.f32 0.7978846, %v1877_v32  ;;  %v2135_v62 = vmul.f32 0.7978846, %v1879_v49  ;;  %v2604_v53 = vadd.f32 1.0, %v9767_v47  ;;  %9769 = vst [vmem:[#allocation98_spill] sm:$0xff] %v6448_v3 }
 0x18d   :  { %4734 = vtanh.f32 %v2134_v44  ;;  %v2136_v39 = vmul.f32 0.7978846, %v1880_v30  ;;  %v1882_v16 = vadd.f32 %v1626_v54, %v6404_v23  ;;  %v1881_v2 = vadd.f32 %v1625_v14, %v6408_v26  ;;  %v9770_v35 = vld [vmem:[#allocation45_spill] sm:$0xff]  ;;  %v6451_v5 = vpop.f32.mrb[54].mxu1  ;;  %v6454_v44 = vpop.f32.mrb[55].mxu0  ;;  %v9774_v14 = vld [vmem:[#allocation14_spill] sm:$0xff] }
 0x18e   :  { %4736 = vtanh.f32 %v2133_v56  ;;  %v1627_v57 = vmul.f32 0.044715, %v1371_v50  ;;  %v2608_v13 = vadd.f32 1.0, %v9770_v35  ;;  %v2860_v31 = vmul.f32 0.5, %v2604_v53  ;;  %9771 = vst [vmem:[#allocation45_spill] sm:$0xff] %v6451_v5  ;;  %v9772_v32 = vld [vmem:[#allocation37_spill] sm:$0xff] }
 0x18f   :  { %4738 = vtanh.f32 %v2135_v62  ;;  %v2138_v49 = vmul.f32 0.7978846, %v1882_v16  ;;  %v2137_v47 = vmul.f32 0.7978846, %v1881_v2  ;;  %v2606_v46 = vadd.f32 1.0, %v9772_v32  ;;  %9773 = vst [vmem:[#allocation37_spill] sm:$0xff] %v6454_v44 }
 0x190   :  { %4740 = vtanh.f32 %v2136_v39  ;;  %v1883_v30 = vadd.f32 %v1627_v57, %v6425_v45  ;;  %v2864_v54 = vmul.f32 0.5, %v2608_v13  ;;  %v3116_v3 = vmul.f32 %v2860_v31, %v9774_v14  ;;  %v6458_v56 = vpop.f32.mrb[55].mxu1  ;;  %v9776_v50 = vld [vmem:[#allocation48_spill] sm:$0xff]  ;;  %v9778_v5 = vld [vmem:[#allocation15_spill] sm:$0xff]  ;;  %v6521_v23 = vpop.f32.mrb[56].mxu0 }
 0x191   :  { %9775 = vst [vmem:[#allocation14_spill] sm:$0xff] %v6458_v56  ;;  %4742 = vtanh.f32 %v2138_v49  ;;  %v2610_v53 = vadd.f32 1.0, %v9776_v50  ;;  %v2862_v35 = vmul.f32 0.5, %v2606_v46  ;;  %v2613_v62 = vadd.f32 1.0, %v6069_v58  ;;  %v9777_v16 = vld [vmem:[#allocation20_spill] sm:$0xff]  ;;  %v9779_v46 = vld [vmem:[#allocation21_spill] sm:$0xff] }
 0x192   :  { %4744 = vtanh.f32 %v2137_v47  ;;  %v2139_v2 = vmul.f32 0.7978846, %v1883_v30  ;;  %v3120_v32 = vmul.f32 %v2864_v54, %v9777_v16  ;;  %v2617_v44 = vadd.f32 1.0, %v6102_v40  ;;  %v9780_v58 = vld [vmem:[#allocation28_spill] sm:$0xff]  ;;  %v9781_v54 = vld [vmem:[#allocation54_spill] sm:$0xff] }
 0x193   :  { %v2866_v39 = vmul.f32 0.5, %v2610_v53  ;;  %v3118_v57 = vmul.f32 %v2862_v35, %v9778_v5  ;;  %v2869_v13 = vmul.f32 0.5, %v2613_v62  ;;  %v2615_v31 = vadd.f32 1.0, %v6078_v55  ;;  %v9784_v5 = vld [vmem:[#allocation36_spill] sm:$0xff]  ;;  %9796 = vst [vmem:[#allocation54_spill] sm:$0xff] %v6521_v23 }
 0x194   :  { %4746 = vtanh.f32 %v2139_v2  ;;  %v3364_v14 = vpack.c.bf16 %v3120_v32, %v3116_v3  ;;  %v2873_v49 = vmul.f32 0.5, %v2617_v44  ;;  %v2619_v50 = vadd.f32 1.0, %v6117_v20  ;;  %v9785_v3 = vld [vmem:[#allocation55_spill] sm:$0xff]  ;;  %v9787_v20 = vld [vmem:[#allocation58_spill] sm:$0xff]  ;;  %v9789_v32 = vld [vmem:[#allocation29_spill] sm:$0xff] }
 0x195   :  { %v3122_v56 = vmul.f32 %v2866_v39, %v9779_v46  ;;  %v3125_v47 = vmul.f32 %v2869_v13, %v9780_v58  ;;  %v2871_v30 = vmul.f32 0.5, %v2615_v31  ;;  %v6471_v16 = vadd.f32 %v9781_v54, %v5576_v28  ;;  %v9790_v31 = vld [vmem:[#allocation59_spill] sm:$0xff] }
 0x196   :  { %v6473_v40 = vpop.eup %4732  ;;  %3796 = vmatmul.mubr.bf16.gmra.mrb[136].mxu0 %v3364_v14  ;;  %v3129_v53 = vmul.f32 %v2873_v49, %v9784_v5  ;;  %v2875_v55 = vmul.f32 0.5, %v2619_v50  ;;  %v6478_v44 = vadd.f32 %v9785_v3, %v5578_v29  ;;  %v6482_v35 = vadd.f32 %v9787_v20, %v5580_v33  ;;  %v9791_v46 = vld [vmem:[#allocation39_spill] sm:$0xff]  ;;  %v9792_v3 = vld [vmem:[#allocation60_spill] sm:$0xff] }
 0x197   :  { %9782 = vst [vmem:[#allocation48_spill] sm:$0xff] %v6471_v16  ;;  %9783 = vst [vmem:[#allocation20_spill] sm:$0xff] %v6473_v40  ;;  %v6484_v62 = vpop.eup %4734  ;;  %v3366_v2 = vpack.c.bf16 %v3122_v56, %v3118_v57  ;;  %v3127_v39 = vmul.f32 %v2871_v30, %v9789_v32  ;;  %v1116_v13 = vmul.f32 %v6471_v16, %v6471_v16 }
 0x198   :  { %9786 = vst [vmem:[#allocation15_spill] sm:$0xff] %v6478_v44  ;;  %9788 = vst [vmem:[#allocation21_spill] sm:$0xff] %v6484_v62  ;;  %v6491_v14 = vadd.f32 %v9790_v31, %v5582_v34  ;;  %v6493_v49 = vpop.eup %4736  ;;  %v3369_v50 = vpack.c.bf16 %v3129_v53, %v3125_v47  ;;  %v3131_v58 = vmul.f32 %v2875_v55, %v9791_v46  ;;  %v9793_v47 = vld [vmem:[#allocation61_spill] sm:$0xff] }
 0x199   :  { %v1118_v54 = vmul.f32 %v6478_v44, %v6478_v44  ;;  %v1117_v56 = vmul.f32 %v6482_v35, %v6482_v35  ;;  %v6500_v57 = vpop.eup %4738  ;;  %4085 = vmatmul.mubr.bf16.gmra.mrb[136].mxu1 %v3366_v2  ;;  %v1372_v30 = vmul.f32 %v1116_v13, %v6471_v16  ;;  %v6507_v20 = vadd.f32 %v9792_v3, %v5576_v28  ;;  %v9795_v13 = vld [vmem:[#allocation62_spill] sm:$0xff] }
 0x19a   :  { %v1119_v5 = vmul.f32 %v6491_v14, %v6491_v14  ;;  %v6511_v53 = vadd.f32 %v9793_v47, %v5578_v29  ;;  %v6513_v55 = vpop.eup %4740  ;;  %3803 = vmatprep.mubr.bf16.mxu0 %v3369_v50  ;;  %v3371_v32 = vpack.c.bf16 %v3131_v58, %v3127_v39  ;;  %v6519_v46 = vadd.f32 %v9795_v13, %v5580_v33  ;;  %v9798_v13 = vld [vmem:[#allocation63_spill] sm:$0xff] }
 0x19b   :  { %9794 = vst [vmem:[#allocation28_spill] sm:$0xff] %v6513_v55  ;;  %v1374_v31 = vmul.f32 %v1118_v54, %v6478_v44  ;;  %v1373_v2 = vmul.f32 %v1117_v56, %v6482_v35  ;;  %v6523_v3 = vpop.eup %4742  ;;  %v1628_v21 = vmul.f32 0.044715, %v1372_v30  ;;  %v1120_v24 = vmul.f32 %v6507_v20, %v6507_v20 }
 0x19c   :  { %9797 = vst [vmem:[#allocation36_spill] sm:$0xff] %v6523_v3  ;;  %v1375_v47 = vmul.f32 %v1119_v5, %v6491_v14  ;;  %v1122_v39 = vmul.f32 %v6511_v53, %v6511_v53  ;;  %v6530_v50 = vpop.eup %4744  ;;  %4092 = vmatprep.mubr.bf16.mxu1 %v3371_v32  ;;  %v1121_v56 = vmul.f32 %v6519_v46, %v6519_v46 }
 0x19d   :  { %v1630_v58 = vmul.f32 0.044715, %v1374_v31  ;;  %v1629_v54 = vmul.f32 0.044715, %v1373_v2  ;;  %v6536_v23 = vadd.f32 %v9798_v13, %v5582_v34  ;;  %v1884_v30 = vadd.f32 %v1628_v21, %v6471_v16 }
 0x19e   :  { %v1631_v5 = vmul.f32 0.044715, %v1375_v47  ;;  %v1376_v3 = vmul.f32 %v1120_v24, %v6507_v20  ;;  %v1378_v62 = vmul.f32 %v1122_v39, %v6511_v53  ;;  %v6541_v55 = vpop.eup %4746  ;;  %v1377_v2 = vmul.f32 %v1121_v56, %v6519_v46  ;;  %v6552_v56 = vpop.f32.mrb[56].mxu1 }
 0x19f   :  { %v1886_v32 = vadd.f32 %v1630_v58, %v6478_v44  ;;  %v1885_v31 = vadd.f32 %v1629_v54, %v6482_v35  ;;  %v1123_v40 = vmul.f32 %v6536_v23, %v6536_v23  ;;  %v2140_v13 = vmul.f32 0.7978846, %v1884_v30  ;;  %9799 = vst [vmem:[#allocation55_spill] sm:$0xff] %v6552_v56  ;;  %v6554_v44 = vpop.f32.mrb[57].mxu0 }
 0x1a0   :  { %v1887_v45 = vadd.f32 %v1631_v5, %v6491_v14  ;;  %v1632_v21 = vmul.f32 0.044715, %v1376_v3  ;;  %v1634_v47 = vmul.f32 0.044715, %v1378_v62  ;;  %v1633_v63 = vmul.f32 0.044715, %v1377_v2 }
 0x1a1   :  { %v2142_v16 = vmul.f32 0.7978846, %v1886_v32  ;;  %v2141_v24 = vmul.f32 0.7978846, %v1885_v31  ;;  %v1379_v39 = vmul.f32 %v1123_v40, %v6536_v23  ;;  %4748 = vtanh.f32 %v2140_v13  ;;  %9800 = vst [vmem:[#allocation58_spill] sm:$0xff] %v6554_v44  ;;  %v9801_v62 = vld [vmem:[#allocation53_spill] sm:$0xff] }
 0x1a2   :  { %v2143_v26 = vmul.f32 0.7978846, %v1887_v45  ;;  %v1888_v58 = vadd.f32 %v1632_v21, %v6507_v20  ;;  %v1890_v54 = vadd.f32 %v1634_v47, %v6511_v53  ;;  %v1889_v30 = vadd.f32 %v1633_v63, %v6519_v46  ;;  %v6558_v32 = vpop.f32.mrb[57].mxu1  ;;  %v6560_v31 = vpop.f32.mrb[58].mxu0  ;;  %v9804_v2 = vld [vmem:[#allocation64_spill] sm:$0xff] }
 0x1a3   :  { %4750 = vtanh.f32 %v2142_v16  ;;  %v1635_v3 = vmul.f32 0.044715, %v1379_v39  ;;  %v2612_v5 = vadd.f32 1.0, %v9801_v62  ;;  %9802 = vst [vmem:[#allocation29_spill] sm:$0xff] %v6558_v32  ;;  %9803 = vst [vmem:[#allocation59_spill] sm:$0xff] %v6560_v31  ;;  %v2616_v13 = vadd.f32 1.0, %v9804_v2 }
 0x1a4   :  { %4752 = vtanh.f32 %v2141_v24  ;;  %v2144_v45 = vmul.f32 0.7978846, %v1888_v58  ;;  %v2146_v40 = vmul.f32 0.7978846, %v1890_v54  ;;  %v6563_v21 = vpop.f32.mrb[58].mxu1  ;;  %v6566_v63 = vpop.f32.mrb[59].mxu0 }
 0x1a5   :  { %9805 = vst [vmem:[#allocation39_spill] sm:$0xff] %v6563_v21  ;;  %4754 = vtanh.f32 %v2143_v26  ;;  %v2145_v47 = vmul.f32 0.7978846, %v1889_v30  ;;  %v1891_v16 = vadd.f32 %v1635_v3, %v6536_v23  ;;  %v2868_v44 = vmul.f32 0.5, %v2612_v5  ;;  %9806 = vst [vmem:[#allocation60_spill] sm:$0xff] %v6566_v63  ;;  %v9807_v62 = vld [vmem:[#allocation56_spill] sm:$0xff] }
 0x1a6   :  { %4756 = vtanh.f32 %v2144_v45  ;;  %v2872_v39 = vmul.f32 0.5, %v2616_v13  ;;  %v2614_v32 = vadd.f32 1.0, %v9807_v62  ;;  %v2618_v31 = vadd.f32 1.0, %v6095_v42  ;;  %v6570_v24 = vpop.f32.mrb[59].mxu1  ;;  %v9809_v54 = vld [vmem:[#allocation26_spill] sm:$0xff]  ;;  %v9811_v63 = vld [vmem:[#allocation27_spill] sm:$0xff] }
 0x1a7   :  { %9808 = vst [vmem:[#allocation61_spill] sm:$0xff] %v6570_v24  ;;  %4758 = vtanh.f32 %v2146_v40  ;;  %v2147_v58 = vmul.f32 0.7978846, %v1891_v16  ;;  %v3124_v2 = vmul.f32 %v2868_v44, %v9809_v54  ;;  %v2621_v26 = vadd.f32 1.0, %v6171_v25  ;;  %v9810_v30 = vld [vmem:[#allocation30_spill] sm:$0xff]  ;;  %v9812_v40 = vld [vmem:[#allocation35_spill] sm:$0xff] }
 0x1a8   :  { %4760 = vtanh.f32 %v2145_v47  ;;  %v3128_v3 = vmul.f32 %v2872_v39, %v9810_v30  ;;  %v2870_v5 = vmul.f32 0.5, %v2614_v32  ;;  %v2874_v21 = vmul.f32 0.5, %v2618_v31  ;;  %v9813_v25 = vld [vmem:[#allocation50_spill] sm:$0xff] }
 0x1a9   :  { %4762 = vtanh.f32 %v2147_v58  ;;  %v2625_v45 = vadd.f32 1.0, %v6216_v27  ;;  %v2877_v13 = vmul.f32 0.5, %v2621_v26  ;;  %v2623_v62 = vadd.f32 1.0, %v6185_v6  ;;  %v9816_v58 = vld [vmem:[#allocation51_spill] sm:$0xff] }
 0x1aa   :  { %v3368_v42 = vpack.c.bf16 %v3128_v3, %v3124_v2  ;;  %v3126_v24 = vmul.f32 %v2870_v5, %v9811_v63  ;;  %v3130_v16 = vmul.f32 %v2874_v21, %v9812_v40  ;;  %v2627_v44 = vadd.f32 1.0, %v6224_v1 }
 0x1ab   :  { %v2881_v54 = vmul.f32 0.5, %v2625_v45  ;;  %v3133_v47 = vmul.f32 %v2877_v13, %v9813_v25  ;;  %v2879_v56 = vmul.f32 0.5, %v2623_v62  ;;  %v6583_v32 = vadd.f32 %v6091_v7, %v5576_v28  ;;  %v6585_v31 = vpop.eup %4748 }
 0x1ac   :  { %3804 = vmatmul.mubr.bf16.gmra.mrb[140].mxu0 %v3368_v42  ;;  %v3370_v27 = vpack.c.bf16 %v3130_v16, %v3126_v24  ;;  %v2883_v6 = vmul.f32 0.5, %v2627_v44  ;;  %v6589_v63 = vadd.f32 %v6093_v4, %v5578_v29  ;;  %v6593_v1 = vadd.f32 %v6098_v37, %v5580_v33  ;;  %v9817_v24 = vld [vmem:[#allocation65_spill] sm:$0xff]  ;;  %v6631_v44 = vpop.f32.mrb[60].mxu0 }
 0x1ad   :  { %9814 = vst [vmem:[#allocation62_spill] sm:$0xff] %v6583_v32  ;;  %v6595_v21 = vpop.eup %4750  ;;  %v3137_v39 = vmul.f32 %v2881_v54, %v6056_v22  ;;  %v3135_v7 = vmul.f32 %v2879_v56, %v9816_v58  ;;  %v1124_v2 = vmul.f32 %v6583_v32, %v6583_v32  ;;  %v6603_v26 = vadd.f32 %v9817_v24, %v5582_v34 }
 0x1ae   :  { %9815 = vst [vmem:[#allocation63_spill] sm:$0xff] %v6589_v63  ;;  %v6605_v30 = vpop.eup %4752  ;;  %4093 = vmatmul.mubr.bf16.gmra.mrb[140].mxu1 %v3370_v27  ;;  %v3139_v4 = vmul.f32 %v2883_v6, %v6076_v9  ;;  %v1126_v37 = vmul.f32 %v6589_v63, %v6589_v63  ;;  %v1125_v22 = vmul.f32 %v6593_v1, %v6593_v1  ;;  %9820 = vst [vmem:[#allocation56_spill] sm:$0xff] %v6631_v44 }
 0x1af   :  { %v6614_v56 = vadd.f32 %v6107_v17, %v5576_v28  ;;  %v6616_v3 = vpop.eup %4754  ;;  %v3373_v5 = vpack.c.bf16 %v3137_v39, %v3133_v47  ;;  %v1380_v45 = vmul.f32 %v1124_v2, %v6583_v32  ;;  %v1127_v13 = vmul.f32 %v6603_v26, %v6603_v26 }
 0x1b0   :  { %v6623_v9 = vadd.f32 %v6109_v52, %v5578_v29  ;;  %v6625_v62 = vpop.eup %4756  ;;  %v3375_v42 = vpack.c.bf16 %v3139_v4, %v3135_v7  ;;  %v1382_v40 = vmul.f32 %v1126_v37, %v6589_v63  ;;  %v1381_v17 = vmul.f32 %v1125_v22, %v6593_v1 }
 0x1b1   :  { %9818 = vst [vmem:[#allocation53_spill] sm:$0xff] %v6614_v56  ;;  %v1128_v16 = vmul.f32 %v6614_v56, %v6614_v56  ;;  %v6633_v54 = vpop.eup %4758  ;;  %3811 = vmatprep.mubr.bf16.mxu0 %v3373_v5  ;;  %v1636_v25 = vmul.f32 0.044715, %v1380_v45  ;;  %v1383_v47 = vmul.f32 %v1127_v13, %v6603_v26  ;;  %v6640_v27 = vadd.f32 %v6113_v36, %v5580_v33 }
 0x1b2   :  { %9819 = vst [vmem:[#allocation64_spill] sm:$0xff] %v6623_v9  ;;  %v1130_v52 = vmul.f32 %v6623_v9, %v6623_v9  ;;  %v6642_v6 = vpop.eup %4760  ;;  %4100 = vmatprep.mubr.bf16.mxu1 %v3375_v42  ;;  %v1638_v39 = vmul.f32 0.044715, %v1382_v40  ;;  %v1637_v58 = vmul.f32 0.044715, %v1381_v17  ;;  %v6647_v2 = vadd.f32 %v6115_v8, %v5582_v34 }
 0x1b3   :  { %v1384_v7 = vmul.f32 %v1128_v16, %v6614_v56  ;;  %v6649_v24 = vpop.eup %4762  ;;  %v1892_v4 = vadd.f32 %v1636_v25, %v6583_v32  ;;  %v1639_v37 = vmul.f32 0.044715, %v1383_v47  ;;  %v1129_v36 = vmul.f32 %v6640_v27, %v6640_v27  ;;  %v6661_v25 = vpop.f32.mrb[60].mxu1 }
 0x1b4   :  { %v1386_v22 = vmul.f32 %v1130_v52, %v6623_v9  ;;  %v1894_v5 = vadd.f32 %v1638_v39, %v6589_v63  ;;  %v1893_v45 = vadd.f32 %v1637_v58, %v6593_v1  ;;  %v1131_v42 = vmul.f32 %v6647_v2, %v6647_v2  ;;  %9821 = vst [vmem:[#allocation26_spill] sm:$0xff] %v6661_v25  ;;  %v6665_v63 = vpop.f32.mrb[61].mxu0  ;;  %v6668_v32 = vpop.f32.mrb[61].mxu1 }
 0x1b5   :  { %v1640_v13 = vmul.f32 0.044715, %v1384_v7  ;;  %v2148_v8 = vmul.f32 0.7978846, %v1892_v4  ;;  %v1895_v40 = vadd.f32 %v1639_v37, %v6603_v26  ;;  %v1385_v16 = vmul.f32 %v1129_v36, %v6640_v27  ;;  %9822 = vst [vmem:[#allocation30_spill] sm:$0xff] %v6665_v63  ;;  %9823 = vst [vmem:[#allocation27_spill] sm:$0xff] %v6668_v32 }
 0x1b6   :  { %v1642_v17 = vmul.f32 0.044715, %v1386_v22  ;;  %v2150_v47 = vmul.f32 0.7978846, %v1894_v5  ;;  %v2149_v52 = vmul.f32 0.7978846, %v1893_v45  ;;  %v1387_v39 = vmul.f32 %v1131_v42, %v6647_v2 }
 0x1b7   :  { %v1896_v44 = vadd.f32 %v1640_v13, %v6614_v56  ;;  %4764 = vtanh.f32 %v2148_v8  ;;  %v2151_v58 = vmul.f32 0.7978846, %v1895_v40  ;;  %v1641_v4 = vmul.f32 0.044715, %v1385_v16  ;;  %v9824_v36 = vld [vmem:[#allocation68_spill] sm:$0xff]  ;;  %v6671_v5 = vpop.f32.mrb[62].mxu0 }
 0x1b8   :  { %v1898_v7 = vadd.f32 %v1642_v17, %v6623_v9  ;;  %4766 = vtanh.f32 %v2150_v47  ;;  %v1643_v22 = vmul.f32 0.044715, %v1387_v39  ;;  %v2620_v25 = vadd.f32 1.0, %v9824_v36  ;;  %9825 = vst [vmem:[#allocation35_spill] sm:$0xff] %v6671_v5  ;;  %v6675_v8 = vpop.f32.mrb[62].mxu1  ;;  %v9827_v16 = vld [vmem:[#allocation69_spill] sm:$0xff] }
 0x1b9   :  { %v2152_v37 = vmul.f32 0.7978846, %v1896_v44  ;;  %4768 = vtanh.f32 %v2149_v52  ;;  %v1897_v13 = vadd.f32 %v1641_v4, %v6640_v27  ;;  %v2624_v42 = vadd.f32 1.0, %v6205_v11  ;;  %9826 = vst [vmem:[#allocation50_spill] sm:$0xff] %v6675_v8  ;;  %v6679_v44 = vpop.f32.mrb[63].mxu0  ;;  %v9830_v11 = vld [vmem:[#allocation40_spill] sm:$0xff] }
 0x1ba   :  { %v2154_v45 = vmul.f32 0.7978846, %v1898_v7  ;;  %4770 = vtanh.f32 %v2151_v58  ;;  %v1899_v40 = vadd.f32 %v1643_v22, %v6647_v2  ;;  %v2876_v17 = vmul.f32 0.5, %v2620_v25  ;;  %9828 = vst [vmem:[#allocation51_spill] sm:$0xff] %v6679_v44  ;;  %v6682_v7 = vpop.f32.mrb[63].mxu1  ;;  %v9831_v58 = vld [vmem:[#allocation52_spill] sm:$0xff] }
 0x1bb   :  { %v2622_v47 = vadd.f32 1.0, %v9827_v16  ;;  %4772 = vtanh.f32 %v2152_v37  ;;  %v2153_v39 = vmul.f32 0.7978846, %v1897_v13  ;;  %v2880_v36 = vmul.f32 0.5, %v2624_v42  ;;  %9829 = vst [vmem:[#allocation65_spill] sm:$0xff] %v6682_v7  ;;  %v9832_v44 = vld [vmem:[#allocation43_spill] sm:$0xff] }
 0x1bc   :  { %v2626_v52 = vadd.f32 1.0, %v6211_v59  ;;  %4774 = vtanh.f32 %v2154_v45  ;;  %v2155_v4 = vmul.f32 0.7978846, %v1899_v40  ;;  %v3132_v5 = vmul.f32 %v2876_v17, %v9830_v11  ;;  %v9833_v7 = vld [vmem:[#allocation57_spill] sm:$0xff]  ;;  %v9851_v32 = vld [vmem:[#allocation80_spill] sm:$0xff] }
 0x1bd   :  { %v2878_v8 = vmul.f32 0.5, %v2622_v47  ;;  %4776 = vtanh.f32 %v2153_v39  ;;  %v3136_v22 = vmul.f32 %v2880_v36, %v9831_v58  ;;  %v2629_v16 = vadd.f32 1.0, %v6301_v10  ;;  %v9834_v36 = vld [vmem:[#allocation73_spill] sm:$0xff]  ;;  %v9836_v10 = vld [vmem:[#allocation74_spill] sm:$0xff] }
 0x1be   :  { %v2882_v25 = vmul.f32 0.5, %v2626_v52  ;;  %4778 = vtanh.f32 %v2155_v4  ;;  %v2633_v13 = vadd.f32 1.0, %v6323_v60  ;;  %v2631_v59 = vadd.f32 1.0, %v6307_v48  ;;  %v9840_v58 = vld [vmem:[#allocation70_spill] sm:$0xff] }
 0x1bf   :  { %v3134_v37 = vmul.f32 %v2878_v8, %v9832_v44  ;;  %v3372_v42 = vpack.c.bf16 %v3136_v22, %v3132_v5  ;;  %v2885_v40 = vmul.f32 0.5, %v2629_v16  ;;  %v2635_v17 = vadd.f32 1.0, %v6329_v18  ;;  %v9838_v44 = vld [vmem:[#allocation75_spill] sm:$0xff] }
 0x1c0   :  { %v3138_v45 = vmul.f32 %v2882_v25, %v9833_v7  ;;  %v2889_v47 = vmul.f32 0.5, %v2633_v13  ;;  %v2887_v39 = vmul.f32 0.5, %v2631_v59  ;;  %v6694_v52 = vadd.f32 %v9834_v36, %v5576_v28  ;;  %v9841_v59 = vld [vmem:[#allocation76_spill] sm:$0xff] }
 0x1c1   :  { %v6698_v4 = vadd.f32 %v9836_v10, %v5578_v29  ;;  %v6700_v8 = vpop.eup %4764  ;;  %3812 = vmatmul.mubr.bf16.gmra.mrb[144].mxu0 %v3372_v42  ;;  %v3141_v48 = vmul.f32 %v2885_v40, %v6140_v41  ;;  %v2891_v5 = vmul.f32 0.5, %v2635_v17  ;;  %v6705_v18 = vadd.f32 %v9838_v44, %v5580_v33 }
 0x1c2   :  { %9835 = vst [vmem:[#allocation68_spill] sm:$0xff] %v6694_v52  ;;  %v3374_v60 = vpack.c.bf16 %v3138_v45, %v3134_v37  ;;  %v6707_v7 = vpop.eup %4766  ;;  %v3145_v11 = vmul.f32 %v2889_v47, %v6179_v19  ;;  %v3143_v22 = vmul.f32 %v2887_v39, %v9840_v58  ;;  %v1132_v25 = vmul.f32 %v6694_v52, %v6694_v52  ;;  %v9843_v19 = vld [vmem:[#allocation77_spill] sm:$0xff] }
 0x1c3   :  { %9837 = vst [vmem:[#allocation69_spill] sm:$0xff] %v6698_v4  ;;  %9839 = vst [vmem:[#allocation40_spill] sm:$0xff] %v6707_v7  ;;  %v1134_v16 = vmul.f32 %v6698_v4, %v6698_v4  ;;  %v6715_v37 = vpop.eup %4768  ;;  %v3147_v41 = vmul.f32 %v2891_v5, %v6191_v61  ;;  %v1133_v13 = vmul.f32 %v6705_v18, %v6705_v18  ;;  %v9845_v61 = vld [vmem:[#allocation78_spill] sm:$0xff] }
 0x1c4   :  { %4101 = vmatmul.mubr.bf16.gmra.mrb[144].mxu1 %v3374_v60  ;;  %v6722_v42 = vadd.f32 %v9841_v59, %v5582_v34  ;;  %v6726_v45 = vadd.f32 %v9843_v19, %v5576_v28  ;;  %v6728_v40 = vpop.eup %4770  ;;  %v3377_v17 = vpack.c.bf16 %v3145_v11, %v3141_v48  ;;  %v1388_v47 = vmul.f32 %v1132_v25, %v6694_v52  ;;  %v6743_v48 = vpop.f32.mrb[64].mxu0 }
 0x1c5   :  { %v1390_v39 = vmul.f32 %v1134_v16, %v6698_v4  ;;  %v6734_v36 = vadd.f32 %v9845_v61, %v5578_v29  ;;  %v6736_v10 = vpop.eup %4772  ;;  %v3379_v60 = vpack.c.bf16 %v3147_v41, %v3143_v22  ;;  %v1389_v5 = vmul.f32 %v1133_v13, %v6705_v18  ;;  %9847 = vst [vmem:[#allocation73_spill] sm:$0xff] %v6743_v48  ;;  %v9849_v22 = vld [vmem:[#allocation79_spill] sm:$0xff] }
 0x1c6   :  { %9842 = vst [vmem:[#allocation52_spill] sm:$0xff] %v6722_v42  ;;  %9844 = vst [vmem:[#allocation43_spill] sm:$0xff] %v6726_v45  ;;  %v1135_v44 = vmul.f32 %v6722_v42, %v6722_v42  ;;  %v1136_v58 = vmul.f32 %v6726_v45, %v6726_v45  ;;  %v6745_v11 = vpop.eup %4774  ;;  %3819 = vmatprep.mubr.bf16.mxu0 %v3377_v17  ;;  %v1644_v25 = vmul.f32 0.044715, %v1388_v47 }
 0x1c7   :  { %9846 = vst [vmem:[#allocation57_spill] sm:$0xff] %v6734_v36  ;;  %9848 = vst [vmem:[#allocation74_spill] sm:$0xff] %v6745_v11  ;;  %v1646_v16 = vmul.f32 0.044715, %v1390_v39  ;;  %v1138_v59 = vmul.f32 %v6734_v36, %v6734_v36  ;;  %v6751_v41 = vadd.f32 %v9849_v22, %v5580_v33  ;;  %v6753_v13 = vpop.eup %4776  ;;  %4108 = vmatprep.mubr.bf16.mxu1 %v3379_v60  ;;  %v1645_v19 = vmul.f32 0.044715, %v1389_v5 }
 0x1c8   :  { %v1391_v61 = vmul.f32 %v1135_v44, %v6722_v42  ;;  %v1392_v48 = vmul.f32 %v1136_v58, %v6726_v45  ;;  %v6759_v17 = vadd.f32 %v9851_v32, %v5582_v34  ;;  %v6761_v47 = vpop.eup %4778  ;;  %v1900_v39 = vadd.f32 %v1644_v25, %v6694_v52  ;;  %v6775_v52 = vpop.f32.mrb[64].mxu1 }
 0x1c9   :  { %9850 = vst [vmem:[#allocation75_spill] sm:$0xff] %v6751_v41  ;;  %v1902_v63 = vadd.f32 %v1646_v16, %v6698_v4  ;;  %v1394_v22 = vmul.f32 %v1138_v59, %v6734_v36  ;;  %v1137_v60 = vmul.f32 %v6751_v41, %v6751_v41  ;;  %v1901_v5 = vadd.f32 %v1645_v19, %v6705_v18  ;;  %v6777_v19 = vpop.f32.mrb[65].mxu0 }
 0x1ca   :  { %9852 = vst [vmem:[#allocation70_spill] sm:$0xff] %v6759_v17  ;;  %v1647_v44 = vmul.f32 0.044715, %v1391_v61  ;;  %v1648_v9 = vmul.f32 0.044715, %v1392_v48  ;;  %v1139_v58 = vmul.f32 %v6759_v17, %v6759_v17  ;;  %9853 = vst [vmem:[#allocation76_spill] sm:$0xff] %v6775_v52 }
 0x1cb   :  { %v2156_v32 = vmul.f32 0.7978846, %v1900_v39  ;;  %v2158_v56 = vmul.f32 0.7978846, %v1902_v63  ;;  %v1650_v11 = vmul.f32 0.044715, %v1394_v22  ;;  %v1393_v7 = vmul.f32 %v1137_v60, %v6751_v41 }
 0x1cc   :  { %v2157_v25 = vmul.f32 0.7978846, %v1901_v5  ;;  %v1903_v16 = vadd.f32 %v1647_v44, %v6722_v42  ;;  %v1904_v59 = vadd.f32 %v1648_v9, %v6726_v45  ;;  %v1395_v4 = vmul.f32 %v1139_v58, %v6759_v17  ;;  %9854 = vst [vmem:[#allocation77_spill] sm:$0xff] %v6777_v19  ;;  %v6781_v39 = vpop.f32.mrb[65].mxu1  ;;  %v6785_v52 = vpop.f32.mrb[66].mxu0  ;;  %v9866_v19 = vld [vmem:[#allocation46_spill] sm:$0xff] }
 0x1cd   :  { %4780 = vtanh.f32 %v2156_v32  ;;  %v1906_v48 = vadd.f32 %v1650_v11, %v6734_v36  ;;  %v1649_v61 = vmul.f32 0.044715, %v1393_v7  ;;  %v2628_v63 = vadd.f32 1.0, %v6272_v43  ;;  %9855 = vst [vmem:[#allocation78_spill] sm:$0xff] %v6781_v39  ;;  %9856 = vst [vmem:[#allocation79_spill] sm:$0xff] %v6785_v52  ;;  %v6787_v32 = vpop.f32.mrb[66].mxu1 }
 0x1ce   :  { %4782 = vtanh.f32 %v2158_v56  ;;  %v2159_v22 = vmul.f32 0.7978846, %v1903_v16  ;;  %v2160_v60 = vmul.f32 0.7978846, %v1904_v59  ;;  %v1651_v5 = vmul.f32 0.044715, %v1395_v4 }
 0x1cf   :  { %4784 = vtanh.f32 %v2157_v25  ;;  %v2162_v9 = vmul.f32 0.7978846, %v1906_v48  ;;  %v1905_v44 = vadd.f32 %v1649_v61, %v6751_v41  ;;  %v2632_v58 = vadd.f32 1.0, %v6313_v0  ;;  %9857 = vst [vmem:[#allocation80_spill] sm:$0xff] %v6787_v32  ;;  %v9858_v11 = vld [vmem:[#allocation90_spill] sm:$0xff]  ;;  %v6791_v56 = vpop.f32.mrb[67].mxu0 }
 0x1d0   :  { %4786 = vtanh.f32 %v2159_v22  ;;  %v1907_v7 = vadd.f32 %v1651_v5, %v6759_v17  ;;  %v2884_v43 = vmul.f32 0.5, %v2628_v63  ;;  %v2630_v39 = vadd.f32 1.0, %v9858_v11  ;;  %9859 = vst [vmem:[#allocation90_spill] sm:$0xff] %v6791_v56  ;;  %v6794_v59 = vpop.f32.mrb[67].mxu1  ;;  %v9861_v48 = vld [vmem:[#allocation66_spill] sm:$0xff]  ;;  %v9862_v22 = vld [vmem:[#allocation71_spill] sm:$0xff] }
 0x1d1   :  { %4788 = vtanh.f32 %v2160_v60  ;;  %v2161_v4 = vmul.f32 0.7978846, %v1905_v44  ;;  %v2888_v25 = vmul.f32 0.5, %v2632_v58  ;;  %v2634_v16 = vadd.f32 1.0, %v6317_v51  ;;  %9860 = vst [vmem:[#allocation99_spill] sm:$0xff] %v6794_v59  ;;  %v9863_v56 = vld [vmem:[#allocation67_spill] sm:$0xff] }
 0x1d2   :  { %4790 = vtanh.f32 %v2162_v9  ;;  %v2163_v0 = vmul.f32 0.7978846, %v1907_v7  ;;  %v3140_v61 = vmul.f32 %v2884_v43, %v9861_v48  ;;  %v2886_v32 = vmul.f32 0.5, %v2630_v39  ;;  %v9864_v58 = vld [vmem:[#allocation16_spill] sm:$0xff] }
 0x1d3   :  { %4792 = vtanh.f32 %v2161_v4  ;;  %v3144_v5 = vmul.f32 %v2888_v25, %v9862_v22  ;;  %v2890_v63 = vmul.f32 0.5, %v2634_v16  ;;  %v2637_v11 = vadd.f32 1.0, %v6382_v12  ;;  %v9865_v59 = vld [vmem:[#allocation72_spill] sm:$0xff]  ;;  %v9867_v25 = vld [vmem:[#allocation81_spill] sm:$0xff]  ;;  %v9869_v12 = vld [vmem:[#allocation82_spill] sm:$0xff] }
 0x1d4   :  { %4794 = vtanh.f32 %v2163_v0  ;;  %v3142_v60 = vmul.f32 %v2886_v32, %v9863_v56  ;;  %v2641_v44 = vadd.f32 1.0, %v6416_v15  ;;  %v2639_v51 = vadd.f32 1.0, %v9864_v58  ;;  %v9872_v56 = vld [vmem:[#allocation13_spill] sm:$0xff] }
 0x1d5   :  { %v3376_v52 = vpack.c.bf16 %v3144_v5, %v3140_v61  ;;  %v3146_v9 = vmul.f32 %v2890_v63, %v9865_v59  ;;  %v2893_v7 = vmul.f32 0.5, %v2637_v11  ;;  %v2643_v43 = vadd.f32 1.0, %v9866_v19  ;;  %v9873_v61 = vld [vmem:[#allocation83_spill] sm:$0xff] }
 0x1d6   :  { %v2897_v39 = vmul.f32 0.5, %v2641_v44  ;;  %v2895_v4 = vmul.f32 0.5, %v2639_v51  ;;  %v6806_v16 = vadd.f32 %v9867_v25, %v5576_v28  ;;  %v6810_v0 = vadd.f32 %v9869_v12, %v5578_v29  ;;  %v9875_v5 = vld [vmem:[#allocation91_spill] sm:$0xff]  ;;  %v9877_v51 = vld [vmem:[#allocation93_spill] sm:$0xff] }
 0x1d7   :  { %v6812_v32 = vpop.eup %4780  ;;  %3820 = vmatmul.mubr.bf16.gmra.mrb[148].mxu0 %v3376_v52  ;;  %v3378_v15 = vpack.c.bf16 %v3146_v9, %v3142_v60  ;;  %v3149_v48 = vmul.f32 %v2893_v7, %v9872_v56  ;;  %v2899_v59 = vmul.f32 0.5, %v2643_v43  ;;  %v6817_v19 = vadd.f32 %v9873_v61, %v5580_v33  ;;  %v9876_v11 = vld [vmem:[#allocation31_spill] sm:$0xff]  ;;  %v9878_v43 = vld [vmem:[#allocation84_spill] sm:$0xff] }
 0x1d8   :  { %9868 = vst [vmem:[#allocation66_spill] sm:$0xff] %v6806_v16  ;;  %9870 = vst [vmem:[#allocation71_spill] sm:$0xff] %v6810_v0  ;;  %v6819_v22 = vpop.eup %4782  ;;  %v3153_v63 = vmul.f32 %v2897_v39, %v9875_v5  ;;  %v3151_v44 = vmul.f32 %v2895_v4, %v9876_v11  ;;  %v1140_v58 = vmul.f32 %v6806_v16, %v6806_v16  ;;  %v9880_v39 = vld [vmem:[#allocation85_spill] sm:$0xff] }
 0x1d9   :  { %9871 = vst [vmem:[#allocation67_spill] sm:$0xff] %v6812_v32  ;;  %9874 = vst [vmem:[#allocation16_spill] sm:$0xff] %v6819_v22  ;;  %v1142_v52 = vmul.f32 %v6810_v0, %v6810_v0  ;;  %v6827_v60 = vpop.eup %4784  ;;  %4109 = vmatmul.mubr.bf16.gmra.mrb[148].mxu1 %v3378_v15  ;;  %v3155_v9 = vmul.f32 %v2899_v59, %v9877_v51  ;;  %v1141_v7 = vmul.f32 %v6817_v19, %v6817_v19  ;;  %v9882_v59 = vld [vmem:[#allocation86_spill] sm:$0xff] }
 0x1da   :  { %v6834_v25 = vadd.f32 %v9878_v43, %v5582_v34  ;;  %v6838_v4 = vadd.f32 %v9880_v39, %v5576_v28  ;;  %v6840_v12 = vpop.eup %4786  ;;  %v3381_v56 = vpack.c.bf16 %v3153_v63, %v3149_v48  ;;  %v1396_v61 = vmul.f32 %v1140_v58, %v6806_v16  ;;  %v6855_v48 = vpop.f32.mrb[68].mxu0 }
 0x1db   :  { %v1398_v15 = vmul.f32 %v1142_v52, %v6810_v0  ;;  %v6846_v5 = vadd.f32 %v9882_v59, %v5578_v29  ;;  %v6848_v11 = vpop.eup %4788  ;;  %v3383_v51 = vpack.c.bf16 %v3155_v9, %v3151_v44  ;;  %v1397_v43 = vmul.f32 %v1141_v7, %v6817_v19  ;;  %9885 = vst [vmem:[#allocation13_spill] sm:$0xff] %v6855_v48  ;;  %v9887_v44 = vld [vmem:[#allocation87_spill] sm:$0xff] }
 0x1dc   :  { %9879 = vst [vmem:[#allocation72_spill] sm:$0xff] %v6834_v25  ;;  %9881 = vst [vmem:[#allocation46_spill] sm:$0xff] %v6838_v4  ;;  %v1143_v39 = vmul.f32 %v6834_v25, %v6834_v25  ;;  %v1144_v36 = vmul.f32 %v6838_v4, %v6838_v4  ;;  %v6857_v63 = vpop.eup %4790  ;;  %3827 = vmatprep.mubr.bf16.mxu0 %v3381_v56  ;;  %v1652_v58 = vmul.f32 0.044715, %v1396_v61 }
 0x1dd   :  { %9883 = vst [vmem:[#allocation81_spill] sm:$0xff] %v6846_v5  ;;  %9884 = vst [vmem:[#allocation82_spill] sm:$0xff] %v6848_v11  ;;  %v1654_v52 = vmul.f32 0.044715, %v1398_v15  ;;  %v1146_v59 = vmul.f32 %v6846_v5, %v6846_v5  ;;  %v6863_v9 = vadd.f32 %v9887_v44, %v5580_v33  ;;  %v6865_v7 = vpop.eup %4792  ;;  %4116 = vmatprep.mubr.bf16.mxu1 %v3383_v51  ;;  %v1653_v45 = vmul.f32 0.044715, %v1397_v43 }
 0x1de   :  { %9886 = vst [vmem:[#allocation83_spill] sm:$0xff] %v6857_v63  ;;  %v1399_v22 = vmul.f32 %v1143_v39, %v6834_v25  ;;  %v1400_v48 = vmul.f32 %v1144_v36, %v6838_v4  ;;  %v9889_v63 = vld [vmem:[#allocation88_spill] sm:$0xff]  ;;  %v6873_v61 = vpop.eup %4794  ;;  %v1908_v15 = vadd.f32 %v1652_v58, %v6806_v16  ;;  %v6887_v16 = vpop.f32.mrb[68].mxu1 }
 0x1df   :  { %9888 = vst [vmem:[#allocation91_spill] sm:$0xff] %v6863_v9  ;;  %v6871_v56 = vadd.f32 %v9889_v63, %v5582_v34  ;;  %v1910_v11 = vadd.f32 %v1654_v52, %v6810_v0  ;;  %v1402_v44 = vmul.f32 %v1146_v59, %v6846_v5  ;;  %v1145_v51 = vmul.f32 %v6863_v9, %v6863_v9 }
 0x1e0   :  { %v1909_v43 = vadd.f32 %v1653_v45, %v6817_v19  ;;  %v1655_v39 = vmul.f32 0.044715, %v1399_v22  ;;  %v1656_v32 = vmul.f32 0.044715, %v1400_v48  ;;  %v2164_v63 = vmul.f32 0.7978846, %v1908_v15 }
 0x1e1   :  { %9890 = vst [vmem:[#allocation31_spill] sm:$0xff] %v6871_v56  ;;  %v1147_v36 = vmul.f32 %v6871_v56, %v6871_v56  ;;  %v2166_v17 = vmul.f32 0.7978846, %v1910_v11  ;;  %v1658_v42 = vmul.f32 0.044715, %v1402_v44  ;;  %v1401_v41 = vmul.f32 %v1145_v51, %v6863_v9  ;;  %9891 = vst [vmem:[#allocation93_spill] sm:$0xff] %v6887_v16 }
 0x1e2   :  { %v2165_v58 = vmul.f32 0.7978846, %v1909_v43  ;;  %v1911_v52 = vadd.f32 %v1655_v39, %v6834_v25  ;;  %v1912_v59 = vadd.f32 %v1656_v32, %v6838_v4  ;;  %v6889_v45 = vpop.f32.mrb[69].mxu0  ;;  %4796 = vtanh.f32 %v2164_v63  ;;  %v9893_v15 = vld [vmem:[#allocation8_spill] sm:$0xff]  ;;  %v6893_v44 = vpop.f32.mrb[69].mxu1  ;;  %v9895_v4 = vld [vmem:[#allocation41_spill] sm:$0xff] }
 0x1e3   :  { %v1403_v0 = vmul.f32 %v1147_v36, %v6871_v56  ;;  %9892 = vst [vmem:[#allocation84_spill] sm:$0xff] %v6889_v45  ;;  %v1914_v22 = vadd.f32 %v1658_v42, %v6846_v5  ;;  %v1657_v48 = vmul.f32 0.044715, %v1401_v41  ;;  %v2636_v11 = vadd.f32 1.0, %v9893_v15  ;;  %9894 = vst [vmem:[#allocation85_spill] sm:$0xff] %v6893_v44  ;;  %v6897_v25 = vpop.f32.mrb[70].mxu0 }
 0x1e4   :  { %4798 = vtanh.f32 %v2166_v17  ;;  %v2167_v51 = vmul.f32 0.7978846, %v1911_v52  ;;  %v2168_v43 = vmul.f32 0.7978846, %v1912_v59  ;;  %v2640_v16 = vadd.f32 1.0, %v9895_v4  ;;  %9896 = vst [vmem:[#allocation86_spill] sm:$0xff] %v6897_v25 }
 0x1e5   :  { %v1659_v39 = vmul.f32 0.044715, %v1403_v0  ;;  %4800 = vtanh.f32 %v2165_v58  ;;  %v2170_v32 = vmul.f32 0.7978846, %v1914_v22  ;;  %v1913_v36 = vadd.f32 %v1657_v48, %v6863_v9  ;;  %v6899_v63 = vpop.f32.mrb[70].mxu1  ;;  %v9898_v15 = vld [vmem:[#allocation11_spill] sm:$0xff] }
 0x1e6   :  { %9897 = vst [vmem:[#allocation87_spill] sm:$0xff] %v6899_v63  ;;  %4802 = vtanh.f32 %v2167_v51  ;;  %v2892_v41 = vmul.f32 0.5, %v2636_v11  ;;  %v2638_v44 = vadd.f32 1.0, %v9898_v15  ;;  %v6903_v17 = vpop.f32.mrb[71].mxu0  ;;  %v2896_v58 = vmul.f32 0.5, %v2640_v16  ;;  %v9900_v52 = vld [vmem:[#allocation17_spill] sm:$0xff] }
 0x1e7   :  { %v1915_v42 = vadd.f32 %v1659_v39, %v6871_v56  ;;  %9899 = vst [vmem:[#allocation88_spill] sm:$0xff] %v6903_v17  ;;  %4804 = vtanh.f32 %v2168_v43  ;;  %v2169_v0 = vmul.f32 0.7978846, %v1913_v36  ;;  %v2642_v59 = vadd.f32 1.0, %v9900_v52  ;;  %v6906_v22 = vpop.f32.mrb[71].mxu1  ;;  %v9902_v48 = vld [vmem:[#allocation89_spill] sm:$0xff] }
 0x1e8   :  { %9901 = vst [vmem:[#allocation8_spill] sm:$0xff] %v6906_v22  ;;  %4806 = vtanh.f32 %v2170_v32  ;;  %v3148_v25 = vmul.f32 %v2892_v41, %v9902_v48  ;;  %v2894_v63 = vmul.f32 0.5, %v2638_v44  ;;  %v9903_v51 = vld [vmem:[#allocation33_spill] sm:$0xff]  ;;  %v2645_v15 = vadd.f32 1.0, %v6493_v49  ;;  %v9904_v17 = vld [vmem:[#allocation10_spill] sm:$0xff] }
 0x1e9   :  { %v2171_v4 = vmul.f32 0.7978846, %v1915_v42  ;;  %4808 = vtanh.f32 %v2169_v0  ;;  %v3152_v39 = vmul.f32 %v2896_v58, %v9903_v51  ;;  %v2898_v11 = vmul.f32 0.5, %v2642_v59  ;;  %v9905_v22 = vld [vmem:[#allocation34_spill] sm:$0xff]  ;;  %v9906_v58 = vld [vmem:[#allocation92_spill] sm:$0xff] }
 0x1ea   :  { %v3150_v43 = vmul.f32 %v2894_v63, %v9904_v17  ;;  %v2649_v16 = vadd.f32 1.0, %v6530_v50  ;;  %v2647_v36 = vadd.f32 1.0, %v6500_v57  ;;  %v2901_v42 = vmul.f32 0.5, %v2645_v15  ;;  %v9908_v49 = vld [vmem:[#allocation94_spill] sm:$0xff]  ;;  %v9911_v17 = vld [vmem:[#allocation95_spill] sm:$0xff] }
 0x1eb   :  { %4810 = vtanh.f32 %v2171_v4  ;;  %v3380_v52 = vpack.c.bf16 %v3152_v39, %v3148_v25  ;;  %v3154_v32 = vmul.f32 %v2898_v11, %v9905_v22  ;;  %v2651_v41 = vadd.f32 1.0, %v6541_v55  ;;  %v9913_v48 = vld [vmem:[#allocation22_spill] sm:$0xff]  ;;  %v9914_v39 = vld [vmem:[#allocation9_spill] sm:$0xff] }
 0x1ec   :  { %v2905_v44 = vmul.f32 0.5, %v2649_v16  ;;  %v2903_v0 = vmul.f32 0.5, %v2647_v36  ;;  %v6918_v59 = vadd.f32 %v9906_v58, %v5576_v28  ;;  %v6922_v4 = vadd.f32 %v9908_v49, %v5578_v29  ;;  %v6924_v63 = vpop.eup %4796 }
 0x1ed   :  { %9910 = vst [vmem:[#allocation17_spill] sm:$0xff] %v6924_v63  ;;  %3828 = vmatmul.mubr.bf16.gmra.mrb[152].mxu0 %v3380_v52  ;;  %v3382_v57 = vpack.c.bf16 %v3154_v32, %v3150_v43  ;;  %v3157_v50 = vmul.f32 %v2901_v42, %v6376_v38  ;;  %v2907_v25 = vmul.f32 0.5, %v2651_v41  ;;  %v6929_v55 = vadd.f32 %v9911_v17, %v5580_v33  ;;  %v9915_v38 = vld [vmem:[#allocation25_spill] sm:$0xff]  ;;  %v9916_v32 = vld [vmem:[#allocation96_spill] sm:$0xff] }
 0x1ee   :  { %9907 = vst [vmem:[#allocation41_spill] sm:$0xff] %v6918_v59  ;;  %9909 = vst [vmem:[#allocation11_spill] sm:$0xff] %v6922_v4  ;;  %v6931_v22 = vpop.eup %4798  ;;  %v3161_v51 = vmul.f32 %v2905_v44, %v9913_v48  ;;  %v3159_v11 = vmul.f32 %v2903_v0, %v9914_v39  ;;  %v1148_v15 = vmul.f32 %v6918_v59, %v6918_v59  ;;  %v9918_v41 = vld [vmem:[#allocation97_spill] sm:$0xff] }
 0x1ef   :  { %9912 = vst [vmem:[#allocation89_spill] sm:$0xff] %v6931_v22  ;;  %v1150_v16 = vmul.f32 %v6922_v4, %v6922_v4  ;;  %v6939_v43 = vpop.eup %4800  ;;  %4117 = vmatmul.mubr.bf16.gmra.mrb[152].mxu1 %v3382_v57  ;;  %v3163_v36 = vmul.f32 %v2907_v25, %v9915_v38  ;;  %v1149_v52 = vmul.f32 %v6929_v55, %v6929_v55  ;;  %v9920_v25 = vld [vmem:[#allocation18_spill] sm:$0xff] }
 0x1f0   :  { %v6946_v42 = vadd.f32 %v9916_v32, %v5582_v34  ;;  %v6950_v44 = vadd.f32 %v9918_v41, %v5576_v28  ;;  %v6952_v0 = vpop.eup %4802  ;;  %v3385_v58 = vpack.c.bf16 %v3161_v51, %v3157_v50  ;;  %v1404_v49 = vmul.f32 %v1148_v15, %v6918_v59  ;;  %v6967_v50 = vpop.f32.mrb[72].mxu0 }
 0x1f1   :  { %v1406_v57 = vmul.f32 %v1150_v16, %v6922_v4  ;;  %v6958_v17 = vadd.f32 %v9920_v25, %v5578_v29  ;;  %v6960_v48 = vpop.eup %4804  ;;  %v3387_v39 = vpack.c.bf16 %v3163_v36, %v3159_v11  ;;  %v1405_v38 = vmul.f32 %v1149_v52, %v6929_v55  ;;  %9923 = vst [vmem:[#allocation94_spill] sm:$0xff] %v6967_v50  ;;  %v9925_v11 = vld [vmem:[#allocation23_spill] sm:$0xff] }
 0x1f2   :  { %9917 = vst [vmem:[#allocation33_spill] sm:$0xff] %v6946_v42  ;;  %9919 = vst [vmem:[#allocation10_spill] sm:$0xff] %v6950_v44  ;;  %v1151_v32 = vmul.f32 %v6946_v42, %v6946_v42  ;;  %v1152_v41 = vmul.f32 %v6950_v44, %v6950_v44  ;;  %v6969_v51 = vpop.eup %4806  ;;  %3835 = vmatprep.mubr.bf16.mxu0 %v3385_v58  ;;  %v1660_v15 = vmul.f32 0.044715, %v1404_v49 }
 0x1f3   :  { %9921 = vst [vmem:[#allocation34_spill] sm:$0xff] %v6958_v17  ;;  %9922 = vst [vmem:[#allocation92_spill] sm:$0xff] %v6960_v48  ;;  %v1662_v16 = vmul.f32 0.044715, %v1406_v57  ;;  %v1154_v25 = vmul.f32 %v6958_v17, %v6958_v17  ;;  %v6975_v36 = vadd.f32 %v9925_v11, %v5580_v33  ;;  %v6977_v52 = vpop.eup %4808  ;;  %4124 = vmatprep.mubr.bf16.mxu1 %v3387_v39  ;;  %v1661_v45 = vmul.f32 0.044715, %v1405_v38 }
 0x1f4   :  { %9924 = vst [vmem:[#allocation95_spill] sm:$0xff] %v6969_v51  ;;  %v1407_v5 = vmul.f32 %v1151_v32, %v6946_v42  ;;  %v1408_v50 = vmul.f32 %v1152_v41, %v6950_v44  ;;  %v9926_v51 = vld [vmem:[#allocation19_spill] sm:$0xff]  ;;  %v1916_v57 = vadd.f32 %v1660_v15, %v6918_v59  ;;  %v6999_v59 = vpop.f32.mrb[72].mxu1 }
 0x1f5   :  { %v6983_v58 = vadd.f32 %v9926_v51, %v5582_v34  ;;  %v6985_v49 = vpop.eup %4810  ;;  %v1918_v22 = vadd.f32 %v1662_v16, %v6922_v4  ;;  %v1410_v11 = vmul.f32 %v1154_v25, %v6958_v17  ;;  %v1153_v39 = vmul.f32 %v6975_v36, %v6975_v36  ;;  %9927 = vst [vmem:[#allocation22_spill] sm:$0xff] %v6999_v59 }
 0x1f6   :  { %v1917_v38 = vadd.f32 %v1661_v45, %v6929_v55  ;;  %v1663_v32 = vmul.f32 0.044715, %v1407_v5  ;;  %v1664_v48 = vmul.f32 0.044715, %v1408_v50  ;;  %v2172_v51 = vmul.f32 0.7978846, %v1916_v57 }
 0x1f7   :  { %v1155_v41 = vmul.f32 %v6983_v58, %v6983_v58  ;;  %v2174_v63 = vmul.f32 0.7978846, %v1918_v22  ;;  %v1666_v56 = vmul.f32 0.044715, %v1410_v11  ;;  %v1409_v9 = vmul.f32 %v1153_v39, %v6975_v36  ;;  %v7001_v45 = vpop.f32.mrb[73].mxu0  ;;  %v9929_v57 = vld [vmem:[#allocation20_spill] sm:$0xff] }
 0x1f8   :  { %v2173_v15 = vmul.f32 0.7978846, %v1917_v38  ;;  %v1919_v16 = vadd.f32 %v1663_v32, %v6946_v42  ;;  %v1920_v25 = vadd.f32 %v1664_v48, %v6950_v44  ;;  %9928 = vst [vmem:[#allocation9_spill] sm:$0xff] %v7001_v45  ;;  %4812 = vtanh.f32 %v2172_v51  ;;  %v7005_v11 = vpop.f32.mrb[73].mxu1  ;;  %v9931_v44 = vld [vmem:[#allocation28_spill] sm:$0xff]  ;;  %v7009_v42 = vpop.f32.mrb[74].mxu0 }
 0x1f9   :  { %v1411_v4 = vmul.f32 %v1155_v41, %v6983_v58  ;;  %v1922_v5 = vadd.f32 %v1666_v56, %v6958_v17  ;;  %v1665_v50 = vmul.f32 0.044715, %v1409_v9  ;;  %v2644_v22 = vadd.f32 1.0, %v9929_v57  ;;  %9930 = vst [vmem:[#allocation25_spill] sm:$0xff] %v7005_v11  ;;  %9932 = vst [vmem:[#allocation96_spill] sm:$0xff] %v7009_v42  ;;  %v7011_v51 = vpop.f32.mrb[74].mxu1 }
 0x1fa   :  { %4814 = vtanh.f32 %v2174_v63  ;;  %v2175_v39 = vmul.f32 0.7978846, %v1919_v16  ;;  %v2176_v38 = vmul.f32 0.7978846, %v1920_v25  ;;  %v2648_v59 = vadd.f32 1.0, %v9931_v44  ;;  %9933 = vst [vmem:[#allocation97_spill] sm:$0xff] %v7011_v51 }
 0x1fb   :  { %v1667_v32 = vmul.f32 0.044715, %v1411_v4  ;;  %4816 = vtanh.f32 %v2173_v15  ;;  %v2178_v48 = vmul.f32 0.7978846, %v1922_v5  ;;  %v1921_v41 = vadd.f32 %v1665_v50, %v6975_v36  ;;  %v9934_v57 = vld [vmem:[#allocation21_spill] sm:$0xff]  ;;  %v7015_v63 = vpop.f32.mrb[75].mxu0 }
 0x1fc   :  { %4818 = vtanh.f32 %v2175_v39  ;;  %v2900_v56 = vmul.f32 0.5, %v2644_v22  ;;  %v2646_v11 = vadd.f32 1.0, %v9934_v57  ;;  %9935 = vst [vmem:[#allocation18_spill] sm:$0xff] %v7015_v63  ;;  %v2904_v15 = vmul.f32 0.5, %v2648_v59  ;;  %v9936_v16 = vld [vmem:[#allocation36_spill] sm:$0xff]  ;;  %v7018_v5 = vpop.f32.mrb[75].mxu1 }
 0x1fd   :  { %v1923_v9 = vadd.f32 %v1667_v32, %v6983_v58  ;;  %4820 = vtanh.f32 %v2176_v38  ;;  %v2177_v4 = vmul.f32 0.7978846, %v1921_v41  ;;  %v2650_v25 = vadd.f32 1.0, %v9936_v16  ;;  %9937 = vst [vmem:[#allocation23_spill] sm:$0xff] %v7018_v5  ;;  %v9938_v50 = vld [vmem:[#allocation24_spill] sm:$0xff]  ;;  %v9940_v63 = vld [vmem:[#allocation38_spill] sm:$0xff] }
 0x1fe   :  { %4822 = vtanh.f32 %v2178_v48  ;;  %v3156_v42 = vmul.f32 %v2900_v56, %v9938_v50  ;;  %v2902_v51 = vmul.f32 0.5, %v2646_v11  ;;  %v9939_v39 = vld [vmem:[#allocation12_spill] sm:$0xff]  ;;  %v2653_v57 = vadd.f32 1.0, %v6605_v30  ;;  %v9941_v5 = vld [vmem:[#allocation42_spill] sm:$0xff]  ;;  %v9944_v30 = vld [vmem:[#allocation47_spill] sm:$0xff] }
 0x1ff   :  { %v2179_v44 = vmul.f32 0.7978846, %v1923_v9  ;;  %4824 = vtanh.f32 %v2177_v4  ;;  %v3160_v32 = vmul.f32 %v2904_v15, %v9939_v39  ;;  %v2906_v22 = vmul.f32 0.5, %v2650_v25  ;;  %v9942_v15 = vld [vmem:[#allocation44_spill] sm:$0xff] }
 0x200   :  { %v3158_v38 = vmul.f32 %v2902_v51, %v9940_v63  ;;  %v2657_v59 = vadd.f32 1.0, %v6642_v6  ;;  %v2655_v41 = vadd.f32 1.0, %v6616_v3  ;;  %v2909_v9 = vmul.f32 0.5, %v2653_v57  ;;  %v9946_v63 = vld [vmem:[#allocation49_spill] sm:$0xff] }
 0x201   :  { %4826 = vtanh.f32 %v2179_v44  ;;  %v3384_v16 = vpack.c.bf16 %v3160_v32, %v3156_v42  ;;  %v3162_v48 = vmul.f32 %v2906_v22, %v9941_v5  ;;  %v2659_v56 = vadd.f32 1.0, %v6649_v24 }
 0x202   :  { %v2913_v11 = vmul.f32 0.5, %v2657_v59  ;;  %v2911_v4 = vmul.f32 0.5, %v2655_v41  ;;  %v7030_v25 = vadd.f32 %v9942_v15, %v5576_v28  ;;  %v7034_v44 = vadd.f32 %v9944_v30, %v5578_v29  ;;  %v7036_v51 = vpop.eup %4812  ;;  %v9948_v59 = vld [vmem:[#allocation32_spill] sm:$0xff] }
 0x203   :  { %3836 = vmatmul.mubr.bf16.gmra.mrb[156].mxu0 %v3384_v16  ;;  %v3386_v3 = vpack.c.bf16 %v3162_v48, %v3158_v38  ;;  %v3165_v6 = vmul.f32 %v2909_v9, %v6482_v35  ;;  %v2915_v42 = vmul.f32 0.5, %v2659_v56  ;;  %v7041_v24 = vadd.f32 %v9946_v63, %v5580_v33 }
 0x204   :  { %9943 = vst [vmem:[#allocation19_spill] sm:$0xff] %v7030_v25  ;;  %9945 = vst [vmem:[#allocation20_spill] sm:$0xff] %v7034_v44  ;;  %v7043_v5 = vpop.eup %4814  ;;  %v3169_v50 = vmul.f32 %v2913_v11, %v6519_v46  ;;  %v3167_v39 = vmul.f32 %v2911_v4, %v6491_v14  ;;  %v1156_v32 = vmul.f32 %v7030_v25, %v7030_v25  ;;  %v9949_v14 = vld [vmem:[#allocation98_spill] sm:$0xff] }
 0x205   :  { %9947 = vst [vmem:[#allocation28_spill] sm:$0xff] %v7043_v5  ;;  %v1158_v22 = vmul.f32 %v7034_v44, %v7034_v44  ;;  %v7051_v57 = vpop.eup %4816  ;;  %4125 = vmatmul.mubr.bf16.gmra.mrb[156].mxu1 %v3386_v3  ;;  %v3171_v35 = vmul.f32 %v2915_v42, %v6536_v23  ;;  %v1157_v38 = vmul.f32 %v7041_v24, %v7041_v24  ;;  %v9950_v23 = vld [vmem:[#allocation45_spill] sm:$0xff] }
 0x206   :  { %v7058_v41 = vadd.f32 %v9948_v59, %v5582_v34  ;;  %v7062_v46 = vadd.f32 %v9949_v14, %v5576_v28  ;;  %v7064_v16 = vpop.eup %4818  ;;  %v3389_v48 = vpack.c.bf16 %v3169_v50, %v3165_v6  ;;  %v1412_v9 = vmul.f32 %v1156_v32, %v7030_v25  ;;  %v7079_v6 = vpop.f32.mrb[76].mxu0 }
 0x207   :  { %v1414_v56 = vmul.f32 %v1158_v22, %v7034_v44  ;;  %v7070_v11 = vadd.f32 %v9950_v23, %v5578_v29  ;;  %v7072_v4 = vpop.eup %4820  ;;  %v3391_v15 = vpack.c.bf16 %v3171_v35, %v3167_v39  ;;  %v1413_v30 = vmul.f32 %v1157_v38, %v7041_v24  ;;  %9952 = vst [vmem:[#allocation36_spill] sm:$0xff] %v7079_v6  ;;  %v9954_v39 = vld [vmem:[#allocation37_spill] sm:$0xff]  ;;  %v9955_v6 = vld [vmem:[#allocation14_spill] sm:$0xff] }
 0x208   :  { %9951 = vst [vmem:[#allocation21_spill] sm:$0xff] %v7072_v4  ;;  %v1159_v3 = vmul.f32 %v7058_v41, %v7058_v41  ;;  %v1160_v42 = vmul.f32 %v7062_v46, %v7062_v46  ;;  %v7081_v63 = vpop.eup %4822  ;;  %3843 = vmatprep.mubr.bf16.mxu0 %v3389_v48  ;;  %v1668_v50 = vmul.f32 0.044715, %v1412_v9  ;;  %v7087_v35 = vadd.f32 %v9954_v39, %v5580_v33 }
 0x209   :  { %9953 = vst [vmem:[#allocation24_spill] sm:$0xff] %v7081_v63  ;;  %v1670_v32 = vmul.f32 0.044715, %v1414_v56  ;;  %v1162_v22 = vmul.f32 %v7070_v11, %v7070_v11  ;;  %v7089_v38 = vpop.eup %4824  ;;  %4132 = vmatprep.mubr.bf16.mxu1 %v3391_v15  ;;  %v1669_v59 = vmul.f32 0.044715, %v1413_v30  ;;  %v7095_v48 = vadd.f32 %v9955_v6, %v5582_v34 }
 0x20a   :  { %v1415_v14 = vmul.f32 %v1159_v3, %v7058_v41  ;;  %v1416_v23 = vmul.f32 %v1160_v42, %v7062_v46  ;;  %v1924_v56 = vadd.f32 %v1668_v50, %v7030_v25  ;;  %v1161_v15 = vmul.f32 %v7087_v35, %v7087_v35  ;;  %v7111_v25 = vpop.f32.mrb[76].mxu1 }
 0x20b   :  { %v7097_v9 = vpop.eup %4826  ;;  %v1926_v45 = vadd.f32 %v1670_v32, %v7034_v44  ;;  %v1418_v39 = vmul.f32 %v1162_v22, %v7070_v11  ;;  %v1925_v30 = vadd.f32 %v1669_v59, %v7041_v24  ;;  %v1163_v42 = vmul.f32 %v7095_v48, %v7095_v48  ;;  %9956 = vst [vmem:[#allocation12_spill] sm:$0xff] %v7111_v25  ;;  %v7113_v59 = vpop.f32.mrb[77].mxu0 }
 0x20c   :  { %v1671_v3 = vmul.f32 0.044715, %v1415_v14  ;;  %v1672_v17 = vmul.f32 0.044715, %v1416_v23  ;;  %v2180_v6 = vmul.f32 0.7978846, %v1924_v56  ;;  %v1417_v4 = vmul.f32 %v1161_v15, %v7087_v35 }
 0x20d   :  { %v2182_v63 = vmul.f32 0.7978846, %v1926_v45  ;;  %v1674_v5 = vmul.f32 0.044715, %v1418_v39  ;;  %v2181_v50 = vmul.f32 0.7978846, %v1925_v30  ;;  %v1419_v44 = vmul.f32 %v1163_v42, %v7095_v48 }
 0x20e   :  { %v1927_v32 = vadd.f32 %v1671_v3, %v7058_v41  ;;  %v1928_v22 = vadd.f32 %v1672_v17, %v7062_v46  ;;  %9957 = vst [vmem:[#allocation38_spill] sm:$0xff] %v7113_v59  ;;  %4828 = vtanh.f32 %v2180_v6  ;;  %v1673_v23 = vmul.f32 0.044715, %v1417_v4  ;;  %v7117_v56 = vpop.f32.mrb[77].mxu1  ;;  %v7121_v25 = vpop.f32.mrb[78].mxu0 }
 0x20f   :  { %v1930_v14 = vadd.f32 %v1674_v5, %v7070_v11  ;;  %v2652_v45 = vadd.f32 1.0, %v6585_v31  ;;  %9958 = vst [vmem:[#allocation42_spill] sm:$0xff] %v7117_v56  ;;  %4830 = vtanh.f32 %v2182_v63  ;;  %v1675_v30 = vmul.f32 0.044715, %v1419_v44  ;;  %9959 = vst [vmem:[#allocation44_spill] sm:$0xff] %v7121_v25  ;;  %v7123_v6 = vpop.f32.mrb[78].mxu1 }
 0x210   :  { %v2183_v39 = vmul.f32 0.7978846, %v1927_v32  ;;  %v2184_v15 = vmul.f32 0.7978846, %v1928_v22  ;;  %4832 = vtanh.f32 %v2181_v50  ;;  %v1929_v3 = vadd.f32 %v1673_v23, %v7087_v35  ;;  %9960 = vst [vmem:[#allocation47_spill] sm:$0xff] %v7123_v6  ;;  %v7127_v63 = vpop.f32.mrb[79].mxu0 }
 0x211   :  { %v2186_v17 = vmul.f32 0.7978846, %v1930_v14  ;;  %v2656_v42 = vadd.f32 1.0, %v6625_v62  ;;  %v1931_v5 = vadd.f32 %v1675_v30, %v7095_v48  ;;  %v2908_v31 = vmul.f32 0.5, %v2652_v45  ;;  %9961 = vst [vmem:[#allocation49_spill] sm:$0xff] %v7127_v63  ;;  %v7130_v22 = vpop.f32.mrb[79].mxu1 }
 0x212   :  { %4834 = vtanh.f32 %v2183_v39  ;;  %v2654_v4 = vadd.f32 1.0, %v6595_v21  ;;  %v2185_v44 = vmul.f32 0.7978846, %v1929_v3  ;;  %v2658_v32 = vadd.f32 1.0, %v6633_v54  ;;  %9962 = vst [vmem:[#allocation32_spill] sm:$0xff] %v7130_v22  ;;  %v9963_v14 = vld [vmem:[#allocation48_spill] sm:$0xff] }
 0x213   :  { %4836 = vtanh.f32 %v2184_v15  ;;  %v2912_v50 = vmul.f32 0.5, %v2656_v42  ;;  %v2187_v62 = vmul.f32 0.7978846, %v1931_v5  ;;  %v3164_v23 = vmul.f32 %v2908_v31, %v9963_v14  ;;  %v9964_v30 = vld [vmem:[#allocation15_spill] sm:$0xff] }
 0x214   :  { %4838 = vtanh.f32 %v2186_v17  ;;  %v2910_v6 = vmul.f32 0.5, %v2654_v4  ;;  %v2914_v45 = vmul.f32 0.5, %v2658_v32  ;;  %v2661_v21 = vadd.f32 1.0, %v6715_v37  ;;  %v9967_v37 = vld [vmem:[#allocation55_spill] sm:$0xff] }
 0x215   :  { %4840 = vtanh.f32 %v2185_v44  ;;  %v3168_v39 = vmul.f32 %v2912_v50, %v6507_v20  ;;  %v2665_v3 = vadd.f32 1.0, %v6753_v13  ;;  %v2663_v54 = vadd.f32 1.0, %v6728_v40  ;;  %v9965_v20 = vld [vmem:[#allocation54_spill] sm:$0xff] }
 0x216   :  { %4842 = vtanh.f32 %v2187_v62  ;;  %v3166_v15 = vmul.f32 %v2910_v6, %v9964_v30  ;;  %v3170_v17 = vmul.f32 %v2914_v45, %v6511_v53  ;;  %v2917_v5 = vmul.f32 0.5, %v2661_v21  ;;  %v9969_v62 = vld [vmem:[#allocation58_spill] sm:$0xff] }
 0x217   :  { %v3388_v42 = vpack.c.bf16 %v3168_v39, %v3164_v23  ;;  %v2667_v31 = vadd.f32 1.0, %v6761_v47  ;;  %v2921_v4 = vmul.f32 0.5, %v2665_v3  ;;  %v2919_v44 = vmul.f32 0.5, %v2663_v54  ;;  %v9970_v3 = vld [vmem:[#allocation29_spill] sm:$0xff] }
 0x218   :  { %v7142_v50 = vadd.f32 %v9965_v20, %v5576_v28  ;;  %v7146_v32 = vadd.f32 %v9967_v37, %v5578_v29  ;;  %v7148_v6 = vpop.eup %4828  ;;  %v3390_v40 = vpack.c.bf16 %v3170_v17, %v3166_v15  ;;  %v3173_v13 = vmul.f32 %v2917_v5, %v6593_v1 }
 0x219   :  { %3844 = vmatmul.mubr.bf16.gmra.mrb[160].mxu0 %v3388_v42  ;;  %v2923_v53 = vmul.f32 0.5, %v2667_v31  ;;  %v7153_v47 = vadd.f32 %v9969_v62, %v5580_v33  ;;  %v7155_v14 = vpop.eup %4830  ;;  %v3177_v23 = vmul.f32 %v2921_v4, %v6640_v27  ;;  %v3175_v39 = vmul.f32 %v2919_v44, %v6603_v26  ;;  %v9971_v26 = vld [vmem:[#allocation59_spill] sm:$0xff] }
 0x21a   :  { %9966 = vst [vmem:[#allocation98_spill] sm:$0xff] %v7142_v50  ;;  %9968 = vst [vmem:[#allocation45_spill] sm:$0xff] %v7146_v32  ;;  %v1164_v45 = vmul.f32 %v7142_v50, %v7142_v50  ;;  %v1166_v21 = vmul.f32 %v7146_v32, %v7146_v32  ;;  %v7163_v30 = vpop.eup %4832  ;;  %4133 = vmatmul.mubr.bf16.gmra.mrb[160].mxu1 %v3390_v40  ;;  %v7170_v54 = vadd.f32 %v9970_v3, %v5582_v34 }
 0x21b   :  { %v3179_v1 = vmul.f32 %v2923_v53, %v6647_v2  ;;  %v1165_v15 = vmul.f32 %v7153_v47, %v7153_v47  ;;  %v7174_v27 = vadd.f32 %v9971_v26, %v5576_v28  ;;  %v3393_v17 = vpack.c.bf16 %v3177_v23, %v3173_v13  ;;  %v9973_v2 = vld [vmem:[#allocation39_spill] sm:$0xff]  ;;  %v7191_v13 = vpop.f32.mrb[80].mxu0 }
 0x21c   :  { %v7176_v42 = vpop.eup %4834  ;;  %v1420_v5 = vmul.f32 %v1164_v45, %v7142_v50  ;;  %v1422_v31 = vmul.f32 %v1166_v21, %v7146_v32  ;;  %v7182_v4 = vadd.f32 %v9973_v2, %v5578_v29  ;;  %v1167_v40 = vmul.f32 %v7170_v54, %v7170_v54  ;;  %9975 = vst [vmem:[#allocation48_spill] sm:$0xff] %v7191_v13  ;;  %v9977_v13 = vld [vmem:[#allocation61_spill] sm:$0xff] }
 0x21d   :  { %9972 = vst [vmem:[#allocation37_spill] sm:$0xff] %v7174_v27  ;;  %v7184_v44 = vpop.eup %4836  ;;  %v3395_v20 = vpack.c.bf16 %v3179_v1, %v3175_v39  ;;  %v1421_v37 = vmul.f32 %v1165_v15, %v7153_v47  ;;  %v1168_v53 = vmul.f32 %v7174_v27, %v7174_v27  ;;  %3851 = vmatprep.mubr.bf16.mxu0 %v3393_v17  ;;  %v9976_v39 = vld [vmem:[#allocation60_spill] sm:$0xff] }
 0x21e   :  { %9974 = vst [vmem:[#allocation14_spill] sm:$0xff] %v7182_v4  ;;  %v7193_v62 = vpop.eup %4838  ;;  %v1676_v23 = vmul.f32 0.044715, %v1420_v5  ;;  %v1678_v45 = vmul.f32 0.044715, %v1422_v31  ;;  %v1170_v21 = vmul.f32 %v7182_v4, %v7182_v4  ;;  %v7199_v1 = vadd.f32 %v9976_v39, %v5580_v33 }
 0x21f   :  { %v7201_v15 = vpop.eup %4840  ;;  %4140 = vmatprep.mubr.bf16.mxu1 %v3395_v20  ;;  %v1677_v3 = vmul.f32 0.044715, %v1421_v37  ;;  %v1423_v26 = vmul.f32 %v1167_v40, %v7170_v54  ;;  %v1424_v2 = vmul.f32 %v1168_v53, %v7174_v27  ;;  %v7207_v17 = vadd.f32 %v9977_v13, %v5582_v34 }
 0x220   :  { %v7209_v5 = vpop.eup %4842  ;;  %v1932_v31 = vadd.f32 %v1676_v23, %v7142_v50  ;;  %v1934_v22 = vadd.f32 %v1678_v45, %v7146_v32  ;;  %v1426_v39 = vmul.f32 %v1170_v21, %v7182_v4  ;;  %v1169_v20 = vmul.f32 %v7199_v1, %v7199_v1  ;;  %v7223_v50 = vpop.f32.mrb[80].mxu1 }
 0x221   :  { %9978 = vst [vmem:[#allocation15_spill] sm:$0xff] %v7207_v17  ;;  %v1933_v37 = vadd.f32 %v1677_v3, %v7153_v47  ;;  %v1679_v40 = vmul.f32 0.044715, %v1423_v26  ;;  %v1680_v63 = vmul.f32 0.044715, %v1424_v2  ;;  %v1171_v53 = vmul.f32 %v7207_v17, %v7207_v17  ;;  %9979 = vst [vmem:[#allocation54_spill] sm:$0xff] %v7223_v50 }
 0x222   :  { %v2188_v13 = vmul.f32 0.7978846, %v1932_v31  ;;  %v2190_v25 = vmul.f32 0.7978846, %v1934_v22  ;;  %v1682_v56 = vmul.f32 0.044715, %v1426_v39  ;;  %v1425_v59 = vmul.f32 %v1169_v20, %v7199_v1 }
 0x223   :  { %v2189_v23 = vmul.f32 0.7978846, %v1933_v37  ;;  %v1935_v45 = vadd.f32 %v1679_v40, %v7170_v54  ;;  %v1936_v21 = vadd.f32 %v1680_v63, %v7174_v27  ;;  %v1427_v32 = vmul.f32 %v1171_v53, %v7207_v17  ;;  %v7225_v3 = vpop.f32.mrb[81].mxu0  ;;  %v7229_v31 = vpop.f32.mrb[81].mxu1  ;;  %v10013_v27 = vld [vmem:[#allocation65_spill] sm:$0xff] }
 0x224   :  { %9980 = vst [vmem:[#allocation55_spill] sm:$0xff] %v7225_v3  ;;  %4844 = vtanh.f32 %v2188_v13  ;;  %v1938_v26 = vadd.f32 %v1682_v56, %v7182_v4  ;;  %v1681_v2 = vmul.f32 0.044715, %v1425_v59  ;;  %v2660_v22 = vadd.f32 1.0, %v6700_v8  ;;  %9981 = vst [vmem:[#allocation58_spill] sm:$0xff] %v7229_v31  ;;  %v7233_v50 = vpop.f32.mrb[82].mxu0 }
 0x225   :  { %4846 = vtanh.f32 %v2190_v25  ;;  %v2191_v39 = vmul.f32 0.7978846, %v1935_v45  ;;  %v2192_v20 = vmul.f32 0.7978846, %v1936_v21  ;;  %v1683_v37 = vmul.f32 0.044715, %v1427_v32 }
 0x226   :  { %4848 = vtanh.f32 %v2189_v23  ;;  %v2194_v63 = vmul.f32 0.7978846, %v1938_v26  ;;  %v1937_v40 = vadd.f32 %v1681_v2, %v7199_v1  ;;  %v2664_v53 = vadd.f32 1.0, %v6736_v10  ;;  %9982 = vst [vmem:[#allocation29_spill] sm:$0xff] %v7233_v50  ;;  %v7235_v13 = vpop.f32.mrb[82].mxu1  ;;  %v9984_v56 = vld [vmem:[#allocation40_spill] sm:$0xff] }
 0x227   :  { %9983 = vst [vmem:[#allocation59_spill] sm:$0xff] %v7235_v13  ;;  %4850 = vtanh.f32 %v2191_v39  ;;  %v1939_v59 = vadd.f32 %v1683_v37, %v7207_v17  ;;  %v2916_v8 = vmul.f32 0.5, %v2660_v22  ;;  %v2662_v31 = vadd.f32 1.0, %v9984_v56  ;;  %v7239_v25 = vpop.f32.mrb[83].mxu0  ;;  %v9986_v45 = vld [vmem:[#allocation74_spill] sm:$0xff]  ;;  %v7242_v26 = vpop.f32.mrb[83].mxu1 }
 0x228   :  { %9985 = vst [vmem:[#allocation39_spill] sm:$0xff] %v7239_v25  ;;  %4852 = vtanh.f32 %v2192_v20  ;;  %v2193_v32 = vmul.f32 0.7978846, %v1937_v40  ;;  %v2920_v23 = vmul.f32 0.5, %v2664_v53  ;;  %v2666_v21 = vadd.f32 1.0, %v9986_v45  ;;  %9987 = vst [vmem:[#allocation60_spill] sm:$0xff] %v7242_v26 }
 0x229   :  { %4854 = vtanh.f32 %v2194_v63  ;;  %v2195_v10 = vmul.f32 0.7978846, %v1939_v59  ;;  %v9988_v2 = vld [vmem:[#allocation62_spill] sm:$0xff]  ;;  %v2918_v13 = vmul.f32 0.5, %v2662_v31  ;;  %v9989_v39 = vld [vmem:[#allocation53_spill] sm:$0xff]  ;;  %v2669_v56 = vadd.f32 1.0, %v6827_v60 }
 0x22a   :  { %v3172_v50 = vmul.f32 %v2916_v8, %v9988_v2  ;;  %4856 = vtanh.f32 %v2193_v32  ;;  %v3176_v37 = vmul.f32 %v2920_v23, %v9989_v39  ;;  %v2922_v22 = vmul.f32 0.5, %v2666_v21  ;;  %v9990_v25 = vld [vmem:[#allocation63_spill] sm:$0xff]  ;;  %v9991_v26 = vld [vmem:[#allocation64_spill] sm:$0xff]  ;;  %v9994_v60 = vld [vmem:[#allocation26_spill] sm:$0xff] }
 0x22b   :  { %4858 = vtanh.f32 %v2195_v10  ;;  %v3174_v20 = vmul.f32 %v2918_v13, %v9990_v25  ;;  %v2673_v40 = vadd.f32 1.0, %v6865_v7  ;;  %v2671_v53 = vadd.f32 1.0, %v6840_v12  ;;  %v9992_v23 = vld [vmem:[#allocation56_spill] sm:$0xff]  ;;  %v9997_v25 = vld [vmem:[#allocation30_spill] sm:$0xff]  ;;  %v9999_v2 = vld [vmem:[#allocation75_spill] sm:$0xff] }
 0x22c   :  { %v3392_v45 = vpack.c.bf16 %v3176_v37, %v3172_v50  ;;  %v3178_v63 = vmul.f32 %v2922_v22, %v9991_v26  ;;  %v2925_v59 = vmul.f32 0.5, %v2669_v56  ;;  %v2675_v8 = vadd.f32 1.0, %v6873_v61  ;;  %v10000_v37 = vld [vmem:[#allocation52_spill] sm:$0xff] }
 0x22d   :  { %v2929_v31 = vmul.f32 0.5, %v2673_v40  ;;  %v2927_v32 = vmul.f32 0.5, %v2671_v53  ;;  %v7254_v21 = vadd.f32 %v9992_v23, %v5576_v28  ;;  %v7258_v10 = vadd.f32 %v9994_v60, %v5578_v29 }
 0x22e   :  { %v7260_v13 = vpop.eup %4844  ;;  %3852 = vmatmul.mubr.bf16.gmra.mrb[164].mxu0 %v3392_v45  ;;  %v3394_v12 = vpack.c.bf16 %v3178_v63, %v3174_v20  ;;  %v3181_v7 = vmul.f32 %v2925_v59, %v6705_v18  ;;  %v2931_v50 = vmul.f32 0.5, %v2675_v8  ;;  %v7265_v61 = vadd.f32 %v9997_v25, %v5580_v33  ;;  %v10001_v18 = vld [vmem:[#allocation70_spill] sm:$0xff]  ;;  %v10002_v63 = vld [vmem:[#allocation27_spill] sm:$0xff] }
 0x22f   :  { %9993 = vst [vmem:[#allocation61_spill] sm:$0xff] %v7254_v21  ;;  %9995 = vst [vmem:[#allocation40_spill] sm:$0xff] %v7258_v10  ;;  %v7267_v26 = vpop.eup %4846  ;;  %v3185_v39 = vmul.f32 %v2929_v31, %v9999_v2  ;;  %v3183_v22 = vmul.f32 %v2927_v32, %v10000_v37  ;;  %v1172_v56 = vmul.f32 %v7254_v21, %v7254_v21  ;;  %v10004_v8 = vld [vmem:[#allocation35_spill] sm:$0xff] }
 0x230   :  { %9996 = vst [vmem:[#allocation74_spill] sm:$0xff] %v7260_v13  ;;  %9998 = vst [vmem:[#allocation62_spill] sm:$0xff] %v7267_v26  ;;  %v1174_v40 = vmul.f32 %v7258_v10, %v7258_v10  ;;  %v7275_v20 = vpop.eup %4848  ;;  %4141 = vmatmul.mubr.bf16.gmra.mrb[164].mxu1 %v3394_v12  ;;  %v3187_v53 = vmul.f32 %v2931_v50, %v10001_v18  ;;  %v1173_v45 = vmul.f32 %v7265_v61, %v7265_v61  ;;  %v10006_v50 = vld [vmem:[#allocation50_spill] sm:$0xff] }
 0x231   :  { %v7282_v59 = vadd.f32 %v10002_v63, %v5582_v34  ;;  %v7286_v31 = vadd.f32 %v10004_v8, %v5576_v28  ;;  %v7288_v32 = vpop.eup %4850  ;;  %v3397_v23 = vpack.c.bf16 %v3185_v39, %v3181_v7  ;;  %v1428_v60 = vmul.f32 %v1172_v56, %v7254_v21  ;;  %v7303_v7 = vpop.f32.mrb[84].mxu0 }
 0x232   :  { %v1430_v12 = vmul.f32 %v1174_v40, %v7258_v10  ;;  %v7294_v25 = vadd.f32 %v10006_v50, %v5578_v29  ;;  %v7296_v2 = vpop.eup %4852  ;;  %v3399_v37 = vpack.c.bf16 %v3187_v53, %v3183_v22  ;;  %v1429_v18 = vmul.f32 %v1173_v45, %v7265_v61  ;;  %10009 = vst [vmem:[#allocation26_spill] sm:$0xff] %v7303_v7  ;;  %v10011_v22 = vld [vmem:[#allocation51_spill] sm:$0xff] }
 0x233   :  { %10003 = vst [vmem:[#allocation53_spill] sm:$0xff] %v7282_v59  ;;  %10005 = vst [vmem:[#allocation63_spill] sm:$0xff] %v7286_v31  ;;  %v1175_v63 = vmul.f32 %v7282_v59, %v7282_v59  ;;  %v1176_v8 = vmul.f32 %v7286_v31, %v7286_v31  ;;  %v7305_v39 = vpop.eup %4854  ;;  %3859 = vmatprep.mubr.bf16.mxu0 %v3397_v23  ;;  %v1684_v56 = vmul.f32 0.044715, %v1428_v60 }
 0x234   :  { %10007 = vst [vmem:[#allocation64_spill] sm:$0xff] %v7294_v25  ;;  %10008 = vst [vmem:[#allocation56_spill] sm:$0xff] %v7296_v2  ;;  %v1686_v40 = vmul.f32 0.044715, %v1430_v12  ;;  %v1178_v50 = vmul.f32 %v7294_v25, %v7294_v25  ;;  %v7311_v53 = vadd.f32 %v10011_v22, %v5580_v33  ;;  %v7313_v45 = vpop.eup %4856  ;;  %4148 = vmatprep.mubr.bf16.mxu1 %v3399_v37  ;;  %v1685_v3 = vmul.f32 0.044715, %v1429_v18 }
 0x235   :  { %10010 = vst [vmem:[#allocation30_spill] sm:$0xff] %v7305_v39  ;;  %v1431_v4 = vmul.f32 %v1175_v63, %v7282_v59  ;;  %v1432_v7 = vmul.f32 %v1176_v8, %v7286_v31  ;;  %v7319_v23 = vadd.f32 %v10013_v27, %v5582_v34  ;;  %v7321_v60 = vpop.eup %4858  ;;  %v1940_v12 = vadd.f32 %v1684_v56, %v7254_v21  ;;  %v7335_v21 = vpop.f32.mrb[84].mxu1 }
 0x236   :  { %10012 = vst [vmem:[#allocation75_spill] sm:$0xff] %v7311_v53  ;;  %v1942_v39 = vadd.f32 %v1686_v40, %v7258_v10  ;;  %v1434_v22 = vmul.f32 %v1178_v50, %v7294_v25  ;;  %v1177_v37 = vmul.f32 %v7311_v53, %v7311_v53  ;;  %v1941_v18 = vadd.f32 %v1685_v3, %v7265_v61  ;;  %v7337_v3 = vpop.f32.mrb[85].mxu0 }
 0x237   :  { %10014 = vst [vmem:[#allocation52_spill] sm:$0xff] %v7319_v23  ;;  %v1687_v63 = vmul.f32 0.044715, %v1431_v4  ;;  %v1688_v26 = vmul.f32 0.044715, %v1432_v7  ;;  %v1179_v8 = vmul.f32 %v7319_v23, %v7319_v23  ;;  %10015 = vst [vmem:[#allocation70_spill] sm:$0xff] %v7335_v21 }
 0x238   :  { %v2196_v27 = vmul.f32 0.7978846, %v1940_v12  ;;  %v2198_v2 = vmul.f32 0.7978846, %v1942_v39  ;;  %v1690_v13 = vmul.f32 0.044715, %v1434_v22  ;;  %v1433_v17 = vmul.f32 %v1177_v37, %v7311_v53 }
 0x239   :  { %v2197_v56 = vmul.f32 0.7978846, %v1941_v18  ;;  %v1943_v40 = vadd.f32 %v1687_v63, %v7282_v59  ;;  %v1944_v50 = vadd.f32 %v1688_v26, %v7286_v31  ;;  %v1435_v10 = vmul.f32 %v1179_v8, %v7319_v23  ;;  %10016 = vst [vmem:[#allocation27_spill] sm:$0xff] %v7337_v3  ;;  %v10017_v12 = vld [vmem:[#allocation67_spill] sm:$0xff]  ;;  %v7341_v22 = vpop.f32.mrb[85].mxu1  ;;  %v10019_v31 = vld [vmem:[#allocation82_spill] sm:$0xff] }
 0x23a   :  { %4860 = vtanh.f32 %v2196_v27  ;;  %v1946_v4 = vadd.f32 %v1690_v13, %v7294_v25  ;;  %v1689_v7 = vmul.f32 0.044715, %v1433_v17  ;;  %v2668_v39 = vadd.f32 1.0, %v10017_v12  ;;  %10018 = vst [vmem:[#allocation35_spill] sm:$0xff] %v7341_v22  ;;  %v7345_v59 = vpop.f32.mrb[86].mxu0  ;;  %v7347_v27 = vpop.f32.mrb[86].mxu1 }
 0x23b   :  { %4862 = vtanh.f32 %v2198_v2  ;;  %v2199_v37 = vmul.f32 0.7978846, %v1943_v40  ;;  %v2200_v18 = vmul.f32 0.7978846, %v1944_v50  ;;  %v1691_v63 = vmul.f32 0.044715, %v1435_v10 }
 0x23c   :  { %4864 = vtanh.f32 %v2197_v56  ;;  %v2202_v26 = vmul.f32 0.7978846, %v1946_v4  ;;  %v1945_v8 = vadd.f32 %v1689_v7, %v7311_v53  ;;  %v2672_v21 = vadd.f32 1.0, %v10019_v31  ;;  %10020 = vst [vmem:[#allocation50_spill] sm:$0xff] %v7345_v59  ;;  %10021 = vst [vmem:[#allocation51_spill] sm:$0xff] %v7347_v27  ;;  %v10022_v12 = vld [vmem:[#allocation16_spill] sm:$0xff] }
 0x23d   :  { %4866 = vtanh.f32 %v2199_v37  ;;  %v1947_v17 = vadd.f32 %v1691_v63, %v7319_v23  ;;  %v2924_v13 = vmul.f32 0.5, %v2668_v39  ;;  %v2670_v22 = vadd.f32 1.0, %v10022_v12  ;;  %v7351_v2 = vpop.f32.mrb[87].mxu0  ;;  %v10024_v40 = vld [vmem:[#allocation83_spill] sm:$0xff]  ;;  %v7354_v4 = vpop.f32.mrb[87].mxu1  ;;  %v10026_v7 = vld [vmem:[#allocation68_spill] sm:$0xff] }
 0x23e   :  { %10023 = vst [vmem:[#allocation65_spill] sm:$0xff] %v7351_v2  ;;  %4868 = vtanh.f32 %v2200_v18  ;;  %v2201_v10 = vmul.f32 0.7978846, %v1945_v8  ;;  %v2928_v56 = vmul.f32 0.5, %v2672_v21  ;;  %v2674_v50 = vadd.f32 1.0, %v10024_v40  ;;  %10025 = vst [vmem:[#allocation67_spill] sm:$0xff] %v7354_v4 }
 0x23f   :  { %4870 = vtanh.f32 %v2202_v26  ;;  %v2203_v31 = vmul.f32 0.7978846, %v1947_v17  ;;  %v3180_v59 = vmul.f32 %v2924_v13, %v10026_v7  ;;  %v2926_v27 = vmul.f32 0.5, %v2670_v22  ;;  %v10027_v37 = vld [vmem:[#allocation43_spill] sm:$0xff]  ;;  %v10028_v2 = vld [vmem:[#allocation69_spill] sm:$0xff] }
 0x240   :  { %4872 = vtanh.f32 %v2201_v10  ;;  %v3184_v63 = vmul.f32 %v2928_v56, %v10027_v37  ;;  %v2930_v39 = vmul.f32 0.5, %v2674_v50  ;;  %v2677_v12 = vadd.f32 1.0, %v6939_v43  ;;  %v10029_v4 = vld [vmem:[#allocation57_spill] sm:$0xff]  ;;  %v10032_v43 = vld [vmem:[#allocation76_spill] sm:$0xff]  ;;  %v10037_v7 = vld [vmem:[#allocation91_spill] sm:$0xff] }
 0x241   :  { %4874 = vtanh.f32 %v2203_v31  ;;  %v3182_v18 = vmul.f32 %v2926_v27, %v10028_v2  ;;  %v2681_v21 = vadd.f32 1.0, %v6977_v52  ;;  %v2679_v8 = vadd.f32 1.0, %v6952_v0  ;;  %v10030_v56 = vld [vmem:[#allocation73_spill] sm:$0xff] }
 0x242   :  { %v3396_v40 = vpack.c.bf16 %v3184_v63, %v3180_v59  ;;  %v3186_v26 = vmul.f32 %v2930_v39, %v10029_v4  ;;  %v2933_v17 = vmul.f32 0.5, %v2677_v12  ;;  %v2683_v13 = vadd.f32 1.0, %v6985_v49  ;;  %v10035_v2 = vld [vmem:[#allocation77_spill] sm:$0xff]  ;;  %v10038_v63 = vld [vmem:[#allocation72_spill] sm:$0xff] }
 0x243   :  { %v2937_v22 = vmul.f32 0.5, %v2681_v21  ;;  %v2935_v10 = vmul.f32 0.5, %v2679_v8  ;;  %v7366_v50 = vadd.f32 %v10030_v56, %v5576_v28  ;;  %v7370_v31 = vadd.f32 %v10032_v43, %v5578_v29 }
 0x244   :  { %v7372_v27 = vpop.eup %4860  ;;  %3860 = vmatmul.mubr.bf16.gmra.mrb[168].mxu0 %v3396_v40  ;;  %v3398_v0 = vpack.c.bf16 %v3186_v26, %v3182_v18  ;;  %v3189_v52 = vmul.f32 %v2933_v17, %v6817_v19  ;;  %v2939_v59 = vmul.f32 0.5, %v2683_v13  ;;  %v7377_v49 = vadd.f32 %v10035_v2, %v5580_v33  ;;  %v10039_v19 = vld [vmem:[#allocation31_spill] sm:$0xff]  ;;  %v10040_v26 = vld [vmem:[#allocation78_spill] sm:$0xff] }
 0x245   :  { %10031 = vst [vmem:[#allocation82_spill] sm:$0xff] %v7366_v50  ;;  %10033 = vst [vmem:[#allocation16_spill] sm:$0xff] %v7370_v31  ;;  %v7379_v4 = vpop.eup %4862  ;;  %v3193_v37 = vmul.f32 %v2937_v22, %v10037_v7  ;;  %v3191_v39 = vmul.f32 %v2935_v10, %v10038_v63  ;;  %v1180_v12 = vmul.f32 %v7366_v50, %v7366_v50  ;;  %v10042_v13 = vld [vmem:[#allocation79_spill] sm:$0xff] }
 0x246   :  { %10034 = vst [vmem:[#allocation83_spill] sm:$0xff] %v7372_v27  ;;  %10036 = vst [vmem:[#allocation68_spill] sm:$0xff] %v7379_v4  ;;  %v1182_v21 = vmul.f32 %v7370_v31, %v7370_v31  ;;  %v7387_v18 = vpop.eup %4864  ;;  %4149 = vmatmul.mubr.bf16.gmra.mrb[168].mxu1 %v3398_v0  ;;  %v3195_v8 = vmul.f32 %v2939_v59, %v10039_v19  ;;  %v1181_v40 = vmul.f32 %v7377_v49, %v7377_v49  ;;  %v10044_v59 = vld [vmem:[#allocation80_spill] sm:$0xff] }
 0x247   :  { %v7394_v17 = vadd.f32 %v10040_v26, %v5582_v34  ;;  %v7398_v22 = vadd.f32 %v10042_v13, %v5576_v28  ;;  %v7400_v10 = vpop.eup %4866  ;;  %v3401_v56 = vpack.c.bf16 %v3193_v37, %v3189_v52  ;;  %v1436_v43 = vmul.f32 %v1180_v12, %v7366_v50  ;;  %v7415_v52 = vpop.f32.mrb[88].mxu0 }
 0x248   :  { %v1438_v0 = vmul.f32 %v1182_v21, %v7370_v31  ;;  %v7406_v2 = vadd.f32 %v10044_v59, %v5578_v29  ;;  %v7408_v7 = vpop.eup %4868  ;;  %v3403_v63 = vpack.c.bf16 %v3195_v8, %v3191_v39  ;;  %v1437_v19 = vmul.f32 %v1181_v40, %v7377_v49  ;;  %10047 = vst [vmem:[#allocation76_spill] sm:$0xff] %v7415_v52  ;;  %v10049_v39 = vld [vmem:[#allocation90_spill] sm:$0xff] }
 0x249   :  { %10041 = vst [vmem:[#allocation43_spill] sm:$0xff] %v7394_v17  ;;  %10043 = vst [vmem:[#allocation69_spill] sm:$0xff] %v7398_v22  ;;  %v1183_v26 = vmul.f32 %v7394_v17, %v7394_v17  ;;  %v1184_v13 = vmul.f32 %v7398_v22, %v7398_v22  ;;  %v7417_v37 = vpop.eup %4870  ;;  %3867 = vmatprep.mubr.bf16.mxu0 %v3401_v56  ;;  %v1692_v12 = vmul.f32 0.044715, %v1436_v43 }
 0x24a   :  { %10045 = vst [vmem:[#allocation57_spill] sm:$0xff] %v7406_v2  ;;  %10046 = vst [vmem:[#allocation73_spill] sm:$0xff] %v7408_v7  ;;  %v1694_v21 = vmul.f32 0.044715, %v1438_v0  ;;  %v1186_v59 = vmul.f32 %v7406_v2, %v7406_v2  ;;  %v7423_v8 = vadd.f32 %v10049_v39, %v5580_v33  ;;  %v7425_v40 = vpop.eup %4872  ;;  %4156 = vmatprep.mubr.bf16.mxu1 %v3403_v63  ;;  %v1693_v3 = vmul.f32 0.044715, %v1437_v19 }
 0x24b   :  { %10048 = vst [vmem:[#allocation77_spill] sm:$0xff] %v7417_v37  ;;  %v1439_v25 = vmul.f32 %v1183_v26, %v7394_v17  ;;  %v1440_v52 = vmul.f32 %v1184_v13, %v7398_v22  ;;  %v10050_v37 = vld [vmem:[#allocation99_spill] sm:$0xff]  ;;  %v7433_v43 = vpop.eup %4874  ;;  %v1948_v0 = vadd.f32 %v1692_v12, %v7366_v50  ;;  %v7447_v50 = vpop.f32.mrb[88].mxu1 }
 0x24c   :  { %v7431_v56 = vadd.f32 %v10050_v37, %v5582_v34  ;;  %v1950_v4 = vadd.f32 %v1694_v21, %v7370_v31  ;;  %v1442_v39 = vmul.f32 %v1186_v59, %v7406_v2  ;;  %v1185_v63 = vmul.f32 %v7423_v8, %v7423_v8  ;;  %10051 = vst [vmem:[#allocation91_spill] sm:$0xff] %v7447_v50 }
 0x24d   :  { %v1949_v19 = vadd.f32 %v1693_v3, %v7377_v49  ;;  %v1695_v26 = vmul.f32 0.044715, %v1439_v25  ;;  %v1696_v7 = vmul.f32 0.044715, %v1440_v52  ;;  %v2204_v37 = vmul.f32 0.7978846, %v1948_v0 }
 0x24e   :  { %v1187_v13 = vmul.f32 %v7431_v56, %v7431_v56  ;;  %v2206_v27 = vmul.f32 0.7978846, %v1950_v4  ;;  %v1698_v23 = vmul.f32 0.044715, %v1442_v39  ;;  %v1441_v53 = vmul.f32 %v1185_v63, %v7423_v8  ;;  %v7449_v3 = vpop.f32.mrb[89].mxu0  ;;  %v10053_v0 = vld [vmem:[#allocation17_spill] sm:$0xff] }
 0x24f   :  { %v2205_v12 = vmul.f32 0.7978846, %v1949_v19  ;;  %v1951_v21 = vadd.f32 %v1695_v26, %v7394_v17  ;;  %v1952_v59 = vadd.f32 %v1696_v7, %v7398_v22  ;;  %10052 = vst [vmem:[#allocation72_spill] sm:$0xff] %v7449_v3  ;;  %4876 = vtanh.f32 %v2204_v37  ;;  %v7453_v39 = vpop.f32.mrb[89].mxu1  ;;  %v10055_v22 = vld [vmem:[#allocation92_spill] sm:$0xff]  ;;  %v7457_v17 = vpop.f32.mrb[90].mxu0 }
 0x250   :  { %v1443_v31 = vmul.f32 %v1187_v13, %v7431_v56  ;;  %v1954_v25 = vadd.f32 %v1698_v23, %v7406_v2  ;;  %v1697_v52 = vmul.f32 0.044715, %v1441_v53  ;;  %v2676_v4 = vadd.f32 1.0, %v10053_v0  ;;  %10054 = vst [vmem:[#allocation31_spill] sm:$0xff] %v7453_v39  ;;  %10056 = vst [vmem:[#allocation78_spill] sm:$0xff] %v7457_v17  ;;  %v7459_v37 = vpop.f32.mrb[90].mxu1 }
 0x251   :  { %4878 = vtanh.f32 %v2206_v27  ;;  %v2207_v63 = vmul.f32 0.7978846, %v1951_v21  ;;  %v2208_v19 = vmul.f32 0.7978846, %v1952_v59  ;;  %v2680_v50 = vadd.f32 1.0, %v10055_v22  ;;  %10057 = vst [vmem:[#allocation79_spill] sm:$0xff] %v7459_v37 }
 0x252   :  { %v1699_v26 = vmul.f32 0.044715, %v1443_v31  ;;  %4880 = vtanh.f32 %v2205_v12  ;;  %v2210_v7 = vmul.f32 0.7978846, %v1954_v25  ;;  %v1953_v13 = vadd.f32 %v1697_v52, %v7423_v8  ;;  %v10058_v0 = vld [vmem:[#allocation89_spill] sm:$0xff]  ;;  %v7463_v27 = vpop.f32.mrb[91].mxu0 }
 0x253   :  { %4882 = vtanh.f32 %v2207_v63  ;;  %v2932_v23 = vmul.f32 0.5, %v2676_v4  ;;  %v2678_v39 = vadd.f32 1.0, %v10058_v0  ;;  %10059 = vst [vmem:[#allocation80_spill] sm:$0xff] %v7463_v27  ;;  %v2936_v12 = vmul.f32 0.5, %v2680_v50  ;;  %v10060_v21 = vld [vmem:[#allocation95_spill] sm:$0xff]  ;;  %v7466_v25 = vpop.f32.mrb[91].mxu1 }
 0x254   :  { %v1955_v53 = vadd.f32 %v1699_v26, %v7431_v56  ;;  %4884 = vtanh.f32 %v2208_v19  ;;  %v2209_v31 = vmul.f32 0.7978846, %v1953_v13  ;;  %v2682_v59 = vadd.f32 1.0, %v10060_v21  ;;  %10061 = vst [vmem:[#allocation90_spill] sm:$0xff] %v7466_v25  ;;  %v10062_v52 = vld [vmem:[#allocation66_spill] sm:$0xff]  ;;  %v10064_v27 = vld [vmem:[#allocation71_spill] sm:$0xff] }
 0x255   :  { %4886 = vtanh.f32 %v2210_v7  ;;  %v3188_v17 = vmul.f32 %v2932_v23, %v10062_v52  ;;  %v2934_v37 = vmul.f32 0.5, %v2678_v39  ;;  %v10063_v63 = vld [vmem:[#allocation46_spill] sm:$0xff]  ;;  %v2685_v0 = vadd.f32 1.0, %v7051_v57  ;;  %v10065_v25 = vld [vmem:[#allocation81_spill] sm:$0xff]  ;;  %v10083_v3 = vld [vmem:[#allocation8_spill] sm:$0xff] }
 0x256   :  { %v2211_v22 = vmul.f32 0.7978846, %v1955_v53  ;;  %4888 = vtanh.f32 %v2209_v31  ;;  %v3192_v26 = vmul.f32 %v2936_v12, %v10063_v63  ;;  %v2938_v4 = vmul.f32 0.5, %v2682_v59  ;;  %v10066_v12 = vld [vmem:[#allocation13_spill] sm:$0xff] }
 0x257   :  { %v3190_v19 = vmul.f32 %v2934_v37, %v10064_v27  ;;  %v2689_v50 = vadd.f32 1.0, %v7089_v38  ;;  %v2687_v13 = vadd.f32 1.0, %v7064_v16  ;;  %v2941_v53 = vmul.f32 0.5, %v2685_v0  ;;  %v10068_v57 = vld [vmem:[#allocation93_spill] sm:$0xff]  ;;  %v10071_v27 = vld [vmem:[#allocation84_spill] sm:$0xff] }
 0x258   :  { %4890 = vtanh.f32 %v2211_v22  ;;  %v3400_v21 = vpack.c.bf16 %v3192_v26, %v3188_v17  ;;  %v3194_v7 = vmul.f32 %v2938_v4, %v10065_v25  ;;  %v2691_v23 = vadd.f32 1.0, %v7097_v9  ;;  %v10073_v63 = vld [vmem:[#allocation33_spill] sm:$0xff] }
 0x259   :  { %v2945_v39 = vmul.f32 0.5, %v2689_v50  ;;  %v2943_v31 = vmul.f32 0.5, %v2687_v13  ;;  %v7478_v59 = vadd.f32 %v10066_v12, %v5576_v28  ;;  %v7482_v22 = vadd.f32 %v10068_v57, %v5578_v29  ;;  %v7484_v37 = vpop.eup %4876  ;;  %v10074_v13 = vld [vmem:[#allocation85_spill] sm:$0xff] }
 0x25a   :  { %10070 = vst [vmem:[#allocation92_spill] sm:$0xff] %v7484_v37  ;;  %3868 = vmatmul.mubr.bf16.gmra.mrb[172].mxu0 %v3400_v21  ;;  %v3402_v16 = vpack.c.bf16 %v3194_v7, %v3190_v19  ;;  %v3197_v38 = vmul.f32 %v2941_v53, %v6929_v55  ;;  %v2947_v17 = vmul.f32 0.5, %v2691_v23  ;;  %v7489_v9 = vadd.f32 %v10071_v27, %v5580_v33 }
 0x25b   :  { %10067 = vst [vmem:[#allocation99_spill] sm:$0xff] %v7478_v59  ;;  %10069 = vst [vmem:[#allocation17_spill] sm:$0xff] %v7482_v22  ;;  %v7491_v25 = vpop.eup %4878  ;;  %v3201_v52 = vmul.f32 %v2945_v39, %v6975_v36  ;;  %v3199_v26 = vmul.f32 %v2943_v31, %v10073_v63  ;;  %v1188_v4 = vmul.f32 %v7478_v59, %v7478_v59  ;;  %v10075_v36 = vld [vmem:[#allocation86_spill] sm:$0xff] }
 0x25c   :  { %10072 = vst [vmem:[#allocation89_spill] sm:$0xff] %v7491_v25  ;;  %v1190_v0 = vmul.f32 %v7482_v22, %v7482_v22  ;;  %v7499_v19 = vpop.eup %4880  ;;  %4157 = vmatmul.mubr.bf16.gmra.mrb[172].mxu1 %v3402_v16  ;;  %v3203_v55 = vmul.f32 %v2947_v17, %v6983_v58  ;;  %v1189_v50 = vmul.f32 %v7489_v9, %v7489_v9  ;;  %v10077_v58 = vld [vmem:[#allocation87_spill] sm:$0xff] }
 0x25d   :  { %v7506_v21 = vadd.f32 %v10074_v13, %v5582_v34  ;;  %v7510_v7 = vadd.f32 %v10075_v36, %v5576_v28  ;;  %v7512_v53 = vpop.eup %4882  ;;  %v3405_v23 = vpack.c.bf16 %v3201_v52, %v3197_v38  ;;  %v1444_v39 = vmul.f32 %v1188_v4, %v7478_v59  ;;  %v7527_v38 = vpop.f32.mrb[92].mxu0 }
 0x25e   :  { %v1446_v31 = vmul.f32 %v1190_v0, %v7482_v22  ;;  %v7518_v12 = vadd.f32 %v10077_v58, %v5578_v29  ;;  %v7520_v57 = vpop.eup %4884  ;;  %v3407_v16 = vpack.c.bf16 %v3203_v55, %v3199_v26  ;;  %v1445_v17 = vmul.f32 %v1189_v50, %v7489_v9  ;;  %10080 = vst [vmem:[#allocation71_spill] sm:$0xff] %v7527_v38  ;;  %v10082_v26 = vld [vmem:[#allocation88_spill] sm:$0xff] }
 0x25f   :  { %10076 = vst [vmem:[#allocation95_spill] sm:$0xff] %v7510_v7  ;;  %10079 = vst [vmem:[#allocation46_spill] sm:$0xff] %v7520_v57  ;;  %v1191_v27 = vmul.f32 %v7506_v21, %v7506_v21  ;;  %v1192_v63 = vmul.f32 %v7510_v7, %v7510_v7  ;;  %v7529_v52 = vpop.eup %4886  ;;  %3875 = vmatprep.mubr.bf16.mxu0 %v3405_v23  ;;  %v1700_v4 = vmul.f32 0.044715, %v1444_v39 }
 0x260   :  { %10078 = vst [vmem:[#allocation66_spill] sm:$0xff] %v7518_v12  ;;  %10081 = vst [vmem:[#allocation81_spill] sm:$0xff] %v7529_v52  ;;  %v1702_v0 = vmul.f32 0.044715, %v1446_v31  ;;  %v1194_v13 = vmul.f32 %v7518_v12, %v7518_v12  ;;  %v7535_v55 = vadd.f32 %v10082_v26, %v5580_v33  ;;  %v7537_v50 = vpop.eup %4888  ;;  %4164 = vmatprep.mubr.bf16.mxu1 %v3407_v16  ;;  %v1701_v36 = vmul.f32 0.044715, %v1445_v17 }
 0x261   :  { %v1447_v58 = vmul.f32 %v1191_v27, %v7506_v21  ;;  %v1448_v38 = vmul.f32 %v1192_v63, %v7510_v7  ;;  %v7543_v23 = vadd.f32 %v10083_v3, %v5582_v34  ;;  %v1956_v31 = vadd.f32 %v1700_v4, %v7478_v59  ;;  %v7559_v59 = vpop.f32.mrb[92].mxu1 }
 0x262   :  { %v7545_v39 = vpop.eup %4890  ;;  %v1958_v2 = vadd.f32 %v1702_v0, %v7482_v22  ;;  %v1450_v26 = vmul.f32 %v1194_v13, %v7518_v12  ;;  %v1193_v16 = vmul.f32 %v7535_v55, %v7535_v55  ;;  %v1957_v17 = vadd.f32 %v1701_v36, %v7489_v9  ;;  %10084 = vst [vmem:[#allocation13_spill] sm:$0xff] %v7559_v59  ;;  %v7561_v36 = vpop.f32.mrb[93].mxu0 }
 0x263   :  { %v1703_v27 = vmul.f32 0.044715, %v1447_v58  ;;  %v1704_v52 = vmul.f32 0.044715, %v1448_v38  ;;  %v1195_v63 = vmul.f32 %v7543_v23, %v7543_v23  ;;  %v2212_v3 = vmul.f32 0.7978846, %v1956_v31 }
 0x264   :  { %v2214_v25 = vmul.f32 0.7978846, %v1958_v2  ;;  %v1706_v57 = vmul.f32 0.044715, %v1450_v26  ;;  %v1449_v37 = vmul.f32 %v1193_v16, %v7535_v55  ;;  %v2213_v4 = vmul.f32 0.7978846, %v1957_v17 }
 0x265   :  { %v1959_v0 = vadd.f32 %v1703_v27, %v7506_v21  ;;  %v1960_v13 = vadd.f32 %v1704_v52, %v7510_v7  ;;  %v1451_v22 = vmul.f32 %v1195_v63, %v7543_v23  ;;  %10085 = vst [vmem:[#allocation93_spill] sm:$0xff] %v7561_v36  ;;  %4892 = vtanh.f32 %v2212_v3  ;;  %v7565_v31 = vpop.f32.mrb[93].mxu1  ;;  %v10087_v63 = vld [vmem:[#allocation21_spill] sm:$0xff]  ;;  %v7569_v7 = vpop.f32.mrb[94].mxu0 }
 0x266   :  { %v1962_v38 = vadd.f32 %v1706_v57, %v7518_v12  ;;  %v1705_v58 = vmul.f32 0.044715, %v1449_v37  ;;  %v2684_v2 = vadd.f32 1.0, %v7036_v51  ;;  %10086 = vst [vmem:[#allocation84_spill] sm:$0xff] %v7565_v31  ;;  %4894 = vtanh.f32 %v2214_v25  ;;  %10088 = vst [vmem:[#allocation33_spill] sm:$0xff] %v7569_v7  ;;  %v7571_v3 = vpop.f32.mrb[94].mxu1 }
 0x267   :  { %v2215_v26 = vmul.f32 0.7978846, %v1959_v0  ;;  %v2216_v16 = vmul.f32 0.7978846, %v1960_v13  ;;  %v1707_v17 = vmul.f32 0.044715, %v1451_v22  ;;  %4896 = vtanh.f32 %v2213_v4 }
 0x268   :  { %v2218_v52 = vmul.f32 0.7978846, %v1962_v38  ;;  %v1961_v27 = vadd.f32 %v1705_v58, %v7535_v55  ;;  %v2688_v59 = vadd.f32 1.0, %v10087_v63  ;;  %10089 = vst [vmem:[#allocation85_spill] sm:$0xff] %v7571_v3  ;;  %v2940_v51 = vmul.f32 0.5, %v2684_v2  ;;  %v10090_v57 = vld [vmem:[#allocation28_spill] sm:$0xff] }
 0x269   :  { %4898 = vtanh.f32 %v2215_v26  ;;  %v1963_v37 = vadd.f32 %v1707_v17, %v7543_v23  ;;  %v2686_v31 = vadd.f32 1.0, %v10090_v57  ;;  %v7575_v25 = vpop.f32.mrb[95].mxu0  ;;  %v10092_v0 = vld [vmem:[#allocation24_spill] sm:$0xff]  ;;  %v7578_v38 = vpop.f32.mrb[95].mxu1  ;;  %v10094_v63 = vld [vmem:[#allocation41_spill] sm:$0xff]  ;;  %v10095_v26 = vld [vmem:[#allocation10_spill] sm:$0xff] }
 0x26a   :  { %10091 = vst [vmem:[#allocation86_spill] sm:$0xff] %v7575_v25  ;;  %4900 = vtanh.f32 %v2216_v16  ;;  %v2217_v22 = vmul.f32 0.7978846, %v1961_v27  ;;  %v2944_v4 = vmul.f32 0.5, %v2688_v59  ;;  %v2690_v13 = vadd.f32 1.0, %v10092_v0  ;;  %10093 = vst [vmem:[#allocation87_spill] sm:$0xff] %v7578_v38 }
 0x26b   :  { %4902 = vtanh.f32 %v2218_v52  ;;  %v2219_v58 = vmul.f32 0.7978846, %v1963_v37  ;;  %v3196_v7 = vmul.f32 %v2940_v51, %v10094_v63  ;;  %v2942_v3 = vmul.f32 0.5, %v2686_v31  ;;  %v10096_v25 = vld [vmem:[#allocation11_spill] sm:$0xff]  ;;  %v10097_v38 = vld [vmem:[#allocation34_spill] sm:$0xff] }
 0x26c   :  { %4904 = vtanh.f32 %v2217_v22  ;;  %v3200_v17 = vmul.f32 %v2944_v4, %v10095_v26  ;;  %v2946_v2 = vmul.f32 0.5, %v2690_v13  ;;  %v2693_v57 = vadd.f32 1.0, %v7163_v30  ;;  %v10098_v4 = vld [vmem:[#allocation94_spill] sm:$0xff] }
 0x26d   :  { %4906 = vtanh.f32 %v2219_v58  ;;  %v3198_v16 = vmul.f32 %v2942_v3, %v10096_v25  ;;  %v2697_v59 = vadd.f32 1.0, %v7201_v15  ;;  %v2695_v27 = vadd.f32 1.0, %v7176_v42  ;;  %v10100_v30 = vld [vmem:[#allocation22_spill] sm:$0xff]  ;;  %v10102_v25 = vld [vmem:[#allocation9_spill] sm:$0xff] }
 0x26e   :  { %v3404_v0 = vpack.c.bf16 %v3200_v17, %v3196_v7  ;;  %v3202_v52 = vmul.f32 %v2946_v2, %v10097_v38  ;;  %v2949_v37 = vmul.f32 0.5, %v2693_v57  ;;  %v2699_v51 = vadd.f32 1.0, %v7209_v5 }
 0x26f   :  { %v2953_v31 = vmul.f32 0.5, %v2697_v59  ;;  %v2951_v22 = vmul.f32 0.5, %v2695_v27  ;;  %v7590_v13 = vadd.f32 %v10098_v4, %v5576_v28  ;;  %v7594_v58 = vadd.f32 %v10100_v30, %v5578_v29  ;;  %v7596_v3 = vpop.eup %4892  ;;  %v10104_v59 = vld [vmem:[#allocation25_spill] sm:$0xff] }
 0x270   :  { %3876 = vmatmul.mubr.bf16.gmra.mrb[176].mxu0 %v3404_v0  ;;  %v3406_v42 = vpack.c.bf16 %v3202_v52, %v3198_v16  ;;  %v3205_v15 = vmul.f32 %v2949_v37, %v7041_v24  ;;  %v2955_v7 = vmul.f32 0.5, %v2699_v51  ;;  %v7601_v5 = vadd.f32 %v10102_v25, %v5580_v33  ;;  %v7603_v38 = vpop.eup %4894 }
 0x271   :  { %10099 = vst [vmem:[#allocation88_spill] sm:$0xff] %v7590_v13  ;;  %10101 = vst [vmem:[#allocation8_spill] sm:$0xff] %v7594_v58  ;;  %v3209_v63 = vmul.f32 %v2953_v31, %v7087_v35  ;;  %v3207_v26 = vmul.f32 %v2951_v22, %v7058_v41  ;;  %v1196_v17 = vmul.f32 %v7590_v13, %v7590_v13  ;;  %v7611_v57 = vpop.eup %4896  ;;  %v10105_v41 = vld [vmem:[#allocation96_spill] sm:$0xff] }
 0x272   :  { %10103 = vst [vmem:[#allocation21_spill] sm:$0xff] %v7603_v38  ;;  %v1198_v2 = vmul.f32 %v7594_v58, %v7594_v58  ;;  %4165 = vmatmul.mubr.bf16.gmra.mrb[176].mxu1 %v3406_v42  ;;  %v3211_v24 = vmul.f32 %v2955_v7, %v7095_v48  ;;  %v1197_v16 = vmul.f32 %v7601_v5, %v7601_v5  ;;  %v10106_v48 = vld [vmem:[#allocation97_spill] sm:$0xff] }
 0x273   :  { %v7618_v27 = vadd.f32 %v10104_v59, %v5582_v34  ;;  %v7622_v35 = vadd.f32 %v10105_v41, %v5576_v28  ;;  %v7624_v0 = vpop.eup %4898  ;;  %v3409_v52 = vpack.c.bf16 %v3209_v63, %v3205_v15  ;;  %v1452_v37 = vmul.f32 %v1196_v17, %v7590_v13  ;;  %v7639_v15 = vpop.f32.mrb[96].mxu0 }
 0x274   :  { %v1454_v51 = vmul.f32 %v1198_v2, %v7594_v58  ;;  %v7630_v31 = vadd.f32 %v10106_v48, %v5578_v29  ;;  %v7632_v22 = vpop.eup %4900  ;;  %v3411_v4 = vpack.c.bf16 %v3211_v24, %v3207_v26  ;;  %v1453_v30 = vmul.f32 %v1197_v16, %v7601_v5  ;;  %10109 = vst [vmem:[#allocation41_spill] sm:$0xff] %v7639_v15  ;;  %v10111_v26 = vld [vmem:[#allocation18_spill] sm:$0xff]  ;;  %v10112_v15 = vld [vmem:[#allocation23_spill] sm:$0xff] }
 0x275   :  { %10108 = vst [vmem:[#allocation24_spill] sm:$0xff] %v7632_v22  ;;  %v1199_v42 = vmul.f32 %v7618_v27, %v7618_v27  ;;  %v1200_v7 = vmul.f32 %v7622_v35, %v7622_v35  ;;  %v7641_v25 = vpop.eup %4902  ;;  %3883 = vmatprep.mubr.bf16.mxu0 %v3409_v52  ;;  %v1708_v63 = vmul.f32 0.044715, %v1452_v37  ;;  %v7647_v24 = vadd.f32 %v10111_v26, %v5580_v33 }
 0x276   :  { %10107 = vst [vmem:[#allocation28_spill] sm:$0xff] %v7630_v31  ;;  %10110 = vst [vmem:[#allocation10_spill] sm:$0xff] %v7641_v25  ;;  %v1710_v17 = vmul.f32 0.044715, %v1454_v51  ;;  %v1202_v2 = vmul.f32 %v7630_v31, %v7630_v31  ;;  %v7649_v16 = vpop.eup %4904  ;;  %4172 = vmatprep.mubr.bf16.mxu1 %v3411_v4  ;;  %v1709_v59 = vmul.f32 0.044715, %v1453_v30  ;;  %v7655_v52 = vadd.f32 %v10112_v15, %v5582_v34 }
 0x277   :  { %v1455_v41 = vmul.f32 %v1199_v42, %v7618_v27  ;;  %v1456_v48 = vmul.f32 %v1200_v7, %v7622_v35  ;;  %v7657_v37 = vpop.eup %4906  ;;  %v1964_v51 = vadd.f32 %v1708_v63, %v7590_v13  ;;  %v1201_v4 = vmul.f32 %v7647_v24, %v7647_v24  ;;  %v7671_v13 = vpop.f32.mrb[96].mxu1 }
 0x278   :  { %v1966_v36 = vadd.f32 %v1710_v17, %v7594_v58  ;;  %v1458_v26 = vmul.f32 %v1202_v2, %v7630_v31  ;;  %v1965_v30 = vadd.f32 %v1709_v59, %v7601_v5  ;;  %v1203_v7 = vmul.f32 %v7655_v52, %v7655_v52  ;;  %10113 = vst [vmem:[#allocation11_spill] sm:$0xff] %v7671_v13  ;;  %v7673_v59 = vpop.f32.mrb[97].mxu0 }
 0x279   :  { %v1711_v42 = vmul.f32 0.044715, %v1455_v41  ;;  %v1712_v12 = vmul.f32 0.044715, %v1456_v48  ;;  %v2220_v15 = vmul.f32 0.7978846, %v1964_v51  ;;  %v1457_v22 = vmul.f32 %v1201_v4, %v7647_v24 }
 0x27a   :  { %v2222_v25 = vmul.f32 0.7978846, %v1966_v36  ;;  %v1714_v38 = vmul.f32 0.044715, %v1458_v26  ;;  %v2221_v63 = vmul.f32 0.7978846, %v1965_v30  ;;  %v1459_v58 = vmul.f32 %v1203_v7, %v7655_v52 }
 0x27b   :  { %v1967_v17 = vadd.f32 %v1711_v42, %v7618_v27  ;;  %v1968_v2 = vadd.f32 %v1712_v12, %v7622_v35  ;;  %10114 = vst [vmem:[#allocation34_spill] sm:$0xff] %v7673_v59  ;;  %4908 = vtanh.f32 %v2220_v15  ;;  %v1713_v48 = vmul.f32 0.044715, %v1457_v22  ;;  %v7677_v51 = vpop.f32.mrb[97].mxu1  ;;  %v7681_v13 = vpop.f32.mrb[98].mxu0 }
 0x27c   :  { %v1970_v41 = vadd.f32 %v1714_v38, %v7630_v31  ;;  %v2692_v36 = vadd.f32 1.0, %v7148_v6  ;;  %10115 = vst [vmem:[#allocation94_spill] sm:$0xff] %v7677_v51  ;;  %4910 = vtanh.f32 %v2222_v25  ;;  %v1715_v30 = vmul.f32 0.044715, %v1459_v58  ;;  %10116 = vst [vmem:[#allocation22_spill] sm:$0xff] %v7681_v13  ;;  %v7683_v15 = vpop.f32.mrb[98].mxu1 }
 0x27d   :  { %v2223_v26 = vmul.f32 0.7978846, %v1967_v17  ;;  %v2224_v4 = vmul.f32 0.7978846, %v1968_v2  ;;  %4912 = vtanh.f32 %v2221_v63  ;;  %v1969_v42 = vadd.f32 %v1713_v48, %v7647_v24  ;;  %10117 = vst [vmem:[#allocation9_spill] sm:$0xff] %v7683_v15  ;;  %v7687_v25 = vpop.f32.mrb[99].mxu0 }
 0x27e   :  { %v2226_v12 = vmul.f32 0.7978846, %v1970_v41  ;;  %v2696_v7 = vadd.f32 1.0, %v7184_v44  ;;  %v1971_v38 = vadd.f32 %v1715_v30, %v7655_v52  ;;  %v2948_v6 = vmul.f32 0.5, %v2692_v36  ;;  %10118 = vst [vmem:[#allocation25_spill] sm:$0xff] %v7687_v25  ;;  %v7690_v2 = vpop.f32.mrb[99].mxu1 }
 0x27f   :  { %4914 = vtanh.f32 %v2223_v26  ;;  %v2694_v22 = vadd.f32 1.0, %v7155_v14  ;;  %v2225_v58 = vmul.f32 0.7978846, %v1969_v42  ;;  %v2698_v17 = vadd.f32 1.0, %v7193_v62  ;;  %10119 = vst [vmem:[#allocation96_spill] sm:$0xff] %v7690_v2  ;;  %v10120_v41 = vld [vmem:[#allocation19_spill] sm:$0xff] }
 0x280   :  { %4916 = vtanh.f32 %v2224_v4  ;;  %v2952_v63 = vmul.f32 0.5, %v2696_v7  ;;  %v2227_v44 = vmul.f32 0.7978846, %v1971_v38  ;;  %v3204_v48 = vmul.f32 %v2948_v6, %v10120_v41  ;;  %v10121_v30 = vld [vmem:[#allocation20_spill] sm:$0xff] }
 0x281   :  { %4918 = vtanh.f32 %v2226_v12  ;;  %v2950_v15 = vmul.f32 0.5, %v2694_v22  ;;  %v2954_v36 = vmul.f32 0.5, %v2698_v17  ;;  %v2701_v14 = vadd.f32 1.0, %v7275_v20  ;;  %v10124_v20 = vld [vmem:[#allocation12_spill] sm:$0xff] }
 0x282   :  { %4920 = vtanh.f32 %v2225_v58  ;;  %v3208_v26 = vmul.f32 %v2952_v63, %v7062_v46  ;;  %v2705_v42 = vadd.f32 1.0, %v7313_v45  ;;  %v2703_v62 = vadd.f32 1.0, %v7288_v32  ;;  %v10122_v46 = vld [vmem:[#allocation36_spill] sm:$0xff] }
 0x283   :  { %4922 = vtanh.f32 %v2227_v44  ;;  %v3206_v4 = vmul.f32 %v2950_v15, %v10121_v30  ;;  %v3210_v12 = vmul.f32 %v2954_v36, %v7070_v11  ;;  %v2957_v38 = vmul.f32 0.5, %v2701_v14  ;;  %v10126_v44 = vld [vmem:[#allocation38_spill] sm:$0xff]  ;;  %v10137_v2 = vld [vmem:[#allocation32_spill] sm:$0xff] }
 0x284   :  { %v3408_v7 = vpack.c.bf16 %v3208_v26, %v3204_v48  ;;  %v2707_v6 = vadd.f32 1.0, %v7321_v60  ;;  %v2961_v22 = vmul.f32 0.5, %v2705_v42  ;;  %v2959_v58 = vmul.f32 0.5, %v2703_v62  ;;  %v10128_v62 = vld [vmem:[#allocation42_spill] sm:$0xff] }
 0x285   :  { %v7702_v63 = vadd.f32 %v10122_v46, %v5576_v28  ;;  %v7706_v17 = vadd.f32 %v10124_v20, %v5578_v29  ;;  %v7708_v15 = vpop.eup %4908  ;;  %v3410_v32 = vpack.c.bf16 %v3210_v12, %v3206_v4  ;;  %v3213_v45 = vmul.f32 %v2957_v38, %v7153_v47  ;;  %v10127_v47 = vld [vmem:[#allocation15_spill] sm:$0xff] }
 0x286   :  { %3884 = vmatmul.mubr.bf16.gmra.mrb[180].mxu0 %v3408_v7  ;;  %v2963_v11 = vmul.f32 0.5, %v2707_v6  ;;  %v7713_v60 = vadd.f32 %v10126_v44, %v5580_v33  ;;  %v7715_v41 = vpop.eup %4910  ;;  %v3217_v48 = vmul.f32 %v2961_v22, %v7199_v1  ;;  %v3215_v26 = vmul.f32 %v2959_v58, %v7170_v54  ;;  %v10130_v54 = vld [vmem:[#allocation44_spill] sm:$0xff]  ;;  %v10132_v58 = vld [vmem:[#allocation47_spill] sm:$0xff] }
 0x287   :  { %10123 = vst [vmem:[#allocation97_spill] sm:$0xff] %v7702_v63  ;;  %10125 = vst [vmem:[#allocation18_spill] sm:$0xff] %v7706_v17  ;;  %v1204_v36 = vmul.f32 %v7702_v63, %v7702_v63  ;;  %v1206_v14 = vmul.f32 %v7706_v17, %v7706_v17  ;;  %v7723_v30 = vpop.eup %4912  ;;  %4173 = vmatmul.mubr.bf16.gmra.mrb[180].mxu1 %v3410_v32  ;;  %v7730_v7 = vadd.f32 %v10128_v62, %v5582_v34 }
 0x288   :  { %v3219_v4 = vmul.f32 %v2963_v11, %v10127_v47  ;;  %v1205_v42 = vmul.f32 %v7713_v60, %v7713_v60  ;;  %v7734_v1 = vadd.f32 %v10130_v54, %v5576_v28  ;;  %v3413_v38 = vpack.c.bf16 %v3217_v48, %v3213_v45  ;;  %v7751_v45 = vpop.f32.mrb[100].mxu0 }
 0x289   :  { %10129 = vst [vmem:[#allocation23_spill] sm:$0xff] %v7730_v7  ;;  %v7736_v12 = vpop.eup %4914  ;;  %v1460_v6 = vmul.f32 %v1204_v36, %v7702_v63  ;;  %v1462_v22 = vmul.f32 %v1206_v14, %v7706_v17  ;;  %v7742_v46 = vadd.f32 %v10132_v58, %v5578_v29  ;;  %v1207_v44 = vmul.f32 %v7730_v7, %v7730_v7 }
 0x28a   :  { %10131 = vst [vmem:[#allocation19_spill] sm:$0xff] %v7734_v1  ;;  %v7744_v20 = vpop.eup %4916  ;;  %v3415_v32 = vpack.c.bf16 %v3219_v4, %v3215_v26  ;;  %v1461_v11 = vmul.f32 %v1205_v42, %v7713_v60  ;;  %v1208_v47 = vmul.f32 %v7734_v1, %v7734_v1  ;;  %10134 = vst [vmem:[#allocation36_spill] sm:$0xff] %v7751_v45  ;;  %3891 = vmatprep.mubr.bf16.mxu0 %v3413_v38  ;;  %v10135_v26 = vld [vmem:[#allocation49_spill] sm:$0xff] }
 0x28b   :  { %10133 = vst [vmem:[#allocation20_spill] sm:$0xff] %v7742_v46  ;;  %v7753_v48 = vpop.eup %4918  ;;  %v1716_v36 = vmul.f32 0.044715, %v1460_v6  ;;  %v1718_v14 = vmul.f32 0.044715, %v1462_v22  ;;  %v1210_v62 = vmul.f32 %v7742_v46, %v7742_v46  ;;  %v7759_v4 = vadd.f32 %v10135_v26, %v5580_v33 }
 0x28c   :  { %v7761_v42 = vpop.eup %4920  ;;  %4180 = vmatprep.mubr.bf16.mxu1 %v3415_v32  ;;  %v1717_v54 = vmul.f32 0.044715, %v1461_v11  ;;  %v1463_v58 = vmul.f32 %v1207_v44, %v7730_v7  ;;  %v1464_v45 = vmul.f32 %v1208_v47, %v7734_v1  ;;  %v7767_v38 = vadd.f32 %v10137_v2, %v5582_v34 }
 0x28d   :  { %10136 = vst [vmem:[#allocation12_spill] sm:$0xff] %v7759_v4  ;;  %v7769_v6 = vpop.eup %4922  ;;  %v1972_v22 = vadd.f32 %v1716_v36, %v7702_v63  ;;  %v1974_v25 = vadd.f32 %v1718_v14, %v7706_v17  ;;  %v1466_v26 = vmul.f32 %v1210_v62, %v7742_v46  ;;  %v1209_v32 = vmul.f32 %v7759_v4, %v7759_v4  ;;  %v7783_v63 = vpop.f32.mrb[100].mxu1 }
 0x28e   :  { %10138 = vst [vmem:[#allocation38_spill] sm:$0xff] %v7767_v38  ;;  %v1973_v11 = vadd.f32 %v1717_v54, %v7713_v60  ;;  %v1719_v44 = vmul.f32 0.044715, %v1463_v58  ;;  %v1720_v13 = vmul.f32 0.044715, %v1464_v45  ;;  %v1211_v47 = vmul.f32 %v7767_v38, %v7767_v38  ;;  %10139 = vst [vmem:[#allocation15_spill] sm:$0xff] %v7783_v63 }
 0x28f   :  { %v2228_v2 = vmul.f32 0.7978846, %v1972_v22  ;;  %v2230_v51 = vmul.f32 0.7978846, %v1974_v25  ;;  %v1722_v59 = vmul.f32 0.044715, %v1466_v26  ;;  %v1465_v31 = vmul.f32 %v1209_v32, %v7759_v4 }
 0x290   :  { %v2229_v36 = vmul.f32 0.7978846, %v1973_v11  ;;  %v1975_v14 = vadd.f32 %v1719_v44, %v7730_v7  ;;  %v1976_v62 = vadd.f32 %v1720_v13, %v7734_v1  ;;  %v1467_v17 = vmul.f32 %v1211_v47, %v7767_v38  ;;  %v7785_v54 = vpop.f32.mrb[101].mxu0  ;;  %v10141_v22 = vld [vmem:[#allocation74_spill] sm:$0xff]  ;;  %v7789_v26 = vpop.f32.mrb[101].mxu1  ;;  %v10143_v1 = vld [vmem:[#allocation56_spill] sm:$0xff] }
 0x291   :  { %10140 = vst [vmem:[#allocation42_spill] sm:$0xff] %v7785_v54  ;;  %4924 = vtanh.f32 %v2228_v2  ;;  %v1978_v45 = vadd.f32 %v1722_v59, %v7742_v46  ;;  %v1721_v58 = vmul.f32 0.044715, %v1465_v31  ;;  %v2700_v25 = vadd.f32 1.0, %v10141_v22  ;;  %10142 = vst [vmem:[#allocation44_spill] sm:$0xff] %v7789_v26  ;;  %v7793_v7 = vpop.f32.mrb[102].mxu0 }
 0x292   :  { %4926 = vtanh.f32 %v2230_v51  ;;  %v2231_v32 = vmul.f32 0.7978846, %v1975_v14  ;;  %v2232_v11 = vmul.f32 0.7978846, %v1976_v62  ;;  %v1723_v44 = vmul.f32 0.044715, %v1467_v17 }
 0x293   :  { %4928 = vtanh.f32 %v2229_v36  ;;  %v2234_v13 = vmul.f32 0.7978846, %v1978_v45  ;;  %v1977_v47 = vadd.f32 %v1721_v58, %v7759_v4  ;;  %v2704_v63 = vadd.f32 1.0, %v10143_v1  ;;  %10144 = vst [vmem:[#allocation47_spill] sm:$0xff] %v7793_v7  ;;  %v7795_v2 = vpop.f32.mrb[102].mxu1  ;;  %v10146_v22 = vld [vmem:[#allocation62_spill] sm:$0xff] }
 0x294   :  { %10145 = vst [vmem:[#allocation49_spill] sm:$0xff] %v7795_v2  ;;  %4930 = vtanh.f32 %v2231_v32  ;;  %v1979_v31 = vadd.f32 %v1723_v44, %v7767_v38  ;;  %v2956_v59 = vmul.f32 0.5, %v2700_v25  ;;  %v2702_v26 = vadd.f32 1.0, %v10146_v22  ;;  %v7799_v51 = vpop.f32.mrb[103].mxu0  ;;  %v10148_v14 = vld [vmem:[#allocation30_spill] sm:$0xff]  ;;  %v7802_v45 = vpop.f32.mrb[103].mxu1 }
 0x295   :  { %10147 = vst [vmem:[#allocation32_spill] sm:$0xff] %v7799_v51  ;;  %4932 = vtanh.f32 %v2232_v11  ;;  %v2233_v17 = vmul.f32 0.7978846, %v1977_v47  ;;  %v2960_v36 = vmul.f32 0.5, %v2704_v63  ;;  %v2706_v62 = vadd.f32 1.0, %v10148_v14  ;;  %10149 = vst [vmem:[#allocation74_spill] sm:$0xff] %v7802_v45 }
 0x296   :  { %4934 = vtanh.f32 %v2234_v13  ;;  %v2235_v1 = vmul.f32 0.7978846, %v1979_v31  ;;  %v10150_v58 = vld [vmem:[#allocation98_spill] sm:$0xff]  ;;  %v2958_v2 = vmul.f32 0.5, %v2702_v26  ;;  %v10151_v32 = vld [vmem:[#allocation37_spill] sm:$0xff]  ;;  %v2709_v22 = vadd.f32 1.0, %v7387_v18 }
 0x297   :  { %v3212_v7 = vmul.f32 %v2956_v59, %v10150_v58  ;;  %4936 = vtanh.f32 %v2233_v17  ;;  %v3216_v44 = vmul.f32 %v2960_v36, %v10151_v32  ;;  %v2962_v25 = vmul.f32 0.5, %v2706_v62  ;;  %v10152_v51 = vld [vmem:[#allocation45_spill] sm:$0xff]  ;;  %v10153_v45 = vld [vmem:[#allocation14_spill] sm:$0xff]  ;;  %v10154_v36 = vld [vmem:[#allocation48_spill] sm:$0xff] }
 0x298   :  { %4938 = vtanh.f32 %v2235_v1  ;;  %v3214_v11 = vmul.f32 %v2958_v2, %v10152_v51  ;;  %v2713_v63 = vadd.f32 1.0, %v7425_v40  ;;  %v2711_v47 = vadd.f32 1.0, %v7400_v10  ;;  %v10156_v18 = vld [vmem:[#allocation54_spill] sm:$0xff]  ;;  %v10159_v51 = vld [vmem:[#allocation55_spill] sm:$0xff] }
 0x299   :  { %v3412_v14 = vpack.c.bf16 %v3216_v44, %v3212_v7  ;;  %v3218_v13 = vmul.f32 %v2962_v25, %v10153_v45  ;;  %v2965_v31 = vmul.f32 0.5, %v2709_v22  ;;  %v2715_v59 = vadd.f32 1.0, %v7433_v43  ;;  %v10161_v58 = vld [vmem:[#allocation75_spill] sm:$0xff]  ;;  %v10162_v44 = vld [vmem:[#allocation53_spill] sm:$0xff] }
 0x29a   :  { %v2969_v26 = vmul.f32 0.5, %v2713_v63  ;;  %v2967_v17 = vmul.f32 0.5, %v2711_v47  ;;  %v7814_v62 = vadd.f32 %v10154_v36, %v5576_v28  ;;  %v7818_v1 = vadd.f32 %v10156_v18, %v5578_v29 }
 0x29b   :  { %v7820_v2 = vpop.eup %4924  ;;  %3892 = vmatmul.mubr.bf16.gmra.mrb[184].mxu0 %v3412_v14  ;;  %v3414_v10 = vpack.c.bf16 %v3218_v13, %v3214_v11  ;;  %v3221_v40 = vmul.f32 %v2965_v31, %v7265_v61  ;;  %v2971_v7 = vmul.f32 0.5, %v2715_v59  ;;  %v7825_v43 = vadd.f32 %v10159_v51, %v5580_v33  ;;  %v10163_v61 = vld [vmem:[#allocation52_spill] sm:$0xff]  ;;  %v10164_v13 = vld [vmem:[#allocation58_spill] sm:$0xff]  ;;  %v10166_v59 = vld [vmem:[#allocation29_spill] sm:$0xff] }
 0x29c   :  { %10155 = vst [vmem:[#allocation56_spill] sm:$0xff] %v7814_v62  ;;  %10157 = vst [vmem:[#allocation62_spill] sm:$0xff] %v7818_v1  ;;  %v7827_v45 = vpop.eup %4926  ;;  %v3225_v32 = vmul.f32 %v2969_v26, %v10161_v58  ;;  %v3223_v25 = vmul.f32 %v2967_v17, %v10162_v44  ;;  %v1212_v22 = vmul.f32 %v7814_v62, %v7814_v62 }
 0x29d   :  { %10158 = vst [vmem:[#allocation30_spill] sm:$0xff] %v7820_v2  ;;  %10160 = vst [vmem:[#allocation98_spill] sm:$0xff] %v7827_v45  ;;  %v1214_v63 = vmul.f32 %v7818_v1, %v7818_v1  ;;  %v7835_v11 = vpop.eup %4928  ;;  %4181 = vmatmul.mubr.bf16.gmra.mrb[184].mxu1 %v3414_v10  ;;  %v3227_v47 = vmul.f32 %v2971_v7, %v10163_v61  ;;  %v1213_v14 = vmul.f32 %v7825_v43, %v7825_v43  ;;  %v10168_v7 = vld [vmem:[#allocation59_spill] sm:$0xff] }
 0x29e   :  { %v7842_v31 = vadd.f32 %v10164_v13, %v5582_v34  ;;  %v7846_v26 = vadd.f32 %v10166_v59, %v5576_v28  ;;  %v7848_v17 = vpop.eup %4930  ;;  %v3417_v36 = vpack.c.bf16 %v3225_v32, %v3221_v40  ;;  %v1468_v18 = vmul.f32 %v1212_v22, %v7814_v62  ;;  %v7863_v40 = vpop.f32.mrb[104].mxu0 }
 0x29f   :  { %v1470_v10 = vmul.f32 %v1214_v63, %v7818_v1  ;;  %v7854_v51 = vadd.f32 %v10168_v7, %v5578_v29  ;;  %v7856_v58 = vpop.eup %4932  ;;  %v3419_v44 = vpack.c.bf16 %v3227_v47, %v3223_v25  ;;  %v1469_v61 = vmul.f32 %v1213_v14, %v7825_v43  ;;  %10171 = vst [vmem:[#allocation54_spill] sm:$0xff] %v7863_v40  ;;  %v10173_v25 = vld [vmem:[#allocation39_spill] sm:$0xff] }
 0x2a0   :  { %10165 = vst [vmem:[#allocation37_spill] sm:$0xff] %v7842_v31  ;;  %10167 = vst [vmem:[#allocation45_spill] sm:$0xff] %v7846_v26  ;;  %v1215_v13 = vmul.f32 %v7842_v31, %v7842_v31  ;;  %v1216_v59 = vmul.f32 %v7846_v26, %v7846_v26  ;;  %v7865_v32 = vpop.eup %4934  ;;  %3899 = vmatprep.mubr.bf16.mxu0 %v3417_v36  ;;  %v1724_v22 = vmul.f32 0.044715, %v1468_v18 }
 0x2a1   :  { %10169 = vst [vmem:[#allocation14_spill] sm:$0xff] %v7854_v51  ;;  %10170 = vst [vmem:[#allocation48_spill] sm:$0xff] %v7856_v58  ;;  %v1726_v63 = vmul.f32 0.044715, %v1470_v10  ;;  %v1218_v7 = vmul.f32 %v7854_v51, %v7854_v51  ;;  %v7871_v47 = vadd.f32 %v10173_v25, %v5580_v33  ;;  %v7873_v14 = vpop.eup %4936  ;;  %4188 = vmatprep.mubr.bf16.mxu1 %v3419_v44  ;;  %v1725_v54 = vmul.f32 0.044715, %v1469_v61 }
 0x2a2   :  { %10172 = vst [vmem:[#allocation55_spill] sm:$0xff] %v7865_v32  ;;  %v1471_v46 = vmul.f32 %v1215_v13, %v7842_v31  ;;  %v1472_v40 = vmul.f32 %v1216_v59, %v7846_v26  ;;  %v10174_v32 = vld [vmem:[#allocation60_spill] sm:$0xff]  ;;  %v7881_v18 = vpop.eup %4938  ;;  %v1980_v10 = vadd.f32 %v1724_v22, %v7814_v62  ;;  %v7895_v62 = vpop.f32.mrb[104].mxu1 }
 0x2a3   :  { %v7879_v36 = vadd.f32 %v10174_v32, %v5582_v34  ;;  %v1982_v45 = vadd.f32 %v1726_v63, %v7818_v1  ;;  %v1474_v25 = vmul.f32 %v1218_v7, %v7854_v51  ;;  %v1217_v44 = vmul.f32 %v7871_v47, %v7871_v47  ;;  %10175 = vst [vmem:[#allocation75_spill] sm:$0xff] %v7895_v62 }
 0x2a4   :  { %v1981_v61 = vadd.f32 %v1725_v54, %v7825_v43  ;;  %v1727_v13 = vmul.f32 0.044715, %v1471_v46  ;;  %v1728_v58 = vmul.f32 0.044715, %v1472_v40  ;;  %v2236_v32 = vmul.f32 0.7978846, %v1980_v10 }
 0x2a5   :  { %v1219_v59 = vmul.f32 %v7879_v36, %v7879_v36  ;;  %v2238_v2 = vmul.f32 0.7978846, %v1982_v45  ;;  %v1730_v38 = vmul.f32 0.044715, %v1474_v25  ;;  %v1473_v4 = vmul.f32 %v1217_v44, %v7871_v47  ;;  %v7897_v54 = vpop.f32.mrb[105].mxu0  ;;  %v10177_v10 = vld [vmem:[#allocation83_spill] sm:$0xff] }
 0x2a6   :  { %v2237_v22 = vmul.f32 0.7978846, %v1981_v61  ;;  %v1983_v63 = vadd.f32 %v1727_v13, %v7842_v31  ;;  %v1984_v7 = vadd.f32 %v1728_v58, %v7846_v26  ;;  %10176 = vst [vmem:[#allocation53_spill] sm:$0xff] %v7897_v54  ;;  %4940 = vtanh.f32 %v2236_v32  ;;  %v7901_v25 = vpop.f32.mrb[105].mxu1  ;;  %v10179_v26 = vld [vmem:[#allocation73_spill] sm:$0xff]  ;;  %v7905_v31 = vpop.f32.mrb[106].mxu0 }
 0x2a7   :  { %v1475_v1 = vmul.f32 %v1219_v59, %v7879_v36  ;;  %v1986_v46 = vadd.f32 %v1730_v38, %v7854_v51  ;;  %v1729_v40 = vmul.f32 0.044715, %v1473_v4  ;;  %v2708_v45 = vadd.f32 1.0, %v10177_v10  ;;  %10178 = vst [vmem:[#allocation52_spill] sm:$0xff] %v7901_v25  ;;  %10180 = vst [vmem:[#allocation58_spill] sm:$0xff] %v7905_v31  ;;  %v7907_v32 = vpop.f32.mrb[106].mxu1 }
 0x2a8   :  { %4942 = vtanh.f32 %v2238_v2  ;;  %v2239_v44 = vmul.f32 0.7978846, %v1983_v63  ;;  %v2240_v61 = vmul.f32 0.7978846, %v1984_v7  ;;  %v2712_v62 = vadd.f32 1.0, %v10179_v26  ;;  %10181 = vst [vmem:[#allocation29_spill] sm:$0xff] %v7907_v32 }
 0x2a9   :  { %v1731_v13 = vmul.f32 0.044715, %v1475_v1  ;;  %4944 = vtanh.f32 %v2237_v22  ;;  %v2242_v58 = vmul.f32 0.7978846, %v1986_v46  ;;  %v1985_v59 = vadd.f32 %v1729_v40, %v7871_v47  ;;  %v10182_v10 = vld [vmem:[#allocation68_spill] sm:$0xff]  ;;  %v7911_v2 = vpop.f32.mrb[107].mxu0 }
 0x2aa   :  { %4946 = vtanh.f32 %v2239_v44  ;;  %v2964_v38 = vmul.f32 0.5, %v2708_v45  ;;  %v2710_v25 = vadd.f32 1.0, %v10182_v10  ;;  %10183 = vst [vmem:[#allocation59_spill] sm:$0xff] %v7911_v2  ;;  %v2968_v22 = vmul.f32 0.5, %v2712_v62  ;;  %v10184_v63 = vld [vmem:[#allocation77_spill] sm:$0xff]  ;;  %v7914_v46 = vpop.f32.mrb[107].mxu1 }
 0x2ab   :  { %v1987_v4 = vadd.f32 %v1731_v13, %v7879_v36  ;;  %4948 = vtanh.f32 %v2240_v61  ;;  %v2241_v1 = vmul.f32 0.7978846, %v1985_v59  ;;  %v2714_v7 = vadd.f32 1.0, %v10184_v63  ;;  %10185 = vst [vmem:[#allocation39_spill] sm:$0xff] %v7914_v46  ;;  %v10186_v40 = vld [vmem:[#allocation61_spill] sm:$0xff]  ;;  %v10187_v44 = vld [vmem:[#allocation63_spill] sm:$0xff] }
 0x2ac   :  { %4950 = vtanh.f32 %v2242_v58  ;;  %v3220_v31 = vmul.f32 %v2964_v38, %v10186_v40  ;;  %v2966_v32 = vmul.f32 0.5, %v2710_v25  ;;  %v3224_v13 = vmul.f32 %v2968_v22, %v10187_v44  ;;  %v10188_v2 = vld [vmem:[#allocation40_spill] sm:$0xff]  ;;  %v10190_v22 = vld [vmem:[#allocation26_spill] sm:$0xff]  ;;  %v10197_v44 = vld [vmem:[#allocation43_spill] sm:$0xff] }
 0x2ad   :  { %v2243_v26 = vmul.f32 0.7978846, %v1987_v4  ;;  %4952 = vtanh.f32 %v2241_v1  ;;  %v2970_v45 = vmul.f32 0.5, %v2714_v7  ;;  %v2717_v10 = vadd.f32 1.0, %v7499_v19  ;;  %v10189_v46 = vld [vmem:[#allocation64_spill] sm:$0xff]  ;;  %v10192_v19 = vld [vmem:[#allocation70_spill] sm:$0xff] }
 0x2ae   :  { %v3222_v61 = vmul.f32 %v2966_v32, %v10188_v2  ;;  %v2721_v62 = vadd.f32 1.0, %v7537_v50  ;;  %v2719_v59 = vadd.f32 1.0, %v7512_v53  ;;  %v3416_v63 = vpack.c.bf16 %v3224_v13, %v3220_v31  ;;  %v10195_v2 = vld [vmem:[#allocation27_spill] sm:$0xff] }
 0x2af   :  { %4954 = vtanh.f32 %v2243_v26  ;;  %v3226_v58 = vmul.f32 %v2970_v45, %v10189_v46  ;;  %v2973_v4 = vmul.f32 0.5, %v2717_v10  ;;  %v2723_v38 = vadd.f32 1.0, %v7545_v39  ;;  %v10208_v54 = vld [vmem:[#allocation67_spill] sm:$0xff] }
 0x2b0   :  { %v2977_v25 = vmul.f32 0.5, %v2721_v62  ;;  %v2975_v1 = vmul.f32 0.5, %v2719_v59  ;;  %v7926_v7 = vadd.f32 %v10190_v22, %v5576_v28  ;;  %v7930_v26 = vadd.f32 %v10192_v19, %v5578_v29  ;;  %v7932_v32 = vpop.eup %4940  ;;  %3900 = vmatmul.mubr.bf16.gmra.mrb[188].mxu0 %v3416_v63  ;;  %v10198_v59 = vld [vmem:[#allocation35_spill] sm:$0xff] }
 0x2b1   :  { %10194 = vst [vmem:[#allocation73_spill] sm:$0xff] %v7932_v32  ;;  %v3418_v53 = vpack.c.bf16 %v3226_v58, %v3222_v61  ;;  %v3229_v50 = vmul.f32 %v2973_v4, %v7377_v49  ;;  %v2979_v31 = vmul.f32 0.5, %v2723_v38  ;;  %v7937_v39 = vadd.f32 %v10195_v2, %v5580_v33 }
 0x2b2   :  { %10191 = vst [vmem:[#allocation60_spill] sm:$0xff] %v7926_v7  ;;  %10193 = vst [vmem:[#allocation83_spill] sm:$0xff] %v7930_v26  ;;  %v7939_v46 = vpop.eup %4942  ;;  %v3233_v40 = vmul.f32 %v2977_v25, %v7423_v8  ;;  %v3231_v13 = vmul.f32 %v2975_v1, %v10197_v44  ;;  %v1220_v45 = vmul.f32 %v7926_v7, %v7926_v7  ;;  %v10200_v8 = vld [vmem:[#allocation50_spill] sm:$0xff] }
 0x2b3   :  { %10196 = vst [vmem:[#allocation68_spill] sm:$0xff] %v7939_v46  ;;  %v1222_v10 = vmul.f32 %v7930_v26, %v7930_v26  ;;  %v7947_v61 = vpop.eup %4944  ;;  %4189 = vmatmul.mubr.bf16.gmra.mrb[188].mxu1 %v3418_v53  ;;  %v3235_v49 = vmul.f32 %v2979_v31, %v7431_v56  ;;  %v1221_v62 = vmul.f32 %v7937_v39, %v7937_v39  ;;  %v10202_v56 = vld [vmem:[#allocation51_spill] sm:$0xff] }
 0x2b4   :  { %v7954_v63 = vadd.f32 %v10198_v59, %v5582_v34  ;;  %v7958_v58 = vadd.f32 %v10200_v8, %v5576_v28  ;;  %v7960_v4 = vpop.eup %4946  ;;  %v3421_v38 = vpack.c.bf16 %v3233_v40, %v3229_v50  ;;  %v1476_v25 = vmul.f32 %v1220_v45, %v7926_v7  ;;  %v7975_v50 = vpop.f32.mrb[108].mxu0 }
 0x2b5   :  { %v1478_v1 = vmul.f32 %v1222_v10, %v7930_v26  ;;  %v7966_v22 = vadd.f32 %v10202_v56, %v5578_v29  ;;  %v7968_v19 = vpop.eup %4948  ;;  %v3423_v53 = vpack.c.bf16 %v3235_v49, %v3231_v13  ;;  %v1477_v31 = vmul.f32 %v1221_v62, %v7937_v39  ;;  %10205 = vst [vmem:[#allocation64_spill] sm:$0xff] %v7975_v50  ;;  %v10207_v13 = vld [vmem:[#allocation65_spill] sm:$0xff] }
 0x2b6   :  { %10199 = vst [vmem:[#allocation77_spill] sm:$0xff] %v7954_v63  ;;  %10201 = vst [vmem:[#allocation61_spill] sm:$0xff] %v7958_v58  ;;  %v1223_v2 = vmul.f32 %v7954_v63, %v7954_v63  ;;  %v1224_v44 = vmul.f32 %v7958_v58, %v7958_v58  ;;  %v7977_v40 = vpop.eup %4950  ;;  %3907 = vmatprep.mubr.bf16.mxu0 %v3421_v38  ;;  %v1732_v45 = vmul.f32 0.044715, %v1476_v25 }
 0x2b7   :  { %10203 = vst [vmem:[#allocation63_spill] sm:$0xff] %v7966_v22  ;;  %10204 = vst [vmem:[#allocation40_spill] sm:$0xff] %v7968_v19  ;;  %v1734_v10 = vmul.f32 0.044715, %v1478_v1  ;;  %v1226_v59 = vmul.f32 %v7966_v22, %v7966_v22  ;;  %v7983_v49 = vadd.f32 %v10207_v13, %v5580_v33  ;;  %v7985_v62 = vpop.eup %4952  ;;  %4196 = vmatprep.mubr.bf16.mxu1 %v3423_v53  ;;  %v1733_v8 = vmul.f32 0.044715, %v1477_v31 }
 0x2b8   :  { %10206 = vst [vmem:[#allocation26_spill] sm:$0xff] %v7977_v40  ;;  %v1479_v56 = vmul.f32 %v1223_v2, %v7954_v63  ;;  %v1480_v50 = vmul.f32 %v1224_v44, %v7958_v58  ;;  %v7991_v38 = vadd.f32 %v10208_v54, %v5582_v34  ;;  %v1988_v1 = vadd.f32 %v1732_v45, %v7926_v7  ;;  %v8007_v7 = vpop.f32.mrb[108].mxu1 }
 0x2b9   :  { %v7993_v25 = vpop.eup %4954  ;;  %v1990_v51 = vadd.f32 %v1734_v10, %v7930_v26  ;;  %v1482_v13 = vmul.f32 %v1226_v59, %v7966_v22  ;;  %v1225_v53 = vmul.f32 %v7983_v49, %v7983_v49  ;;  %v1989_v31 = vadd.f32 %v1733_v8, %v7937_v39  ;;  %10209 = vst [vmem:[#allocation70_spill] sm:$0xff] %v8007_v7  ;;  %v8009_v8 = vpop.f32.mrb[109].mxu0 }
 0x2ba   :  { %v1735_v2 = vmul.f32 0.044715, %v1479_v56  ;;  %v1736_v40 = vmul.f32 0.044715, %v1480_v50  ;;  %v1227_v44 = vmul.f32 %v7991_v38, %v7991_v38  ;;  %v2244_v54 = vmul.f32 0.7978846, %v1988_v1 }
 0x2bb   :  { %v2246_v46 = vmul.f32 0.7978846, %v1990_v51  ;;  %v1738_v19 = vmul.f32 0.044715, %v1482_v13  ;;  %v1481_v32 = vmul.f32 %v1225_v53, %v7983_v49  ;;  %v2245_v45 = vmul.f32 0.7978846, %v1989_v31 }
 0x2bc   :  { %v1991_v10 = vadd.f32 %v1735_v2, %v7954_v63  ;;  %v1992_v59 = vadd.f32 %v1736_v40, %v7958_v58  ;;  %v1483_v26 = vmul.f32 %v1227_v44, %v7991_v38  ;;  %10210 = vst [vmem:[#allocation27_spill] sm:$0xff] %v8009_v8  ;;  %4956 = vtanh.f32 %v2244_v54  ;;  %v10211_v1 = vld [vmem:[#allocation92_spill] sm:$0xff]  ;;  %v8013_v13 = vpop.f32.mrb[109].mxu1  ;;  %v10213_v58 = vld [vmem:[#allocation46_spill] sm:$0xff]  ;;  %v8017_v63 = vpop.f32.mrb[110].mxu0 }
 0x2bd   :  { %v1994_v50 = vadd.f32 %v1738_v19, %v7966_v22  ;;  %v1737_v56 = vmul.f32 0.044715, %v1481_v32  ;;  %v2716_v51 = vadd.f32 1.0, %v10211_v1  ;;  %10212 = vst [vmem:[#allocation43_spill] sm:$0xff] %v8013_v13  ;;  %4958 = vtanh.f32 %v2246_v46  ;;  %10214 = vst [vmem:[#allocation35_spill] sm:$0xff] %v8017_v63  ;;  %v8019_v54 = vpop.f32.mrb[110].mxu1 }
 0x2be   :  { %v2247_v53 = vmul.f32 0.7978846, %v1991_v10  ;;  %v2248_v31 = vmul.f32 0.7978846, %v1992_v59  ;;  %v1739_v2 = vmul.f32 0.044715, %v1483_v26  ;;  %4960 = vtanh.f32 %v2245_v45 }
 0x2bf   :  { %v2250_v40 = vmul.f32 0.7978846, %v1994_v50  ;;  %v1993_v44 = vadd.f32 %v1737_v56, %v7983_v49  ;;  %v2720_v7 = vadd.f32 1.0, %v10213_v58  ;;  %10215 = vst [vmem:[#allocation50_spill] sm:$0xff] %v8019_v54  ;;  %v2972_v19 = vmul.f32 0.5, %v2716_v51  ;;  %v10216_v1 = vld [vmem:[#allocation89_spill] sm:$0xff] }
 0x2c0   :  { %4962 = vtanh.f32 %v2247_v53  ;;  %v1995_v32 = vadd.f32 %v1739_v2, %v7991_v38  ;;  %v2718_v13 = vadd.f32 1.0, %v10216_v1  ;;  %v8023_v46 = vpop.f32.mrb[111].mxu0  ;;  %v10218_v10 = vld [vmem:[#allocation81_spill] sm:$0xff]  ;;  %v8026_v50 = vpop.f32.mrb[111].mxu1  ;;  %v10220_v56 = vld [vmem:[#allocation82_spill] sm:$0xff]  ;;  %v2725_v1 = vadd.f32 1.0, %v7611_v57 }
 0x2c1   :  { %10217 = vst [vmem:[#allocation51_spill] sm:$0xff] %v8023_v46  ;;  %4964 = vtanh.f32 %v2248_v31  ;;  %v2249_v26 = vmul.f32 0.7978846, %v1993_v44  ;;  %v2976_v45 = vmul.f32 0.5, %v2720_v7  ;;  %v2722_v59 = vadd.f32 1.0, %v10218_v10  ;;  %10219 = vst [vmem:[#allocation65_spill] sm:$0xff] %v8026_v50 }
 0x2c2   :  { %4966 = vtanh.f32 %v2250_v40  ;;  %v2251_v58 = vmul.f32 0.7978846, %v1995_v32  ;;  %v3228_v63 = vmul.f32 %v2972_v19, %v10220_v56  ;;  %v2974_v54 = vmul.f32 0.5, %v2718_v13  ;;  %v10221_v53 = vld [vmem:[#allocation69_spill] sm:$0xff]  ;;  %v10222_v46 = vld [vmem:[#allocation16_spill] sm:$0xff]  ;;  %v10226_v57 = vld [vmem:[#allocation91_spill] sm:$0xff] }
 0x2c3   :  { %4968 = vtanh.f32 %v2249_v26  ;;  %v3232_v2 = vmul.f32 %v2976_v45, %v10221_v53  ;;  %v2978_v51 = vmul.f32 0.5, %v2722_v59  ;;  %v2729_v7 = vadd.f32 1.0, %v7649_v16  ;;  %v10223_v50 = vld [vmem:[#allocation57_spill] sm:$0xff]  ;;  %v10224_v45 = vld [vmem:[#allocation76_spill] sm:$0xff] }
 0x2c4   :  { %4970 = vtanh.f32 %v2251_v58  ;;  %v3230_v31 = vmul.f32 %v2974_v54, %v10222_v46  ;;  %v2727_v44 = vadd.f32 1.0, %v7624_v0  ;;  %v2981_v32 = vmul.f32 0.5, %v2725_v1  ;;  %v10228_v46 = vld [vmem:[#allocation72_spill] sm:$0xff] }
 0x2c5   :  { %v3420_v10 = vpack.c.bf16 %v3232_v2, %v3228_v63  ;;  %v3234_v40 = vmul.f32 %v2978_v51, %v10223_v50  ;;  %v2731_v19 = vadd.f32 1.0, %v7657_v37  ;;  %v2985_v13 = vmul.f32 0.5, %v2729_v7  ;;  %v10230_v7 = vld [vmem:[#allocation31_spill] sm:$0xff] }
 0x2c6   :  { %v2983_v26 = vmul.f32 0.5, %v2727_v44  ;;  %v8038_v59 = vadd.f32 %v10224_v45, %v5576_v28  ;;  %v8042_v58 = vadd.f32 %v10226_v57, %v5578_v29  ;;  %v8044_v54 = vpop.eup %4956  ;;  %v3237_v16 = vmul.f32 %v2981_v32, %v7489_v9 }
 0x2c7   :  { %3908 = vmatmul.mubr.bf16.gmra.mrb[192].mxu0 %v3420_v10  ;;  %v3422_v0 = vpack.c.bf16 %v3234_v40, %v3230_v31  ;;  %v2987_v63 = vmul.f32 0.5, %v2731_v19  ;;  %v8049_v37 = vadd.f32 %v10228_v46, %v5580_v33  ;;  %v8051_v50 = vpop.eup %4958  ;;  %v3241_v56 = vmul.f32 %v2985_v13, %v7535_v55 }
 0x2c8   :  { %10225 = vst [vmem:[#allocation67_spill] sm:$0xff] %v8038_v59  ;;  %10227 = vst [vmem:[#allocation92_spill] sm:$0xff] %v8042_v58  ;;  %v3239_v53 = vmul.f32 %v2983_v26, %v7506_v21  ;;  %v1228_v2 = vmul.f32 %v8038_v59, %v8038_v59  ;;  %v1230_v51 = vmul.f32 %v8042_v58, %v8042_v58  ;;  %v8059_v1 = vpop.eup %4960  ;;  %v10231_v21 = vld [vmem:[#allocation78_spill] sm:$0xff] }
 0x2c9   :  { %10229 = vst [vmem:[#allocation46_spill] sm:$0xff] %v8051_v50  ;;  %4197 = vmatmul.mubr.bf16.gmra.mrb[192].mxu1 %v3422_v0  ;;  %v3243_v9 = vmul.f32 %v2987_v63, %v7543_v23  ;;  %v1229_v31 = vmul.f32 %v8049_v37, %v8049_v37  ;;  %v8066_v44 = vadd.f32 %v10230_v7, %v5582_v34  ;;  %v10233_v23 = vld [vmem:[#allocation79_spill] sm:$0xff] }
 0x2ca   :  { %v8070_v55 = vadd.f32 %v10231_v21, %v5576_v28  ;;  %v8072_v10 = vpop.eup %4962  ;;  %v3425_v40 = vpack.c.bf16 %v3241_v56, %v3237_v16  ;;  %v1484_v32 = vmul.f32 %v1228_v2, %v8038_v59  ;;  %v1486_v19 = vmul.f32 %v1230_v51, %v8042_v58  ;;  %v8087_v16 = vpop.f32.mrb[112].mxu0 }
 0x2cb   :  { %v8078_v13 = vadd.f32 %v10233_v23, %v5578_v29  ;;  %v8080_v26 = vpop.eup %4964  ;;  %v3427_v45 = vpack.c.bf16 %v3243_v9, %v3239_v53  ;;  %v1485_v57 = vmul.f32 %v1229_v31, %v8049_v37  ;;  %v1231_v0 = vmul.f32 %v8066_v44, %v8066_v44  ;;  %10236 = vst [vmem:[#allocation69_spill] sm:$0xff] %v8087_v16  ;;  %v10238_v53 = vld [vmem:[#allocation80_spill] sm:$0xff]  ;;  %v10239_v16 = vld [vmem:[#allocation90_spill] sm:$0xff] }
 0x2cc   :  { %10232 = vst [vmem:[#allocation89_spill] sm:$0xff] %v8070_v55  ;;  %10235 = vst [vmem:[#allocation82_spill] sm:$0xff] %v8080_v26  ;;  %v1232_v63 = vmul.f32 %v8070_v55, %v8070_v55  ;;  %v8089_v46 = vpop.eup %4966  ;;  %3915 = vmatprep.mubr.bf16.mxu0 %v3425_v40  ;;  %v1740_v56 = vmul.f32 0.044715, %v1484_v32  ;;  %v1742_v2 = vmul.f32 0.044715, %v1486_v19  ;;  %v8095_v9 = vadd.f32 %v10238_v53, %v5580_v33 }
 0x2cd   :  { %10234 = vst [vmem:[#allocation81_spill] sm:$0xff] %v8078_v13  ;;  %10237 = vst [vmem:[#allocation16_spill] sm:$0xff] %v8089_v46  ;;  %v1234_v51 = vmul.f32 %v8078_v13, %v8078_v13  ;;  %v8097_v31 = vpop.eup %4968  ;;  %4204 = vmatprep.mubr.bf16.mxu1 %v3427_v45  ;;  %v1741_v7 = vmul.f32 0.044715, %v1485_v57  ;;  %v1487_v21 = vmul.f32 %v1231_v0, %v8066_v44 }
 0x2ce   :  { %v1488_v23 = vmul.f32 %v1232_v63, %v8070_v55  ;;  %v8103_v40 = vadd.f32 %v10239_v16, %v5582_v34  ;;  %v8105_v32 = vpop.eup %4970  ;;  %v1996_v19 = vadd.f32 %v1740_v56, %v8038_v59  ;;  %v1998_v8 = vadd.f32 %v1742_v2, %v8042_v58  ;;  %v8119_v59 = vpop.f32.mrb[112].mxu1 }
 0x2cf   :  { %v1490_v53 = vmul.f32 %v1234_v51, %v8078_v13  ;;  %v1233_v45 = vmul.f32 %v8095_v9, %v8095_v9  ;;  %v1997_v57 = vadd.f32 %v1741_v7, %v8049_v37  ;;  %v1743_v0 = vmul.f32 0.044715, %v1487_v21  ;;  %10240 = vst [vmem:[#allocation57_spill] sm:$0xff] %v8119_v59  ;;  %v8121_v7 = vpop.f32.mrb[113].mxu0 }
 0x2d0   :  { %v1744_v22 = vmul.f32 0.044715, %v1488_v23  ;;  %v1235_v63 = vmul.f32 %v8103_v40, %v8103_v40  ;;  %v2252_v16 = vmul.f32 0.7978846, %v1996_v19  ;;  %v2254_v46 = vmul.f32 0.7978846, %v1998_v8 }
 0x2d1   :  { %v1746_v50 = vmul.f32 0.044715, %v1490_v53  ;;  %v1489_v26 = vmul.f32 %v1233_v45, %v8095_v9  ;;  %v2253_v56 = vmul.f32 0.7978846, %v1997_v57  ;;  %v1999_v2 = vadd.f32 %v1743_v0, %v8066_v44  ;;  %10241 = vst [vmem:[#allocation76_spill] sm:$0xff] %v8121_v7  ;;  %v8125_v19 = vpop.f32.mrb[113].mxu1 }
 0x2d2   :  { %v2000_v51 = vadd.f32 %v1744_v22, %v8070_v55  ;;  %v1491_v58 = vmul.f32 %v1235_v63, %v8103_v40  ;;  %4972 = vtanh.f32 %v2252_v16  ;;  %v2724_v8 = vadd.f32 1.0, %v7596_v3  ;;  %10242 = vst [vmem:[#allocation91_spill] sm:$0xff] %v8125_v19  ;;  %v10243_v63 = vld [vmem:[#allocation24_spill] sm:$0xff]  ;;  %v8129_v55 = vpop.f32.mrb[114].mxu0  ;;  %v8131_v16 = vpop.f32.mrb[114].mxu1 }
 0x2d3   :  { %v2002_v21 = vadd.f32 %v1746_v50, %v8078_v13  ;;  %v1745_v23 = vmul.f32 0.044715, %v1489_v26  ;;  %4974 = vtanh.f32 %v2254_v46  ;;  %v2255_v53 = vmul.f32 0.7978846, %v1999_v2  ;;  %10244 = vst [vmem:[#allocation72_spill] sm:$0xff] %v8129_v55  ;;  %10245 = vst [vmem:[#allocation31_spill] sm:$0xff] %v8131_v16 }
 0x2d4   :  { %v2256_v45 = vmul.f32 0.7978846, %v2000_v51  ;;  %v1747_v57 = vmul.f32 0.044715, %v1491_v58  ;;  %4976 = vtanh.f32 %v2253_v56  ;;  %v2728_v59 = vadd.f32 1.0, %v10243_v63  ;;  %v10246_v26 = vld [vmem:[#allocation21_spill] sm:$0xff] }
 0x2d5   :  { %v2258_v22 = vmul.f32 0.7978846, %v2002_v21  ;;  %v2001_v0 = vadd.f32 %v1745_v23, %v8095_v9  ;;  %4978 = vtanh.f32 %v2255_v53  ;;  %v2980_v3 = vmul.f32 0.5, %v2724_v8  ;;  %v8135_v46 = vpop.f32.mrb[115].mxu0  ;;  %v10248_v2 = vld [vmem:[#allocation10_spill] sm:$0xff]  ;;  %v8138_v21 = vpop.f32.mrb[115].mxu1 }
 0x2d6   :  { %v2003_v50 = vadd.f32 %v1747_v57, %v8103_v40  ;;  %v2726_v19 = vadd.f32 1.0, %v10246_v26  ;;  %10247 = vst [vmem:[#allocation78_spill] sm:$0xff] %v8135_v46  ;;  %4980 = vtanh.f32 %v2256_v45  ;;  %v2984_v56 = vmul.f32 0.5, %v2728_v59  ;;  %10249 = vst [vmem:[#allocation79_spill] sm:$0xff] %v8138_v21  ;;  %v10250_v63 = vld [vmem:[#allocation99_spill] sm:$0xff]  ;;  %v10252_v46 = vld [vmem:[#allocation17_spill] sm:$0xff] }
 0x2d7   :  { %v2257_v58 = vmul.f32 0.7978846, %v2001_v0  ;;  %v2730_v51 = vadd.f32 1.0, %v10248_v2  ;;  %4982 = vtanh.f32 %v2258_v22  ;;  %v3236_v55 = vmul.f32 %v2980_v3, %v10250_v63  ;;  %v10251_v53 = vld [vmem:[#allocation95_spill] sm:$0xff]  ;;  %v10253_v21 = vld [vmem:[#allocation66_spill] sm:$0xff] }
 0x2d8   :  { %v2259_v23 = vmul.f32 0.7978846, %v2003_v50  ;;  %v2982_v16 = vmul.f32 0.5, %v2726_v19  ;;  %v3240_v57 = vmul.f32 %v2984_v56, %v10251_v53  ;;  %v2733_v26 = vadd.f32 1.0, %v7723_v30  ;;  %v10254_v56 = vld [vmem:[#allocation71_spill] sm:$0xff]  ;;  %v10256_v30 = vld [vmem:[#allocation13_spill] sm:$0xff] }
 0x2d9   :  { %4984 = vtanh.f32 %v2257_v58  ;;  %v2986_v8 = vmul.f32 0.5, %v2730_v51  ;;  %v2737_v59 = vadd.f32 1.0, %v7761_v42  ;;  %v2735_v0 = vadd.f32 1.0, %v7736_v12 }
 0x2da   :  { %4986 = vtanh.f32 %v2259_v23  ;;  %v3238_v45 = vmul.f32 %v2982_v16, %v10252_v46  ;;  %v3424_v2 = vpack.c.bf16 %v3240_v57, %v3236_v55  ;;  %v2989_v50 = vmul.f32 0.5, %v2733_v26  ;;  %v10258_v46 = vld [vmem:[#allocation93_spill] sm:$0xff] }
 0x2db   :  { %v3242_v22 = vmul.f32 %v2986_v8, %v10253_v21  ;;  %v2739_v3 = vadd.f32 1.0, %v7769_v6  ;;  %v2993_v19 = vmul.f32 0.5, %v2737_v59  ;;  %v2991_v58 = vmul.f32 0.5, %v2735_v0  ;;  %v10260_v59 = vld [vmem:[#allocation84_spill] sm:$0xff] }
 0x2dc   :  { %v8150_v51 = vadd.f32 %v10254_v56, %v5576_v28  ;;  %v8154_v23 = vadd.f32 %v10256_v30, %v5578_v29  ;;  %v8156_v16 = vpop.eup %4972  ;;  %3916 = vmatmul.mubr.bf16.gmra.mrb[196].mxu0 %v3424_v2  ;;  %v3245_v42 = vmul.f32 %v2989_v50, %v7601_v5  ;;  %v8161_v6 = vadd.f32 %v10258_v46, %v5580_v33 }
 0x2dd   :  { %v3426_v12 = vpack.c.bf16 %v3242_v22, %v3238_v45  ;;  %v2995_v55 = vmul.f32 0.5, %v2739_v3  ;;  %v8163_v21 = vpop.eup %4974  ;;  %v3249_v63 = vmul.f32 %v2993_v19, %v7647_v24  ;;  %v3247_v53 = vmul.f32 %v2991_v58, %v7618_v27  ;;  %v10261_v27 = vld [vmem:[#allocation33_spill] sm:$0xff] }
 0x2de   :  { %10255 = vst [vmem:[#allocation80_spill] sm:$0xff] %v8150_v51  ;;  %10257 = vst [vmem:[#allocation90_spill] sm:$0xff] %v8154_v23  ;;  %v1236_v57 = vmul.f32 %v8150_v51, %v8150_v51  ;;  %v1238_v8 = vmul.f32 %v8154_v23, %v8154_v23  ;;  %v8171_v26 = vpop.eup %4976  ;;  %v1237_v45 = vmul.f32 %v8161_v6, %v8161_v6 }
 0x2df   :  { %10259 = vst [vmem:[#allocation24_spill] sm:$0xff] %v8163_v21  ;;  %4205 = vmatmul.mubr.bf16.gmra.mrb[196].mxu1 %v3426_v12  ;;  %v3251_v5 = vmul.f32 %v2995_v55, %v7655_v52  ;;  %v8178_v0 = vadd.f32 %v10260_v59, %v5582_v34  ;;  %v8182_v24 = vadd.f32 %v10261_v27, %v5576_v28  ;;  %v8184_v2 = vpop.eup %4978  ;;  %v10263_v52 = vld [vmem:[#allocation85_spill] sm:$0xff] }
 0x2e0   :  { %v3429_v22 = vpack.c.bf16 %v3249_v63, %v3245_v42  ;;  %v1492_v50 = vmul.f32 %v1236_v57, %v8150_v51  ;;  %v1494_v3 = vmul.f32 %v1238_v8, %v8154_v23  ;;  %v8190_v19 = vadd.f32 %v10263_v52, %v5578_v29  ;;  %v8192_v58 = vpop.eup %4980  ;;  %v8199_v42 = vpop.f32.mrb[116].mxu0 }
 0x2e1   :  { %10262 = vst [vmem:[#allocation21_spill] sm:$0xff] %v8182_v24  ;;  %10265 = vst [vmem:[#allocation99_spill] sm:$0xff] %v8192_v58  ;;  %v3431_v56 = vpack.c.bf16 %v3251_v5, %v3247_v53  ;;  %v1493_v30 = vmul.f32 %v1237_v45, %v8161_v6  ;;  %v1239_v12 = vmul.f32 %v8178_v0, %v8178_v0  ;;  %v8201_v46 = vpop.eup %4982  ;;  %v10268_v53 = vld [vmem:[#allocation86_spill] sm:$0xff] }
 0x2e2   :  { %10264 = vst [vmem:[#allocation10_spill] sm:$0xff] %v8190_v19  ;;  %v1240_v55 = vmul.f32 %v8182_v24, %v8182_v24  ;;  %10266 = vst [vmem:[#allocation95_spill] sm:$0xff] %v8199_v42  ;;  %3923 = vmatprep.mubr.bf16.mxu0 %v3429_v22  ;;  %v1748_v63 = vmul.f32 0.044715, %v1492_v50  ;;  %v1750_v57 = vmul.f32 0.044715, %v1494_v3  ;;  %v1242_v8 = vmul.f32 %v8190_v19, %v8190_v19 }
 0x2e3   :  { %10267 = vst [vmem:[#allocation17_spill] sm:$0xff] %v8201_v46  ;;  %v8207_v5 = vadd.f32 %v10268_v53, %v5580_v33  ;;  %v8209_v45 = vpop.eup %4984  ;;  %4212 = vmatprep.mubr.bf16.mxu1 %v3431_v56  ;;  %v1749_v59 = vmul.f32 0.044715, %v1493_v30  ;;  %v1495_v27 = vmul.f32 %v1239_v12, %v8178_v0  ;;  %v10269_v42 = vld [vmem:[#allocation87_spill] sm:$0xff] }
 0x2e4   :  { %v1496_v52 = vmul.f32 %v1240_v55, %v8182_v24  ;;  %v8215_v22 = vadd.f32 %v10269_v42, %v5582_v34  ;;  %v8217_v50 = vpop.eup %4986  ;;  %v2004_v3 = vadd.f32 %v1748_v63, %v8150_v51  ;;  %v2006_v7 = vadd.f32 %v1750_v57, %v8154_v23  ;;  %v8231_v51 = vpop.f32.mrb[116].mxu1 }
 0x2e5   :  { %v1498_v53 = vmul.f32 %v1242_v8, %v8190_v19  ;;  %v1241_v56 = vmul.f32 %v8207_v5, %v8207_v5  ;;  %v2005_v30 = vadd.f32 %v1749_v59, %v8161_v6  ;;  %v1751_v12 = vmul.f32 0.044715, %v1495_v27  ;;  %10270 = vst [vmem:[#allocation66_spill] sm:$0xff] %v8231_v51  ;;  %v8233_v59 = vpop.f32.mrb[117].mxu0 }
 0x2e6   :  { %v1752_v13 = vmul.f32 0.044715, %v1496_v52  ;;  %v1243_v55 = vmul.f32 %v8215_v22, %v8215_v22  ;;  %v2260_v42 = vmul.f32 0.7978846, %v2004_v3  ;;  %v2262_v46 = vmul.f32 0.7978846, %v2006_v7 }
 0x2e7   :  { %v1754_v21 = vmul.f32 0.044715, %v1498_v53  ;;  %v1497_v58 = vmul.f32 %v1241_v56, %v8207_v5  ;;  %v2261_v63 = vmul.f32 0.7978846, %v2005_v30  ;;  %v2007_v57 = vadd.f32 %v1751_v12, %v8178_v0  ;;  %10271 = vst [vmem:[#allocation71_spill] sm:$0xff] %v8233_v59  ;;  %v8237_v3 = vpop.f32.mrb[117].mxu1 }
 0x2e8   :  { %v2008_v8 = vadd.f32 %v1752_v13, %v8182_v24  ;;  %v1499_v23 = vmul.f32 %v1243_v55, %v8215_v22  ;;  %4988 = vtanh.f32 %v2260_v42  ;;  %v2732_v7 = vadd.f32 1.0, %v7708_v15  ;;  %10272 = vst [vmem:[#allocation13_spill] sm:$0xff] %v8237_v3  ;;  %v8241_v51 = vpop.f32.mrb[118].mxu0  ;;  %v8243_v42 = vpop.f32.mrb[118].mxu1  ;;  %v10298_v3 = vld [vmem:[#allocation96_spill] sm:$0xff] }
 0x2e9   :  { %v2010_v27 = vadd.f32 %v1754_v21, %v8190_v19  ;;  %v1753_v52 = vmul.f32 0.044715, %v1497_v58  ;;  %4990 = vtanh.f32 %v2262_v46  ;;  %v2263_v53 = vmul.f32 0.7978846, %v2007_v57  ;;  %10273 = vst [vmem:[#allocation93_spill] sm:$0xff] %v8241_v51  ;;  %10274 = vst [vmem:[#allocation84_spill] sm:$0xff] %v8243_v42 }
 0x2ea   :  { %v2264_v56 = vmul.f32 0.7978846, %v2008_v8  ;;  %v1755_v30 = vmul.f32 0.044715, %v1499_v23  ;;  %4992 = vtanh.f32 %v2261_v63  ;;  %v2736_v55 = vadd.f32 1.0, %v7744_v20  ;;  %v8247_v46 = vpop.f32.mrb[119].mxu0 }
 0x2eb   :  { %v2266_v13 = vmul.f32 0.7978846, %v2010_v27  ;;  %v2009_v12 = vadd.f32 %v1753_v52, %v8207_v5  ;;  %4994 = vtanh.f32 %v2263_v53  ;;  %v2988_v15 = vmul.f32 0.5, %v2732_v7  ;;  %10275 = vst [vmem:[#allocation33_spill] sm:$0xff] %v8247_v46  ;;  %v8250_v8 = vpop.f32.mrb[119].mxu1  ;;  %v10277_v27 = vld [vmem:[#allocation88_spill] sm:$0xff] }
 0x2ec   :  { %v2011_v21 = vadd.f32 %v1755_v30, %v8215_v22  ;;  %v2734_v58 = vadd.f32 1.0, %v7715_v41  ;;  %4996 = vtanh.f32 %v2264_v56  ;;  %v2992_v63 = vmul.f32 0.5, %v2736_v55  ;;  %10276 = vst [vmem:[#allocation85_spill] sm:$0xff] %v8250_v8  ;;  %v10278_v30 = vld [vmem:[#allocation8_spill] sm:$0xff] }
 0x2ed   :  { %v2265_v23 = vmul.f32 0.7978846, %v2009_v12  ;;  %v2738_v57 = vadd.f32 1.0, %v7753_v48  ;;  %4998 = vtanh.f32 %v2266_v13  ;;  %v3244_v52 = vmul.f32 %v2988_v15, %v10277_v27  ;;  %v10279_v8 = vld [vmem:[#allocation28_spill] sm:$0xff] }
 0x2ee   :  { %v2267_v20 = vmul.f32 0.7978846, %v2011_v21  ;;  %v2990_v42 = vmul.f32 0.5, %v2734_v58  ;;  %v3248_v53 = vmul.f32 %v2992_v63, %v7622_v35  ;;  %v2741_v41 = vadd.f32 1.0, %v7835_v11  ;;  %v10280_v35 = vld [vmem:[#allocation41_spill] sm:$0xff]  ;;  %v10282_v11 = vld [vmem:[#allocation11_spill] sm:$0xff] }
 0x2ef   :  { %5000 = vtanh.f32 %v2265_v23  ;;  %v2994_v7 = vmul.f32 0.5, %v2738_v57  ;;  %v2745_v12 = vadd.f32 1.0, %v7873_v14  ;;  %v2743_v48 = vadd.f32 1.0, %v7848_v17 }
 0x2f0   :  { %5002 = vtanh.f32 %v2267_v20  ;;  %v3246_v56 = vmul.f32 %v2990_v42, %v10278_v30  ;;  %v3428_v55 = vpack.c.bf16 %v3248_v53, %v3244_v52  ;;  %v2997_v21 = vmul.f32 0.5, %v2741_v41  ;;  %v10284_v20 = vld [vmem:[#allocation34_spill] sm:$0xff]  ;;  %v10286_v52 = vld [vmem:[#allocation12_spill] sm:$0xff] }
 0x2f1   :  { %v3250_v13 = vmul.f32 %v2994_v7, %v10279_v8  ;;  %v2747_v15 = vadd.f32 1.0, %v7881_v18  ;;  %v3001_v58 = vmul.f32 0.5, %v2745_v12  ;;  %v2999_v23 = vmul.f32 0.5, %v2743_v48  ;;  %v10287_v7 = vld [vmem:[#allocation23_spill] sm:$0xff] }
 0x2f2   :  { %v8262_v63 = vadd.f32 %v10280_v35, %v5576_v28  ;;  %v8266_v57 = vadd.f32 %v10282_v11, %v5578_v29  ;;  %v8268_v42 = vpop.eup %4988  ;;  %3924 = vmatmul.mubr.bf16.gmra.mrb[200].mxu0 %v3428_v55  ;;  %v3253_v14 = vmul.f32 %v2997_v21, %v7713_v60  ;;  %v8273_v18 = vadd.f32 %v10284_v20, %v5580_v33  ;;  %v10288_v60 = vld [vmem:[#allocation38_spill] sm:$0xff] }
 0x2f3   :  { %v3430_v17 = vpack.c.bf16 %v3250_v13, %v3246_v56  ;;  %v3003_v8 = vmul.f32 0.5, %v2747_v15  ;;  %v8275_v27 = vpop.eup %4990  ;;  %v3257_v53 = vmul.f32 %v3001_v58, %v10286_v52  ;;  %v3255_v41 = vmul.f32 %v2999_v23, %v10287_v7  ;;  %v10289_v13 = vld [vmem:[#allocation94_spill] sm:$0xff] }
 0x2f4   :  { %10281 = vst [vmem:[#allocation86_spill] sm:$0xff] %v8262_v63  ;;  %10283 = vst [vmem:[#allocation87_spill] sm:$0xff] %v8266_v57  ;;  %v1244_v30 = vmul.f32 %v8262_v63, %v8262_v63  ;;  %v1246_v12 = vmul.f32 %v8266_v57, %v8266_v57  ;;  %v8283_v56 = vpop.eup %4992  ;;  %v1245_v55 = vmul.f32 %v8273_v18, %v8273_v18  ;;  %v10291_v15 = vld [vmem:[#allocation22_spill] sm:$0xff] }
 0x2f5   :  { %10285 = vst [vmem:[#allocation88_spill] sm:$0xff] %v8275_v27  ;;  %4213 = vmatmul.mubr.bf16.gmra.mrb[200].mxu1 %v3430_v17  ;;  %v3259_v48 = vmul.f32 %v3003_v8, %v10288_v60  ;;  %v8290_v21 = vadd.f32 %v10289_v13, %v5582_v34  ;;  %v8294_v58 = vadd.f32 %v10291_v15, %v5576_v28  ;;  %v8296_v23 = vpop.eup %4994  ;;  %v10293_v8 = vld [vmem:[#allocation9_spill] sm:$0xff] }
 0x2f6   :  { %v3433_v35 = vpack.c.bf16 %v3257_v53, %v3253_v14  ;;  %v1500_v11 = vmul.f32 %v1244_v30, %v8262_v63  ;;  %v1502_v17 = vmul.f32 %v1246_v12, %v8266_v57  ;;  %v8302_v20 = vadd.f32 %v10293_v8, %v5578_v29  ;;  %v8304_v52 = vpop.eup %4996  ;;  %v8311_v14 = vpop.f32.mrb[120].mxu0 }
 0x2f7   :  { %10290 = vst [vmem:[#allocation8_spill] sm:$0xff] %v8290_v21  ;;  %10292 = vst [vmem:[#allocation28_spill] sm:$0xff] %v8294_v58  ;;  %v3435_v7 = vpack.c.bf16 %v3259_v48, %v3255_v41  ;;  %v1501_v60 = vmul.f32 %v1245_v55, %v8273_v18  ;;  %v1247_v13 = vmul.f32 %v8290_v21, %v8290_v21  ;;  %v8313_v53 = vpop.eup %4998  ;;  %v10297_v41 = vld [vmem:[#allocation25_spill] sm:$0xff] }
 0x2f8   :  { %10294 = vst [vmem:[#allocation41_spill] sm:$0xff] %v8302_v20  ;;  %v1248_v15 = vmul.f32 %v8294_v58, %v8294_v58  ;;  %10295 = vst [vmem:[#allocation11_spill] sm:$0xff] %v8311_v14  ;;  %3931 = vmatprep.mubr.bf16.mxu0 %v3433_v35  ;;  %v1756_v30 = vmul.f32 0.044715, %v1500_v11  ;;  %v1758_v12 = vmul.f32 0.044715, %v1502_v17  ;;  %v1250_v8 = vmul.f32 %v8302_v20, %v8302_v20 }
 0x2f9   :  { %10296 = vst [vmem:[#allocation34_spill] sm:$0xff] %v8313_v53  ;;  %v8319_v48 = vadd.f32 %v10297_v41, %v5580_v33  ;;  %v8321_v55 = vpop.eup %5000  ;;  %4220 = vmatprep.mubr.bf16.mxu1 %v3435_v7  ;;  %v1757_v46 = vmul.f32 0.044715, %v1501_v60  ;;  %v1503_v51 = vmul.f32 %v1247_v13, %v8290_v21  ;;  %v8327_v35 = vadd.f32 %v10298_v3, %v5582_v34 }
 0x2fa   :  { %v1504_v14 = vmul.f32 %v1248_v15, %v8294_v58  ;;  %v8329_v11 = vpop.eup %5002  ;;  %v2012_v17 = vadd.f32 %v1756_v30, %v8262_v63  ;;  %v2014_v59 = vadd.f32 %v1758_v12, %v8266_v57  ;;  %v1506_v41 = vmul.f32 %v1250_v8, %v8302_v20  ;;  %v8343_v63 = vpop.f32.mrb[120].mxu1 }
 0x2fb   :  { %v1249_v7 = vmul.f32 %v8319_v48, %v8319_v48  ;;  %v2013_v60 = vadd.f32 %v1757_v46, %v8273_v18  ;;  %v1759_v13 = vmul.f32 0.044715, %v1503_v51  ;;  %v1251_v15 = vmul.f32 %v8327_v35, %v8327_v35  ;;  %10299 = vst [vmem:[#allocation12_spill] sm:$0xff] %v8343_v63  ;;  %v8345_v46 = vpop.f32.mrb[121].mxu0 }
 0x2fc   :  { %v1760_v19 = vmul.f32 0.044715, %v1504_v14  ;;  %v2268_v3 = vmul.f32 0.7978846, %v2012_v17  ;;  %v2270_v24 = vmul.f32 0.7978846, %v2014_v59 }
 0x2fd   :  { %v1762_v53 = vmul.f32 0.044715, %v1506_v41  ;;  %v1505_v27 = vmul.f32 %v1249_v7, %v8319_v48  ;;  %v2269_v30 = vmul.f32 0.7978846, %v2013_v60  ;;  %v2015_v12 = vadd.f32 %v1759_v13, %v8290_v21  ;;  %10300 = vst [vmem:[#allocation23_spill] sm:$0xff] %v8345_v46  ;;  %v10301_v17 = vld [vmem:[#allocation30_spill] sm:$0xff] }
 0x2fe   :  { %v2016_v8 = vadd.f32 %v1760_v19, %v8294_v58  ;;  %v1507_v57 = vmul.f32 %v1251_v15, %v8327_v35  ;;  %5004 = vtanh.f32 %v2268_v3  ;;  %v2740_v59 = vadd.f32 1.0, %v10301_v17  ;;  %v8349_v41 = vpop.f32.mrb[121].mxu1  ;;  %v10303_v58 = vld [vmem:[#allocation48_spill] sm:$0xff]  ;;  %v8353_v21 = vpop.f32.mrb[122].mxu0  ;;  %v10306_v17 = vld [vmem:[#allocation98_spill] sm:$0xff] }
 0x2ff   :  { %v2018_v51 = vadd.f32 %v1762_v53, %v8302_v20  ;;  %v1761_v14 = vmul.f32 0.044715, %v1505_v27  ;;  %10302 = vst [vmem:[#allocation38_spill] sm:$0xff] %v8349_v41  ;;  %5006 = vtanh.f32 %v2270_v24  ;;  %v2271_v7 = vmul.f32 0.7978846, %v2015_v12  ;;  %10304 = vst [vmem:[#allocation94_spill] sm:$0xff] %v8353_v21 }
 0x300   :  { %v2272_v60 = vmul.f32 0.7978846, %v2016_v8  ;;  %v1763_v13 = vmul.f32 0.044715, %v1507_v57  ;;  %5008 = vtanh.f32 %v2269_v30  ;;  %v2744_v63 = vadd.f32 1.0, %v10303_v58  ;;  %v8355_v3 = vpop.f32.mrb[122].mxu1 }
 0x301   :  { %v2274_v19 = vmul.f32 0.7978846, %v2018_v51  ;;  %v2017_v15 = vadd.f32 %v1761_v14, %v8319_v48  ;;  %10305 = vst [vmem:[#allocation22_spill] sm:$0xff] %v8355_v3  ;;  %5010 = vtanh.f32 %v2271_v7  ;;  %v2996_v53 = vmul.f32 0.5, %v2740_v59  ;;  %v8359_v24 = vpop.f32.mrb[123].mxu0  ;;  %v10308_v12 = vld [vmem:[#allocation55_spill] sm:$0xff] }
 0x302   :  { %v2019_v27 = vadd.f32 %v1763_v13, %v8327_v35  ;;  %v2742_v41 = vadd.f32 1.0, %v10306_v17  ;;  %10307 = vst [vmem:[#allocation9_spill] sm:$0xff] %v8359_v24  ;;  %5012 = vtanh.f32 %v2272_v60  ;;  %v3000_v30 = vmul.f32 0.5, %v2744_v63  ;;  %v8362_v51 = vpop.f32.mrb[123].mxu1  ;;  %v10310_v14 = vld [vmem:[#allocation97_spill] sm:$0xff]  ;;  %v10311_v7 = vld [vmem:[#allocation19_spill] sm:$0xff] }
 0x303   :  { %v2273_v57 = vmul.f32 0.7978846, %v2017_v15  ;;  %v2746_v8 = vadd.f32 1.0, %v10308_v12  ;;  %10309 = vst [vmem:[#allocation25_spill] sm:$0xff] %v8362_v51  ;;  %5014 = vtanh.f32 %v2274_v19  ;;  %v3252_v21 = vmul.f32 %v2996_v53, %v10310_v14  ;;  %v10312_v24 = vld [vmem:[#allocation18_spill] sm:$0xff]  ;;  %v10313_v51 = vld [vmem:[#allocation20_spill] sm:$0xff] }
 0x304   :  { %v2275_v58 = vmul.f32 0.7978846, %v2019_v27  ;;  %v2998_v3 = vmul.f32 0.5, %v2742_v41  ;;  %v3256_v13 = vmul.f32 %v3000_v30, %v10311_v7  ;;  %v2749_v17 = vadd.f32 1.0, %v7947_v61  ;;  %v10314_v30 = vld [vmem:[#allocation36_spill] sm:$0xff]  ;;  %v10316_v61 = vld [vmem:[#allocation15_spill] sm:$0xff] }
 0x305   :  { %5016 = vtanh.f32 %v2273_v57  ;;  %v3002_v59 = vmul.f32 0.5, %v2746_v8  ;;  %v2753_v63 = vadd.f32 1.0, %v7985_v62  ;;  %v2751_v15 = vadd.f32 1.0, %v7960_v4  ;;  %v10321_v7 = vld [vmem:[#allocation37_spill] sm:$0xff]  ;;  %v10332_v46 = vld [vmem:[#allocation74_spill] sm:$0xff] }
 0x306   :  { %5018 = vtanh.f32 %v2275_v58  ;;  %v3254_v60 = vmul.f32 %v2998_v3, %v10312_v24  ;;  %v3432_v12 = vpack.c.bf16 %v3256_v13, %v3252_v21  ;;  %v3005_v27 = vmul.f32 0.5, %v2749_v17  ;;  %v10319_v24 = vld [vmem:[#allocation42_spill] sm:$0xff] }
 0x307   :  { %v3258_v19 = vmul.f32 %v3002_v59, %v10313_v51  ;;  %v2755_v53 = vadd.f32 1.0, %v7993_v25  ;;  %v3009_v41 = vmul.f32 0.5, %v2753_v63  ;;  %v3007_v57 = vmul.f32 0.5, %v2751_v15  ;;  %v10322_v15 = vld [vmem:[#allocation44_spill] sm:$0xff] }
 0x308   :  { %v8374_v8 = vadd.f32 %v10314_v30, %v5576_v28  ;;  %v8378_v58 = vadd.f32 %v10316_v61, %v5578_v29  ;;  %v8380_v3 = vpop.eup %5004  ;;  %3932 = vmatmul.mubr.bf16.gmra.mrb[204].mxu0 %v3432_v12  ;;  %v3261_v62 = vmul.f32 %v3005_v27, %v7825_v43  ;;  %v8385_v25 = vadd.f32 %v10319_v24, %v5580_v33 }
 0x309   :  { %10318 = vst [vmem:[#allocation48_spill] sm:$0xff] %v8380_v3  ;;  %v3434_v4 = vpack.c.bf16 %v3258_v19, %v3254_v60  ;;  %v3011_v21 = vmul.f32 0.5, %v2755_v53  ;;  %v8387_v51 = vpop.eup %5006  ;;  %v3265_v14 = vmul.f32 %v3009_v41, %v7871_v47  ;;  %v3263_v13 = vmul.f32 %v3007_v57, %v10321_v7  ;;  %v10324_v47 = vld [vmem:[#allocation47_spill] sm:$0xff] }
 0x30a   :  { %10315 = vst [vmem:[#allocation96_spill] sm:$0xff] %v8374_v8  ;;  %10317 = vst [vmem:[#allocation30_spill] sm:$0xff] %v8378_v58  ;;  %v1252_v59 = vmul.f32 %v8374_v8, %v8374_v8  ;;  %v1254_v17 = vmul.f32 %v8378_v58, %v8378_v58  ;;  %v8395_v60 = vpop.eup %5008  ;;  %v1253_v63 = vmul.f32 %v8385_v25, %v8385_v25 }
 0x30b   :  { %10320 = vst [vmem:[#allocation98_spill] sm:$0xff] %v8387_v51  ;;  %4221 = vmatmul.mubr.bf16.gmra.mrb[204].mxu1 %v3434_v4  ;;  %v3267_v43 = vmul.f32 %v3011_v21, %v7879_v36  ;;  %v8402_v12 = vadd.f32 %v10322_v15, %v5582_v34  ;;  %v8406_v19 = vadd.f32 %v10324_v47, %v5576_v28  ;;  %v8408_v27 = vpop.eup %5010  ;;  %v10326_v36 = vld [vmem:[#allocation49_spill] sm:$0xff] }
 0x30c   :  { %v3437_v53 = vpack.c.bf16 %v3265_v14, %v3261_v62  ;;  %v1508_v41 = vmul.f32 %v1252_v59, %v8374_v8  ;;  %v1510_v57 = vmul.f32 %v1254_v17, %v8378_v58  ;;  %v8414_v30 = vadd.f32 %v10326_v36, %v5578_v29  ;;  %v8416_v61 = vpop.eup %5012  ;;  %v8423_v62 = vpop.f32.mrb[124].mxu0 }
 0x30d   :  { %10323 = vst [vmem:[#allocation55_spill] sm:$0xff] %v8402_v12  ;;  %10325 = vst [vmem:[#allocation97_spill] sm:$0xff] %v8406_v19  ;;  %v3439_v4 = vpack.c.bf16 %v3267_v43, %v3263_v13  ;;  %v1509_v21 = vmul.f32 %v1253_v63, %v8385_v25  ;;  %v1255_v24 = vmul.f32 %v8402_v12, %v8402_v12  ;;  %v8425_v14 = vpop.eup %5014  ;;  %v10331_v13 = vld [vmem:[#allocation32_spill] sm:$0xff] }
 0x30e   :  { %10327 = vst [vmem:[#allocation19_spill] sm:$0xff] %v8414_v30  ;;  %10328 = vst [vmem:[#allocation18_spill] sm:$0xff] %v8416_v61  ;;  %v1256_v7 = vmul.f32 %v8406_v19, %v8406_v19  ;;  %3939 = vmatprep.mubr.bf16.mxu0 %v3437_v53  ;;  %v1764_v59 = vmul.f32 0.044715, %v1508_v41  ;;  %v1766_v17 = vmul.f32 0.044715, %v1510_v57  ;;  %v1258_v15 = vmul.f32 %v8414_v30, %v8414_v30 }
 0x30f   :  { %10329 = vst [vmem:[#allocation20_spill] sm:$0xff] %v8423_v62  ;;  %10330 = vst [vmem:[#allocation36_spill] sm:$0xff] %v8425_v14  ;;  %v8431_v43 = vadd.f32 %v10331_v13, %v5580_v33  ;;  %v8433_v63 = vpop.eup %5016  ;;  %4228 = vmatprep.mubr.bf16.mxu1 %v3439_v4  ;;  %v1765_v47 = vmul.f32 0.044715, %v1509_v21  ;;  %v1511_v36 = vmul.f32 %v1255_v24, %v8402_v12 }
 0x310   :  { %v1512_v62 = vmul.f32 %v1256_v7, %v8406_v19  ;;  %v8439_v53 = vadd.f32 %v10332_v46, %v5582_v34  ;;  %v8441_v41 = vpop.eup %5018  ;;  %v2020_v57 = vadd.f32 %v1764_v59, %v8374_v8  ;;  %v2022_v20 = vadd.f32 %v1766_v17, %v8378_v58  ;;  %v8455_v8 = vpop.f32.mrb[124].mxu1 }
 0x311   :  { %v1514_v13 = vmul.f32 %v1258_v15, %v8414_v30  ;;  %v1257_v4 = vmul.f32 %v8431_v43, %v8431_v43  ;;  %v2021_v21 = vadd.f32 %v1765_v47, %v8385_v25  ;;  %v1767_v24 = vmul.f32 0.044715, %v1511_v36  ;;  %10334 = vst [vmem:[#allocation42_spill] sm:$0xff] %v8455_v8  ;;  %v8457_v47 = vpop.f32.mrb[125].mxu0 }
 0x312   :  { %10333 = vst [vmem:[#allocation15_spill] sm:$0xff] %v8439_v53  ;;  %v1768_v14 = vmul.f32 0.044715, %v1512_v62  ;;  %v1259_v7 = vmul.f32 %v8439_v53, %v8439_v53  ;;  %v2276_v46 = vmul.f32 0.7978846, %v2020_v57  ;;  %10335 = vst [vmem:[#allocation37_spill] sm:$0xff] %v8457_v47 }
 0x313   :  { %v2278_v51 = vmul.f32 0.7978846, %v2022_v20  ;;  %v1770_v61 = vmul.f32 0.044715, %v1514_v13  ;;  %v1513_v3 = vmul.f32 %v1257_v4, %v8431_v43  ;;  %v2277_v59 = vmul.f32 0.7978846, %v2021_v21 }
 0x314   :  { %v2023_v17 = vadd.f32 %v1767_v24, %v8402_v12  ;;  %v2024_v15 = vadd.f32 %v1768_v14, %v8406_v19  ;;  %v1515_v58 = vmul.f32 %v1259_v7, %v8439_v53  ;;  %5020 = vtanh.f32 %v2276_v46  ;;  %v10336_v57 = vld [vmem:[#allocation73_spill] sm:$0xff]  ;;  %v8461_v13 = vpop.f32.mrb[125].mxu1  ;;  %v10338_v19 = vld [vmem:[#allocation40_spill] sm:$0xff]  ;;  %v8465_v12 = vpop.f32.mrb[126].mxu0 }
 0x315   :  { %v2026_v62 = vadd.f32 %v1770_v61, %v8414_v30  ;;  %v1769_v36 = vmul.f32 0.044715, %v1513_v3  ;;  %v2748_v20 = vadd.f32 1.0, %v10336_v57  ;;  %10337 = vst [vmem:[#allocation44_spill] sm:$0xff] %v8461_v13  ;;  %5022 = vtanh.f32 %v2278_v51  ;;  %10339 = vst [vmem:[#allocation47_spill] sm:$0xff] %v8465_v12  ;;  %v8467_v46 = vpop.f32.mrb[126].mxu1 }
 0x316   :  { %v2279_v4 = vmul.f32 0.7978846, %v2023_v17  ;;  %v2280_v21 = vmul.f32 0.7978846, %v2024_v15  ;;  %v1771_v24 = vmul.f32 0.044715, %v1515_v58  ;;  %5024 = vtanh.f32 %v2277_v59 }
 0x317   :  { %v2282_v14 = vmul.f32 0.7978846, %v2026_v62  ;;  %v2025_v7 = vadd.f32 %v1769_v36, %v8431_v43  ;;  %v2752_v8 = vadd.f32 1.0, %v10338_v19  ;;  %10340 = vst [vmem:[#allocation49_spill] sm:$0xff] %v8467_v46  ;;  %v3004_v61 = vmul.f32 0.5, %v2748_v20  ;;  %v10341_v57 = vld [vmem:[#allocation68_spill] sm:$0xff] }
 0x318   :  { %5026 = vtanh.f32 %v2279_v4  ;;  %v2027_v3 = vadd.f32 %v1771_v24, %v8439_v53  ;;  %v2750_v13 = vadd.f32 1.0, %v10341_v57  ;;  %v8471_v51 = vpop.f32.mrb[127].mxu0  ;;  %v10343_v17 = vld [vmem:[#allocation26_spill] sm:$0xff]  ;;  %v8474_v62 = vpop.f32.mrb[127].mxu1  ;;  %v10345_v36 = vld [vmem:[#allocation56_spill] sm:$0xff]  ;;  %v10346_v4 = vld [vmem:[#allocation45_spill] sm:$0xff] }
 0x319   :  { %10342 = vst [vmem:[#allocation32_spill] sm:$0xff] %v8471_v51  ;;  %5028 = vtanh.f32 %v2280_v21  ;;  %v2281_v58 = vmul.f32 0.7978846, %v2025_v7  ;;  %v3008_v59 = vmul.f32 0.5, %v2752_v8  ;;  %v2754_v15 = vadd.f32 1.0, %v10343_v17  ;;  %10344 = vst [vmem:[#allocation74_spill] sm:$0xff] %v8474_v62 }
 0x31a   :  { %5030 = vtanh.f32 %v2282_v14  ;;  %v2283_v19 = vmul.f32 0.7978846, %v2027_v3  ;;  %v3260_v12 = vmul.f32 %v3004_v61, %v10345_v36  ;;  %v3006_v46 = vmul.f32 0.5, %v2750_v13  ;;  %v10347_v51 = vld [vmem:[#allocation62_spill] sm:$0xff] }
 0x31b   :  { %5032 = vtanh.f32 %v2281_v58  ;;  %v3264_v24 = vmul.f32 %v3008_v59, %v10346_v4  ;;  %v3010_v20 = vmul.f32 0.5, %v2754_v15  ;;  %v2757_v57 = vadd.f32 1.0, %v8059_v1  ;;  %v10348_v62 = vld [vmem:[#allocation14_spill] sm:$0xff]  ;;  %v10351_v1 = vld [vmem:[#allocation75_spill] sm:$0xff]  ;;  %v10356_v4 = vld [vmem:[#allocation77_spill] sm:$0xff] }
 0x31c   :  { %5034 = vtanh.f32 %v2283_v19  ;;  %v3262_v21 = vmul.f32 %v3006_v46, %v10347_v51  ;;  %v2761_v8 = vadd.f32 1.0, %v8097_v31  ;;  %v2759_v7 = vadd.f32 1.0, %v8072_v10  ;;  %v10349_v59 = vld [vmem:[#allocation54_spill] sm:$0xff]  ;;  %v10354_v51 = vld [vmem:[#allocation53_spill] sm:$0xff] }
 0x31d   :  { %v3436_v17 = vpack.c.bf16 %v3264_v24, %v3260_v12  ;;  %v3266_v14 = vmul.f32 %v3010_v20, %v10348_v62  ;;  %v3013_v3 = vmul.f32 0.5, %v2757_v57  ;;  %v2763_v61 = vadd.f32 1.0, %v8105_v32 }
 0x31e   :  { %v3017_v13 = vmul.f32 0.5, %v2761_v8  ;;  %v3015_v58 = vmul.f32 0.5, %v2759_v7  ;;  %v8486_v15 = vadd.f32 %v10349_v59, %v5576_v28  ;;  %v8490_v19 = vadd.f32 %v10351_v1, %v5578_v29  ;;  %v8492_v46 = vpop.eup %5020  ;;  %v10357_v7 = vld [vmem:[#allocation52_spill] sm:$0xff] }
 0x31f   :  { %10353 = vst [vmem:[#allocation68_spill] sm:$0xff] %v8492_v46  ;;  %3940 = vmatmul.mubr.bf16.gmra.mrb[208].mxu0 %v3436_v17  ;;  %v3438_v10 = vpack.c.bf16 %v3266_v14, %v3262_v21  ;;  %v3269_v31 = vmul.f32 %v3013_v3, %v7937_v39  ;;  %v3019_v12 = vmul.f32 0.5, %v2763_v61  ;;  %v8497_v32 = vadd.f32 %v10354_v51, %v5580_v33  ;;  %v8499_v62 = vpop.eup %5022 }
 0x320   :  { %10350 = vst [vmem:[#allocation73_spill] sm:$0xff] %v8486_v15  ;;  %10352 = vst [vmem:[#allocation40_spill] sm:$0xff] %v8490_v19  ;;  %v3273_v36 = vmul.f32 %v3017_v13, %v7983_v49  ;;  %v3271_v24 = vmul.f32 %v3015_v58, %v10356_v4  ;;  %v1260_v20 = vmul.f32 %v8486_v15, %v8486_v15  ;;  %v8507_v21 = vpop.eup %5024  ;;  %v10358_v49 = vld [vmem:[#allocation58_spill] sm:$0xff] }
 0x321   :  { %10355 = vst [vmem:[#allocation26_spill] sm:$0xff] %v8499_v62  ;;  %v1262_v57 = vmul.f32 %v8490_v19, %v8490_v19  ;;  %4229 = vmatmul.mubr.bf16.gmra.mrb[208].mxu1 %v3438_v10  ;;  %v3275_v39 = vmul.f32 %v3019_v12, %v7991_v38  ;;  %v1261_v8 = vmul.f32 %v8497_v32, %v8497_v32  ;;  %v10360_v38 = vld [vmem:[#allocation29_spill] sm:$0xff] }
 0x322   :  { %v8514_v17 = vadd.f32 %v10357_v7, %v5582_v34  ;;  %v8518_v14 = vadd.f32 %v10358_v49, %v5576_v28  ;;  %v8520_v3 = vpop.eup %5026  ;;  %v3441_v61 = vpack.c.bf16 %v3273_v36, %v3269_v31  ;;  %v1516_v13 = vmul.f32 %v1260_v20, %v8486_v15  ;;  %v8535_v31 = vpop.f32.mrb[128].mxu0 }
 0x323   :  { %v1518_v58 = vmul.f32 %v1262_v57, %v8490_v19  ;;  %v8526_v59 = vadd.f32 %v10360_v38, %v5578_v29  ;;  %v8528_v1 = vpop.eup %5028  ;;  %v3443_v10 = vpack.c.bf16 %v3275_v39, %v3271_v24  ;;  %v1517_v12 = vmul.f32 %v1261_v8, %v8497_v32  ;;  %10363 = vst [vmem:[#allocation14_spill] sm:$0xff] %v8535_v31  ;;  %v8537_v36 = vpop.f32.mrb[128].mxu1  ;;  %v10366_v39 = vld [vmem:[#allocation59_spill] sm:$0xff] }
 0x324   :  { %10359 = vst [vmem:[#allocation56_spill] sm:$0xff] %v8518_v14  ;;  %10362 = vst [vmem:[#allocation62_spill] sm:$0xff] %v8528_v1  ;;  %v1263_v51 = vmul.f32 %v8514_v17, %v8514_v17  ;;  %v1264_v4 = vmul.f32 %v8518_v14, %v8518_v14  ;;  %v8539_v20 = vpop.eup %5030  ;;  %3947 = vmatprep.mubr.bf16.mxu0 %v3441_v61  ;;  %v1772_v57 = vmul.f32 0.044715, %v1516_v13  ;;  %v3783_v49 = vpop.f32.mrb[129].mxu0  ;;  %v10367_v61 = vld [vmem:[#allocation39_spill] sm:$0xff] }
 0x325   :  { %10361 = vst [vmem:[#allocation45_spill] sm:$0xff] %v8526_v59  ;;  %10364 = vst [vmem:[#allocation54_spill] sm:$0xff] %v8537_v36  ;;  %v1774_v7 = vmul.f32 0.044715, %v1518_v58  ;;  %v1266_v24 = vmul.f32 %v8526_v59, %v8526_v59  ;;  %v8545_v8 = vadd.f32 %v10366_v39, %v5580_v33  ;;  %v4072_v38 = vpop.f32.mrb[129].mxu1  ;;  %v8547_v47 = vpop.eup %5032  ;;  %4236 = vmatprep.mubr.bf16.mxu1 %v3443_v10 }
 0x326   :  { %10365 = vst [vmem:[#allocation75_spill] sm:$0xff] %v8539_v20  ;;  %v1773_v31 = vmul.f32 0.044715, %v1517_v12  ;;  %v1519_v36 = vmul.f32 %v1263_v51, %v8514_v17  ;;  %v1520_v30 = vmul.f32 %v1264_v4, %v8518_v14  ;;  %v8553_v13 = vadd.f32 %v10367_v61, %v5582_v34  ;;  %v8555_v58 = vpop.f32.mrb[130].mxu0  ;;  %v8557_v20 = vpop.f32.mrb[130].mxu1 }
 0x327   :  { %10368 = vst [vmem:[#allocation53_spill] sm:$0xff] %v8555_v58  ;;  %10369 = vst [vmem:[#allocation77_spill] sm:$0xff] %v8557_v20  ;;  %v8559_v39 = vpop.eup %5034  ;;  %v2028_v49 = vadd.f32 %v1772_v57, %v8486_v15  ;;  %v2030_v38 = vadd.f32 %v1774_v7, %v8490_v19  ;;  %v1522_v10 = vmul.f32 %v1266_v24, %v8526_v59  ;;  %v3786_v51 = vpop.f32.mrb[131].mxu0 }
 0x328   :  { %v1265_v12 = vmul.f32 %v8545_v8, %v8545_v8  ;;  %v4075_v4 = vpop.f32.mrb[131].mxu1  ;;  %v2029_v61 = vadd.f32 %v1773_v31, %v8497_v32  ;;  %v1775_v62 = vmul.f32 0.044715, %v1519_v36  ;;  %v1776_v1 = vmul.f32 0.044715, %v1520_v30  ;;  %v8577_v15 = vpop.f32.mrb[132].mxu0 }
 0x329   :  { %v1267_v20 = vmul.f32 %v8553_v13, %v8553_v13  ;;  %v2284_v58 = vmul.f32 0.7978846, %v2028_v49  ;;  %v2286_v46 = vmul.f32 0.7978846, %v2030_v38  ;;  %v1778_v53 = vmul.f32 0.044715, %v1522_v10 }
 0x32a   :  { %v1521_v57 = vmul.f32 %v1265_v12, %v8545_v8  ;;  %v2285_v7 = vmul.f32 0.7978846, %v2029_v61  ;;  %v2031_v24 = vadd.f32 %v1775_v62, %v8514_v17  ;;  %v2032_v19 = vadd.f32 %v1776_v1, %v8518_v14  ;;  %v10370_v61 = vld [vmem:[#allocation82_spill] sm:$0xff]  ;;  %10371 = vst [vmem:[#allocation52_spill] sm:$0xff] %v8577_v15  ;;  %v8579_v1 = vpop.f32.mrb[132].mxu1 }
 0x32b   :  { %v1523_v51 = vmul.f32 %v1267_v20, %v8553_v13  ;;  %5036 = vtanh.f32 %v2284_v58  ;;  %v2034_v31 = vadd.f32 %v1778_v53, %v8526_v59  ;;  %v2756_v30 = vadd.f32 1.0, %v8044_v54  ;;  %10372 = vst [vmem:[#allocation58_spill] sm:$0xff] %v8579_v1  ;;  %v10373_v58 = vld [vmem:[#allocation46_spill] sm:$0xff]  ;;  %v10377_v1 = vld [vmem:[#allocation60_spill] sm:$0xff] }
 0x32c   :  { %v1777_v36 = vmul.f32 0.044715, %v1521_v57  ;;  %5038 = vtanh.f32 %v2286_v46  ;;  %v2287_v4 = vmul.f32 0.7978846, %v2031_v24  ;;  %v2288_v49 = vmul.f32 0.7978846, %v2032_v19 }
 0x32d   :  { %v1779_v38 = vmul.f32 0.044715, %v1523_v51  ;;  %5040 = vtanh.f32 %v2285_v7  ;;  %v2290_v10 = vmul.f32 0.7978846, %v2034_v31  ;;  %v2760_v62 = vadd.f32 1.0, %v10370_v61  ;;  %v3791_v46 = vpop.f32.mrb[133].mxu0 }
 0x32e   :  { %v2033_v12 = vadd.f32 %v1777_v36, %v8545_v8  ;;  %5042 = vtanh.f32 %v2287_v4  ;;  %v3012_v20 = vmul.f32 0.5, %v2756_v30  ;;  %v2758_v54 = vadd.f32 1.0, %v10373_v58  ;;  %v4080_v57 = vpop.f32.mrb[133].mxu1  ;;  %v10374_v24 = vld [vmem:[#allocation16_spill] sm:$0xff]  ;;  %v8584_v31 = vpop.f32.mrb[134].mxu0  ;;  %v10378_v58 = vld [vmem:[#allocation61_spill] sm:$0xff] }
 0x32f   :  { %v2035_v53 = vadd.f32 %v1779_v38, %v8553_v13  ;;  %5044 = vtanh.f32 %v2288_v49  ;;  %v3016_v7 = vmul.f32 0.5, %v2760_v62  ;;  %v2762_v51 = vadd.f32 1.0, %v10374_v24  ;;  %10375 = vst [vmem:[#allocation29_spill] sm:$0xff] %v8584_v31  ;;  %v8586_v36 = vpop.f32.mrb[134].mxu1  ;;  %v3794_v38 = vpop.f32.mrb[135].mxu0 }
 0x330   :  { %v2289_v19 = vmul.f32 0.7978846, %v2033_v12  ;;  %10376 = vst [vmem:[#allocation59_spill] sm:$0xff] %v8586_v36  ;;  %5046 = vtanh.f32 %v2290_v10  ;;  %v3268_v4 = vmul.f32 %v3012_v20, %v10377_v1  ;;  %v3014_v15 = vmul.f32 0.5, %v2758_v54  ;;  %v4083_v30 = vpop.f32.mrb[135].mxu1  ;;  %v10379_v12 = vld [vmem:[#allocation83_spill] sm:$0xff] }
 0x331   :  { %v2291_v61 = vmul.f32 0.7978846, %v2035_v53  ;;  %v3272_v46 = vmul.f32 %v3016_v7, %v10378_v58  ;;  %v3018_v57 = vmul.f32 0.5, %v2762_v51  ;;  %v2765_v49 = vadd.f32 1.0, %v8171_v26  ;;  %v10380_v53 = vld [vmem:[#allocation63_spill] sm:$0xff]  ;;  %v10381_v7 = vld [vmem:[#allocation64_spill] sm:$0xff] }
 0x332   :  { %5048 = vtanh.f32 %v2289_v19  ;;  %v3270_v62 = vmul.f32 %v3014_v15, %v10379_v12  ;;  %v2769_v24 = vadd.f32 1.0, %v8209_v45  ;;  %v2767_v36 = vadd.f32 1.0, %v8184_v2  ;;  %v10383_v26 = vld [vmem:[#allocation70_spill] sm:$0xff]  ;;  %v8604_v15 = vpop.f32.mrb[136].mxu0  ;;  %v8606_v45 = vpop.f32.mrb[136].mxu1 }
 0x333   :  { %5050 = vtanh.f32 %v2291_v61  ;;  %v3440_v10 = vpack.c.bf16 %v3272_v46, %v3268_v4  ;;  %v3274_v31 = vmul.f32 %v3018_v57, %v10380_v53  ;;  %v3021_v1 = vmul.f32 0.5, %v2765_v49  ;;  %10385 = vst [vmem:[#allocation46_spill] sm:$0xff] %v8604_v15  ;;  %10386 = vst [vmem:[#allocation16_spill] sm:$0xff] %v8606_v45  ;;  %v3799_v58 = vpop.f32.mrb[137].mxu0  ;;  %v4088_v46 = vpop.f32.mrb[137].mxu1 }
 0x334   :  { %v2771_v20 = vadd.f32 1.0, %v8217_v50  ;;  %v3025_v54 = vmul.f32 0.5, %v2769_v24  ;;  %v3023_v19 = vmul.f32 0.5, %v2767_v36  ;;  %v8598_v51 = vadd.f32 %v10381_v7, %v5576_v28  ;;  %v10387_v36 = vld [vmem:[#allocation27_spill] sm:$0xff] }
 0x335   :  { %v8602_v61 = vadd.f32 %v10383_v26, %v5578_v29  ;;  %v8608_v2 = vpop.eup %5036  ;;  %3948 = vmatmul.mubr.bf16.gmra.mrb[212].mxu0 %v3440_v10  ;;  %v3442_v4 = vpack.c.bf16 %v3274_v31, %v3270_v62  ;;  %v3277_v50 = vmul.f32 %v3021_v1, %v8049_v37  ;;  %v8613_v30 = vadd.f32 %v10387_v36, %v5580_v33  ;;  %v8623_v37 = vpop.f32.mrb[138].mxu0 }
 0x336   :  { %10382 = vst [vmem:[#allocation39_spill] sm:$0xff] %v8598_v51  ;;  %v3027_v38 = vmul.f32 0.5, %v2771_v20  ;;  %v8615_v57 = vpop.eup %5038  ;;  %v3281_v49 = vmul.f32 %v3025_v54, %v8095_v9  ;;  %v3279_v12 = vmul.f32 %v3023_v19, %v8066_v44  ;;  %v1268_v24 = vmul.f32 %v8598_v51, %v8598_v51  ;;  %10390 = vst [vmem:[#allocation83_spill] sm:$0xff] %v8623_v37  ;;  %v8625_v62 = vpop.f32.mrb[138].mxu1  ;;  %v10392_v44 = vld [vmem:[#allocation43_spill] sm:$0xff]  ;;  %v10399_v37 = vld [vmem:[#allocation65_spill] sm:$0xff] }
 0x337   :  { %10384 = vst [vmem:[#allocation82_spill] sm:$0xff] %v8602_v61  ;;  %10388 = vst [vmem:[#allocation60_spill] sm:$0xff] %v8613_v30  ;;  %v1270_v31 = vmul.f32 %v8602_v61, %v8602_v61  ;;  %v8627_v10 = vpop.eup %5040  ;;  %4237 = vmatmul.mubr.bf16.gmra.mrb[212].mxu1 %v3442_v4  ;;  %v1269_v9 = vmul.f32 %v8613_v30, %v8613_v30  ;;  %v8634_v1 = vadd.f32 %v10392_v44, %v5582_v34  ;;  %v10393_v20 = vld [vmem:[#allocation35_spill] sm:$0xff]  ;;  %v3802_v19 = vpop.f32.mrb[139].mxu0 }
 0x338   :  { %10389 = vst [vmem:[#allocation61_spill] sm:$0xff] %v8615_v57  ;;  %10391 = vst [vmem:[#allocation63_spill] sm:$0xff] %v8625_v62  ;;  %v3283_v53 = vmul.f32 %v3027_v38, %v8103_v40  ;;  %v8638_v54 = vadd.f32 %v10393_v20, %v5576_v28  ;;  %v4091_v7 = vpop.f32.mrb[139].mxu1  ;;  %v8640_v26 = vpop.eup %5042  ;;  %v3445_v36 = vpack.c.bf16 %v3281_v49, %v3277_v50  ;;  %v10395_v38 = vld [vmem:[#allocation50_spill] sm:$0xff] }
 0x339   :  { %v1524_v4 = vmul.f32 %v1268_v24, %v8598_v51  ;;  %v1526_v40 = vmul.f32 %v1270_v31, %v8602_v61  ;;  %v8646_v58 = vadd.f32 %v10395_v38, %v5578_v29  ;;  %v8648_v46 = vpop.eup %5044  ;;  %v1525_v62 = vmul.f32 %v1269_v9, %v8613_v30  ;;  %v10398_v7 = vld [vmem:[#allocation51_spill] sm:$0xff]  ;;  %v8683_v14 = vpop.f32.mrb[140].mxu1 }
 0x33a   :  { %10394 = vst [vmem:[#allocation64_spill] sm:$0xff] %v8638_v54  ;;  %v3447_v44 = vpack.c.bf16 %v3283_v53, %v3279_v12  ;;  %v1271_v20 = vmul.f32 %v8634_v1, %v8634_v1  ;;  %v1272_v19 = vmul.f32 %v8638_v54, %v8638_v54  ;;  %v8655_v50 = vpop.eup %5046  ;;  %3955 = vmatprep.mubr.bf16.mxu0 %v3445_v36  ;;  %10401 = vst [vmem:[#allocation35_spill] sm:$0xff] %v8683_v14 }
 0x33b   :  { %10396 = vst [vmem:[#allocation70_spill] sm:$0xff] %v8646_v58  ;;  %10397 = vst [vmem:[#allocation27_spill] sm:$0xff] %v8655_v50  ;;  %v1780_v49 = vmul.f32 0.044715, %v1524_v4  ;;  %v1782_v24 = vmul.f32 0.044715, %v1526_v40  ;;  %v1274_v31 = vmul.f32 %v8646_v58, %v8646_v58  ;;  %v8661_v38 = vadd.f32 %v10398_v7, %v5580_v33 }
 0x33c   :  { %v8663_v12 = vpop.eup %5048  ;;  %4244 = vmatprep.mubr.bf16.mxu1 %v3447_v44  ;;  %v1781_v53 = vmul.f32 0.044715, %v1525_v62  ;;  %v1527_v9 = vmul.f32 %v1271_v20, %v8634_v1  ;;  %v1528_v45 = vmul.f32 %v1272_v19, %v8638_v54  ;;  %v8669_v36 = vadd.f32 %v10399_v37, %v5582_v34  ;;  %v8681_v37 = vpop.f32.mrb[140].mxu0 }
 0x33d   :  { %v8671_v4 = vpop.eup %5050  ;;  %v2036_v40 = vadd.f32 %v1780_v49, %v8598_v51  ;;  %v2038_v15 = vadd.f32 %v1782_v24, %v8602_v61  ;;  %v1530_v7 = vmul.f32 %v1274_v31, %v8646_v58  ;;  %v1273_v44 = vmul.f32 %v8661_v38, %v8661_v38  ;;  %10400 = vst [vmem:[#allocation43_spill] sm:$0xff] %v8681_v37 }
 0x33e   :  { %v2037_v62 = vadd.f32 %v1781_v53, %v8613_v30  ;;  %v1783_v20 = vmul.f32 0.044715, %v1527_v9  ;;  %v1784_v59 = vmul.f32 0.044715, %v1528_v45  ;;  %v1275_v19 = vmul.f32 %v8669_v36, %v8669_v36  ;;  %v3807_v45 = vpop.f32.mrb[141].mxu0  ;;  %v4096_v9 = vpop.f32.mrb[141].mxu1 }
 0x33f   :  { %v2292_v50 = vmul.f32 0.7978846, %v2036_v40  ;;  %v2294_v49 = vmul.f32 0.7978846, %v2038_v15  ;;  %v1786_v51 = vmul.f32 0.044715, %v1530_v7  ;;  %v1529_v24 = vmul.f32 %v1273_v44, %v8661_v38 }
 0x340   :  { %v2293_v31 = vmul.f32 0.7978846, %v2037_v62  ;;  %v2039_v61 = vadd.f32 %v1783_v20, %v8634_v1  ;;  %v2040_v57 = vadd.f32 %v1784_v59, %v8638_v54  ;;  %v1531_v53 = vmul.f32 %v1275_v19, %v8669_v36  ;;  %v8691_v40 = vpop.f32.mrb[142].mxu0  ;;  %v8693_v15 = vpop.f32.mrb[142].mxu1  ;;  %v10404_v19 = vld [vmem:[#allocation99_spill] sm:$0xff] }
 0x341   :  { %5052 = vtanh.f32 %v2292_v50  ;;  %v2042_v30 = vadd.f32 %v1786_v51, %v8646_v58  ;;  %v1785_v37 = vmul.f32 0.044715, %v1529_v24  ;;  %v2764_v14 = vadd.f32 1.0, %v8156_v16  ;;  %10402 = vst [vmem:[#allocation50_spill] sm:$0xff] %v8691_v40  ;;  %10403 = vst [vmem:[#allocation51_spill] sm:$0xff] %v8693_v15  ;;  %v3810_v50 = vpop.f32.mrb[143].mxu0 }
 0x342   :  { %5054 = vtanh.f32 %v2294_v49  ;;  %v2295_v7 = vmul.f32 0.7978846, %v2039_v61  ;;  %v2296_v44 = vmul.f32 0.7978846, %v2040_v57  ;;  %v1787_v62 = vmul.f32 0.044715, %v1531_v53 }
 0x343   :  { %5056 = vtanh.f32 %v2293_v31  ;;  %v2298_v59 = vmul.f32 0.7978846, %v2042_v30  ;;  %v2041_v20 = vadd.f32 %v1785_v37, %v8661_v38  ;;  %v2768_v45 = vadd.f32 1.0, %v10404_v19  ;;  %v4099_v9 = vpop.f32.mrb[143].mxu1  ;;  %v10405_v24 = vld [vmem:[#allocation24_spill] sm:$0xff]  ;;  %v10406_v61 = vld [vmem:[#allocation17_spill] sm:$0xff] }
 0x344   :  { %5058 = vtanh.f32 %v2295_v7  ;;  %v2043_v51 = vadd.f32 %v1787_v62, %v8669_v36  ;;  %v3020_v16 = vmul.f32 0.5, %v2764_v14  ;;  %v2766_v40 = vadd.f32 1.0, %v10405_v24  ;;  %v10407_v30 = vld [vmem:[#allocation67_spill] sm:$0xff]  ;;  %v8701_v58 = vpop.f32.mrb[144].mxu0  ;;  %v8703_v19 = vpop.f32.mrb[144].mxu1  ;;  %v10410_v7 = vld [vmem:[#allocation89_spill] sm:$0xff] }
 0x345   :  { %5060 = vtanh.f32 %v2296_v44  ;;  %v2297_v15 = vmul.f32 0.7978846, %v2041_v20  ;;  %v3024_v49 = vmul.f32 0.5, %v2768_v45  ;;  %v2770_v57 = vadd.f32 1.0, %v10406_v61  ;;  %10408 = vst [vmem:[#allocation65_spill] sm:$0xff] %v8701_v58  ;;  %10409 = vst [vmem:[#allocation99_spill] sm:$0xff] %v8703_v19 }
 0x346   :  { %5062 = vtanh.f32 %v2298_v59  ;;  %v2299_v31 = vmul.f32 0.7978846, %v2043_v51  ;;  %v3276_v53 = vmul.f32 %v3020_v16, %v10407_v30  ;;  %v3022_v37 = vmul.f32 0.5, %v2766_v40  ;;  %v3815_v44 = vpop.f32.mrb[145].mxu0  ;;  %v4104_v20 = vpop.f32.mrb[145].mxu1  ;;  %v10411_v45 = vld [vmem:[#allocation92_spill] sm:$0xff] }
 0x347   :  { %5064 = vtanh.f32 %v2297_v15  ;;  %v3280_v62 = vmul.f32 %v3024_v49, %v10410_v7  ;;  %v3026_v14 = vmul.f32 0.5, %v2770_v57  ;;  %v2773_v50 = vadd.f32 1.0, %v8283_v56  ;;  %v8710_v40 = vpop.f32.mrb[146].mxu0  ;;  %v8712_v16 = vpop.f32.mrb[146].mxu1  ;;  %v10414_v15 = vld [vmem:[#allocation81_spill] sm:$0xff] }
 0x348   :  { %5066 = vtanh.f32 %v2299_v31  ;;  %v3278_v9 = vmul.f32 %v3022_v37, %v10411_v45  ;;  %v2777_v59 = vadd.f32 1.0, %v8321_v55  ;;  %v2775_v51 = vadd.f32 1.0, %v8296_v23  ;;  %10412 = vst [vmem:[#allocation24_spill] sm:$0xff] %v8710_v40  ;;  %10413 = vst [vmem:[#allocation17_spill] sm:$0xff] %v8712_v16  ;;  %v3818_v56 = vpop.f32.mrb[147].mxu0  ;;  %v4107_v30 = vpop.f32.mrb[147].mxu1 }
 0x349   :  { %v3444_v24 = vpack.c.bf16 %v3280_v62, %v3276_v53  ;;  %v3282_v61 = vmul.f32 %v3026_v14, %v10414_v15  ;;  %v3029_v49 = vmul.f32 0.5, %v2773_v50  ;;  %v2779_v57 = vadd.f32 1.0, %v8329_v11  ;;  %v10415_v37 = vld [vmem:[#allocation69_spill] sm:$0xff]  ;;  %v10419_v11 = vld [vmem:[#allocation76_spill] sm:$0xff] }
 0x34a   :  { %v3033_v7 = vmul.f32 0.5, %v2777_v59  ;;  %v3031_v31 = vmul.f32 0.5, %v2775_v51  ;;  %v8718_v44 = vadd.f32 %v10415_v37, %v5576_v28  ;;  %v10417_v23 = vld [vmem:[#allocation57_spill] sm:$0xff]  ;;  %v8729_v50 = vadd.f32 %v10419_v11, %v5580_v33  ;;  %v10424_v56 = vld [vmem:[#allocation72_spill] sm:$0xff] }
 0x34b   :  { %v8722_v55 = vadd.f32 %v10417_v23, %v5578_v29  ;;  %v8724_v20 = vpop.eup %5052  ;;  %3956 = vmatmul.mubr.bf16.gmra.mrb[216].mxu0 %v3444_v24  ;;  %v3446_v53 = vpack.c.bf16 %v3282_v61, %v3278_v9  ;;  %v3285_v62 = vmul.f32 %v3029_v49, %v8161_v6  ;;  %v3035_v14 = vmul.f32 0.5, %v2779_v57  ;;  %v8739_v9 = vpop.f32.mrb[148].mxu0 }
 0x34c   :  { %10416 = vst [vmem:[#allocation67_spill] sm:$0xff] %v8718_v44  ;;  %v8731_v45 = vpop.eup %5054  ;;  %v3289_v59 = vmul.f32 %v3033_v7, %v8207_v5  ;;  %v3287_v51 = vmul.f32 %v3031_v31, %v8178_v0  ;;  %v1276_v15 = vmul.f32 %v8718_v44, %v8718_v44  ;;  %10421 = vst [vmem:[#allocation81_spill] sm:$0xff] %v8739_v9  ;;  %v8741_v6 = vpop.f32.mrb[148].mxu1  ;;  %v10423_v0 = vld [vmem:[#allocation91_spill] sm:$0xff] }
 0x34d   :  { %10418 = vst [vmem:[#allocation89_spill] sm:$0xff] %v8722_v55  ;;  %10420 = vst [vmem:[#allocation92_spill] sm:$0xff] %v8731_v45  ;;  %v1278_v24 = vmul.f32 %v8722_v55, %v8722_v55  ;;  %v8743_v61 = vpop.eup %5056  ;;  %4245 = vmatmul.mubr.bf16.gmra.mrb[216].mxu1 %v3446_v53  ;;  %v3291_v49 = vmul.f32 %v3035_v14, %v8215_v22  ;;  %v1277_v5 = vmul.f32 %v8729_v50, %v8729_v50  ;;  %v3823_v7 = vpop.f32.mrb[149].mxu0  ;;  %v10426_v14 = vld [vmem:[#allocation31_spill] sm:$0xff] }
 0x34e   :  { %10422 = vst [vmem:[#allocation69_spill] sm:$0xff] %v8741_v6  ;;  %v8750_v57 = vadd.f32 %v10423_v0, %v5582_v34  ;;  %v8754_v30 = vadd.f32 %v10424_v56, %v5576_v28  ;;  %v4112_v31 = vpop.f32.mrb[149].mxu1  ;;  %v8756_v37 = vpop.eup %5058  ;;  %v3449_v23 = vpack.c.bf16 %v3289_v59, %v3285_v62  ;;  %v1532_v53 = vmul.f32 %v1276_v15, %v8718_v44 }
 0x34f   :  { %v1534_v22 = vmul.f32 %v1278_v24, %v8722_v55  ;;  %v8762_v11 = vadd.f32 %v10426_v14, %v5578_v29  ;;  %v8764_v6 = vpop.f32.mrb[150].mxu0  ;;  %v8766_v0 = vpop.f32.mrb[150].mxu1  ;;  %v3451_v56 = vpack.c.bf16 %v3291_v49, %v3287_v51  ;;  %v1533_v7 = vmul.f32 %v1277_v5, %v8729_v50  ;;  %v10432_v51 = vld [vmem:[#allocation78_spill] sm:$0xff] }
 0x350   :  { %10425 = vst [vmem:[#allocation57_spill] sm:$0xff] %v8754_v30  ;;  %10428 = vst [vmem:[#allocation91_spill] sm:$0xff] %v8764_v6  ;;  %v8768_v9 = vpop.eup %5060  ;;  %v1279_v62 = vmul.f32 %v8750_v57, %v8750_v57  ;;  %v1280_v59 = vmul.f32 %v8754_v30, %v8754_v30  ;;  %v3826_v15 = vpop.f32.mrb[151].mxu0  ;;  %3963 = vmatprep.mubr.bf16.mxu0 %v3449_v23  ;;  %v1788_v14 = vmul.f32 0.044715, %v1532_v53  ;;  %v10435_v53 = vld [vmem:[#allocation79_spill] sm:$0xff] }
 0x351   :  { %10427 = vst [vmem:[#allocation76_spill] sm:$0xff] %v8762_v11  ;;  %10429 = vst [vmem:[#allocation72_spill] sm:$0xff] %v8766_v0  ;;  %v4115_v24 = vpop.f32.mrb[151].mxu1  ;;  %v8775_v31 = vpop.eup %5062  ;;  %v1790_v6 = vmul.f32 0.044715, %v1534_v22  ;;  %v1282_v0 = vmul.f32 %v8762_v11, %v8762_v11  ;;  %v8781_v49 = vadd.f32 %v10432_v51, %v5580_v33  ;;  %4252 = vmatprep.mubr.bf16.mxu1 %v3451_v56 }
 0x352   :  { %10430 = vst [vmem:[#allocation31_spill] sm:$0xff] %v8768_v9  ;;  %10431 = vst [vmem:[#allocation100_spill] sm:$0xff] %v8775_v31  ;;  %v8783_v5 = vpop.f32.mrb[152].mxu0  ;;  %v8785_v16 = vpop.f32.mrb[152].mxu1  ;;  %v1789_v15 = vmul.f32 0.044715, %v1533_v7  ;;  %v1535_v24 = vmul.f32 %v1279_v62, %v8750_v57  ;;  %v1536_v23 = vmul.f32 %v1280_v59, %v8754_v30  ;;  %v8793_v22 = vadd.f32 %v10435_v53, %v5582_v34 }
 0x353   :  { %10433 = vst [vmem:[#allocation78_spill] sm:$0xff] %v8783_v5  ;;  %10434 = vst [vmem:[#allocation101_spill] sm:$0xff] %v8785_v16  ;;  %v8787_v19 = vpop.eup %5064  ;;  %v3831_v40 = vpop.f32.mrb[153].mxu0  ;;  %v2044_v5 = vadd.f32 %v1788_v14, %v8718_v44  ;;  %v2046_v16 = vadd.f32 %v1790_v6, %v8722_v55  ;;  %v1538_v54 = vmul.f32 %v1282_v0, %v8762_v11 }
 0x354   :  { %v4120_v58 = vpop.f32.mrb[153].mxu1  ;;  %v8795_v51 = vpop.eup %5066  ;;  %v1281_v56 = vmul.f32 %v8781_v49, %v8781_v49  ;;  %v2045_v59 = vadd.f32 %v1789_v15, %v8729_v50  ;;  %v1791_v53 = vmul.f32 0.044715, %v1535_v24  ;;  %v1792_v40 = vmul.f32 0.044715, %v1536_v23 }
 0x355   :  { %v8802_v7 = vpop.f32.mrb[154].mxu0  ;;  %v8804_v62 = vpop.f32.mrb[154].mxu1  ;;  %v1283_v58 = vmul.f32 %v8793_v22, %v8793_v22  ;;  %v2300_v44 = vmul.f32 0.7978846, %v2044_v5  ;;  %v2302_v6 = vmul.f32 0.7978846, %v2046_v16 }
 0x356   :  { %10436 = vst [vmem:[#allocation79_spill] sm:$0xff] %v8802_v7  ;;  %10437 = vst [vmem:[#allocation102_spill] sm:$0xff] %v8804_v62  ;;  %v3834_v31 = vpop.f32.mrb[155].mxu0  ;;  %v4123_v14 = vpop.f32.mrb[155].mxu1  ;;  %v1794_v55 = vmul.f32 0.044715, %v1538_v54  ;;  %v1537_v0 = vmul.f32 %v1281_v56, %v8781_v49  ;;  %v2047_v9 = vadd.f32 %v1791_v53, %v8750_v57  ;;  %v2048_v7 = vadd.f32 %v1792_v40, %v8754_v30 }
 0x357   :  { %v2301_v45 = vmul.f32 0.7978846, %v2045_v59  ;;  %v1539_v62 = vmul.f32 %v1283_v58, %v8793_v22  ;;  %v8813_v15 = vpop.f32.mrb[156].mxu0  ;;  %v8815_v24 = vpop.f32.mrb[156].mxu1  ;;  %5068 = vtanh.f32 %v2300_v44  ;;  %v2772_v16 = vadd.f32 1.0, %v8268_v42 }
 0x358   :  { %10438 = vst [vmem:[#allocation103_spill] sm:$0xff] %v8813_v15  ;;  %10439 = vst [vmem:[#allocation104_spill] sm:$0xff] %v8815_v24  ;;  %v2050_v31 = vadd.f32 %v1794_v55, %v8762_v11  ;;  %v1793_v23 = vmul.f32 0.044715, %v1537_v0  ;;  %v3839_v54 = vpop.f32.mrb[157].mxu0  ;;  %v4128_v5 = vpop.f32.mrb[157].mxu1  ;;  %5070 = vtanh.f32 %v2302_v6 }
 0x359   :  { %v2303_v56 = vmul.f32 0.7978846, %v2047_v9  ;;  %v2304_v59 = vmul.f32 0.7978846, %v2048_v7  ;;  %v1795_v53 = vmul.f32 0.044715, %v1539_v62  ;;  %5072 = vtanh.f32 %v2301_v45 }
 0x35a   :  { %v2306_v40 = vmul.f32 0.7978846, %v2050_v31  ;;  %v2049_v58 = vadd.f32 %v1793_v23, %v8781_v49  ;;  %v2776_v14 = vadd.f32 1.0, %v8304_v52  ;;  %v8821_v15 = vpop.f32.mrb[158].mxu0  ;;  %v8823_v44 = vpop.f32.mrb[158].mxu1  ;;  %v3028_v42 = vmul.f32 0.5, %v2772_v16 }
 0x35b   :  { %10440 = vst [vmem:[#allocation105_spill] sm:$0xff] %v8821_v15  ;;  %10441 = vst [vmem:[#allocation106_spill] sm:$0xff] %v8823_v44  ;;  %5074 = vtanh.f32 %v2303_v56  ;;  %v2051_v55 = vadd.f32 %v1795_v53, %v8793_v22  ;;  %v10442_v0 = vld [vmem:[#allocation88_spill] sm:$0xff]  ;;  %v3842_v6 = vpop.f32.mrb[159].mxu0  ;;  %v4131_v9 = vpop.f32.mrb[159].mxu1  ;;  %v10443_v62 = vld [vmem:[#allocation34_spill] sm:$0xff] }
 0x35c   :  { %v2774_v54 = vadd.f32 1.0, %v10442_v0  ;;  %5076 = vtanh.f32 %v2304_v59  ;;  %v2305_v7 = vmul.f32 0.7978846, %v2049_v58  ;;  %v3032_v45 = vmul.f32 0.5, %v2776_v14  ;;  %v8828_v23 = vpop.f32.mrb[160].mxu0  ;;  %v8830_v52 = vpop.f32.mrb[160].mxu1 }
 0x35d   :  { %v2778_v31 = vadd.f32 1.0, %v10443_v62  ;;  %10444 = vst [vmem:[#allocation88_spill] sm:$0xff] %v8828_v23  ;;  %10445 = vst [vmem:[#allocation34_spill] sm:$0xff] %v8830_v52  ;;  %5078 = vtanh.f32 %v2306_v40  ;;  %v2307_v5 = vmul.f32 0.7978846, %v2051_v55  ;;  %v10446_v44 = vld [vmem:[#allocation80_spill] sm:$0xff] }
 0x35e   :  { %v3284_v56 = vmul.f32 %v3028_v42, %v10446_v44  ;;  %v3030_v24 = vmul.f32 0.5, %v2774_v54  ;;  %v3847_v53 = vpop.f32.mrb[161].mxu0  ;;  %v4136_v16 = vpop.f32.mrb[161].mxu1  ;;  %5080 = vtanh.f32 %v2305_v7  ;;  %v10447_v0 = vld [vmem:[#allocation21_spill] sm:$0xff]  ;;  %v2781_v59 = vadd.f32 1.0, %v8395_v60  ;;  %v10450_v62 = vld [vmem:[#allocation90_spill] sm:$0xff] }
 0x35f   :  { %v3288_v6 = vmul.f32 %v3032_v45, %v10447_v0  ;;  %v3034_v9 = vmul.f32 0.5, %v2778_v31  ;;  %v8835_v58 = vpop.f32.mrb[162].mxu0  ;;  %v8837_v14 = vpop.f32.mrb[162].mxu1  ;;  %5082 = vtanh.f32 %v2307_v5  ;;  %v2785_v40 = vadd.f32 1.0, %v8433_v63  ;;  %v10451_v7 = vld [vmem:[#allocation10_spill] sm:$0xff] }
 0x360   :  { %10448 = vst [vmem:[#allocation80_spill] sm:$0xff] %v8835_v58  ;;  %10449 = vst [vmem:[#allocation21_spill] sm:$0xff] %v8837_v14  ;;  %v3286_v52 = vmul.f32 %v3030_v24, %v10450_v62  ;;  %v2783_v44 = vadd.f32 1.0, %v8408_v27  ;;  %v3850_v55 = vpop.f32.mrb[163].mxu0  ;;  %v4139_v42 = vpop.f32.mrb[163].mxu1  ;;  %v3037_v45 = vmul.f32 0.5, %v2781_v59 }
 0x361   :  { %v3448_v54 = vpack.c.bf16 %v3288_v6, %v3284_v56  ;;  %v3290_v53 = vmul.f32 %v3034_v9, %v10451_v7  ;;  %v2787_v31 = vadd.f32 1.0, %v8441_v41  ;;  %v8844_v60 = vpop.f32.mrb[164].mxu0  ;;  %v8846_v16 = vpop.f32.mrb[164].mxu1  ;;  %v3041_v0 = vmul.f32 0.5, %v2785_v40  ;;  %v10454_v24 = vld [vmem:[#allocation95_spill] sm:$0xff]  ;;  %v10456_v27 = vld [vmem:[#allocation66_spill] sm:$0xff] }
 0x362   :  { %10452 = vst [vmem:[#allocation90_spill] sm:$0xff] %v8844_v60  ;;  %10453 = vst [vmem:[#allocation10_spill] sm:$0xff] %v8846_v16  ;;  %v3039_v5 = vmul.f32 0.5, %v2783_v44  ;;  %v8850_v62 = vadd.f32 %v10454_v24, %v5576_v28  ;;  %v8854_v63 = vadd.f32 %v10456_v27, %v5578_v29  ;;  %v3855_v56 = vpop.f32.mrb[165].mxu0  ;;  %v4144_v6 = vpop.f32.mrb[165].mxu1  ;;  %v3293_v59 = vmul.f32 %v3037_v45, %v8273_v18  ;;  %v10458_v40 = vld [vmem:[#allocation71_spill] sm:$0xff] }
 0x363   :  { %v8856_v9 = vpop.eup %5068  ;;  %3964 = vmatmul.mubr.bf16.gmra.mrb[220].mxu0 %v3448_v54  ;;  %v3450_v41 = vpack.c.bf16 %v3290_v53, %v3286_v52  ;;  %v3043_v55 = vmul.f32 0.5, %v2787_v31  ;;  %v8861_v44 = vadd.f32 %v10458_v40, %v5580_v33  ;;  %v8863_v42 = vpop.f32.mrb[166].mxu0  ;;  %v3297_v27 = vmul.f32 %v3041_v0, %v8319_v48  ;;  %v10463_v56 = vld [vmem:[#allocation8_spill] sm:$0xff]  ;;  %v10464_v48 = vld [vmem:[#allocation13_spill] sm:$0xff] }
 0x364   :  { %10455 = vst [vmem:[#allocation95_spill] sm:$0xff] %v8850_v62  ;;  %10457 = vst [vmem:[#allocation66_spill] sm:$0xff] %v8854_v63  ;;  %v8865_v7 = vpop.f32.mrb[166].mxu1  ;;  %v8867_v24 = vpop.eup %5070  ;;  %v3295_v6 = vmul.f32 %v3039_v5, %v10463_v56  ;;  %v1284_v52 = vmul.f32 %v8850_v62, %v8850_v62  ;;  %v1286_v18 = vmul.f32 %v8854_v63, %v8854_v63  ;;  %v10465_v5 = vld [vmem:[#allocation93_spill] sm:$0xff]  ;;  %v10469_v16 = vld [vmem:[#allocation84_spill] sm:$0xff] }
 0x365   :  { %10459 = vst [vmem:[#allocation71_spill] sm:$0xff] %v8861_v44  ;;  %10460 = vst [vmem:[#allocation107_spill] sm:$0xff] %v8863_v42  ;;  %v3858_v54 = vpop.f32.mrb[167].mxu0  ;;  %v4147_v53 = vpop.f32.mrb[167].mxu1  ;;  %4253 = vmatmul.mubr.bf16.gmra.mrb[220].mxu1 %v3450_v41  ;;  %v3299_v31 = vmul.f32 %v3043_v55, %v8327_v35  ;;  %v1285_v40 = vmul.f32 %v8861_v44, %v8861_v44  ;;  %v8882_v0 = vadd.f32 %v10464_v48, %v5582_v34 }
 0x366   :  { %10461 = vst [vmem:[#allocation108_spill] sm:$0xff] %v8865_v7  ;;  %10462 = vst [vmem:[#allocation109_spill] sm:$0xff] %v8867_v24  ;;  %v8875_v45 = vpop.eup %5072  ;;  %v8886_v56 = vadd.f32 %v10465_v5, %v5576_v28  ;;  %v8888_v7 = vpop.f32.mrb[168].mxu0  ;;  %v3453_v41 = vpack.c.bf16 %v3297_v27, %v3293_v59  ;;  %v1540_v35 = vmul.f32 %v1284_v52, %v8850_v62 }
 0x367   :  { %10467 = vst [vmem:[#allocation13_spill] sm:$0xff] %v8888_v7  ;;  %v8890_v54 = vpop.f32.mrb[168].mxu1  ;;  %v8892_v53 = vpop.eup %5074  ;;  %v1542_v55 = vmul.f32 %v1286_v18, %v8854_v63  ;;  %v8898_v14 = vadd.f32 %v10469_v16, %v5578_v29  ;;  %v3455_v5 = vpack.c.bf16 %v3299_v31, %v3295_v6  ;;  %v1541_v7 = vmul.f32 %v1285_v40, %v8861_v44  ;;  %v10475_v31 = vld [vmem:[#allocation33_spill] sm:$0xff] }
 0x368   :  { %10466 = vst [vmem:[#allocation8_spill] sm:$0xff] %v8886_v56  ;;  %10468 = vst [vmem:[#allocation93_spill] sm:$0xff] %v8890_v54  ;;  %v3863_v48 = vpop.f32.mrb[169].mxu0  ;;  %v4152_v42 = vpop.f32.mrb[169].mxu1  ;;  %v1287_v54 = vmul.f32 %v8882_v0, %v8882_v0  ;;  %v1288_v59 = vmul.f32 %v8886_v56, %v8886_v56  ;;  %3971 = vmatprep.mubr.bf16.mxu0 %v3453_v41  ;;  %v1796_v16 = vmul.f32 0.044715, %v1540_v35 }
 0x369   :  { %10470 = vst [vmem:[#allocation84_spill] sm:$0xff] %v8898_v14  ;;  %v8900_v60 = vpop.eup %5076  ;;  %v8907_v27 = vpop.f32.mrb[170].mxu0  ;;  %v1798_v42 = vmul.f32 0.044715, %v1542_v55  ;;  %v1290_v6 = vmul.f32 %v8898_v14, %v8898_v14  ;;  %v8917_v40 = vadd.f32 %v10475_v31, %v5580_v33  ;;  %4260 = vmatprep.mubr.bf16.mxu1 %v3455_v5  ;;  %v10476_v41 = vld [vmem:[#allocation85_spill] sm:$0xff] }
 0x36a   :  { %10471 = vst [vmem:[#allocation110_spill] sm:$0xff] %v8900_v60  ;;  %10472 = vst [vmem:[#allocation111_spill] sm:$0xff] %v8907_v27  ;;  %v8909_v52 = vpop.f32.mrb[170].mxu1  ;;  %v8911_v18 = vpop.eup %5078  ;;  %v1797_v27 = vmul.f32 0.044715, %v1541_v7  ;;  %v1544_v15 = vmul.f32 %v1288_v59, %v8886_v56  ;;  %v8925_v35 = vadd.f32 %v10476_v41, %v5582_v34  ;;  %v10481_v60 = vld [vmem:[#allocation48_spill] sm:$0xff] }
 0x36b   :  { %10473 = vst [vmem:[#allocation112_spill] sm:$0xff] %v8909_v52  ;;  %10474 = vst [vmem:[#allocation113_spill] sm:$0xff] %v8911_v18  ;;  %v3866_v48 = vpop.f32.mrb[171].mxu0  ;;  %v4155_v58 = vpop.f32.mrb[171].mxu1  ;;  %v1543_v52 = vmul.f32 %v1287_v54, %v8882_v0  ;;  %v1546_v7 = vmul.f32 %v1290_v6, %v8898_v14  ;;  %v1289_v54 = vmul.f32 %v8917_v40, %v8917_v40 }
 0x36c   :  { %v8919_v23 = vpop.eup %5080  ;;  %v8927_v55 = vpop.f32.mrb[172].mxu0  ;;  %v2052_v58 = vadd.f32 %v1796_v16, %v8850_v62  ;;  %v2054_v48 = vadd.f32 %v1798_v42, %v8854_v63  ;;  %v2053_v41 = vadd.f32 %v1797_v27, %v8861_v44  ;;  %v1800_v18 = vmul.f32 0.044715, %v1544_v15 }
 0x36d   :  { %10477 = vst [vmem:[#allocation33_spill] sm:$0xff] %v8927_v55  ;;  %v8929_v11 = vpop.f32.mrb[172].mxu1  ;;  %v8931_v31 = vpop.eup %5082  ;;  %v1799_v30 = vmul.f32 0.044715, %v1543_v52  ;;  %v1802_v63 = vmul.f32 0.044715, %v1546_v7  ;;  %v1545_v6 = vmul.f32 %v1289_v54, %v8917_v40 }
 0x36e   :  { %10478 = vst [vmem:[#allocation85_spill] sm:$0xff] %v8929_v11  ;;  %v3871_v5 = vpop.f32.mrb[173].mxu0  ;;  %v4160_v59 = vpop.f32.mrb[173].mxu1  ;;  %v1291_v11 = vmul.f32 %v8925_v35, %v8925_v35  ;;  %v2308_v16 = vmul.f32 0.7978846, %v2052_v58 }
 0x36f   :  { %v8941_v55 = vpop.f32.mrb[174].mxu0  ;;  %v8943_v24 = vpop.f32.mrb[174].mxu1  ;;  %v2310_v42 = vmul.f32 0.7978846, %v2054_v48  ;;  %v2309_v62 = vmul.f32 0.7978846, %v2053_v41  ;;  %v2055_v5 = vadd.f32 %v1799_v30, %v8882_v0  ;;  %v2056_v59 = vadd.f32 %v1800_v18, %v8886_v56 }
 0x370   :  { %10479 = vst [vmem:[#allocation114_spill] sm:$0xff] %v8941_v55  ;;  %10480 = vst [vmem:[#allocation115_spill] sm:$0xff] %v8943_v24  ;;  %v1547_v27 = vmul.f32 %v1291_v11, %v8925_v35  ;;  %v3874_v15 = vpop.f32.mrb[175].mxu0  ;;  %v4163_v52 = vpop.f32.mrb[175].mxu1  ;;  %5084 = vtanh.f32 %v2308_v16  ;;  %v2058_v44 = vadd.f32 %v1802_v63, %v8898_v14  ;;  %v1801_v55 = vmul.f32 0.044715, %v1545_v6 }
 0x371   :  { %v2780_v24 = vadd.f32 1.0, %v10481_v60  ;;  %v8951_v58 = vpop.f32.mrb[176].mxu0  ;;  %v8953_v48 = vpop.f32.mrb[176].mxu1  ;;  %5086 = vtanh.f32 %v2310_v42  ;;  %v2311_v7 = vmul.f32 0.7978846, %v2055_v5  ;;  %v10484_v41 = vld [vmem:[#allocation18_spill] sm:$0xff] }
 0x372   :  { %10482 = vst [vmem:[#allocation48_spill] sm:$0xff] %v8951_v58  ;;  %10483 = vst [vmem:[#allocation116_spill] sm:$0xff] %v8953_v48  ;;  %v2312_v54 = vmul.f32 0.7978846, %v2056_v59  ;;  %v1803_v30 = vmul.f32 0.044715, %v1547_v27  ;;  %5088 = vtanh.f32 %v2309_v62  ;;  %v2057_v11 = vadd.f32 %v1801_v55, %v8917_v40 }
 0x373   :  { %v2314_v18 = vmul.f32 0.7978846, %v2058_v44  ;;  %v2784_v15 = vadd.f32 1.0, %v10484_v41  ;;  %v3879_v16 = vpop.f32.mrb[177].mxu0  ;;  %v4168_v52 = vpop.f32.mrb[177].mxu1  ;;  %5090 = vtanh.f32 %v2311_v7  ;;  %v3036_v60 = vmul.f32 0.5, %v2780_v24 }
 0x374   :  { %v2059_v63 = vadd.f32 %v1803_v30, %v8925_v35  ;;  %v10485_v6 = vld [vmem:[#allocation98_spill] sm:$0xff]  ;;  %v8959_v14 = vpop.f32.mrb[178].mxu0  ;;  %v8961_v42 = vpop.f32.mrb[178].mxu1  ;;  %5092 = vtanh.f32 %v2312_v54  ;;  %v2313_v5 = vmul.f32 0.7978846, %v2057_v11  ;;  %v10488_v44 = vld [vmem:[#allocation36_spill] sm:$0xff] }
 0x375   :  { %v2782_v58 = vadd.f32 1.0, %v10485_v6  ;;  %10486 = vst [vmem:[#allocation18_spill] sm:$0xff] %v8959_v14  ;;  %10487 = vst [vmem:[#allocation98_spill] sm:$0xff] %v8961_v42  ;;  %v3040_v62 = vmul.f32 0.5, %v2784_v15  ;;  %v2786_v59 = vadd.f32 1.0, %v10488_v44  ;;  %v3882_v55 = vpop.f32.mrb[179].mxu0  ;;  %5094 = vtanh.f32 %v2314_v18 }
 0x376   :  { %v4171_v27 = vpop.f32.mrb[179].mxu1  ;;  %v2315_v41 = vmul.f32 0.7978846, %v2059_v63  ;;  %v10489_v16 = vld [vmem:[#allocation86_spill] sm:$0xff]  ;;  %v8965_v30 = vpop.f32.mrb[180].mxu0  ;;  %5096 = vtanh.f32 %v2313_v5  ;;  %v10492_v6 = vld [vmem:[#allocation28_spill] sm:$0xff] }
 0x377   :  { %v3292_v7 = vmul.f32 %v3036_v60, %v10489_v16  ;;  %v3038_v52 = vmul.f32 0.5, %v2782_v58  ;;  %10490 = vst [vmem:[#allocation36_spill] sm:$0xff] %v8965_v30  ;;  %v8967_v24 = vpop.f32.mrb[180].mxu1  ;;  %v3296_v48 = vmul.f32 %v3040_v62, %v10492_v6  ;;  %v3042_v42 = vmul.f32 0.5, %v2786_v59  ;;  %v3887_v11 = vpop.f32.mrb[181].mxu0  ;;  %v10493_v44 = vld [vmem:[#allocation87_spill] sm:$0xff] }
 0x378   :  { %10491 = vst [vmem:[#allocation86_spill] sm:$0xff] %v8967_v24  ;;  %v2789_v54 = vadd.f32 1.0, %v8507_v21  ;;  %v4176_v15 = vpop.f32.mrb[181].mxu1  ;;  %5098 = vtanh.f32 %v2315_v41  ;;  %v2793_v18 = vadd.f32 1.0, %v8547_v47  ;;  %v2791_v63 = vadd.f32 1.0, %v8520_v3  ;;  %v8974_v58 = vpop.f32.mrb[182].mxu0 }
 0x379   :  { %v3294_v55 = vmul.f32 %v3038_v52, %v10493_v44  ;;  %10494 = vst [vmem:[#allocation28_spill] sm:$0xff] %v8974_v58  ;;  %v8976_v60 = vpop.f32.mrb[182].mxu1  ;;  %v3452_v27 = vpack.c.bf16 %v3296_v48, %v3292_v7  ;;  %v10496_v5 = vld [vmem:[#allocation41_spill] sm:$0xff]  ;;  %v2795_v59 = vadd.f32 1.0, %v8559_v39  ;;  %v3890_v21 = vpop.f32.mrb[183].mxu0  ;;  %v10497_v52 = vld [vmem:[#allocation11_spill] sm:$0xff] }
 0x37a   :  { %10495 = vst [vmem:[#allocation87_spill] sm:$0xff] %v8976_v60  ;;  %v3298_v16 = vmul.f32 %v3042_v42, %v10496_v5  ;;  %v3045_v62 = vmul.f32 0.5, %v2789_v54  ;;  %v4179_v6 = vpop.f32.mrb[183].mxu1  ;;  %v3049_v11 = vmul.f32 0.5, %v2793_v18  ;;  %v3047_v41 = vmul.f32 0.5, %v2791_v63  ;;  %v10499_v47 = vld [vmem:[#allocation12_spill] sm:$0xff]  ;;  %v8988_v44 = vpop.eup %5084 }
 0x37b   :  { %v8982_v15 = vadd.f32 %v10497_v52, %v5576_v28  ;;  %v8986_v3 = vadd.f32 %v10499_v47, %v5578_v29  ;;  %10501 = vst [vmem:[#allocation12_spill] sm:$0xff] %v8988_v44  ;;  %3972 = vmatmul.mubr.bf16.gmra.mrb[224].mxu0 %v3452_v27  ;;  %v3051_v7 = vmul.f32 0.5, %v2795_v59  ;;  %v10502_v39 = vld [vmem:[#allocation23_spill] sm:$0xff]  ;;  %v8995_v18 = vpop.eup %5086  ;;  %v9026_v24 = vpop.f32.mrb[184].mxu1 }
 0x37c   :  { %v3454_v48 = vpack.c.bf16 %v3298_v16, %v3294_v55  ;;  %v3301_v42 = vmul.f32 %v3045_v62, %v8385_v25  ;;  %v8993_v54 = vadd.f32 %v10502_v39, %v5580_v33  ;;  %10504 = vst [vmem:[#allocation117_spill] sm:$0xff] %v8995_v18  ;;  %v3305_v63 = vmul.f32 %v3049_v11, %v8431_v43  ;;  %v10505_v5 = vld [vmem:[#allocation55_spill] sm:$0xff]  ;;  %v9003_v55 = vpop.f32.mrb[184].mxu0  ;;  %v9005_v25 = vpop.eup %5088  ;;  %v10508_v43 = vld [vmem:[#allocation38_spill] sm:$0xff] }
 0x37d   :  { %10498 = vst [vmem:[#allocation41_spill] sm:$0xff] %v8982_v15  ;;  %10500 = vst [vmem:[#allocation11_spill] sm:$0xff] %v8986_v3  ;;  %v3303_v21 = vmul.f32 %v3047_v41, %v10505_v5  ;;  %v1292_v6 = vmul.f32 %v8982_v15, %v8982_v15  ;;  %v1294_v27 = vmul.f32 %v8986_v3, %v8986_v3  ;;  %v10507_v16 = vld [vmem:[#allocation15_spill] sm:$0xff]  ;;  %v10509_v41 = vld [vmem:[#allocation94_spill] sm:$0xff]  ;;  %v3895_v47 = vpop.f32.mrb[185].mxu0  ;;  %v9018_v39 = vpop.eup %5090 }
 0x37e   :  { %10503 = vst [vmem:[#allocation23_spill] sm:$0xff] %v8993_v54  ;;  %10506 = vst [vmem:[#allocation55_spill] sm:$0xff] %v9003_v55  ;;  %4261 = vmatmul.mubr.bf16.gmra.mrb[224].mxu1 %v3454_v48  ;;  %v3307_v62 = vmul.f32 %v3051_v7, %v10507_v16  ;;  %v1293_v59 = vmul.f32 %v8993_v54, %v8993_v54  ;;  %v9012_v11 = vadd.f32 %v10508_v43, %v5582_v34  ;;  %v10511_v7 = vld [vmem:[#allocation22_spill] sm:$0xff]  ;;  %v9028_v43 = vpop.f32.mrb[186].mxu0  ;;  %v9030_v55 = vpop.eup %5092 }
 0x37f   :  { %v9016_v52 = vadd.f32 %v10509_v41, %v5576_v28  ;;  %v3457_v5 = vpack.c.bf16 %v3305_v63, %v3301_v42  ;;  %v1548_v60 = vmul.f32 %v1292_v6, %v8982_v15  ;;  %v1550_v48 = vmul.f32 %v1294_v27, %v8986_v3  ;;  %10512 = vst [vmem:[#allocation38_spill] sm:$0xff] %v9026_v24  ;;  %v4184_v6 = vpop.f32.mrb[185].mxu1  ;;  %v3898_v27 = vpop.f32.mrb[187].mxu0 }
 0x380   :  { %v9024_v16 = vadd.f32 %v10511_v7, %v5578_v29  ;;  %10513 = vst [vmem:[#allocation94_spill] sm:$0xff] %v9028_v43  ;;  %10514 = vst [vmem:[#allocation22_spill] sm:$0xff] %v9030_v55  ;;  %v3459_v41 = vpack.c.bf16 %v3307_v62, %v3303_v21  ;;  %v1549_v47 = vmul.f32 %v1293_v59, %v8993_v54  ;;  %v9037_v58 = vpop.eup %5094  ;;  %v10516_v21 = vld [vmem:[#allocation9_spill] sm:$0xff]  ;;  %v9045_v59 = vpop.f32.mrb[186].mxu1 }
 0x381   :  { %10510 = vst [vmem:[#allocation15_spill] sm:$0xff] %v9016_v52  ;;  %v1295_v42 = vmul.f32 %v9012_v11, %v9012_v11  ;;  %v1296_v63 = vmul.f32 %v9016_v52, %v9016_v52  ;;  %10515 = vst [vmem:[#allocation118_spill] sm:$0xff] %v9037_v58  ;;  %3979 = vmatprep.mubr.bf16.mxu0 %v3457_v5  ;;  %v1804_v7 = vmul.f32 0.044715, %v1548_v60  ;;  %v1806_v24 = vmul.f32 0.044715, %v1550_v48  ;;  %v9047_v30 = vpop.eup %5096 }
 0x382   :  { %v1298_v43 = vmul.f32 %v9024_v16, %v9024_v16  ;;  %v9043_v62 = vadd.f32 %v10516_v21, %v5580_v33  ;;  %10517 = vst [vmem:[#allocation9_spill] sm:$0xff] %v9045_v59  ;;  %4268 = vmatprep.mubr.bf16.mxu1 %v3459_v41  ;;  %v1805_v14 = vmul.f32 0.044715, %v1549_v47  ;;  %v10518_v60 = vld [vmem:[#allocation25_spill] sm:$0xff]  ;;  %v4187_v48 = vpop.f32.mrb[187].mxu1  ;;  %v9055_v56 = vpop.eup %5098 }
 0x383   :  { %v1551_v6 = vmul.f32 %v1295_v42, %v9012_v11  ;;  %v1552_v27 = vmul.f32 %v1296_v63, %v9016_v52  ;;  %v9053_v5 = vadd.f32 %v10518_v60, %v5582_v34  ;;  %v2060_v21 = vadd.f32 %v1804_v7, %v8982_v15 }
 0x384   :  { %v2062_v58 = vadd.f32 %v1806_v24, %v8986_v3  ;;  %v1554_v59 = vmul.f32 %v1298_v43, %v9024_v16  ;;  %v1297_v41 = vmul.f32 %v9043_v62, %v9043_v62  ;;  %v2061_v47 = vadd.f32 %v1805_v14, %v8993_v54 }
 0x385   :  { %v1807_v42 = vmul.f32 0.044715, %v1551_v6  ;;  %v1808_v63 = vmul.f32 0.044715, %v1552_v27  ;;  %v1299_v60 = vmul.f32 %v9053_v5, %v9053_v5  ;;  %v2316_v18 = vmul.f32 0.7978846, %v2060_v21 }
 0x386   :  { %v2318_v48 = vmul.f32 0.7978846, %v2062_v58  ;;  %v1810_v55 = vmul.f32 0.044715, %v1554_v59  ;;  %v1553_v44 = vmul.f32 %v1297_v41, %v9043_v62  ;;  %v2317_v7 = vmul.f32 0.7978846, %v2061_v47 }
 0x387   :  { %v2063_v24 = vadd.f32 %v1807_v42, %v9012_v11  ;;  %v2064_v43 = vadd.f32 %v1808_v63, %v9016_v52  ;;  %v1555_v3 = vmul.f32 %v1299_v60, %v9053_v5  ;;  %5100 = vtanh.f32 %v2316_v18  ;;  %v10519_v27 = vld [vmem:[#allocation68_spill] sm:$0xff]  ;;  %v10520_v47 = vld [vmem:[#allocation62_spill] sm:$0xff] }
 0x388   :  { %v2066_v14 = vadd.f32 %v1810_v55, %v9024_v16  ;;  %v1809_v6 = vmul.f32 0.044715, %v1553_v44  ;;  %v2788_v15 = vadd.f32 1.0, %v10519_v27  ;;  %5102 = vtanh.f32 %v2318_v48  ;;  %v10521_v18 = vld [vmem:[#allocation26_spill] sm:$0xff]  ;;  %v10522_v27 = vld [vmem:[#allocation75_spill] sm:$0xff] }
 0x389   :  { %v2319_v54 = vmul.f32 0.7978846, %v2063_v24  ;;  %v2320_v21 = vmul.f32 0.7978846, %v2064_v43  ;;  %v1811_v58 = vmul.f32 0.044715, %v1555_v3  ;;  %5104 = vtanh.f32 %v2317_v7 }
 0x38a   :  { %v2322_v59 = vmul.f32 0.7978846, %v2066_v14  ;;  %v2065_v41 = vadd.f32 %v1809_v6, %v9043_v62  ;;  %v2792_v42 = vadd.f32 1.0, %v10520_v47  ;;  %v3044_v60 = vmul.f32 0.5, %v2788_v15  ;;  %v10523_v3 = vld [vmem:[#allocation96_spill] sm:$0xff]  ;;  %v10524_v14 = vld [vmem:[#allocation97_spill] sm:$0xff] }
 0x38b   :  { %5106 = vtanh.f32 %v2319_v54  ;;  %v2067_v63 = vadd.f32 %v1811_v58, %v9053_v5  ;;  %v2790_v52 = vadd.f32 1.0, %v10521_v18  ;;  %v2794_v48 = vadd.f32 1.0, %v10522_v27  ;;  %v10525_v15 = vld [vmem:[#allocation30_spill] sm:$0xff]  ;;  %v10526_v18 = vld [vmem:[#allocation19_spill] sm:$0xff] }
 0x38c   :  { %5108 = vtanh.f32 %v2320_v21  ;;  %v2321_v44 = vmul.f32 0.7978846, %v2065_v41  ;;  %v3048_v55 = vmul.f32 0.5, %v2792_v42  ;;  %v3300_v7 = vmul.f32 %v3044_v60, %v10523_v3 }
 0x38d   :  { %5110 = vtanh.f32 %v2322_v59  ;;  %v2323_v24 = vmul.f32 0.7978846, %v2067_v63  ;;  %v3046_v43 = vmul.f32 0.5, %v2790_v52  ;;  %v3050_v47 = vmul.f32 0.5, %v2794_v48 }
 0x38e   :  { %5112 = vtanh.f32 %v2321_v44  ;;  %v3304_v6 = vmul.f32 %v3048_v55, %v10524_v14  ;;  %v2797_v54 = vadd.f32 1.0, %v8627_v10  ;;  %v2801_v21 = vadd.f32 1.0, %v8663_v12  ;;  %v10527_v55 = vld [vmem:[#allocation20_spill] sm:$0xff]  ;;  %v10529_v10 = vld [vmem:[#allocation42_spill] sm:$0xff] }
 0x38f   :  { %5114 = vtanh.f32 %v2323_v24  ;;  %v3302_v58 = vmul.f32 %v3046_v43, %v10525_v15  ;;  %v2799_v41 = vadd.f32 1.0, %v8640_v26  ;;  %v3306_v59 = vmul.f32 %v3050_v47, %v10526_v18  ;;  %v9107_v15 = vpop.f32.mrb[188].mxu0 }
 0x390   :  { %v3456_v42 = vpack.c.bf16 %v3304_v6, %v3300_v7  ;;  %v3053_v63 = vmul.f32 0.5, %v2797_v54  ;;  %v2803_v60 = vadd.f32 1.0, %v8671_v4  ;;  %v3057_v52 = vmul.f32 0.5, %v2801_v21  ;;  %v10531_v7 = vld [vmem:[#allocation37_spill] sm:$0xff]  ;;  %10532 = vst [vmem:[#allocation62_spill] sm:$0xff] %v9107_v15  ;;  %v3903_v18 = vpop.f32.mrb[189].mxu0 }
 0x391   :  { %v3055_v44 = vmul.f32 0.5, %v2799_v41  ;;  %v9086_v27 = vadd.f32 %v10527_v55, %v5576_v28  ;;  %v9090_v48 = vadd.f32 %v10529_v10, %v5578_v29  ;;  %v9092_v24 = vpop.eup %5100  ;;  %v3458_v26 = vpack.c.bf16 %v3306_v59, %v3302_v58  ;;  %v9130_v55 = vpop.f32.mrb[188].mxu1 }
 0x392   :  { %3980 = vmatmul.mubr.bf16.gmra.mrb[228].mxu0 %v3456_v42  ;;  %v3309_v12 = vmul.f32 %v3053_v63, %v8497_v32  ;;  %v3059_v3 = vmul.f32 0.5, %v2803_v60  ;;  %v9097_v4 = vadd.f32 %v10531_v7, %v5580_v33  ;;  %v9099_v43 = vpop.eup %5102  ;;  %v3313_v14 = vmul.f32 %v3057_v52, %v8545_v8  ;;  %v10533_v8 = vld [vmem:[#allocation44_spill] sm:$0xff]  ;;  %10537 = vst [vmem:[#allocation75_spill] sm:$0xff] %v9130_v55  ;;  %v9132_v10 = vpop.f32.mrb[190].mxu0 }
 0x393   :  { %10528 = vst [vmem:[#allocation25_spill] sm:$0xff] %v9086_v27  ;;  %10530 = vst [vmem:[#allocation68_spill] sm:$0xff] %v9090_v48  ;;  %v3311_v6 = vmul.f32 %v3055_v44, %v8514_v17  ;;  %v1300_v47 = vmul.f32 %v9086_v27, %v9086_v27  ;;  %v1302_v54 = vmul.f32 %v9090_v48, %v9090_v48  ;;  %v9109_v32 = vpop.eup %5104  ;;  %4269 = vmatmul.mubr.bf16.gmra.mrb[228].mxu1 %v3458_v26  ;;  %v10534_v17 = vld [vmem:[#allocation47_spill] sm:$0xff] }
 0x394   :  { %v3315_v58 = vmul.f32 %v3059_v3, %v8553_v13  ;;  %v1301_v21 = vmul.f32 %v9097_v4, %v9097_v4  ;;  %v9116_v41 = vadd.f32 %v10533_v8, %v5582_v34  ;;  %v9120_v42 = vadd.f32 %v10534_v17, %v5576_v28  ;;  %v10535_v13 = vld [vmem:[#allocation49_spill] sm:$0xff]  ;;  %10538 = vst [vmem:[#allocation96_spill] sm:$0xff] %v9132_v10 }
 0x395   :  { %v9122_v59 = vpop.eup %5106  ;;  %v3461_v63 = vpack.c.bf16 %v3313_v14, %v3309_v12  ;;  %v1556_v60 = vmul.f32 %v1300_v47, %v9086_v27  ;;  %v1558_v52 = vmul.f32 %v1302_v54, %v9090_v48  ;;  %v9128_v44 = vadd.f32 %v10535_v13, %v5578_v29  ;;  %v4192_v14 = vpop.f32.mrb[189].mxu1 }
 0x396   :  { %v9134_v26 = vpop.eup %5108  ;;  %v3463_v28 = vpack.c.bf16 %v3315_v58, %v3311_v6  ;;  %v1557_v3 = vmul.f32 %v1301_v21, %v9097_v4  ;;  %v1303_v12 = vmul.f32 %v9116_v41, %v9116_v41  ;;  %v1304_v7 = vmul.f32 %v9120_v42, %v9120_v42  ;;  %v3906_v47 = vpop.f32.mrb[191].mxu0  ;;  %v10539_v6 = vld [vmem:[#allocation32_spill] sm:$0xff] }
 0x397   :  { %10536 = vst [vmem:[#allocation26_spill] sm:$0xff] %v9128_v44  ;;  %v9141_v54 = vpop.eup %5110  ;;  %3987 = vmatprep.mubr.bf16.mxu0 %v3461_v63  ;;  %v1812_v29 = vmul.f32 0.044715, %v1556_v60  ;;  %v1814_v8 = vmul.f32 0.044715, %v1558_v52  ;;  %v1306_v17 = vmul.f32 %v9128_v44, %v9128_v44  ;;  %v9147_v58 = vadd.f32 %v10539_v6, %v5580_v33  ;;  %v9149_v21 = vpop.f32.mrb[190].mxu1 }
 0x398   :  { %10540 = vst [vmem:[#allocation97_spill] sm:$0xff] %v9149_v21  ;;  %v9151_v18 = vpop.eup %5112  ;;  %4276 = vmatprep.mubr.bf16.mxu1 %v3463_v28  ;;  %v1813_v13 = vmul.f32 0.044715, %v1557_v3  ;;  %v1559_v14 = vmul.f32 %v1303_v12, %v9116_v41  ;;  %v1560_v47 = vmul.f32 %v1304_v7, %v9120_v42  ;;  %v10541_v63 = vld [vmem:[#allocation74_spill] sm:$0xff]  ;;  %v4195_v52 = vpop.f32.mrb[191].mxu1 }
 0x399   :  { %v9157_v60 = vadd.f32 %v10541_v63, %v5582_v34  ;;  %v9159_v55 = vpop.eup %5114  ;;  %v2068_v33 = vadd.f32 %v1812_v29, %v9086_v27  ;;  %v2070_v6 = vadd.f32 %v1814_v8, %v9090_v48  ;;  %v1562_v21 = vmul.f32 %v1306_v17, %v9128_v44 }
 0x39a   :  { %v1305_v28 = vmul.f32 %v9147_v58, %v9147_v58  ;;  %v2069_v3 = vadd.f32 %v1813_v13, %v9097_v4  ;;  %v1815_v12 = vmul.f32 0.044715, %v1559_v14  ;;  %v1816_v7 = vmul.f32 0.044715, %v1560_v47 }
 0x39b   :  { %v1307_v34 = vmul.f32 %v9157_v60, %v9157_v60  ;;  %v2324_v63 = vmul.f32 0.7978846, %v2068_v33  ;;  %v2326_v52 = vmul.f32 0.7978846, %v2070_v6  ;;  %v1818_v10 = vmul.f32 0.044715, %v1562_v21 }
 0x39c   :  { %v1561_v15 = vmul.f32 %v1305_v28, %v9147_v58  ;;  %v2325_v29 = vmul.f32 0.7978846, %v2069_v3  ;;  %v2071_v8 = vadd.f32 %v1815_v12, %v9116_v41  ;;  %v2072_v17 = vadd.f32 %v1816_v7, %v9120_v42 }
 0x39d   :  { %v1563_v48 = vmul.f32 %v1307_v34, %v9157_v60  ;;  %5116 = vtanh.f32 %v2324_v63  ;;  %v2074_v13 = vadd.f32 %v1818_v10, %v9128_v44  ;;  %v2796_v47 = vadd.f32 1.0, %v8608_v2  ;;  %v10542_v34 = vld [vmem:[#allocation61_spill] sm:$0xff]  ;;  %v10543_v2 = vld [vmem:[#allocation27_spill] sm:$0xff] }
 0x39e   :  { %v1817_v14 = vmul.f32 0.044715, %v1561_v15  ;;  %5118 = vtanh.f32 %v2326_v52  ;;  %v2327_v27 = vmul.f32 0.7978846, %v2071_v8  ;;  %v2328_v33 = vmul.f32 0.7978846, %v2072_v17 }
 0x39f   :  { %v1819_v6 = vmul.f32 0.044715, %v1563_v48  ;;  %5120 = vtanh.f32 %v2325_v29  ;;  %v2330_v21 = vmul.f32 0.7978846, %v2074_v13  ;;  %v2800_v3 = vadd.f32 1.0, %v8648_v46  ;;  %v10544_v48 = vld [vmem:[#allocation73_spill] sm:$0xff] }
 0x3a0   :  { %v2073_v28 = vadd.f32 %v1817_v14, %v9147_v58  ;;  %5122 = vtanh.f32 %v2327_v27  ;;  %v3052_v7 = vmul.f32 0.5, %v2796_v47  ;;  %v2798_v63 = vadd.f32 1.0, %v10542_v34  ;;  %v10545_v13 = vld [vmem:[#allocation56_spill] sm:$0xff] }
 0x3a1   :  { %v2075_v12 = vadd.f32 %v1819_v6, %v9157_v60  ;;  %5124 = vtanh.f32 %v2328_v33  ;;  %v3056_v10 = vmul.f32 0.5, %v2800_v3  ;;  %v2802_v52 = vadd.f32 1.0, %v10543_v2  ;;  %v9186_v47 = vld [vmem:[%s9465_s4] ss:$0 sm:$0xff] }
 0x3a2   :  { %v2329_v15 = vmul.f32 0.7978846, %v2073_v28  ;;  %5126 = vtanh.f32 %v2330_v21  ;;  %v3308_v29 = vmul.f32 %v3052_v7, %v10544_v48  ;;  %v3054_v17 = vmul.f32 0.5, %v2798_v63  ;;  %v10546_v33 = vld [vmem:[#allocation40_spill] sm:$0xff] }
 0x3a3   :  { %v2331_v8 = vmul.f32 0.7978846, %v2075_v12  ;;  %v3312_v14 = vmul.f32 %v3056_v10, %v10545_v13  ;;  %v3058_v46 = vmul.f32 0.5, %v2802_v52  ;;  %v2805_v27 = vadd.f32 1.0, %v8743_v61  ;;  %v10547_v12 = vld [vmem:[#allocation45_spill] sm:$0xff]  ;;  %v10548_v10 = vld [vmem:[#allocation14_spill] sm:$0xff] }
 0x3a4   :  { %5128 = vtanh.f32 %v2329_v15  ;;  %v3310_v6 = vmul.f32 %v3054_v17, %v10546_v33  ;;  %v2809_v21 = vadd.f32 1.0, %v8787_v19  ;;  %v2807_v28 = vadd.f32 1.0, %v8756_v37  ;;  %v10549_v52 = vld [vmem:[#allocation53_spill] sm:$0xff]  ;;  %v10550_v17 = vld [vmem:[#allocation60_spill] sm:$0xff] }
 0x3a5   :  { %5130 = vtanh.f32 %v2331_v8  ;;  %v3460_v3 = vpack.c.bf16 %v3312_v14, %v3308_v29  ;;  %v3314_v7 = vmul.f32 %v3058_v46, %v10547_v12  ;;  %v3061_v34 = vmul.f32 0.5, %v2805_v27  ;;  %v10551_v27 = vld [vmem:[#allocation54_spill] sm:$0xff]  ;;  %v9207_v12 = vpop.f32.mrb[192].mxu0 }
 0x3a6   :  { %v2811_v63 = vadd.f32 1.0, %v8795_v51  ;;  %v3065_v15 = vmul.f32 0.5, %v2809_v21  ;;  %v3063_v61 = vmul.f32 0.5, %v2807_v28  ;;  %v3782_v2 = vadd.f32 %v9186_v47, %v10548_v10  ;;  %v10552_v21 = vld [vmem:[#allocation77_spill] sm:$0xff]  ;;  %10553 = vst [vmem:[#allocation30_spill] sm:$0xff] %v9207_v12 }
 0x3a7   :  { %v3785_v8 = vadd.f32 %v9186_v47, %v10549_v52  ;;  %v9197_v48 = vpop.eup %5116  ;;  %3988 = vmatmul.mubr.bf16.gmra.mrb[232].mxu0 %v3460_v3  ;;  %v3462_v19 = vpack.c.bf16 %v3314_v7, %v3310_v6  ;;  %v3317_v37 = vmul.f32 %v3061_v34, %v10550_v17  ;;  %v2804_v13 = vadd.f32 1.0, %v8724_v20  ;;  %v10554_v3 = vld [vmem:[#allocation31_spill] sm:$0xff]  ;;  %v10555_v34 = vld [vmem:[#allocation92_spill] sm:$0xff]  ;;  %v3911_v52 = vpop.f32.mrb[193].mxu0 }
 0x3a8   :  { %v3067_v29 = vmul.f32 0.5, %v2811_v63  ;;  %v9201_v14 = vpop.eup %5118  ;;  %v3321_v51 = vmul.f32 %v3065_v15, %v8661_v38  ;;  %v3319_v46 = vmul.f32 %v3063_v61, %v8634_v1  ;;  %v4071_v33 = vadd.f32 %v10551_v27, %v3782_v2  ;;  %v5132_v15 = vld [vmem:[#allocation2] sm:$0xff]  ;;  %v5133_v2 = vld [vmem:[#allocation2 + $0x8] sm:$0xff] }
 0x3a9   :  { %v4074_v28 = vadd.f32 %v10552_v21, %v3785_v8  ;;  %v9209_v10 = vpop.eup %5120  ;;  %4277 = vmatmul.mubr.bf16.gmra.mrb[232].mxu1 %v3462_v19  ;;  %v2808_v7 = vadd.f32 1.0, %v10554_v3  ;;  %v3060_v20 = vmul.f32 0.5, %v2804_v13  ;;  %v2806_v63 = vadd.f32 1.0, %v10555_v34  ;;  %v10556_v17 = vld [vmem:[#allocation100_spill] sm:$0xff]  ;;  %v9217_v21 = vpop.f32.mrb[192].mxu1  ;;  %v10558_v3 = vld [vmem:[#allocation39_spill] sm:$0xff] }
 0x3aa   :  { %v3323_v6 = vmul.f32 %v3067_v29, %v8669_v36  ;;  %v9214_v38 = vpop.eup %5122  ;;  %v3465_v1 = vpack.c.bf16 %v3321_v51, %v3317_v37  ;;  %v4325_v61 = vadd.f32 %v5132_v15, %v4071_v33  ;;  %v2810_v27 = vadd.f32 1.0, %v10556_v17  ;;  %10557 = vst [vmem:[#allocation19_spill] sm:$0xff] %v9217_v21  ;;  %v9219_v19 = vpop.f32.mrb[194].mxu0 }
 0x3ab   :  { %v4326_v8 = vadd.f32 %v5133_v2, %v4074_v28  ;;  %v9221_v36 = vpop.eup %5124  ;;  %v3064_v13 = vmul.f32 0.5, %v2808_v7  ;;  %v3316_v34 = vmul.f32 %v3060_v20, %v10558_v3  ;;  %v3062_v52 = vmul.f32 0.5, %v2806_v63  ;;  %v4200_v12 = vpop.f32.mrb[193].mxu1  ;;  %v10562_v63 = vld [vmem:[#allocation52_spill] sm:$0xff] }
 0x3ac   :  { %v3467_v29 = vpack.c.bf16 %v3323_v6, %v3319_v46  ;;  %v3914_v44 = vpop.f32.mrb[195].mxu0  ;;  %v9224_v37 = vpop.eup %5126  ;;  %3995 = vmatprep.mubr.bf16.mxu0 %v3465_v1  ;;  %4389 = vst [vmem:[#allocation5] sm:$0xff] %v4325_v61  ;;  %v3066_v51 = vmul.f32 0.5, %v2810_v27  ;;  %v2813_v33 = vadd.f32 1.0, %v8875_v45  ;;  %v2817_v28 = vadd.f32 1.0, %v8919_v23  ;;  %v10560_v6 = vld [vmem:[#allocation64_spill] sm:$0xff] }
 0x3ad   :  { %4390 = vst [vmem:[#allocation5 + $0x8] sm:$0xff] %v4326_v8  ;;  %v2815_v15 = vadd.f32 1.0, %v8892_v53  ;;  %v9229_v2 = vpop.f32.mrb[194].mxu1  ;;  %v3320_v12 = vmul.f32 %v3064_v13, %v10560_v6  ;;  %v10561_v44 = vld [vmem:[#allocation82_spill] sm:$0xff]  ;;  %v2819_v20 = vadd.f32 1.0, %v8931_v31  ;;  %v3790_v1 = vadd.f32 %v9186_v47, %v10562_v63  ;;  %v10565_v13 = vld [vmem:[#allocation29_spill] sm:$0xff] }
 0x3ae   :  { %10559 = vst [vmem:[#allocation20_spill] sm:$0xff] %v9229_v2  ;;  %v9231_v46 = vpop.eup %5128  ;;  %4284 = vmatprep.mubr.bf16.mxu1 %v3467_v29  ;;  %v3318_v7 = vmul.f32 %v3062_v52, %v10561_v44  ;;  %v4203_v61 = vpop.f32.mrb[195].mxu1  ;;  %v10563_v23 = vld [vmem:[#allocation70_spill] sm:$0xff]  ;;  %v3069_v53 = vmul.f32 0.5, %v2813_v33  ;;  %v3073_v17 = vmul.f32 0.5, %v2817_v28  ;;  %v3793_v52 = vadd.f32 %v9186_v47, %v10565_v13 }
 0x3af   :  { %v9238_v45 = vpop.eup %5130  ;;  %v3322_v8 = vmul.f32 %v3066_v51, %v10563_v23  ;;  %v3071_v27 = vmul.f32 0.5, %v2815_v15  ;;  %v3464_v3 = vpack.c.bf16 %v3320_v12, %v3316_v34  ;;  %v3075_v2 = vmul.f32 0.5, %v2819_v20  ;;  %v10564_v29 = vld [vmem:[#allocation58_spill] sm:$0xff]  ;;  %v10566_v15 = vld [vmem:[#allocation59_spill] sm:$0xff] }
 0x3b0   :  { %v4079_v21 = vadd.f32 %v10564_v29, %v3790_v1  ;;  %v3325_v31 = vmul.f32 %v3069_v53, %v8729_v50  ;;  %v3329_v44 = vmul.f32 %v3073_v17, %v8781_v49  ;;  %v5134_v33 = vld [vmem:[#allocation2 + $0x10] sm:$0xff]  ;;  %v4082_v34 = vadd.f32 %v10566_v15, %v3793_v52  ;;  %v10569_v50 = vld [vmem:[#allocation113_spill] sm:$0xff]  ;;  %v10574_v15 = vld [vmem:[#allocation71_spill] sm:$0xff] }
 0x3b1   :  { %v3466_v6 = vpack.c.bf16 %v3322_v8, %v3318_v7  ;;  %v3327_v63 = vmul.f32 %v3071_v27, %v8750_v57  ;;  %3996 = vmatmul.mubr.bf16.gmra.mrb[236].mxu0 %v3464_v3  ;;  %v3331_v51 = vmul.f32 %v3075_v2, %v8793_v22  ;;  %v2812_v12 = vadd.f32 1.0, %v8856_v9  ;;  %v10567_v1 = vld [vmem:[#allocation110_spill] sm:$0xff]  ;;  %v10568_v7 = vld [vmem:[#allocation109_spill] sm:$0xff]  ;;  %v5135_v57 = vld [vmem:[#allocation2 + $0x18] sm:$0xff] }
 0x3b2   :  { %v4327_v28 = vadd.f32 %v5134_v33, %v4079_v21  ;;  %v3469_v20 = vpack.c.bf16 %v3329_v44, %v3325_v31  ;;  %v2816_v61 = vadd.f32 1.0, %v10567_v1  ;;  %v2814_v23 = vadd.f32 1.0, %v10568_v7  ;;  %v10570_v3 = vld [vmem:[#allocation67_spill] sm:$0xff]  ;;  %v10571_v31 = vld [vmem:[#allocation57_spill] sm:$0xff] }
 0x3b3   :  { %4285 = vmatmul.mubr.bf16.gmra.mrb[236].mxu1 %v3466_v6  ;;  %v2818_v8 = vadd.f32 1.0, %v10569_v50  ;;  %v3471_v49 = vpack.c.bf16 %v3331_v51, %v3327_v63  ;;  %v4328_v53 = vadd.f32 %v5135_v57, %v4082_v34  ;;  %v3068_v17 = vmul.f32 0.5, %v2812_v12  ;;  %v10572_v63 = vld [vmem:[#allocation89_spill] sm:$0xff] }
 0x3b4   :  { %4391 = vst [vmem:[#allocation5 + $0x10] sm:$0xff] %v4327_v28  ;;  %v2821_v22 = vadd.f32 1.0, %v9005_v25  ;;  %4003 = vmatprep.mubr.bf16.mxu0 %v3469_v20  ;;  %v3072_v21 = vmul.f32 0.5, %v2816_v61  ;;  %v3070_v2 = vmul.f32 0.5, %v2814_v23  ;;  %v2825_v9 = vadd.f32 1.0, %v9047_v30  ;;  %v10573_v25 = vld [vmem:[#allocation76_spill] sm:$0xff] }
 0x3b5   :  { %v3074_v27 = vmul.f32 0.5, %v2818_v8  ;;  %4292 = vmatprep.mubr.bf16.mxu1 %v3471_v49  ;;  %4392 = vst [vmem:[#allocation5 + $0x18] sm:$0xff] %v4328_v53  ;;  %v3324_v29 = vmul.f32 %v3068_v17, %v10570_v3  ;;  %v2823_v52 = vadd.f32 1.0, %v9018_v39  ;;  %v2827_v6 = vadd.f32 1.0, %v9055_v56  ;;  %v10575_v20 = vld [vmem:[#allocation46_spill] sm:$0xff]  ;;  %v10576_v23 = vld [vmem:[#allocation83_spill] sm:$0xff] }
 0x3b6   :  { %v3077_v13 = vmul.f32 0.5, %v2821_v22  ;;  %v3328_v44 = vmul.f32 %v3072_v21, %v10571_v31  ;;  %v3326_v51 = vmul.f32 %v3070_v2, %v10572_v63  ;;  %v3081_v28 = vmul.f32 0.5, %v2825_v9  ;;  %v10577_v49 = vld [vmem:[#allocation16_spill] sm:$0xff]  ;;  %v10579_v21 = vld [vmem:[#allocation63_spill] sm:$0xff]  ;;  %v10581_v3 = vld [vmem:[#allocation117_spill] sm:$0xff] }
 0x3b7   :  { %v3330_v33 = vmul.f32 %v3074_v27, %v10573_v25  ;;  %v3079_v12 = vmul.f32 0.5, %v2823_v52  ;;  %v3083_v30 = vmul.f32 0.5, %v2827_v6  ;;  %v3798_v1 = vadd.f32 %v9186_v47, %v10575_v20  ;;  %v10578_v53 = vld [vmem:[#allocation12_spill] sm:$0xff]  ;;  %v10580_v27 = vld [vmem:[#allocation22_spill] sm:$0xff] }
 0x3b8   :  { %v3333_v34 = vmul.f32 %v3077_v13, %v10574_v15  ;;  %v3468_v61 = vpack.c.bf16 %v3328_v44, %v3324_v29  ;;  %v3337_v39 = vmul.f32 %v3081_v28, %v8917_v40  ;;  %v3801_v56 = vadd.f32 %v9186_v47, %v10576_v23  ;;  %v5136_v13 = vld [vmem:[#allocation2 + $0x20] sm:$0xff] }
 0x3b9   :  { %v3470_v7 = vpack.c.bf16 %v3330_v33, %v3326_v51  ;;  %v3335_v50 = vmul.f32 %v3079_v12, %v8882_v0  ;;  %v3339_v8 = vmul.f32 %v3083_v30, %v8925_v35  ;;  %v4087_v57 = vadd.f32 %v10577_v49, %v3798_v1  ;;  %v10582_v0 = vld [vmem:[#allocation118_spill] sm:$0xff]  ;;  %v5137_v35 = vld [vmem:[#allocation2 + $0x28] sm:$0xff]  ;;  %v10583_v33 = vld [vmem:[#allocation95_spill] sm:$0xff]  ;;  %v9279_v30 = vpop.f32.mrb[196].mxu0 }
 0x3ba   :  { %v2820_v17 = vadd.f32 1.0, %v10578_v53  ;;  %4004 = vmatmul.mubr.bf16.gmra.mrb[240].mxu0 %v3468_v61  ;;  %v3473_v22 = vpack.c.bf16 %v3337_v39, %v3333_v34  ;;  %v4090_v2 = vadd.f32 %v10579_v21, %v3801_v56  ;;  %v2824_v9 = vadd.f32 1.0, %v10580_v27  ;;  %v10584_v20 = vld [vmem:[#allocation8_spill] sm:$0xff]  ;;  %v10585_v61 = vld [vmem:[#allocation66_spill] sm:$0xff]  ;;  %v9287_v53 = vpop.f32.mrb[196].mxu1 }
 0x3bb   :  { %4293 = vmatmul.mubr.bf16.gmra.mrb[240].mxu1 %v3470_v7  ;;  %v2822_v40 = vadd.f32 1.0, %v10581_v3  ;;  %v3475_v29 = vpack.c.bf16 %v3339_v8, %v3335_v50  ;;  %v4329_v52 = vadd.f32 %v5136_v13, %v4087_v57  ;;  %v2826_v31 = vadd.f32 1.0, %v10582_v0  ;;  %v10586_v56 = vld [vmem:[#allocation84_spill] sm:$0xff]  ;;  %v10587_v57 = vld [vmem:[#allocation43_spill] sm:$0xff]  ;;  %v10589_v27 = vld [vmem:[#allocation50_spill] sm:$0xff] }
 0x3bc   :  { %v3076_v6 = vmul.f32 0.5, %v2820_v17  ;;  %4011 = vmatprep.mubr.bf16.mxu0 %v3473_v22  ;;  %v4330_v44 = vadd.f32 %v5137_v35, %v4090_v2  ;;  %v3080_v63 = vmul.f32 0.5, %v2824_v9  ;;  %v2829_v25 = vadd.f32 1.0, %v9109_v32  ;;  %v3919_v32 = vpop.f32.mrb[197].mxu0  ;;  %v10588_v22 = vld [vmem:[#allocation23_spill] sm:$0xff] }
 0x3bd   :  { %v3078_v51 = vmul.f32 0.5, %v2822_v40  ;;  %4300 = vmatprep.mubr.bf16.mxu1 %v3475_v29  ;;  %4393 = vst [vmem:[#allocation5 + $0x20] sm:$0xff] %v4329_v52  ;;  %v3082_v15 = vmul.f32 0.5, %v2826_v31  ;;  %v2833_v34 = vadd.f32 1.0, %v9151_v18  ;;  %v2831_v12 = vadd.f32 1.0, %v9122_v59  ;;  %v9289_v59 = vpop.f32.mrb[198].mxu0 }
 0x3be   :  { %v3332_v28 = vmul.f32 %v3076_v6, %v10583_v33  ;;  %4394 = vst [vmem:[#allocation5 + $0x28] sm:$0xff] %v4330_v44  ;;  %v3336_v1 = vmul.f32 %v3080_v63, %v10584_v20  ;;  %v3085_v39 = vmul.f32 0.5, %v2829_v25  ;;  %v2835_v23 = vadd.f32 1.0, %v9159_v55  ;;  %v4208_v55 = vpop.f32.mrb[197].mxu1  ;;  %v3922_v3 = vpop.f32.mrb[199].mxu0  ;;  %v10590_v52 = vld [vmem:[#allocation35_spill] sm:$0xff] }
 0x3bf   :  { %v3334_v7 = vmul.f32 %v3078_v51, %v10585_v61  ;;  %v3338_v50 = vmul.f32 %v3082_v15, %v10586_v56  ;;  %v3089_v8 = vmul.f32 0.5, %v2833_v34  ;;  %v3087_v49 = vmul.f32 0.5, %v2831_v12  ;;  %v9297_v0 = vpop.f32.mrb[198].mxu1  ;;  %v10591_v35 = vld [vmem:[#allocation51_spill] sm:$0xff] }
 0x3c0   :  { %v3806_v18 = vadd.f32 %v9186_v47, %v10587_v57  ;;  %v3472_v17 = vpack.c.bf16 %v3336_v1, %v3332_v28  ;;  %v3341_v21 = vmul.f32 %v3085_v39, %v10588_v22  ;;  %v3091_v2 = vmul.f32 0.5, %v2835_v23  ;;  %v4211_v25 = vpop.f32.mrb[199].mxu1  ;;  %v5138_v28 = vld [vmem:[#allocation2 + $0x30] sm:$0xff]  ;;  %v5139_v12 = vld [vmem:[#allocation2 + $0x38] sm:$0xff]  ;;  %v10592_v39 = vld [vmem:[#allocation41_spill] sm:$0xff] }
 0x3c1   :  { %v3809_v9 = vadd.f32 %v9186_v47, %v10589_v27  ;;  %v3474_v40 = vpack.c.bf16 %v3338_v50, %v3334_v7  ;;  %v3345_v29 = vmul.f32 %v3089_v8, %v9043_v62  ;;  %v3343_v13 = vmul.f32 %v3087_v49, %v9012_v11  ;;  %v10594_v50 = vld [vmem:[#allocation11_spill] sm:$0xff] }
 0x3c2   :  { %v4095_v6 = vadd.f32 %v10590_v52, %v3806_v18  ;;  %4012 = vmatmul.mubr.bf16.gmra.mrb[244].mxu0 %v3472_v17  ;;  %v3347_v31 = vmul.f32 %v3091_v2, %v9053_v5  ;;  %v2828_v63 = vadd.f32 1.0, %v9092_v24  ;;  %v2832_v51 = vadd.f32 1.0, %v9134_v26  ;;  %v10597_v3 = vld [vmem:[#allocation99_spill] sm:$0xff]  ;;  %v10598_v52 = vld [vmem:[#allocation17_spill] sm:$0xff] }
 0x3c3   :  { %v4098_v44 = vadd.f32 %v10591_v35, %v3809_v9  ;;  %4301 = vmatmul.mubr.bf16.gmra.mrb[244].mxu1 %v3474_v40  ;;  %v3477_v33 = vpack.c.bf16 %v3345_v29, %v3341_v21  ;;  %v2830_v11 = vadd.f32 1.0, %v9099_v43  ;;  %v2834_v15 = vadd.f32 1.0, %v9141_v54  ;;  %v10593_v43 = vld [vmem:[#allocation15_spill] sm:$0xff]  ;;  %v5140_v35 = vld [vmem:[#allocation2 + $0x40] sm:$0xff] }
 0x3c4   :  { %v4331_v62 = vadd.f32 %v5138_v28, %v4095_v6  ;;  %v3479_v34 = vpack.c.bf16 %v3347_v31, %v3343_v13  ;;  %v3084_v1 = vmul.f32 0.5, %v2828_v63  ;;  %v3088_v5 = vmul.f32 0.5, %v2832_v51 }
 0x3c5   :  { %v4332_v20 = vadd.f32 %v5139_v12, %v4098_v44  ;;  %4019 = vmatprep.mubr.bf16.mxu0 %v3477_v33  ;;  %v3086_v61 = vmul.f32 0.5, %v2830_v11  ;;  %v3090_v24 = vmul.f32 0.5, %v2834_v15  ;;  %v2837_v26 = vadd.f32 1.0, %v9209_v10 }
 0x3c6   :  { %4395 = vst [vmem:[#allocation5 + $0x30] sm:$0xff] %v4331_v62  ;;  %v2841_v7 = vadd.f32 1.0, %v9231_v46  ;;  %4308 = vmatprep.mubr.bf16.mxu1 %v3479_v34  ;;  %v3340_v23 = vmul.f32 %v3084_v1, %v10592_v39  ;;  %v3344_v32 = vmul.f32 %v3088_v5, %v10593_v43  ;;  %v2839_v54 = vadd.f32 1.0, %v9214_v38  ;;  %v10595_v46 = vld [vmem:[#allocation65_spill] sm:$0xff]  ;;  %v10596_v38 = vld [vmem:[#allocation24_spill] sm:$0xff]  ;;  %v10602_v34 = vld [vmem:[#allocation78_spill] sm:$0xff] }
 0x3c7   :  { %4396 = vst [vmem:[#allocation5 + $0x38] sm:$0xff] %v4332_v20  ;;  %v2843_v56 = vadd.f32 1.0, %v9238_v45  ;;  %v3342_v8 = vmul.f32 %v3086_v61, %v10594_v50  ;;  %v3346_v49 = vmul.f32 %v3090_v24, %v9024_v16  ;;  %v3093_v57 = vmul.f32 0.5, %v2837_v26  ;;  %v10600_v62 = vld [vmem:[#allocation25_spill] sm:$0xff]  ;;  %v10603_v20 = vld [vmem:[#allocation68_spill] sm:$0xff]  ;;  %v10605_v24 = vld [vmem:[#allocation79_spill] sm:$0xff] }
 0x3c8   :  { %v3097_v18 = vmul.f32 0.5, %v2841_v7  ;;  %v3476_v17 = vpack.c.bf16 %v3344_v32, %v3340_v23  ;;  %v3095_v10 = vmul.f32 0.5, %v2839_v54  ;;  %v3814_v21 = vadd.f32 %v9186_v47, %v10595_v46  ;;  %v10604_v5 = vld [vmem:[#allocation69_spill] sm:$0xff]  ;;  %v10606_v7 = vld [vmem:[#allocation26_spill] sm:$0xff]  ;;  %v10607_v23 = vld [vmem:[#allocation72_spill] sm:$0xff] }
 0x3c9   :  { %v3099_v22 = vmul.f32 0.5, %v2843_v56  ;;  %v3478_v2 = vpack.c.bf16 %v3346_v49, %v3342_v8  ;;  %v3349_v27 = vmul.f32 %v3093_v57, %v9097_v4  ;;  %v3817_v45 = vadd.f32 %v9186_v47, %v10596_v38  ;;  %v10608_v32 = vld [vmem:[#allocation101_spill] sm:$0xff]  ;;  %v10609_v56 = vld [vmem:[#allocation103_spill] sm:$0xff]  ;;  %v5142_v49 = vld [vmem:[#allocation2 + $0x50] sm:$0xff] }
 0x3ca   :  { %v3353_v9 = vmul.f32 %v3097_v18, %v9147_v58  ;;  %4020 = vmatmul.mubr.bf16.gmra.mrb[248].mxu0 %v3476_v17  ;;  %v3351_v55 = vmul.f32 %v3095_v10, %v9116_v41  ;;  %v4103_v40 = vadd.f32 %v10597_v3, %v3814_v21  ;;  %v2836_v29 = vadd.f32 1.0, %v9197_v48  ;;  %v10599_v48 = vld [vmem:[#allocation81_spill] sm:$0xff]  ;;  %v5143_v46 = vld [vmem:[#allocation2 + $0x58] sm:$0xff]  ;;  %v10613_v3 = vld [vmem:[#allocation106_spill] sm:$0xff] }
 0x3cb   :  { %v3355_v16 = vmul.f32 %v3099_v22, %v9157_v60  ;;  %4309 = vmatmul.mubr.bf16.gmra.mrb[248].mxu1 %v3478_v2  ;;  %v4106_v6 = vadd.f32 %v10598_v52, %v3817_v45  ;;  %v2840_v4 = vadd.f32 1.0, %v9221_v36  ;;  %v2838_v58 = vadd.f32 1.0, %v9201_v14  ;;  %v5141_v60 = vld [vmem:[#allocation2 + $0x48] sm:$0xff]  ;;  %v10601_v14 = vld [vmem:[#allocation91_spill] sm:$0xff]  ;;  %v5144_v2 = vld [vmem:[#allocation2 + $0x60] sm:$0xff]  ;;  %v9348_v45 = vpop.f32.mrb[200].mxu0 }
 0x3cc   :  { %v3481_v13 = vpack.c.bf16 %v3353_v9, %v3349_v27  ;;  %v4333_v44 = vadd.f32 %v5140_v35, %v4103_v40  ;;  %v3092_v63 = vmul.f32 0.5, %v2836_v29  ;;  %v2842_v41 = vadd.f32 1.0, %v9224_v37  ;;  %v10611_v17 = vld [vmem:[#allocation105_spill] sm:$0xff]  ;;  %v10612_v9 = vld [vmem:[#allocation104_spill] sm:$0xff]  ;;  %v10616_v35 = vld [vmem:[#allocation90_spill] sm:$0xff] }
 0x3cd   :  { %v3483_v31 = vpack.c.bf16 %v3355_v16, %v3351_v55  ;;  %v4334_v51 = vadd.f32 %v5141_v60, %v4106_v6  ;;  %v3096_v25 = vmul.f32 0.5, %v2840_v4  ;;  %v3094_v33 = vmul.f32 0.5, %v2838_v58  ;;  %v5145_v55 = vld [vmem:[#allocation2 + $0x68] sm:$0xff]  ;;  %v10614_v29 = vld [vmem:[#allocation88_spill] sm:$0xff]  ;;  %v3927_v4 = vpop.f32.mrb[201].mxu0  ;;  %v5146_v58 = vld [vmem:[#allocation2 + $0x70] sm:$0xff] }
 0x3ce   :  { %4027 = vmatprep.mubr.bf16.mxu0 %v3481_v13  ;;  %v3822_v28 = vadd.f32 %v9186_v47, %v10599_v48  ;;  %4397 = vst [vmem:[#allocation5 + $0x40] sm:$0xff] %v4333_v44  ;;  %v3348_v36 = vmul.f32 %v3092_v63, %v10600_v62  ;;  %v3098_v11 = vmul.f32 0.5, %v2842_v41  ;;  %v3825_v15 = vadd.f32 %v9186_v47, %v10601_v14  ;;  %v10615_v52 = vld [vmem:[#allocation80_spill] sm:$0xff]  ;;  %v10617_v63 = vld [vmem:[#allocation107_spill] sm:$0xff]  ;;  %v10618_v60 = vld [vmem:[#allocation13_spill] sm:$0xff] }
 0x3cf   :  { %4316 = vmatprep.mubr.bf16.mxu1 %v3483_v31  ;;  %v3830_v12 = vadd.f32 %v9186_v47, %v10602_v34  ;;  %4398 = vst [vmem:[#allocation5 + $0x48] sm:$0xff] %v4334_v51  ;;  %v3352_v37 = vmul.f32 %v3096_v25, %v9120_v42  ;;  %v3350_v1 = vmul.f32 %v3094_v33, %v10603_v20  ;;  %v10610_v42 = vld [vmem:[#allocation102_spill] sm:$0xff]  ;;  %v9361_v25 = vpop.f32.mrb[200].mxu1  ;;  %v9363_v33 = vpop.f32.mrb[202].mxu0  ;;  %v5147_v48 = vld [vmem:[#allocation2 + $0x78] sm:$0xff]  ;;  %v10632_v4 = vld [vmem:[#allocation36_spill] sm:$0xff] }
 0x3d0   :  { %v4111_v61 = vadd.f32 %v10604_v5, %v3822_v28  ;;  %v3833_v26 = vadd.f32 %v9186_v47, %v10605_v24  ;;  %v3354_v39 = vmul.f32 %v3098_v11, %v10606_v7  ;;  %v4114_v43 = vadd.f32 %v10607_v23, %v3825_v15  ;;  %v10619_v62 = vld [vmem:[#allocation34_spill] sm:$0xff]  ;;  %v10620_v11 = vld [vmem:[#allocation21_spill] sm:$0xff]  ;;  %v10621_v15 = vld [vmem:[#allocation111_spill] sm:$0xff] }
 0x3d1   :  { %v4119_v54 = vadd.f32 %v10608_v32, %v3830_v12  ;;  %v3838_v50 = vadd.f32 %v9186_v47, %v10609_v56  ;;  %v3480_v8 = vpack.c.bf16 %v3352_v37, %v3348_v36  ;;  %v3841_v10 = vadd.f32 %v9186_v47, %v10611_v17  ;;  %v4216_v12 = vpop.f32.mrb[201].mxu1  ;;  %v3930_v37 = vpop.f32.mrb[203].mxu0  ;;  %v10622_v20 = vld [vmem:[#allocation10_spill] sm:$0xff]  ;;  %v10623_v5 = vld [vmem:[#allocation108_spill] sm:$0xff]  ;;  %v10624_v24 = vld [vmem:[#allocation93_spill] sm:$0xff] }
 0x3d2   :  { %v4335_v57 = vadd.f32 %v5142_v49, %v4111_v61  ;;  %v4122_v18 = vadd.f32 %v10610_v42, %v3833_v26  ;;  %v3482_v22 = vpack.c.bf16 %v3354_v39, %v3350_v1  ;;  %v4336_v21 = vadd.f32 %v5143_v46, %v4114_v43  ;;  %v10625_v7 = vld [vmem:[#allocation33_spill] sm:$0xff]  ;;  %v9374_v23 = vpop.f32.mrb[202].mxu1  ;;  %v5148_v43 = vld [vmem:[#allocation2 + $0x80] sm:$0xff]  ;;  %v10627_v49 = vld [vmem:[#allocation114_spill] sm:$0xff] }
 0x3d3   :  { %v4337_v27 = vadd.f32 %v5144_v2, %v4119_v54  ;;  %v4127_v38 = vadd.f32 %v10612_v9, %v3838_v50  ;;  %4028 = vmatmul.mubr.bf16.gmra.mrb[252].mxu0 %v3480_v8  ;;  %v4130_v40 = vadd.f32 %v10613_v3, %v3841_v10  ;;  %v3846_v13 = vadd.f32 %v9186_v47, %v10614_v29  ;;  %v5149_v54 = vld [vmem:[#allocation2 + $0x88] sm:$0xff]  ;;  %v10626_v50 = vld [vmem:[#allocation112_spill] sm:$0xff]  ;;  %v4219_v42 = vpop.f32.mrb[203].mxu1  ;;  %v5151_v10 = vld [vmem:[#allocation2 + $0x98] sm:$0xff] }
 0x3d4   :  { %4399 = vst [vmem:[#allocation5 + $0x50] sm:$0xff] %v4335_v57  ;;  %v4338_v16 = vadd.f32 %v5145_v55, %v4122_v18  ;;  %v3849_v6 = vadd.f32 %v9186_v47, %v10615_v52  ;;  %4317 = vmatmul.mubr.bf16.gmra.mrb[252].mxu1 %v3482_v22  ;;  %4400 = vst [vmem:[#allocation5 + $0x58] sm:$0xff] %v4336_v21  ;;  %v3854_v44 = vadd.f32 %v9186_v47, %v10616_v35  ;;  %v5150_v18 = vld [vmem:[#allocation2 + $0x90] sm:$0xff]  ;;  %v5152_v46 = vld [vmem:[#allocation2 + $0xa0] sm:$0xff] }
 0x3d5   :  { %4401 = vst [vmem:[#allocation5 + $0x60] sm:$0xff] %v4337_v27  ;;  %v4339_v31 = vadd.f32 %v5146_v58, %v4127_v38  ;;  %v3857_v41 = vadd.f32 %v9186_v47, %v10617_v63  ;;  %v3862_v51 = vadd.f32 %v9186_v47, %v10618_v60  ;;  %v4340_v28 = vadd.f32 %v5147_v48, %v4130_v40  ;;  %v10628_v2 = vld [vmem:[#allocation85_spill] sm:$0xff]  ;;  %v10629_v55 = vld [vmem:[#allocation115_spill] sm:$0xff]  ;;  %v10630_v3 = vld [vmem:[#allocation48_spill] sm:$0xff] }
 0x3d6   :  { %4402 = vst [vmem:[#allocation5 + $0x68] sm:$0xff] %v4338_v16  ;;  %v4135_v36 = vadd.f32 %v10619_v62, %v3846_v13  ;;  %v4138_v14 = vadd.f32 %v10620_v11, %v3849_v6  ;;  %v3865_v34 = vadd.f32 %v9186_v47, %v10621_v15  ;;  %v4143_v1 = vadd.f32 %v10622_v20, %v3854_v44  ;;  %v5153_v9 = vld [vmem:[#allocation2 + $0xa8] sm:$0xff]  ;;  %v10631_v29 = vld [vmem:[#allocation18_spill] sm:$0xff]  ;;  %v10634_v44 = vld [vmem:[#allocation55_spill] sm:$0xff] }
 0x3d7   :  { %4403 = vst [vmem:[#allocation5 + $0x70] sm:$0xff] %v4339_v31  ;;  %v4146_v61 = vadd.f32 %v10623_v5, %v3857_v41  ;;  %v4151_v26 = vadd.f32 %v10624_v24, %v3862_v51  ;;  %v3870_v39 = vadd.f32 %v9186_v47, %v10625_v7  ;;  %4404 = vst [vmem:[#allocation5 + $0x78] sm:$0xff] %v4340_v28  ;;  %v5154_v52 = vld [vmem:[#allocation2 + $0xb0] sm:$0xff]  ;;  %v10633_v31 = vld [vmem:[#allocation28_spill] sm:$0xff] }
 0x3d8   :  { %v4341_v32 = vadd.f32 %v5148_v43, %v4135_v36  ;;  %v4342_v56 = vadd.f32 %v5149_v54, %v4138_v14  ;;  %v4154_v8 = vadd.f32 %v10626_v50, %v3865_v34  ;;  %v3873_v57 = vadd.f32 %v9186_v47, %v10627_v49  ;;  %v5155_v41 = vld [vmem:[#allocation2 + $0xb8] sm:$0xff]  ;;  %v10635_v51 = vld [vmem:[#allocation116_spill] sm:$0xff]  ;;  %v10636_v28 = vld [vmem:[#allocation98_spill] sm:$0xff] }
 0x3d9   :  { %v4343_v17 = vadd.f32 %v5150_v18, %v4143_v1  ;;  %v4344_v22 = vadd.f32 %v5151_v10, %v4146_v61  ;;  %v4345_v21 = vadd.f32 %v5152_v46, %v4151_v26  ;;  %v4159_v27 = vadd.f32 %v10628_v2, %v3870_v39  ;;  %v10637_v36 = vld [vmem:[#allocation94_spill] sm:$0xff]  ;;  %v10639_v34 = vld [vmem:[#allocation87_spill] sm:$0xff]  ;;  %v5156_v61 = vld [vmem:[#allocation2 + $0xc0] sm:$0xff] }
 0x3da   :  { %4405 = vst [vmem:[#allocation5 + $0x80] sm:$0xff] %v4341_v32  ;;  %4406 = vst [vmem:[#allocation5 + $0x88] sm:$0xff] %v4342_v56  ;;  %v4346_v38 = vadd.f32 %v5153_v9, %v4154_v8  ;;  %v4162_v16 = vadd.f32 %v10629_v55, %v3873_v57  ;;  %v3878_v40 = vadd.f32 %v9186_v47, %v10630_v3  ;;  %v10638_v14 = vld [vmem:[#allocation86_spill] sm:$0xff]  ;;  %v5157_v26 = vld [vmem:[#allocation2 + $0xc8] sm:$0xff] }
 0x3db   :  { %v3881_v13 = vadd.f32 %v9186_v47, %v10631_v29  ;;  %4407 = vst [vmem:[#allocation5 + $0x90] sm:$0xff] %v4343_v17  ;;  %4408 = vst [vmem:[#allocation5 + $0x98] sm:$0xff] %v4344_v22  ;;  %v4347_v6 = vadd.f32 %v5154_v52, %v4159_v27  ;;  %v3886_v58 = vadd.f32 %v9186_v47, %v10632_v4  ;;  %v10640_v37 = vld [vmem:[#allocation38_spill] sm:$0xff]  ;;  %v10642_v39 = vld [vmem:[#allocation9_spill] sm:$0xff] }
 0x3dc   :  { %4409 = vst [vmem:[#allocation5 + $0xa0] sm:$0xff] %v4345_v21  ;;  %v3889_v35 = vadd.f32 %v9186_v47, %v10633_v31  ;;  %v3894_v63 = vadd.f32 %v9186_v47, %v10634_v44  ;;  %4410 = vst [vmem:[#allocation5 + $0xa8] sm:$0xff] %v4346_v38  ;;  %v4348_v60 = vadd.f32 %v5155_v41, %v4162_v16  ;;  %v10641_v1 = vld [vmem:[#allocation62_spill] sm:$0xff]  ;;  %v10643_v32 = vld [vmem:[#allocation96_spill] sm:$0xff] }
 0x3dd   :  { %v4167_v48 = vadd.f32 %v10635_v51, %v3878_v40  ;;  %v4170_v62 = vadd.f32 %v10636_v28, %v3881_v13  ;;  %v3897_v11 = vadd.f32 %v9186_v47, %v10637_v36  ;;  %4411 = vst [vmem:[#allocation5 + $0xb0] sm:$0xff] %v4347_v6  ;;  %v4175_v15 = vadd.f32 %v10638_v14, %v3886_v58  ;;  %v5158_v56 = vld [vmem:[#allocation2 + $0xd0] sm:$0xff]  ;;  %v5159_v8 = vld [vmem:[#allocation2 + $0xd8] sm:$0xff]  ;;  %v5160_v57 = vld [vmem:[#allocation2 + $0xe0] sm:$0xff] }
 0x3de   :  { %v4178_v12 = vadd.f32 %v10639_v34, %v3889_v35  ;;  %v4183_v20 = vadd.f32 %v10640_v37, %v3894_v63  ;;  %v3902_v5 = vadd.f32 %v9186_v47, %v10641_v1  ;;  %4412 = vst [vmem:[#allocation5 + $0xb8] sm:$0xff] %v4348_v60  ;;  %v3905_v54 = vadd.f32 %v9186_v47, %v10643_v32  ;;  %v10644_v18 = vld [vmem:[#allocation75_spill] sm:$0xff]  ;;  %v5161_v10 = vld [vmem:[#allocation2 + $0xe8] sm:$0xff]  ;;  %v10646_v2 = vld [vmem:[#allocation30_spill] sm:$0xff]  ;;  %v4222_v14 = vpop.f32.mrb[204].mxu1 }
 0x3df   :  { %v4349_v24 = vadd.f32 %v5156_v61, %v4167_v48  ;;  %v4350_v7 = vadd.f32 %v5157_v26, %v4170_v62  ;;  %v4186_v43 = vadd.f32 %v10642_v39, %v3897_v11  ;;  %v4351_v50 = vadd.f32 %v5158_v56, %v4175_v15  ;;  %v10645_v46 = vld [vmem:[#allocation97_spill] sm:$0xff]  ;;  %v5162_v38 = vld [vmem:[#allocation2 + $0xf0] sm:$0xff]  ;;  %v5163_v29 = vld [vmem:[#allocation2 + $0xf8] sm:$0xff]  ;;  %v4224_v34 = vpop.f32.mrb[205].mxu1 }
 0x3e0   :  { %v4352_v49 = vadd.f32 %v5159_v8, %v4178_v12  ;;  %v4353_v42 = vadd.f32 %v5160_v57, %v4183_v20  ;;  %v4191_v17 = vadd.f32 %v10644_v18, %v3902_v5  ;;  %v4194_v21 = vadd.f32 %v10645_v46, %v3905_v54  ;;  %v10647_v52 = vld [vmem:[#allocation19_spill] sm:$0xff]  ;;  %v5164_v35 = vld [vmem:[#allocation2 + $0x100] sm:$0xff]  ;;  %v5165_v44 = vld [vmem:[#allocation2 + $0x108] sm:$0xff]  ;;  %v4225_v20 = vpop.f32.mrb[206].mxu1 }
 0x3e1   :  { %4413 = vst [vmem:[#allocation5 + $0xc0] sm:$0xff] %v4349_v24  ;;  %4414 = vst [vmem:[#allocation5 + $0xc8] sm:$0xff] %v4350_v7  ;;  %v4354_v22 = vadd.f32 %v5161_v10, %v4186_v43  ;;  %v3910_v27 = vadd.f32 %v9186_v47, %v10646_v2  ;;  %v3913_v9 = vadd.f32 %v9186_v47, %v9219_v19  ;;  %v10648_v19 = vld [vmem:[#allocation20_spill] sm:$0xff]  ;;  %v5166_v60 = vld [vmem:[#allocation2 + $0x110] sm:$0xff]  ;;  %v4227_v24 = vpop.f32.mrb[207].mxu1 }
 0x3e2   :  { %4415 = vst [vmem:[#allocation5 + $0xd0] sm:$0xff] %v4351_v50  ;;  %4416 = vst [vmem:[#allocation5 + $0xd8] sm:$0xff] %v4352_v49  ;;  %v4355_v55 = vadd.f32 %v5162_v38, %v4191_v17  ;;  %v3918_v16 = vadd.f32 %v9186_v47, %v9279_v30  ;;  %v3921_v3 = vadd.f32 %v9186_v47, %v9289_v59  ;;  %v5167_v48 = vld [vmem:[#allocation2 + $0x118] sm:$0xff]  ;;  %v5168_v62 = vld [vmem:[#allocation2 + $0x120] sm:$0xff] }
 0x3e3   :  { %4417 = vst [vmem:[#allocation5 + $0xe0] sm:$0xff] %v4353_v42  ;;  %v3926_v40 = vadd.f32 %v9186_v47, %v9348_v45  ;;  %4418 = vst [vmem:[#allocation5 + $0xe8] sm:$0xff] %v4354_v22  ;;  %v4356_v13 = vadd.f32 %v5163_v29, %v4194_v21  ;;  %v4199_v6 = vadd.f32 %v10647_v52, %v3910_v27  ;;  %v5170_v1 = vld [vmem:[#allocation2 + $0x130] sm:$0xff]  ;;  %v5171_v26 = vld [vmem:[#allocation2 + $0x138] sm:$0xff] }
 0x3e4   :  { %v4202_v4 = vadd.f32 %v10648_v19, %v3913_v9  ;;  %v3929_v58 = vadd.f32 %v9186_v47, %v9363_v33  ;;  %4419 = vst [vmem:[#allocation5 + $0xf0] sm:$0xff] %v4355_v55  ;;  %v4207_v31 = vadd.f32 %v9287_v53, %v3918_v16  ;;  %v4210_v30 = vadd.f32 %v9297_v0, %v3921_v3  ;;  %v5169_v53 = vld [vmem:[#allocation2 + $0x128] sm:$0xff]  ;;  %v3933_v0 = vpop.f32.mrb[204].mxu0  ;;  %v5172_v18 = vld [vmem:[#allocation2 + $0x140] sm:$0xff]  ;;  %v5174_v52 = vld [vmem:[#allocation2 + $0x150] sm:$0xff] }
 0x3e5   :  { %v4215_v59 = vadd.f32 %v9361_v25, %v3926_v40  ;;  %4420 = vst [vmem:[#allocation5 + $0xf8] sm:$0xff] %v4356_v13  ;;  %v4357_v45 = vadd.f32 %v5164_v35, %v4199_v6  ;;  %v3934_v25 = vadd.f32 %v9186_v47, %v3933_v0  ;;  %v3935_v11 = vpop.f32.mrb[205].mxu0  ;;  %v5173_v46 = vld [vmem:[#allocation2 + $0x148] sm:$0xff] }
 0x3e6   :  { %v4358_v63 = vadd.f32 %v5165_v44, %v4202_v4  ;;  %v4218_v41 = vadd.f32 %v9374_v23, %v3929_v58  ;;  %v4359_v51 = vadd.f32 %v5166_v60, %v4207_v31  ;;  %v4360_v28 = vadd.f32 %v5167_v48, %v4210_v30  ;;  %v3936_v23 = vpop.f32.mrb[206].mxu0  ;;  %v5175_v58 = vld [vmem:[#allocation2 + $0x158] sm:$0xff] }
 0x3e7   :  { %v4361_v33 = vadd.f32 %v5168_v62, %v4215_v59  ;;  %4421 = vst [vmem:[#allocation5 + $0x100] sm:$0xff] %v4357_v45  ;;  %v4223_v15 = vadd.f32 %v4222_v14, %v3934_v25  ;;  %v3937_v12 = vadd.f32 %v9186_v47, %v3936_v23  ;;  %v3938_v37 = vpop.f32.mrb[207].mxu0 }
 0x3e8   :  { %4422 = vst [vmem:[#allocation5 + $0x108] sm:$0xff] %v4358_v63  ;;  %v4362_v36 = vadd.f32 %v5169_v53, %v4218_v41  ;;  %4423 = vst [vmem:[#allocation5 + $0x110] sm:$0xff] %v4359_v51 }
 0x3e9   :  { %4424 = vst [vmem:[#allocation5 + $0x118] sm:$0xff] %v4360_v28  ;;  %4425 = vst [vmem:[#allocation5 + $0x120] sm:$0xff] %v4361_v33  ;;  %v4363_v5 = vadd.f32 %v5170_v1, %v4223_v15  ;;  %v4226_v61 = vadd.f32 %v4225_v20, %v3937_v12  ;;  %v5176_v28 = vld [vmem:[#allocation2 + $0x160] sm:$0xff] }
 0x3ea   :  { %4426 = vst [vmem:[#allocation5 + $0x128] sm:$0xff] %v4362_v36  ;;  %v5177_v36 = vld [vmem:[#allocation2 + $0x168] sm:$0xff] }
 0x3eb   :  { %4427 = vst [vmem:[#allocation5 + $0x130] sm:$0xff] %v4363_v5  ;;  %v4364_v7 = vadd.f32 %v5171_v26, %v4226_v61  ;;  %v5178_v5 = vld [vmem:[#allocation2 + $0x170] sm:$0xff] }
 0x3ed   :  { %4428 = vst [vmem:[#allocation5 + $0x138] sm:$0xff] %v4364_v7  ;;  %v5179_v7 = vld [vmem:[#allocation2 + $0x178] sm:$0xff] }
 0x3f2   :  { %v3941_v39 = vpop.f32.mrb[208].mxu0 }
 0x3f3   :  { %v3942_v43 = vadd.f32 %v9186_v47, %v3941_v39  ;;  %v3943_v32 = vpop.f32.mrb[209].mxu0 }
 0x3f4   :  { %v4230_v54 = vpop.f32.mrb[208].mxu1  ;;  %v3944_v56 = vpop.f32.mrb[210].mxu0 }
 0x3f5   :  { %v4231_v50 = vadd.f32 %v4230_v54, %v3942_v43  ;;  %v4232_v8 = vpop.f32.mrb[209].mxu1  ;;  %v3945_v49 = vadd.f32 %v9186_v47, %v3944_v56  ;;  %v3946_v57 = vpop.f32.mrb[211].mxu0 }
 0x3f6   :  { %v4233_v42 = vpop.f32.mrb[210].mxu1 }
 0x3f7   :  { %v4365_v17 = vadd.f32 %v5172_v18, %v4231_v50  ;;  %v4234_v10 = vadd.f32 %v4233_v42, %v3945_v49  ;;  %v4235_v22 = vpop.f32.mrb[211].mxu1 }
 0x3f9   :  { %4429 = vst [vmem:[#allocation5 + $0x140] sm:$0xff] %v4365_v17  ;;  %v4366_v21 = vadd.f32 %v5173_v46, %v4234_v10  ;;  %v5180_v17 = vld [vmem:[#allocation2 + $0x180] sm:$0xff] }
 0x3fb   :  { %4430 = vst [vmem:[#allocation5 + $0x148] sm:$0xff] %v4366_v21  ;;  %v5181_v21 = vld [vmem:[#allocation2 + $0x188] sm:$0xff] }
 0x408   :  { %v3949_v2 = vpop.f32.mrb[212].mxu0 }
 0x409   :  { %v3950_v27 = vadd.f32 %v9186_v47, %v3949_v2  ;;  %v3951_v9 = vpop.f32.mrb[213].mxu0 }
 0x40a   :  { %v4238_v38 = vpop.f32.mrb[212].mxu1  ;;  %v3952_v55 = vpop.f32.mrb[214].mxu0 }
 0x40b   :  { %v4239_v16 = vadd.f32 %v4238_v38, %v3950_v27  ;;  %v4240_v3 = vpop.f32.mrb[213].mxu1  ;;  %v3953_v40 = vadd.f32 %v9186_v47, %v3952_v55  ;;  %v3954_v29 = vpop.f32.mrb[215].mxu0 }
 0x40c   :  { %v4241_v13 = vpop.f32.mrb[214].mxu1 }
 0x40d   :  { %v4367_v6 = vadd.f32 %v5174_v52, %v4239_v16  ;;  %v4242_v19 = vadd.f32 %v4241_v13, %v3953_v40  ;;  %v4243_v4 = vpop.f32.mrb[215].mxu1 }
 0x40f   :  { %4431 = vst [vmem:[#allocation5 + $0x150] sm:$0xff] %v4367_v6  ;;  %v4368_v31 = vadd.f32 %v5175_v58, %v4242_v19  ;;  %v5182_v6 = vld [vmem:[#allocation2 + $0x190] sm:$0xff] }
 0x411   :  { %4432 = vst [vmem:[#allocation5 + $0x158] sm:$0xff] %v4368_v31  ;;  %v5183_v31 = vld [vmem:[#allocation2 + $0x198] sm:$0xff] }
 0x41e   :  { %v3957_v30 = vpop.f32.mrb[216].mxu0 }
 0x41f   :  { %v3958_v59 = vadd.f32 %v9186_v47, %v3957_v30  ;;  %v3959_v35 = vpop.f32.mrb[217].mxu0 }
 0x420   :  { %v4246_v45 = vpop.f32.mrb[216].mxu1  ;;  %v3960_v44 = vpop.f32.mrb[218].mxu0 }
 0x421   :  { %v4247_v63 = vadd.f32 %v4246_v45, %v3958_v59  ;;  %v4248_v41 = vpop.f32.mrb[217].mxu1  ;;  %v3961_v60 = vadd.f32 %v9186_v47, %v3960_v44  ;;  %v3962_v51 = vpop.f32.mrb[219].mxu0 }
 0x422   :  { %v4249_v48 = vpop.f32.mrb[218].mxu1 }
 0x423   :  { %v4369_v62 = vadd.f32 %v5176_v28, %v4247_v63  ;;  %v4250_v33 = vadd.f32 %v4249_v48, %v3961_v60  ;;  %v4251_v53 = vpop.f32.mrb[219].mxu1 }
 0x425   :  { %4433 = vst [vmem:[#allocation5 + $0x160] sm:$0xff] %v4369_v62  ;;  %v4370_v0 = vadd.f32 %v5177_v36, %v4250_v33  ;;  %v5184_v62 = vld [vmem:[#allocation2 + $0x1a0] sm:$0xff] }
 0x427   :  { %4434 = vst [vmem:[#allocation5 + $0x168] sm:$0xff] %v4370_v0  ;;  %v5185_v0 = vld [vmem:[#allocation2 + $0x1a8] sm:$0xff] }
 0x436   :  { %v3965_v25 = vpop.f32.mrb[220].mxu0 }
 0x437   :  { %v3966_v11 = vadd.f32 %v9186_v47, %v3965_v25  ;;  %v3967_v14 = vpop.f32.mrb[221].mxu0 }
 0x438   :  { %v4254_v23 = vpop.f32.mrb[220].mxu1  ;;  %v3968_v15 = vpop.f32.mrb[222].mxu0 }
 0x439   :  { %v4255_v34 = vadd.f32 %v4254_v23, %v3966_v11  ;;  %v4256_v12 = vpop.f32.mrb[221].mxu1  ;;  %v3969_v37 = vadd.f32 %v9186_v47, %v3968_v15  ;;  %v3970_v20 = vpop.f32.mrb[223].mxu0 }
 0x43a   :  { %v4257_v1 = vpop.f32.mrb[222].mxu1 }
 0x43b   :  { %v4371_v61 = vadd.f32 %v5178_v5, %v4255_v34  ;;  %v4258_v24 = vadd.f32 %v4257_v1, %v3969_v37  ;;  %v4259_v26 = vpop.f32.mrb[223].mxu1 }
 0x43d   :  { %4435 = vst [vmem:[#allocation5 + $0x170] sm:$0xff] %v4371_v61  ;;  %v4372_v39 = vadd.f32 %v5179_v7, %v4258_v24  ;;  %v5186_v24 = vld [vmem:[#allocation2 + $0x1b0] sm:$0xff] }
 0x43f   :  { %4436 = vst [vmem:[#allocation5 + $0x178] sm:$0xff] %v4372_v39  ;;  %v5187_v39 = vld [vmem:[#allocation2 + $0x1b8] sm:$0xff] }
 0x44e   :  { %v3973_v43 = vpop.f32.mrb[224].mxu0 }
 0x44f   :  { %v3974_v32 = vadd.f32 %v9186_v47, %v3973_v43  ;;  %v3975_v54 = vpop.f32.mrb[225].mxu0 }
 0x450   :  { %v3976_v50 = vpop.f32.mrb[226].mxu0 }
 0x451   :  { %v4262_v56 = vpop.f32.mrb[224].mxu1  ;;  %v3977_v57 = vadd.f32 %v9186_v47, %v3976_v50  ;;  %v3978_v42 = vpop.f32.mrb[227].mxu0 }
 0x452   :  { %v4263_v8 = vadd.f32 %v4262_v56, %v3974_v32  ;;  %v4264_v49 = vpop.f32.mrb[225].mxu1 }
 0x453   :  { %v4265_v18 = vpop.f32.mrb[226].mxu1 }
 0x454   :  { %v4373_v10 = vadd.f32 %v5180_v17, %v4263_v8  ;;  %v4266_v22 = vadd.f32 %v4265_v18, %v3977_v57  ;;  %v4267_v46 = vpop.f32.mrb[227].mxu1 }
 0x456   :  { %4437 = vst [vmem:[#allocation5 + $0x180] sm:$0xff] %v4373_v10  ;;  %v4374_v2 = vadd.f32 %v5181_v21, %v4266_v22  ;;  %v5188_v22 = vld [vmem:[#allocation2 + $0x1c0] sm:$0xff] }
 0x458   :  { %4438 = vst [vmem:[#allocation5 + $0x188] sm:$0xff] %v4374_v2  ;;  %v5189_v2 = vld [vmem:[#allocation2 + $0x1c8] sm:$0xff] }
 0x465   :  { %v3981_v27 = vpop.f32.mrb[228].mxu0 }
 0x466   :  { %v3982_v9 = vadd.f32 %v9186_v47, %v3981_v27  ;;  %v3983_v38 = vpop.f32.mrb[229].mxu0  ;;  %v4270_v55 = vpop.f32.mrb[228].mxu1 }
 0x467   :  { %v3984_v16 = vpop.f32.mrb[230].mxu0  ;;  %v4272_v40 = vpop.f32.mrb[229].mxu1  ;;  %v5190_v38 = vld [vmem:[%s9465_s4] ss:$0 sm:$0xff]  ;;  %s5249_s4 = smov [#allocation5]  }
 0x468   :  { %v4271_v3 = vadd.f32 %v4270_v55, %v3982_v9  ;;  %v3985_v29 = vadd.f32 %v9186_v47, %v3984_v16  ;;  %v3986_v13 = vpop.f32.mrb[231].mxu0  ;;  %v4273_v52 = vpop.f32.mrb[230].mxu1  ;;  %s4458_s15 = sshll.u32 %s5249_s4, 4  ;;  %s4459_s15 = int_to_ptr.vmem [resolvable:$true] %s4458_s15 }
 0x469   :  { %v4275_v58 = vpop.f32.mrb[231].mxu1  ;;  %s5219_s16 = scalar_lea.vmem %s4459_s15, 8192  ;;  %p5224_p9 = scmp.lt.s32.totalorder %s4459_s15, %s4459_s15 }
 0x46a   :  { %v4375_v19 = vadd.f32 %v5182_v6, %v4271_v3  ;;  %v4274_v4 = vadd.f32 %v4273_v52, %v3985_v29  ;;  %p5220_p8 = scmp.ne.s32.totalorder %s4459_s15, %s5219_s16  ;;  %p5225_p10 = scmp.lt.s32.totalorder %s5219_s16, %s5219_s16 }
 0x46c   :  { %4439 = vst [vmem:[#allocation5 + $0x190] sm:$0xff] %v4375_v19  ;;  %v4376_v30 = vadd.f32 %v5183_v31, %v4274_v4  ;;  %v5191_v4 = vld [vmem:[#allocation2 + $0x1d0] sm:$0xff]  ;;  %p5226_p11 = por %p5225_p10, %p5224_p9 }
 0x46e   :  { %4440 = vst [vmem:[#allocation5 + $0x198] sm:$0xff] %v4376_v30  ;;  %v5192_v30 = vld [vmem:[#allocation2 + $0x1d8] sm:$0xff]  ;;  %p5227_p12 = pnand %p5226_p11, %p5220_p8 }
 0x47a   :  { %v3989_v59 = vpop.f32.mrb[232].mxu0 }
 0x47b   :  { %v3990_v35 = vadd.f32 %v9186_v47, %v3989_v59  ;;  %v3991_v45 = vpop.f32.mrb[233].mxu0 }
 0x47c   :  { %v4278_v44 = vpop.f32.mrb[232].mxu1  ;;  %v3992_v63 = vpop.f32.mrb[234].mxu0 }
 0x47d   :  { %v4279_v41 = vadd.f32 %v4278_v44, %v3990_v35  ;;  %v4280_v60 = vpop.f32.mrb[233].mxu1  ;;  %v3993_v51 = vadd.f32 %v9186_v47, %v3992_v63  ;;  %v3994_v48 = vpop.f32.mrb[235].mxu0 }
 0x47e   :  { %v4281_v28 = vpop.f32.mrb[234].mxu1 }
 0x47f   :  { %v4377_v33 = vadd.f32 %v5184_v62, %v4279_v41  ;;  %v4282_v53 = vadd.f32 %v4281_v28, %v3993_v51  ;;  %v4283_v36 = vpop.f32.mrb[235].mxu1 }
 0x481   :  { %4441 = vst [vmem:[#allocation5 + $0x1a0] sm:$0xff] %v4377_v33  ;;  %v4378_v25 = vadd.f32 %v5185_v0, %v4282_v53  ;;  %v5193_v53 = vld [vmem:[#allocation2 + $0x1e0] sm:$0xff] }
 0x483   :  { %4442 = vst [vmem:[#allocation5 + $0x1a8] sm:$0xff] %v4378_v25  ;;  %v5194_v25 = vld [vmem:[#allocation2 + $0x1e8] sm:$0xff] }
 0x484   :  { %v3997_v11 = vpop.f32.mrb[236].mxu0 }
 0x485   :  { %v3998_v14 = vadd.f32 %v9186_v47, %v3997_v11  ;;  %v3999_v15 = vpop.f32.mrb[237].mxu0 }
 0x486   :  { %v4286_v23 = vpop.f32.mrb[236].mxu1  ;;  %v4000_v12 = vpop.f32.mrb[238].mxu0 }
 0x487   :  { %v4288_v34 = vpop.f32.mrb[237].mxu1  ;;  %v4287_v37 = vadd.f32 %v4286_v23, %v3998_v14  ;;  %v4001_v20 = vadd.f32 %v9186_v47, %v4000_v12  ;;  %v4002_v5 = vpop.f32.mrb[239].mxu0 }
 0x488   :  { %v4289_v1 = vpop.f32.mrb[238].mxu1 }
 0x489   :  { %v4291_v61 = vpop.f32.mrb[239].mxu1  ;;  %v4379_v26 = vadd.f32 %v5186_v24, %v4287_v37  ;;  %v4290_v7 = vadd.f32 %v4289_v1, %v4001_v20 }
 0x48b   :  { %4443 = vst [vmem:[#allocation5 + $0x1b0] sm:$0xff] %v4379_v26  ;;  %v4380_v43 = vadd.f32 %v5187_v39, %v4290_v7  ;;  %v5195_v26 = vld [vmem:[#allocation2 + $0x1f0] sm:$0xff] }
 0x48d   :  { %4444 = vst [vmem:[#allocation5 + $0x1b8] sm:$0xff] %v4380_v43  ;;  %v4005_v32 = vpop.f32.mrb[240].mxu0  ;;  %v5196_v43 = vld [vmem:[#allocation2 + $0x1f8] sm:$0xff] }
 0x48e   :  { %v4294_v54 = vpop.f32.mrb[240].mxu1  ;;  %v4006_v56 = vadd.f32 %v9186_v47, %v4005_v32  ;;  %v4007_v50 = vpop.f32.mrb[241].mxu0 }
 0x48f   :  { %v4296_v8 = vpop.f32.mrb[241].mxu1  ;;  %v4008_v49 = vpop.f32.mrb[242].mxu0 }
 0x490   :  { %v4297_v57 = vpop.f32.mrb[242].mxu1  ;;  %v4295_v42 = vadd.f32 %v4294_v54, %v4006_v56  ;;  %v4009_v18 = vadd.f32 %v9186_v47, %v4008_v49  ;;  %v4010_v17 = vpop.f32.mrb[243].mxu0 }
 0x491   :  { %v4299_v10 = vpop.f32.mrb[243].mxu1 }
 0x492   :  { %v4381_v46 = vadd.f32 %v5188_v22, %v4295_v42  ;;  %v4298_v21 = vadd.f32 %v4297_v57, %v4009_v18 }
 0x494   :  { %4445 = vst [vmem:[#allocation5 + $0x1c0] sm:$0xff] %v4381_v46  ;;  %v4382_v27 = vadd.f32 %v5189_v2, %v4298_v21 }
 0x495   :  { %v4013_v9 = vpop.f32.mrb[244].mxu0 }
 0x496   :  { %4446 = vst [vmem:[#allocation5 + $0x1c8] sm:$0xff] %v4382_v27  ;;  %v4014_v55 = vadd.f32 %v5190_v38, %v4013_v9  ;;  %v4302_v16 = vpop.f32.mrb[244].mxu1  ;;  %v4015_v3 = vpop.f32.mrb[245].mxu0 }
 0x497   :  { %v4304_v40 = vpop.f32.mrb[245].mxu1  ;;  %v4016_v29 = vpop.f32.mrb[246].mxu0 }
 0x498   :  { %v4303_v47 = vadd.f32 %v4302_v16, %v4014_v55  ;;  %v4017_v13 = vadd.f32 %v5190_v38, %v4016_v29  ;;  %v4305_v52 = vpop.f32.mrb[246].mxu1  ;;  %v4018_v6 = vpop.f32.mrb[247].mxu0 }
 0x499   :  { %v4307_v19 = vpop.f32.mrb[247].mxu1 }
 0x49a   :  { %v4383_v58 = vadd.f32 %v5191_v4, %v4303_v47  ;;  %v4306_v31 = vadd.f32 %v4305_v52, %v4017_v13 }
 0x49c   :  { %4447 = vst [vmem:[#allocation5 + $0x1d0] sm:$0xff] %v4383_v58  ;;  %v4384_v59 = vadd.f32 %v5192_v30, %v4306_v31 }
 0x49d   :  { %v4021_v35 = vpop.f32.mrb[248].mxu0 }
 0x49e   :  { %4448 = vst [vmem:[#allocation5 + $0x1d8] sm:$0xff] %v4384_v59  ;;  %v4022_v45 = vadd.f32 %v5190_v38, %v4021_v35  ;;  %v4310_v44 = vpop.f32.mrb[248].mxu1  ;;  %v4023_v63 = vpop.f32.mrb[249].mxu0 }
 0x49f   :  { %v4312_v41 = vpop.f32.mrb[249].mxu1  ;;  %v4024_v60 = vpop.f32.mrb[250].mxu0 }
 0x4a0   :  { %v4311_v51 = vadd.f32 %v4310_v44, %v4022_v45  ;;  %v4025_v48 = vadd.f32 %v5190_v38, %v4024_v60  ;;  %v4313_v28 = vpop.f32.mrb[250].mxu1  ;;  %v4026_v62 = vpop.f32.mrb[251].mxu0 }
 0x4a1   :  { %v4315_v33 = vpop.f32.mrb[251].mxu1 }
 0x4a2   :  { %v4385_v36 = vadd.f32 %v5193_v53, %v4311_v51  ;;  %v4314_v0 = vadd.f32 %v4313_v28, %v4025_v48 }
 0x4a4   :  { %4449 = vst [vmem:[#allocation5 + $0x1e0] sm:$0xff] %v4385_v36  ;;  %v4386_v11 = vadd.f32 %v5194_v25, %v4314_v0 }
 0x4a6   :  { %4450 = vst [vmem:[#allocation5 + $0x1e8] sm:$0xff] %v4386_v11  ;;  %v4029_v14 = vpop.f32.mrb[252].mxu0 }
 0x4a7   :  { %v4030_v23 = vadd.f32 %v5190_v38, %v4029_v14  ;;  %v4318_v15 = vpop.f32.mrb[252].mxu1  ;;  %v4031_v34 = vpop.f32.mrb[253].mxu0 }
 0x4a8   :  { %v4320_v12 = vpop.f32.mrb[253].mxu1  ;;  %v4032_v37 = vpop.f32.mrb[254].mxu0 }
 0x4a9   :  { %v4319_v20 = vadd.f32 %v4318_v15, %v4030_v23  ;;  %v4033_v1 = vadd.f32 %v5190_v38, %v4032_v37  ;;  %v4321_v5 = vpop.f32.mrb[254].mxu1  ;;  %v4034_v61 = vpop.f32.mrb[255].mxu0 }
 0x4aa   :  { %v4323_v24 = vpop.f32.mrb[255].mxu1 }
 0x4ab   :  { %v4387_v7 = vadd.f32 %v5195_v26, %v4319_v20  ;;  %v4322_v39 = vadd.f32 %v4321_v5, %v4033_v1 }
 0x4ad   :  { %4451 = vst [vmem:[#allocation5 + $0x1f0] sm:$0xff] %v4387_v7  ;;  %v4388_v32 = vadd.f32 %v5196_v43, %v4322_v39 }
 0x4af   :  { %4452 = vst [vmem:[#allocation5 + $0x1f8] sm:$0xff] %v4388_v32 }
 0x4b0   :  { %5230 = shalt.err (!%p5227_p12)
}
 0x4b1   :  { %s5231_s19 = scalar_lea.hbm %s9466_s5, 8192 }
 0x4b2   :  { %p5232_p13 = scmp.ne.s32.totalorder %s9466_s5, %s5231_s19  ;;  %p5235_p0 = scmp.lt.u32.totalorder %s5231_s19, %s9466_s5 }
 0x4b4   :  { %p5237_p1 = pnand %p5235_p0, %p5232_p13 }
 0x4b6   :  { %5240 = shalt.err (!%p5237_p1)
}
 0x4b7   :  { %4464 = dma.vmem_to_hbm [thread:$0]  %s4459_s15, 8192, %s9466_s5, [#allocation4], %s5246_s28, %s5246_s28, %s5247_s29  }
 0x4b8   :  { %5243 = dma.done.wait [#allocation4], 8192  }
 0x4b9   :  { %5244 = vsyncadd [#allocation4], 4294959104 }
 0x4ba   :  { %4468 = vsyncpa [#allocation3], 1 }
 0x4bb   :  { %4469 = vsyncpa [#allocation4], 1 }

</bundles_post_ra>
